<compile_context>
chip_gen: v6e
topology: v6e:2x2x1
jax: 0.10.0
libtpu: 0.0.40
codegen_flags: <defaults>
</compile_context>

<pallas_src>
import math

import jax
import jax.numpy as jnp
from jax.experimental import pallas as pl
from jax.experimental.pallas import tpu as pltpu

# ------------------------- tiny GPT2-like config -------------------------
VOCAB = 64
N_EMBD = 32
N_HEAD = 2
N_LAYER = 2
N_POS = 64
MLP_HID = 4 * N_EMBD
NEURON_DIM = 8          # "neuron_dim" of ModelM (small synthetic setting)
FIXED_NEURON = 4        # "fixed_neuron_nums"
NUM_ITERS = 3           # "num_iterations"
LN_EPS = 1e-5

HEAD_DIM = N_EMBD // N_HEAD
ATTN_SCALE = 1.0 / math.sqrt(HEAD_DIM)
NEG_BIG = float(jnp.finfo(jnp.float32).min) / 2.0   # dtype-aware mask value

# Fixed ordering of per-GPT2 weight arrays passed to the kernel.
GPT2_KEYS = ("ln1_g", "ln1_b", "wq", "bq", "wk", "bk", "wv", "bv",
             "wo", "bo", "ln2_g", "ln2_b", "wfc", "bfc", "wfp", "bfp",
             "lnf_g", "lnf_b")
N_GPT2W = len(GPT2_KEYS)          # 18
N_FIXED_IN = 5                    # x_enc, mask_enc, mask_think, wpe_think, neuron0


# ------------------------------ in-kernel pieces ------------------------------
def _layer_norm(x, g, b):
    # x: (T, D) value; g, b: (1, D) values
    mu = jnp.mean(x, axis=-1, keepdims=True)
    xc = x - mu
    var = jnp.mean(xc * xc, axis=-1, keepdims=True)
    return xc * jax.lax.rsqrt(var + LN_EPS) * g + b


def _gpt2_block(x, w, l, mask):
    """One pre-LN GPT2 block, fully in VMEM.

    x: (T, D) value, mask: (T, T) float {1,0} of (causal & key-valid).
    w: dict of VMEM refs (layer-stacked, per-head-sliced weights).
    """
    a = _layer_norm(x, w["ln1_g"][l], w["ln1_b"][l])

    wq_l, wk_l, wv_l = w["wq"][l], w["wk"][l], w["wv"][l]    # (H, D, Dh)
    bq_l, bk_l, bv_l = w["bq"][l], w["bk"][l], w["bv"][l]    # (H, 1, Dh)
    wo_l = w["wo"][l]                                        # (H, Dh, D)

    ctx = None
    for h in range(N_HEAD):
        q = jnp.dot(a, wq_l[h], preferred_element_type=jnp.float32) + bq_l[h]
        k = jnp.dot(a, wk_l[h], preferred_element_type=jnp.float32) + bk_l[h]
        v = jnp.dot(a, wv_l[h], preferred_element_type=jnp.float32) + bv_l[h]
        # scale folded into q; contract on the head dim of both -> no k.T
        s = jax.lax.dot_general(q * ATTN_SCALE, k,
                                dimension_numbers=(((1,), (1,)), ((), ())),
                                preferred_element_type=jnp.float32)   # (T, T)
        s = jnp.where(mask > 0.5, s, NEG_BIG)                  # causal+pad mask
        s = s - jnp.max(s, axis=-1, keepdims=True)
        p = jnp.exp(s)
        p = p * pl.reciprocal(jnp.sum(p, axis=-1, keepdims=True), approx=True)
        o = jnp.dot(p, v, preferred_element_type=jnp.float32)         # (T, Dh)
        # fold the output projection per head: concat(h)->proj == sum_h o_h@W_h
        c = jnp.dot(o, wo_l[h], preferred_element_type=jnp.float32)   # (T, D)
        ctx = c if ctx is None else ctx + c

    h1 = x + ctx + w["bo"][l]                                  # fused residual
    a2 = _layer_norm(h1, w["ln2_g"][l], w["ln2_b"][l])
    m = jnp.dot(a2, w["wfc"][l], preferred_element_type=jnp.float32) + w["bfc"][l]
    m = jax.nn.gelu(m, approximate=True)                       # GPT2 tanh GELU
    m = jnp.dot(m, w["wfp"][l], preferred_element_type=jnp.float32) + w["bfp"][l]
    return h1 + m                                              # fused residual


def _gpt2_forward(x, w, mask):
    h = x
    for l in range(N_LAYER):
        h = _gpt2_block(h, w, l, mask)
    return _layer_norm(h, w["lnf_g"][...], w["lnf_b"][...])


def _modelm_kernel(*args):
    """Whole ModelM.forward for ONE batch element (grid=(B,), 'parallel')."""
    x_ref, menc_ref, mthk_ref, wpe_ref, n0_ref = args[:N_FIXED_IN]
    enc_w = dict(zip(GPT2_KEYS, args[N_FIXED_IN:N_FIXED_IN + N_GPT2W]))
    thk_w = dict(zip(GPT2_KEYS,
                     args[N_FIXED_IN + N_GPT2W:N_FIXED_IN + 2 * N_GPT2W]))
    idx = N_FIXED_IN + 2 * N_GPT2W
    out_ref = args[idx]           # (NUM_ITERS, 1, ND, D) block
    tbuf = args[idx + 1]          # VMEM (TT, D): persistent think input
    obuf = args[idx + 2]          # VMEM (TT, D): think output staging

    S = x_ref.shape[1]            # encoder seq len
    TT = tbuf.shape[0]            # think seq len = S + NEURON_DIM
    ND = n0_ref.shape[1]          # NEURON_DIM

    # -------------------- encoder GPT2 (runs once) --------------------
    enc_out = _gpt2_forward(x_ref[0], enc_w, menc_ref[0])       # (S, D)

    # The encoder part of the think input never changes across iterations:
    # write it once (with the think model's position embeddings pre-added).
    tbuf[0:S, :] = enc_out + wpe_ref[0:S, :]

    n0 = n0_ref[0]                                              # (ND, D)
    m_thk = mthk_ref[0]                                         # (TT, TT)
    rows = jax.lax.broadcasted_iota(jnp.int32, (ND, N_EMBD), 0)

    cur = n0                      # current neuron matrix for this batch elem
    for i in range(NUM_ITERS):
        # neuron rows of the think input (+ their position embeddings)
        tbuf[S:TT, :] = cur + wpe_ref[S:TT, :]
        obuf[...] = _gpt2_forward(tbuf[...], thk_w, m_thk)      # (TT, D)
        nm = obuf[TT - ND:TT, :]                                # last ND rows
        # keep the fixed neuron rows from the original parameter
        cur = jnp.where(rows < FIXED_NEURON, n0, nm)
        out_ref[i, 0] = cur


# ------------------------------ pallas_call wrapper ---------------------------
def _const_index_map(ndim):
    def imap(b):
        return (0,) * ndim
    return imap


def _batch_index_map(ndim):
    def imap(b):
        return (b,) + (0,) * (ndim - 1)
    return imap


def _const_spec(shape):
    return pl.BlockSpec(tuple(shape), _const_index_map(len(shape)))


def _batch_spec(shape):
    return pl.BlockSpec((1,) + tuple(shape[1:]), _batch_index_map(len(shape)))


def _allowed_mask(mask_bt):
    # (B, T) {0,1} -> (B, T, T) float32: allowed[b, q, k] = (k <= q) & mask[b, k]
    m = mask_bt.astype(jnp.float32)
    T = m.shape[1]
    causal = jnp.tril(jnp.ones((T, T), jnp.float32))
    return causal[None, :, :] * m[:, None, :]


def model_forward(params, input_ids, attention_mask):
    enc_p, thk_p = params["encoder"], params["think"]
    B, S = input_ids.shape
    TT = S + NEURON_DIM

    # token + position embeddings for the encoder (gather = XLA glue)
    x = enc_p["wte"][input_ids] + enc_p["wpe"][:S][None, :, :]      # (B, S, D)

    allowed_enc = _allowed_mask(attention_mask)                     # (B, S, S)
    extra = jnp.ones((B, NEURON_DIM), attention_mask.dtype)
    upd_mask = jnp.concatenate([attention_mask, extra], axis=1)     # (B, TT)
    allowed_thk = _allowed_mask(upd_mask)                           # (B, TT, TT)

    wpe_thk = thk_p["wpe"][:TT]                                     # (TT, D)
    neuron0 = params["neuron_matrix"]                               # (B, ND, D)

    inputs = [x, allowed_enc, allowed_thk, wpe_thk, neuron0]
    in_specs = [_batch_spec(x.shape),
                _batch_spec(allowed_enc.shape),
                _batch_spec(allowed_thk.shape),
                _const_spec(wpe_thk.shape),
                _batch_spec(neuron0.shape)]
    for gp in (enc_p, thk_p):
        for k in GPT2_KEYS:
            inputs.append(gp[k])
            in_specs.append(_const_spec(gp[k].shape))

    out = pl.pallas_call(
        _modelm_kernel,
        out_shape=jax.ShapeDtypeStruct((NUM_ITERS, B, NEURON_DIM, N_EMBD),
                                       jnp.float32),
        grid=(B,),
        in_specs=in_specs,
        out_specs=pl.BlockSpec((NUM_ITERS, 1, NEURON_DIM, N_EMBD),
                               lambda b: (0, b, 0, 0)),
        scratch_shapes=[pltpu.VMEM((TT, N_EMBD), jnp.float32),   # think input
                        pltpu.VMEM((TT, N_EMBD), jnp.float32)],  # think output
        compiler_params=pltpu.CompilerParams(
            dimension_semantics=("parallel",)),
    )(*inputs)
    return tuple(out[i] for i in range(NUM_ITERS))


# ------------------------------ deterministic init ---------------------------
def init_gpt2(key):
    """GPT2-like params, already packed into the kernel layout:
    layer-stacked, attention weights pre-sliced per head
    (wq/wk/wv: (L,H,D,Dh), wo: (L,H,Dh,D))."""
    Dh = HEAD_DIM
    ks = jax.random.split(key, 2 + N_LAYER)

    def nrm(k, shape, std=0.02):
        return (std * jax.random.normal(k, shape)).astype(jnp.float32)

    wq, bq, wk, bk, wv, bv = [], [], [], [], [], []
    wo, bo, wfc, bfc, wfp, bfp = [], [], [], [], [], []
    ln1_g, ln1_b, ln2_g, ln2_b = [], [], [], []

    def per_head_w(wm):   # (D, D) -> (H, D, Dh)
        return wm.reshape(N_EMBD, N_HEAD, Dh).transpose(1, 0, 2)

    def per_head_b(bvec):  # (D,) -> (H, 1, Dh)
        return bvec.reshape(N_HEAD, 1, Dh)

    for l in range(N_LAYER):
        lk = jax.random.split(ks[2 + l], 4)
        # HF-GPT2-style parameters for this layer (then repacked):
        c_attn_w = nrm(lk[0], (N_EMBD, 3 * N_EMBD))      # c_attn.weight
        c_attn_b = jnp.zeros((3 * N_EMBD,), jnp.float32)  # c_attn.bias
        c_proj_w = nrm(lk[1], (N_EMBD, N_EMBD))          # attn c_proj.weight
        c_fc_w = nrm(lk[2], (N_EMBD, MLP_HID))           # mlp c_fc.weight
        c_fp_w = nrm(lk[3], (MLP_HID, N_EMBD))           # mlp c_proj.weight

        qw, kw, vw = jnp.split(c_attn_w, 3, axis=1)
        qb, kb_, vb = jnp.split(c_attn_b, 3)

        wq.append(per_head_w(qw)); wk.append(per_head_w(kw)); wv.append(per_head_w(vw))
        bq.append(per_head_b(qb)); bk.append(per_head_b(kb_)); bv.append(per_head_b(vb))
        wo.append(c_proj_w.reshape(N_HEAD, Dh, N_EMBD))   # rows grouped by head
        bo.append(jnp.zeros((1, N_EMBD), jnp.float32))
        wfc.append(c_fc_w); bfc.append(jnp.zeros((1, MLP_HID), jnp.float32))
        wfp.append(c_fp_w); bfp.append(jnp.zeros((1, N_EMBD), jnp.float32))
        ln1_g.append(jnp.ones((1, N_EMBD), jnp.float32))
        ln1_b.append(jnp.zeros((1, N_EMBD), jnp.float32))
        ln2_g.append(jnp.ones((1, N_EMBD), jnp.float32))
        ln2_b.append(jnp.zeros((1, N_EMBD), jnp.float32))

    stk = jnp.stack
    return {
        "wte": nrm(ks[0], (VOCAB, N_EMBD)),
        "wpe": nrm(ks[1], (N_POS, N_EMBD)),
        "ln1_g": stk(ln1_g), "ln1_b": stk(ln1_b),
        "wq": stk(wq), "bq": stk(bq),
        "wk": stk(wk), "bk": stk(bk),
        "wv": stk(wv), "bv": stk(bv),
        "wo": stk(wo), "bo": stk(bo),
        "ln2_g": stk(ln2_g), "ln2_b": stk(ln2_b),
        "wfc": stk(wfc), "bfc": stk(bfc),
        "wfp": stk(wfp), "bfp": stk(bfp),
        "lnf_g": jnp.ones((1, N_EMBD), jnp.float32),
        "lnf_b": jnp.zeros((1, N_EMBD), jnp.float32),
    }


if __name__ == "__main__":
    B, S = 2, 8
    key = jax.random.PRNGKey(0)
    k_enc, k_think, k_neuron, k_ids = jax.random.split(key, 4)

    params = {
        "encoder": init_gpt2(k_enc),
        "think": init_gpt2(k_think),
        "neuron_matrix": jax.random.normal(
            k_neuron, (B, NEURON_DIM, N_EMBD)).astype(jnp.float32),
    }

    input_ids = jax.random.randint(k_ids, (B, S), 0, VOCAB, dtype=jnp.int32)
    attention_mask = jnp.concatenate(
        [jnp.ones((B, S - 2), jnp.int32), jnp.zeros((B, 2), jnp.int32)], axis=1)

    outs = jax.jit(model_forward)(params, input_ids, attention_mask)
    outs = jax.block_until_ready(outs)

    assert len(outs) == NUM_ITERS
    for o in outs:
        assert o.shape == (B, NEURON_DIM, N_EMBD)
        assert bool(jnp.all(jnp.isfinite(o)))
    print("KERNEL_OK")
</pallas_src>

<mosaic_0001>
module attributes {stable_mosaic.version = 11 : i64} {
  func.func @_modelm_kernel(%arg0: i32, %arg1: memref<1x8x32xf32, #tpu.memory_space<vmem>>, %arg2: memref<1x8x8xf32, #tpu.memory_space<vmem>>, %arg3: memref<1x16x16xf32, #tpu.memory_space<vmem>>, %arg4: memref<16x32xf32, #tpu.memory_space<vmem>>, %arg5: memref<1x8x32xf32, #tpu.memory_space<vmem>>, %arg6: memref<2x1x32xf32, #tpu.memory_space<vmem>>, %arg7: memref<2x1x32xf32, #tpu.memory_space<vmem>>, %arg8: memref<2x2x32x16xf32, #tpu.memory_space<vmem>>, %arg9: memref<2x2x1x16xf32, #tpu.memory_space<vmem>>, %arg10: memref<2x2x32x16xf32, #tpu.memory_space<vmem>>, %arg11: memref<2x2x1x16xf32, #tpu.memory_space<vmem>>, %arg12: memref<2x2x32x16xf32, #tpu.memory_space<vmem>>, %arg13: memref<2x2x1x16xf32, #tpu.memory_space<vmem>>, %arg14: memref<2x2x16x32xf32, #tpu.memory_space<vmem>>, %arg15: memref<2x1x32xf32, #tpu.memory_space<vmem>>, %arg16: memref<2x1x32xf32, #tpu.memory_space<vmem>>, %arg17: memref<2x1x32xf32, #tpu.memory_space<vmem>>, %arg18: memref<2x32x128xf32, #tpu.memory_space<vmem>>, %arg19: memref<2x1x128xf32, #tpu.memory_space<vmem>>, %arg20: memref<2x128x32xf32, #tpu.memory_space<vmem>>, %arg21: memref<2x1x32xf32, #tpu.memory_space<vmem>>, %arg22: memref<1x32xf32, #tpu.memory_space<vmem>>, %arg23: memref<1x32xf32, #tpu.memory_space<vmem>>, %arg24: memref<2x1x32xf32, #tpu.memory_space<vmem>>, %arg25: memref<2x1x32xf32, #tpu.memory_space<vmem>>, %arg26: memref<2x2x32x16xf32, #tpu.memory_space<vmem>>, %arg27: memref<2x2x1x16xf32, #tpu.memory_space<vmem>>, %arg28: memref<2x2x32x16xf32, #tpu.memory_space<vmem>>, %arg29: memref<2x2x1x16xf32, #tpu.memory_space<vmem>>, %arg30: memref<2x2x32x16xf32, #tpu.memory_space<vmem>>, %arg31: memref<2x2x1x16xf32, #tpu.memory_space<vmem>>, %arg32: memref<2x2x16x32xf32, #tpu.memory_space<vmem>>, %arg33: memref<2x1x32xf32, #tpu.memory_space<vmem>>, %arg34: memref<2x1x32xf32, #tpu.memory_space<vmem>>, %arg35: memref<2x1x32xf32, #tpu.memory_space<vmem>>, %arg36: memref<2x32x128xf32, #tpu.memory_space<vmem>>, %arg37: memref<2x1x128xf32, #tpu.memory_space<vmem>>, %arg38: memref<2x128x32xf32, #tpu.memory_space<vmem>>, %arg39: memref<2x1x32xf32, #tpu.memory_space<vmem>>, %arg40: memref<1x32xf32, #tpu.memory_space<vmem>>, %arg41: memref<1x32xf32, #tpu.memory_space<vmem>>, %arg42: memref<3x1x8x32xf32, #tpu.memory_space<vmem>>, %arg43: memref<16x32xf32, #tpu.memory_space<vmem>>, %arg44: memref<16x32xf32, #tpu.memory_space<vmem>>) attributes {dimension_semantics = [#tpu.dimension_semantics<parallel>], iteration_bounds = array<i64: 2>, scalar_prefetch = 0 : i64, scratch_operands = 2 : i64, tpu.core_type = #tpu.core_type<tc>, window_params = [{transform_indices = @transform_0, window_bounds = array<i64: 1, 8, 32>}, {transform_indices = @transform_1, window_bounds = array<i64: 1, 8, 8>}, {transform_indices = @transform_2, window_bounds = array<i64: 1, 16, 16>}, {pipeline_mode = #tpu.pipeline_mode<synchronous>, transform_indices = @transform_3, window_bounds = array<i64: 16, 32>}, {transform_indices = @transform_4, window_bounds = array<i64: 1, 8, 32>}, {pipeline_mode = #tpu.pipeline_mode<synchronous>, transform_indices = @transform_5, window_bounds = array<i64: 2, 1, 32>}, {pipeline_mode = #tpu.pipeline_mode<synchronous>, transform_indices = @transform_6, window_bounds = array<i64: 2, 1, 32>}, {pipeline_mode = #tpu.pipeline_mode<synchronous>, transform_indices = @transform_7, window_bounds = array<i64: 2, 2, 32, 16>}, {pipeline_mode = #tpu.pipeline_mode<synchronous>, transform_indices = @transform_8, window_bounds = array<i64: 2, 2, 1, 16>}, {pipeline_mode = #tpu.pipeline_mode<synchronous>, transform_indices = @transform_9, window_bounds = array<i64: 2, 2, 32, 16>}, {pipeline_mode = #tpu.pipeline_mode<synchronous>, transform_indices = @transform_10, window_bounds = array<i64: 2, 2, 1, 16>}, {pipeline_mode = #tpu.pipeline_mode<synchronous>, transform_indices = @transform_11, window_bounds = array<i64: 2, 2, 32, 16>}, {pipeline_mode = #tpu.pipeline_mode<synchronous>, transform_indices = @transform_12, window_bounds = array<i64: 2, 2, 1, 16>}, {pipeline_mode = #tpu.pipeline_mode<synchronous>, transform_indices = @transform_13, window_bounds = array<i64: 2, 2, 16, 32>}, {pipeline_mode = #tpu.pipeline_mode<synchronous>, transform_indices = @transform_14, window_bounds = array<i64: 2, 1, 32>}, {pipeline_mode = #tpu.pipeline_mode<synchronous>, transform_indices = @transform_15, window_bounds = array<i64: 2, 1, 32>}, {pipeline_mode = #tpu.pipeline_mode<synchronous>, transform_indices = @transform_16, window_bounds = array<i64: 2, 1, 32>}, {pipeline_mode = #tpu.pipeline_mode<synchronous>, transform_indices = @transform_17, window_bounds = array<i64: 2, 32, 128>}, {pipeline_mode = #tpu.pipeline_mode<synchronous>, transform_indices = @transform_18, window_bounds = array<i64: 2, 1, 128>}, {pipeline_mode = #tpu.pipeline_mode<synchronous>, transform_indices = @transform_19, window_bounds = array<i64: 2, 128, 32>}, {pipeline_mode = #tpu.pipeline_mode<synchronous>, transform_indices = @transform_20, window_bounds = array<i64: 2, 1, 32>}, {pipeline_mode = #tpu.pipeline_mode<synchronous>, transform_indices = @transform_21, window_bounds = array<i64: 1, 32>}, {pipeline_mode = #tpu.pipeline_mode<synchronous>, transform_indices = @transform_22, window_bounds = array<i64: 1, 32>}, {pipeline_mode = #tpu.pipeline_mode<synchronous>, transform_indices = @transform_23, window_bounds = array<i64: 2, 1, 32>}, {pipeline_mode = #tpu.pipeline_mode<synchronous>, transform_indices = @transform_24, window_bounds = array<i64: 2, 1, 32>}, {pipeline_mode = #tpu.pipeline_mode<synchronous>, transform_indices = @transform_25, window_bounds = array<i64: 2, 2, 32, 16>}, {pipeline_mode = #tpu.pipeline_mode<synchronous>, transform_indices = @transform_26, window_bounds = array<i64: 2, 2, 1, 16>}, {pipeline_mode = #tpu.pipeline_mode<synchronous>, transform_indices = @transform_27, window_bounds = array<i64: 2, 2, 32, 16>}, {pipeline_mode = #tpu.pipeline_mode<synchronous>, transform_indices = @transform_28, window_bounds = array<i64: 2, 2, 1, 16>}, {pipeline_mode = #tpu.pipeline_mode<synchronous>, transform_indices = @transform_29, window_bounds = array<i64: 2, 2, 32, 16>}, {pipeline_mode = #tpu.pipeline_mode<synchronous>, transform_indices = @transform_30, window_bounds = array<i64: 2, 2, 1, 16>}, {pipeline_mode = #tpu.pipeline_mode<synchronous>, transform_indices = @transform_31, window_bounds = array<i64: 2, 2, 16, 32>}, {pipeline_mode = #tpu.pipeline_mode<synchronous>, transform_indices = @transform_32, window_bounds = array<i64: 2, 1, 32>}, {pipeline_mode = #tpu.pipeline_mode<synchronous>, transform_indices = @transform_33, window_bounds = array<i64: 2, 1, 32>}, {pipeline_mode = #tpu.pipeline_mode<synchronous>, transform_indices = @transform_34, window_bounds = array<i64: 2, 1, 32>}, {pipeline_mode = #tpu.pipeline_mode<synchronous>, transform_indices = @transform_35, window_bounds = array<i64: 2, 32, 128>}, {pipeline_mode = #tpu.pipeline_mode<synchronous>, transform_indices = @transform_36, window_bounds = array<i64: 2, 1, 128>}, {pipeline_mode = #tpu.pipeline_mode<synchronous>, transform_indices = @transform_37, window_bounds = array<i64: 2, 128, 32>}, {pipeline_mode = #tpu.pipeline_mode<synchronous>, transform_indices = @transform_38, window_bounds = array<i64: 2, 1, 32>}, {pipeline_mode = #tpu.pipeline_mode<synchronous>, transform_indices = @transform_39, window_bounds = array<i64: 1, 32>}, {pipeline_mode = #tpu.pipeline_mode<synchronous>, transform_indices = @transform_40, window_bounds = array<i64: 1, 32>}, {transform_indices = @transform_41, window_bounds = array<i64: 3, 1, 8, 32>}]} {
    %c0 = arith.constant 0 : index
    %c0_0 = arith.constant 0 : index
    %c0_1 = arith.constant 0 : index
    %0 = vector.load %arg1[%c0, %c0_0, %c0_1] : memref<1x8x32xf32, #tpu.memory_space<vmem>>, vector<1x8x32xf32>
    %1 = vector.shape_cast %0 : vector<1x8x32xf32> to vector<8x32xf32>
    %c0_2 = arith.constant 0 : index
    %c0_3 = arith.constant 0 : index
    %c0_4 = arith.constant 0 : index
    %2 = vector.load %arg2[%c0_2, %c0_3, %c0_4] : memref<1x8x8xf32, #tpu.memory_space<vmem>>, vector<1x8x8xf32>
    %3 = vector.shape_cast %2 : vector<1x8x8xf32> to vector<8x8xf32>
    %c0_5 = arith.constant 0 : index
    %c0_6 = arith.constant 0 : index
    %c0_7 = arith.constant 0 : index
    %4 = vector.load %arg6[%c0_5, %c0_6, %c0_7] : memref<2x1x32xf32, #tpu.memory_space<vmem>>, vector<1x1x32xf32>
    %5 = vector.shape_cast %4 : vector<1x1x32xf32> to vector<1x32xf32>
    %c0_8 = arith.constant 0 : index
    %c0_9 = arith.constant 0 : index
    %c0_10 = arith.constant 0 : index
    %6 = vector.load %arg7[%c0_8, %c0_9, %c0_10] : memref<2x1x32xf32, #tpu.memory_space<vmem>>, vector<1x1x32xf32>
    %7 = vector.shape_cast %6 : vector<1x1x32xf32> to vector<1x32xf32>
    %cst = arith.constant dense<0.000000e+00> : vector<8xf32>
    %8 = vector.multi_reduction <add>, %1, %cst [1] : vector<8x32xf32> to vector<8xf32>
    %9 = vector.shape_cast %8 : vector<8xf32> to vector<8x1xf32>
    %cst_11 = arith.constant 3.200000e+01 : f32
    %10 = vector.broadcast %cst_11 : f32 to vector<8x1xf32>
    %11 = arith.divf %9, %10 : vector<8x1xf32>
    %12 = vector.broadcast %11 : vector<8x1xf32> to vector<8x32xf32>
    %13 = arith.subf %1, %12 : vector<8x32xf32>
    %14 = arith.mulf %13, %13 : vector<8x32xf32>
    %cst_12 = arith.constant dense<0.000000e+00> : vector<8xf32>
    %15 = vector.multi_reduction <add>, %14, %cst_12 [1] : vector<8x32xf32> to vector<8xf32>
    %16 = vector.shape_cast %15 : vector<8xf32> to vector<8x1xf32>
    %cst_13 = arith.constant 3.200000e+01 : f32
    %17 = vector.broadcast %cst_13 : f32 to vector<8x1xf32>
    %18 = arith.divf %16, %17 : vector<8x1xf32>
    %cst_14 = arith.constant 9.99999974E-6 : f32
    %19 = vector.broadcast %cst_14 : f32 to vector<8x1xf32>
    %20 = arith.addf %18, %19 : vector<8x1xf32>
    %21 = math.rsqrt %20 : vector<8x1xf32>
    %22 = vector.broadcast %21 : vector<8x1xf32> to vector<8x32xf32>
    %23 = arith.mulf %13, %22 : vector<8x32xf32>
    %24 = vector.broadcast %5 : vector<1x32xf32> to vector<8x32xf32>
    %25 = arith.mulf %23, %24 : vector<8x32xf32>
    %26 = vector.broadcast %7 : vector<1x32xf32> to vector<8x32xf32>
    %27 = arith.addf %25, %26 : vector<8x32xf32>
    %c0_15 = arith.constant 0 : index
    %c0_16 = arith.constant 0 : index
    %c0_17 = arith.constant 0 : index
    %c0_18 = arith.constant 0 : index
    %28 = vector.load %arg8[%c0_15, %c0_16, %c0_17, %c0_18] : memref<2x2x32x16xf32, #tpu.memory_space<vmem>>, vector<1x2x32x16xf32>
    %29 = vector.shape_cast %28 : vector<1x2x32x16xf32> to vector<2x32x16xf32>
    %c0_19 = arith.constant 0 : index
    %c0_20 = arith.constant 0 : index
    %c0_21 = arith.constant 0 : index
    %c0_22 = arith.constant 0 : index
    %30 = vector.load %arg10[%c0_19, %c0_20, %c0_21, %c0_22] : memref<2x2x32x16xf32, #tpu.memory_space<vmem>>, vector<1x2x32x16xf32>
    %31 = vector.shape_cast %30 : vector<1x2x32x16xf32> to vector<2x32x16xf32>
    %c0_23 = arith.constant 0 : index
    %c0_24 = arith.constant 0 : index
    %c0_25 = arith.constant 0 : index
    %c0_26 = arith.constant 0 : index
    %32 = vector.load %arg12[%c0_23, %c0_24, %c0_25, %c0_26] : memref<2x2x32x16xf32, #tpu.memory_space<vmem>>, vector<1x2x32x16xf32>
    %33 = vector.shape_cast %32 : vector<1x2x32x16xf32> to vector<2x32x16xf32>
    %c0_27 = arith.constant 0 : index
    %c0_28 = arith.constant 0 : index
    %c0_29 = arith.constant 0 : index
    %c0_30 = arith.constant 0 : index
    %34 = vector.load %arg9[%c0_27, %c0_28, %c0_29, %c0_30] : memref<2x2x1x16xf32, #tpu.memory_space<vmem>>, vector<1x2x1x16xf32>
    %35 = vector.shape_cast %34 : vector<1x2x1x16xf32> to vector<2x1x16xf32>
    %c0_31 = arith.constant 0 : index
    %c0_32 = arith.constant 0 : index
    %c0_33 = arith.constant 0 : index
    %c0_34 = arith.constant 0 : index
    %36 = vector.load %arg11[%c0_31, %c0_32, %c0_33, %c0_34] : memref<2x2x1x16xf32, #tpu.memory_space<vmem>>, vector<1x2x1x16xf32>
    %37 = vector.shape_cast %36 : vector<1x2x1x16xf32> to vector<2x1x16xf32>
    %c0_35 = arith.constant 0 : index
    %c0_36 = arith.constant 0 : index
    %c0_37 = arith.constant 0 : index
    %c0_38 = arith.constant 0 : index
    %38 = vector.load %arg13[%c0_35, %c0_36, %c0_37, %c0_38] : memref<2x2x1x16xf32, #tpu.memory_space<vmem>>, vector<1x2x1x16xf32>
    %39 = vector.shape_cast %38 : vector<1x2x1x16xf32> to vector<2x1x16xf32>
    %c0_39 = arith.constant 0 : index
    %c0_40 = arith.constant 0 : index
    %c0_41 = arith.constant 0 : index
    %c0_42 = arith.constant 0 : index
    %40 = vector.load %arg14[%c0_39, %c0_40, %c0_41, %c0_42] : memref<2x2x16x32xf32, #tpu.memory_space<vmem>>, vector<1x2x16x32xf32>
    %41 = vector.shape_cast %40 : vector<1x2x16x32xf32> to vector<2x16x32xf32>
    %42 = vector.extract_strided_slice %29 {offsets = [0, 0, 0], sizes = [1, 32, 16], strides = [1, 1, 1]} : vector<2x32x16xf32> to vector<1x32x16xf32>
    %43 = vector.shape_cast %42 : vector<1x32x16xf32> to vector<32x16xf32>
    %cst_43 = arith.constant dense<0.000000e+00> : vector<8x16xf32>
    %44 = tpu.matmul %27, %43, %cst_43 {dimension_numbers = #tpu.dot_dimension_numbers<[1], [0], [0], [1], [0, 0, 1, 1], [], []>} : vector<8x32xf32>, vector<32x16xf32>, vector<8x16xf32> -> vector<8x16xf32>
    %45 = vector.extract_strided_slice %35 {offsets = [0, 0, 0], sizes = [1, 1, 16], strides = [1, 1, 1]} : vector<2x1x16xf32> to vector<1x1x16xf32>
    %46 = vector.shape_cast %45 : vector<1x1x16xf32> to vector<1x16xf32>
    %47 = vector.broadcast %46 : vector<1x16xf32> to vector<8x16xf32>
    %48 = arith.addf %44, %47 : vector<8x16xf32>
    %49 = vector.extract_strided_slice %31 {offsets = [0, 0, 0], sizes = [1, 32, 16], strides = [1, 1, 1]} : vector<2x32x16xf32> to vector<1x32x16xf32>
    %50 = vector.shape_cast %49 : vector<1x32x16xf32> to vector<32x16xf32>
    %cst_44 = arith.constant dense<0.000000e+00> : vector<8x16xf32>
    %51 = tpu.matmul %27, %50, %cst_44 {dimension_numbers = #tpu.dot_dimension_numbers<[1], [0], [0], [1], [0, 0, 1, 1], [], []>} : vector<8x32xf32>, vector<32x16xf32>, vector<8x16xf32> -> vector<8x16xf32>
    %52 = vector.extract_strided_slice %37 {offsets = [0, 0, 0], sizes = [1, 1, 16], strides = [1, 1, 1]} : vector<2x1x16xf32> to vector<1x1x16xf32>
    %53 = vector.shape_cast %52 : vector<1x1x16xf32> to vector<1x16xf32>
    %54 = vector.broadcast %53 : vector<1x16xf32> to vector<8x16xf32>
    %55 = arith.addf %51, %54 : vector<8x16xf32>
    %56 = vector.extract_strided_slice %33 {offsets = [0, 0, 0], sizes = [1, 32, 16], strides = [1, 1, 1]} : vector<2x32x16xf32> to vector<1x32x16xf32>
    %57 = vector.shape_cast %56 : vector<1x32x16xf32> to vector<32x16xf32>
    %cst_45 = arith.constant dense<0.000000e+00> : vector<8x16xf32>
    %58 = tpu.matmul %27, %57, %cst_45 {dimension_numbers = #tpu.dot_dimension_numbers<[1], [0], [0], [1], [0, 0, 1, 1], [], []>} : vector<8x32xf32>, vector<32x16xf32>, vector<8x16xf32> -> vector<8x16xf32>
    %59 = vector.extract_strided_slice %39 {offsets = [0, 0, 0], sizes = [1, 1, 16], strides = [1, 1, 1]} : vector<2x1x16xf32> to vector<1x1x16xf32>
    %60 = vector.shape_cast %59 : vector<1x1x16xf32> to vector<1x16xf32>
    %61 = vector.broadcast %60 : vector<1x16xf32> to vector<8x16xf32>
    %62 = arith.addf %58, %61 : vector<8x16xf32>
    %cst_46 = arith.constant 2.500000e-01 : f32
    %63 = vector.broadcast %cst_46 : f32 to vector<8x16xf32>
    %64 = arith.mulf %48, %63 : vector<8x16xf32>
    %cst_47 = arith.constant dense<0.000000e+00> : vector<8x8xf32>
    %65 = tpu.matmul %64, %55, %cst_47 {dimension_numbers = #tpu.dot_dimension_numbers<[1], [1], [0], [0], [0, 0, 1, 0], [], []>} : vector<8x16xf32>, vector<8x16xf32>, vector<8x8xf32> -> vector<8x8xf32>
    %cst_48 = arith.constant 5.000000e-01 : f32
    %66 = vector.broadcast %cst_48 : f32 to vector<8x8xf32>
    %67 = arith.cmpf ogt, %3, %66 : vector<8x8xf32>
    %cst_49 = arith.constant -1.70141173E+38 : f32
    %68 = vector.broadcast %cst_49 : f32 to vector<8x8xf32>
    %69 = arith.select %67, %65, %68 : vector<8x8xi1>, vector<8x8xf32>
    %cst_50 = arith.constant dense<0xFF800000> : vector<8xf32>
    %70 = vector.multi_reduction <maximumf>, %69, %cst_50 [1] : vector<8x8xf32> to vector<8xf32>
    %71 = vector.shape_cast %70 : vector<8xf32> to vector<8x1xf32>
    %72 = vector.broadcast %71 : vector<8x1xf32> to vector<8x8xf32>
    %73 = arith.subf %69, %72 : vector<8x8xf32>
    %74 = math.exp %73 : vector<8x8xf32>
    %cst_51 = arith.constant dense<0.000000e+00> : vector<8xf32>
    %75 = vector.multi_reduction <add>, %74, %cst_51 [1] : vector<8x8xf32> to vector<8xf32>
    %76 = vector.shape_cast %75 : vector<8xf32> to vector<8x1xf32>
    %77 = tpu.reciprocal %76 {approx = true} : vector<8x1xf32> -> vector<8x1xf32>
    %78 = vector.broadcast %77 : vector<8x1xf32> to vector<8x8xf32>
    %79 = arith.mulf %74, %78 : vector<8x8xf32>
    %cst_52 = arith.constant dense<0.000000e+00> : vector<8x16xf32>
    %80 = tpu.matmul %79, %62, %cst_52 {dimension_numbers = #tpu.dot_dimension_numbers<[1], [0], [0], [1], [0, 0, 1, 1], [], []>} : vector<8x8xf32>, vector<8x16xf32>, vector<8x16xf32> -> vector<8x16xf32>
    %81 = vector.extract_strided_slice %41 {offsets = [0, 0, 0], sizes = [1, 16, 32], strides = [1, 1, 1]} : vector<2x16x32xf32> to vector<1x16x32xf32>
    %82 = vector.shape_cast %81 : vector<1x16x32xf32> to vector<16x32xf32>
    %cst_53 = arith.constant dense<0.000000e+00> : vector<8x32xf32>
    %83 = tpu.matmul %80, %82, %cst_53 {dimension_numbers = #tpu.dot_dimension_numbers<[1], [0], [0], [1], [0, 0, 1, 1], [], []>} : vector<8x16xf32>, vector<16x32xf32>, vector<8x32xf32> -> vector<8x32xf32>
    %84 = vector.extract_strided_slice %29 {offsets = [1, 0, 0], sizes = [1, 32, 16], strides = [1, 1, 1]} : vector<2x32x16xf32> to vector<1x32x16xf32>
    %85 = vector.shape_cast %84 : vector<1x32x16xf32> to vector<32x16xf32>
    %cst_54 = arith.constant dense<0.000000e+00> : vector<8x16xf32>
    %86 = tpu.matmul %27, %85, %cst_54 {dimension_numbers = #tpu.dot_dimension_numbers<[1], [0], [0], [1], [0, 0, 1, 1], [], []>} : vector<8x32xf32>, vector<32x16xf32>, vector<8x16xf32> -> vector<8x16xf32>
    %87 = vector.extract_strided_slice %35 {offsets = [1, 0, 0], sizes = [1, 1, 16], strides = [1, 1, 1]} : vector<2x1x16xf32> to vector<1x1x16xf32>
    %88 = vector.shape_cast %87 : vector<1x1x16xf32> to vector<1x16xf32>
    %89 = vector.broadcast %88 : vector<1x16xf32> to vector<8x16xf32>
    %90 = arith.addf %86, %89 : vector<8x16xf32>
    %91 = vector.extract_strided_slice %31 {offsets = [1, 0, 0], sizes = [1, 32, 16], strides = [1, 1, 1]} : vector<2x32x16xf32> to vector<1x32x16xf32>
    %92 = vector.shape_cast %91 : vector<1x32x16xf32> to vector<32x16xf32>
    %cst_55 = arith.constant dense<0.000000e+00> : vector<8x16xf32>
    %93 = tpu.matmul %27, %92, %cst_55 {dimension_numbers = #tpu.dot_dimension_numbers<[1], [0], [0], [1], [0, 0, 1, 1], [], []>} : vector<8x32xf32>, vector<32x16xf32>, vector<8x16xf32> -> vector<8x16xf32>
    %94 = vector.extract_strided_slice %37 {offsets = [1, 0, 0], sizes = [1, 1, 16], strides = [1, 1, 1]} : vector<2x1x16xf32> to vector<1x1x16xf32>
    %95 = vector.shape_cast %94 : vector<1x1x16xf32> to vector<1x16xf32>
    %96 = vector.broadcast %95 : vector<1x16xf32> to vector<8x16xf32>
    %97 = arith.addf %93, %96 : vector<8x16xf32>
    %98 = vector.extract_strided_slice %33 {offsets = [1, 0, 0], sizes = [1, 32, 16], strides = [1, 1, 1]} : vector<2x32x16xf32> to vector<1x32x16xf32>
    %99 = vector.shape_cast %98 : vector<1x32x16xf32> to vector<32x16xf32>
    %cst_56 = arith.constant dense<0.000000e+00> : vector<8x16xf32>
    %100 = tpu.matmul %27, %99, %cst_56 {dimension_numbers = #tpu.dot_dimension_numbers<[1], [0], [0], [1], [0, 0, 1, 1], [], []>} : vector<8x32xf32>, vector<32x16xf32>, vector<8x16xf32> -> vector<8x16xf32>
    %101 = vector.extract_strided_slice %39 {offsets = [1, 0, 0], sizes = [1, 1, 16], strides = [1, 1, 1]} : vector<2x1x16xf32> to vector<1x1x16xf32>
    %102 = vector.shape_cast %101 : vector<1x1x16xf32> to vector<1x16xf32>
    %103 = vector.broadcast %102 : vector<1x16xf32> to vector<8x16xf32>
    %104 = arith.addf %100, %103 : vector<8x16xf32>
    %cst_57 = arith.constant 2.500000e-01 : f32
    %105 = vector.broadcast %cst_57 : f32 to vector<8x16xf32>
    %106 = arith.mulf %90, %105 : vector<8x16xf32>
    %cst_58 = arith.constant dense<0.000000e+00> : vector<8x8xf32>
    %107 = tpu.matmul %106, %97, %cst_58 {dimension_numbers = #tpu.dot_dimension_numbers<[1], [1], [0], [0], [0, 0, 1, 0], [], []>} : vector<8x16xf32>, vector<8x16xf32>, vector<8x8xf32> -> vector<8x8xf32>
    %cst_59 = arith.constant 5.000000e-01 : f32
    %108 = vector.broadcast %cst_59 : f32 to vector<8x8xf32>
    %109 = arith.cmpf ogt, %3, %108 : vector<8x8xf32>
    %cst_60 = arith.constant -1.70141173E+38 : f32
    %110 = vector.broadcast %cst_60 : f32 to vector<8x8xf32>
    %111 = arith.select %109, %107, %110 : vector<8x8xi1>, vector<8x8xf32>
    %cst_61 = arith.constant dense<0xFF800000> : vector<8xf32>
    %112 = vector.multi_reduction <maximumf>, %111, %cst_61 [1] : vector<8x8xf32> to vector<8xf32>
    %113 = vector.shape_cast %112 : vector<8xf32> to vector<8x1xf32>
    %114 = vector.broadcast %113 : vector<8x1xf32> to vector<8x8xf32>
    %115 = arith.subf %111, %114 : vector<8x8xf32>
    %116 = math.exp %115 : vector<8x8xf32>
    %cst_62 = arith.constant dense<0.000000e+00> : vector<8xf32>
    %117 = vector.multi_reduction <add>, %116, %cst_62 [1] : vector<8x8xf32> to vector<8xf32>
    %118 = vector.shape_cast %117 : vector<8xf32> to vector<8x1xf32>
    %119 = tpu.reciprocal %118 {approx = true} : vector<8x1xf32> -> vector<8x1xf32>
    %120 = vector.broadcast %119 : vector<8x1xf32> to vector<8x8xf32>
    %121 = arith.mulf %116, %120 : vector<8x8xf32>
    %cst_63 = arith.constant dense<0.000000e+00> : vector<8x16xf32>
    %122 = tpu.matmul %121, %104, %cst_63 {dimension_numbers = #tpu.dot_dimension_numbers<[1], [0], [0], [1], [0, 0, 1, 1], [], []>} : vector<8x8xf32>, vector<8x16xf32>, vector<8x16xf32> -> vector<8x16xf32>
    %123 = vector.extract_strided_slice %41 {offsets = [1, 0, 0], sizes = [1, 16, 32], strides = [1, 1, 1]} : vector<2x16x32xf32> to vector<1x16x32xf32>
    %124 = vector.shape_cast %123 : vector<1x16x32xf32> to vector<16x32xf32>
    %cst_64 = arith.constant dense<0.000000e+00> : vector<8x32xf32>
    %125 = tpu.matmul %122, %124, %cst_64 {dimension_numbers = #tpu.dot_dimension_numbers<[1], [0], [0], [1], [0, 0, 1, 1], [], []>} : vector<8x16xf32>, vector<16x32xf32>, vector<8x32xf32> -> vector<8x32xf32>
    %126 = arith.addf %83, %125 : vector<8x32xf32>
    %127 = arith.addf %1, %126 : vector<8x32xf32>
    %c0_65 = arith.constant 0 : index
    %c0_66 = arith.constant 0 : index
    %c0_67 = arith.constant 0 : index
    %128 = vector.load %arg15[%c0_65, %c0_66, %c0_67] : memref<2x1x32xf32, #tpu.memory_space<vmem>>, vector<1x1x32xf32>
    %129 = vector.shape_cast %128 : vector<1x1x32xf32> to vector<1x32xf32>
    %130 = vector.broadcast %129 : vector<1x32xf32> to vector<8x32xf32>
    %131 = arith.addf %127, %130 : vector<8x32xf32>
    %c0_68 = arith.constant 0 : index
    %c0_69 = arith.constant 0 : index
    %c0_70 = arith.constant 0 : index
    %132 = vector.load %arg16[%c0_68, %c0_69, %c0_70] : memref<2x1x32xf32, #tpu.memory_space<vmem>>, vector<1x1x32xf32>
    %133 = vector.shape_cast %132 : vector<1x1x32xf32> to vector<1x32xf32>
    %c0_71 = arith.constant 0 : index
    %c0_72 = arith.constant 0 : index
    %c0_73 = arith.constant 0 : index
    %134 = vector.load %arg17[%c0_71, %c0_72, %c0_73] : memref<2x1x32xf32, #tpu.memory_space<vmem>>, vector<1x1x32xf32>
    %135 = vector.shape_cast %134 : vector<1x1x32xf32> to vector<1x32xf32>
    %cst_74 = arith.constant dense<0.000000e+00> : vector<8xf32>
    %136 = vector.multi_reduction <add>, %131, %cst_74 [1] : vector<8x32xf32> to vector<8xf32>
    %137 = vector.shape_cast %136 : vector<8xf32> to vector<8x1xf32>
    %cst_75 = arith.constant 3.200000e+01 : f32
    %138 = vector.broadcast %cst_75 : f32 to vector<8x1xf32>
    %139 = arith.divf %137, %138 : vector<8x1xf32>
    %140 = vector.broadcast %139 : vector<8x1xf32> to vector<8x32xf32>
    %141 = arith.subf %131, %140 : vector<8x32xf32>
    %142 = arith.mulf %141, %141 : vector<8x32xf32>
    %cst_76 = arith.constant dense<0.000000e+00> : vector<8xf32>
    %143 = vector.multi_reduction <add>, %142, %cst_76 [1] : vector<8x32xf32> to vector<8xf32>
    %144 = vector.shape_cast %143 : vector<8xf32> to vector<8x1xf32>
    %cst_77 = arith.constant 3.200000e+01 : f32
    %145 = vector.broadcast %cst_77 : f32 to vector<8x1xf32>
    %146 = arith.divf %144, %145 : vector<8x1xf32>
    %cst_78 = arith.constant 9.99999974E-6 : f32
    %147 = vector.broadcast %cst_78 : f32 to vector<8x1xf32>
    %148 = arith.addf %146, %147 : vector<8x1xf32>
    %149 = math.rsqrt %148 : vector<8x1xf32>
    %150 = vector.broadcast %149 : vector<8x1xf32> to vector<8x32xf32>
    %151 = arith.mulf %141, %150 : vector<8x32xf32>
    %152 = vector.broadcast %133 : vector<1x32xf32> to vector<8x32xf32>
    %153 = arith.mulf %151, %152 : vector<8x32xf32>
    %154 = vector.broadcast %135 : vector<1x32xf32> to vector<8x32xf32>
    %155 = arith.addf %153, %154 : vector<8x32xf32>
    %c0_79 = arith.constant 0 : index
    %c0_80 = arith.constant 0 : index
    %c0_81 = arith.constant 0 : index
    %156 = vector.load %arg18[%c0_79, %c0_80, %c0_81] : memref<2x32x128xf32, #tpu.memory_space<vmem>>, vector<1x32x128xf32>
    %157 = vector.shape_cast %156 : vector<1x32x128xf32> to vector<32x128xf32>
    %cst_82 = arith.constant dense<0.000000e+00> : vector<8x128xf32>
    %158 = tpu.matmul %155, %157, %cst_82 {dimension_numbers = #tpu.dot_dimension_numbers<[1], [0], [0], [1], [0, 0, 1, 1], [], []>} : vector<8x32xf32>, vector<32x128xf32>, vector<8x128xf32> -> vector<8x128xf32>
    %c0_83 = arith.constant 0 : index
    %c0_84 = arith.constant 0 : index
    %c0_85 = arith.constant 0 : index
    %159 = vector.load %arg19[%c0_83, %c0_84, %c0_85] : memref<2x1x128xf32, #tpu.memory_space<vmem>>, vector<1x1x128xf32>
    %160 = vector.shape_cast %159 : vector<1x1x128xf32> to vector<1x128xf32>
    %161 = vector.broadcast %160 : vector<1x128xf32> to vector<8x128xf32>
    %162 = arith.addf %158, %161 : vector<8x128xf32>
    %163 = arith.mulf %162, %162 : vector<8x128xf32>
    %164 = arith.mulf %162, %163 : vector<8x128xf32>
    %cst_86 = arith.constant 4.471500e-02 : f32
    %165 = vector.broadcast %cst_86 : f32 to vector<8x128xf32>
    %166 = arith.mulf %165, %164 : vector<8x128xf32>
    %167 = arith.addf %162, %166 : vector<8x128xf32>
    %cst_87 = arith.constant 0.797884583 : f32
    %168 = vector.broadcast %cst_87 : f32 to vector<8x128xf32>
    %169 = arith.mulf %168, %167 : vector<8x128xf32>
    %170 = math.tanh %169 : vector<8x128xf32>
    %cst_88 = arith.constant 1.000000e+00 : f32
    %171 = vector.broadcast %cst_88 : f32 to vector<8x128xf32>
    %172 = arith.addf %171, %170 : vector<8x128xf32>
    %cst_89 = arith.constant 5.000000e-01 : f32
    %173 = vector.broadcast %cst_89 : f32 to vector<8x128xf32>
    %174 = arith.mulf %173, %172 : vector<8x128xf32>
    %175 = arith.mulf %162, %174 : vector<8x128xf32>
    %c0_90 = arith.constant 0 : index
    %c0_91 = arith.constant 0 : index
    %c0_92 = arith.constant 0 : index
    %176 = vector.load %arg20[%c0_90, %c0_91, %c0_92] : memref<2x128x32xf32, #tpu.memory_space<vmem>>, vector<1x128x32xf32>
    %177 = vector.shape_cast %176 : vector<1x128x32xf32> to vector<128x32xf32>
    %cst_93 = arith.constant dense<0.000000e+00> : vector<8x32xf32>
    %178 = tpu.matmul %175, %177, %cst_93 {dimension_numbers = #tpu.dot_dimension_numbers<[1], [0], [0], [1], [0, 0, 1, 1], [], []>} : vector<8x128xf32>, vector<128x32xf32>, vector<8x32xf32> -> vector<8x32xf32>
    %c0_94 = arith.constant 0 : index
    %c0_95 = arith.constant 0 : index
    %c0_96 = arith.constant 0 : index
    %179 = vector.load %arg21[%c0_94, %c0_95, %c0_96] : memref<2x1x32xf32, #tpu.memory_space<vmem>>, vector<1x1x32xf32>
    %180 = vector.shape_cast %179 : vector<1x1x32xf32> to vector<1x32xf32>
    %181 = vector.broadcast %180 : vector<1x32xf32> to vector<8x32xf32>
    %182 = arith.addf %178, %181 : vector<8x32xf32>
    %183 = arith.addf %131, %182 : vector<8x32xf32>
    %c1 = arith.constant 1 : index
    %c0_97 = arith.constant 0 : index
    %c0_98 = arith.constant 0 : index
    %184 = vector.load %arg6[%c1, %c0_97, %c0_98] : memref<2x1x32xf32, #tpu.memory_space<vmem>>, vector<1x1x32xf32>
    %185 = vector.shape_cast %184 : vector<1x1x32xf32> to vector<1x32xf32>
    %c1_99 = arith.constant 1 : index
    %c0_100 = arith.constant 0 : index
    %c0_101 = arith.constant 0 : index
    %186 = vector.load %arg7[%c1_99, %c0_100, %c0_101] : memref<2x1x32xf32, #tpu.memory_space<vmem>>, vector<1x1x32xf32>
    %187 = vector.shape_cast %186 : vector<1x1x32xf32> to vector<1x32xf32>
    %cst_102 = arith.constant dense<0.000000e+00> : vector<8xf32>
    %188 = vector.multi_reduction <add>, %183, %cst_102 [1] : vector<8x32xf32> to vector<8xf32>
    %189 = vector.shape_cast %188 : vector<8xf32> to vector<8x1xf32>
    %cst_103 = arith.constant 3.200000e+01 : f32
    %190 = vector.broadcast %cst_103 : f32 to vector<8x1xf32>
    %191 = arith.divf %189, %190 : vector<8x1xf32>
    %192 = vector.broadcast %191 : vector<8x1xf32> to vector<8x32xf32>
    %193 = arith.subf %183, %192 : vector<8x32xf32>
    %194 = arith.mulf %193, %193 : vector<8x32xf32>
    %cst_104 = arith.constant dense<0.000000e+00> : vector<8xf32>
    %195 = vector.multi_reduction <add>, %194, %cst_104 [1] : vector<8x32xf32> to vector<8xf32>
    %196 = vector.shape_cast %195 : vector<8xf32> to vector<8x1xf32>
    %cst_105 = arith.constant 3.200000e+01 : f32
    %197 = vector.broadcast %cst_105 : f32 to vector<8x1xf32>
    %198 = arith.divf %196, %197 : vector<8x1xf32>
    %cst_106 = arith.constant 9.99999974E-6 : f32
    %199 = vector.broadcast %cst_106 : f32 to vector<8x1xf32>
    %200 = arith.addf %198, %199 : vector<8x1xf32>
    %201 = math.rsqrt %200 : vector<8x1xf32>
    %202 = vector.broadcast %201 : vector<8x1xf32> to vector<8x32xf32>
    %203 = arith.mulf %193, %202 : vector<8x32xf32>
    %204 = vector.broadcast %185 : vector<1x32xf32> to vector<8x32xf32>
    %205 = arith.mulf %203, %204 : vector<8x32xf32>
    %206 = vector.broadcast %187 : vector<1x32xf32> to vector<8x32xf32>
    %207 = arith.addf %205, %206 : vector<8x32xf32>
    %c1_107 = arith.constant 1 : index
    %c0_108 = arith.constant 0 : index
    %c0_109 = arith.constant 0 : index
    %c0_110 = arith.constant 0 : index
    %208 = vector.load %arg8[%c1_107, %c0_108, %c0_109, %c0_110] : memref<2x2x32x16xf32, #tpu.memory_space<vmem>>, vector<1x2x32x16xf32>
    %209 = vector.shape_cast %208 : vector<1x2x32x16xf32> to vector<2x32x16xf32>
    %c1_111 = arith.constant 1 : index
    %c0_112 = arith.constant 0 : index
    %c0_113 = arith.constant 0 : index
    %c0_114 = arith.constant 0 : index
    %210 = vector.load %arg10[%c1_111, %c0_112, %c0_113, %c0_114] : memref<2x2x32x16xf32, #tpu.memory_space<vmem>>, vector<1x2x32x16xf32>
    %211 = vector.shape_cast %210 : vector<1x2x32x16xf32> to vector<2x32x16xf32>
    %c1_115 = arith.constant 1 : index
    %c0_116 = arith.constant 0 : index
    %c0_117 = arith.constant 0 : index
    %c0_118 = arith.constant 0 : index
    %212 = vector.load %arg12[%c1_115, %c0_116, %c0_117, %c0_118] : memref<2x2x32x16xf32, #tpu.memory_space<vmem>>, vector<1x2x32x16xf32>
    %213 = vector.shape_cast %212 : vector<1x2x32x16xf32> to vector<2x32x16xf32>
    %c1_119 = arith.constant 1 : index
    %c0_120 = arith.constant 0 : index
    %c0_121 = arith.constant 0 : index
    %c0_122 = arith.constant 0 : index
    %214 = vector.load %arg9[%c1_119, %c0_120, %c0_121, %c0_122] : memref<2x2x1x16xf32, #tpu.memory_space<vmem>>, vector<1x2x1x16xf32>
    %215 = vector.shape_cast %214 : vector<1x2x1x16xf32> to vector<2x1x16xf32>
    %c1_123 = arith.constant 1 : index
    %c0_124 = arith.constant 0 : index
    %c0_125 = arith.constant 0 : index
    %c0_126 = arith.constant 0 : index
    %216 = vector.load %arg11[%c1_123, %c0_124, %c0_125, %c0_126] : memref<2x2x1x16xf32, #tpu.memory_space<vmem>>, vector<1x2x1x16xf32>
    %217 = vector.shape_cast %216 : vector<1x2x1x16xf32> to vector<2x1x16xf32>
    %c1_127 = arith.constant 1 : index
    %c0_128 = arith.constant 0 : index
    %c0_129 = arith.constant 0 : index
    %c0_130 = arith.constant 0 : index
    %218 = vector.load %arg13[%c1_127, %c0_128, %c0_129, %c0_130] : memref<2x2x1x16xf32, #tpu.memory_space<vmem>>, vector<1x2x1x16xf32>
    %219 = vector.shape_cast %218 : vector<1x2x1x16xf32> to vector<2x1x16xf32>
    %c1_131 = arith.constant 1 : index
    %c0_132 = arith.constant 0 : index
    %c0_133 = arith.constant 0 : index
    %c0_134 = arith.constant 0 : index
    %220 = vector.load %arg14[%c1_131, %c0_132, %c0_133, %c0_134] : memref<2x2x16x32xf32, #tpu.memory_space<vmem>>, vector<1x2x16x32xf32>
    %221 = vector.shape_cast %220 : vector<1x2x16x32xf32> to vector<2x16x32xf32>
    %222 = vector.extract_strided_slice %209 {offsets = [0, 0, 0], sizes = [1, 32, 16], strides = [1, 1, 1]} : vector<2x32x16xf32> to vector<1x32x16xf32>
    %223 = vector.shape_cast %222 : vector<1x32x16xf32> to vector<32x16xf32>
    %cst_135 = arith.constant dense<0.000000e+00> : vector<8x16xf32>
    %224 = tpu.matmul %207, %223, %cst_135 {dimension_numbers = #tpu.dot_dimension_numbers<[1], [0], [0], [1], [0, 0, 1, 1], [], []>} : vector<8x32xf32>, vector<32x16xf32>, vector<8x16xf32> -> vector<8x16xf32>
    %225 = vector.extract_strided_slice %215 {offsets = [0, 0, 0], sizes = [1, 1, 16], strides = [1, 1, 1]} : vector<2x1x16xf32> to vector<1x1x16xf32>
    %226 = vector.shape_cast %225 : vector<1x1x16xf32> to vector<1x16xf32>
    %227 = vector.broadcast %226 : vector<1x16xf32> to vector<8x16xf32>
    %228 = arith.addf %224, %227 : vector<8x16xf32>
    %229 = vector.extract_strided_slice %211 {offsets = [0, 0, 0], sizes = [1, 32, 16], strides = [1, 1, 1]} : vector<2x32x16xf32> to vector<1x32x16xf32>
    %230 = vector.shape_cast %229 : vector<1x32x16xf32> to vector<32x16xf32>
    %cst_136 = arith.constant dense<0.000000e+00> : vector<8x16xf32>
    %231 = tpu.matmul %207, %230, %cst_136 {dimension_numbers = #tpu.dot_dimension_numbers<[1], [0], [0], [1], [0, 0, 1, 1], [], []>} : vector<8x32xf32>, vector<32x16xf32>, vector<8x16xf32> -> vector<8x16xf32>
    %232 = vector.extract_strided_slice %217 {offsets = [0, 0, 0], sizes = [1, 1, 16], strides = [1, 1, 1]} : vector<2x1x16xf32> to vector<1x1x16xf32>
    %233 = vector.shape_cast %232 : vector<1x1x16xf32> to vector<1x16xf32>
    %234 = vector.broadcast %233 : vector<1x16xf32> to vector<8x16xf32>
    %235 = arith.addf %231, %234 : vector<8x16xf32>
    %236 = vector.extract_strided_slice %213 {offsets = [0, 0, 0], sizes = [1, 32, 16], strides = [1, 1, 1]} : vector<2x32x16xf32> to vector<1x32x16xf32>
    %237 = vector.shape_cast %236 : vector<1x32x16xf32> to vector<32x16xf32>
    %cst_137 = arith.constant dense<0.000000e+00> : vector<8x16xf32>
    %238 = tpu.matmul %207, %237, %cst_137 {dimension_numbers = #tpu.dot_dimension_numbers<[1], [0], [0], [1], [0, 0, 1, 1], [], []>} : vector<8x32xf32>, vector<32x16xf32>, vector<8x16xf32> -> vector<8x16xf32>
    %239 = vector.extract_strided_slice %219 {offsets = [0, 0, 0], sizes = [1, 1, 16], strides = [1, 1, 1]} : vector<2x1x16xf32> to vector<1x1x16xf32>
    %240 = vector.shape_cast %239 : vector<1x1x16xf32> to vector<1x16xf32>
    %241 = vector.broadcast %240 : vector<1x16xf32> to vector<8x16xf32>
    %242 = arith.addf %238, %241 : vector<8x16xf32>
    %cst_138 = arith.constant 2.500000e-01 : f32
    %243 = vector.broadcast %cst_138 : f32 to vector<8x16xf32>
    %244 = arith.mulf %228, %243 : vector<8x16xf32>
    %cst_139 = arith.constant dense<0.000000e+00> : vector<8x8xf32>
    %245 = tpu.matmul %244, %235, %cst_139 {dimension_numbers = #tpu.dot_dimension_numbers<[1], [1], [0], [0], [0, 0, 1, 0], [], []>} : vector<8x16xf32>, vector<8x16xf32>, vector<8x8xf32> -> vector<8x8xf32>
    %cst_140 = arith.constant 5.000000e-01 : f32
    %246 = vector.broadcast %cst_140 : f32 to vector<8x8xf32>
    %247 = arith.cmpf ogt, %3, %246 : vector<8x8xf32>
    %cst_141 = arith.constant -1.70141173E+38 : f32
    %248 = vector.broadcast %cst_141 : f32 to vector<8x8xf32>
    %249 = arith.select %247, %245, %248 : vector<8x8xi1>, vector<8x8xf32>
    %cst_142 = arith.constant dense<0xFF800000> : vector<8xf32>
    %250 = vector.multi_reduction <maximumf>, %249, %cst_142 [1] : vector<8x8xf32> to vector<8xf32>
    %251 = vector.shape_cast %250 : vector<8xf32> to vector<8x1xf32>
    %252 = vector.broadcast %251 : vector<8x1xf32> to vector<8x8xf32>
    %253 = arith.subf %249, %252 : vector<8x8xf32>
    %254 = math.exp %253 : vector<8x8xf32>
    %cst_143 = arith.constant dense<0.000000e+00> : vector<8xf32>
    %255 = vector.multi_reduction <add>, %254, %cst_143 [1] : vector<8x8xf32> to vector<8xf32>
    %256 = vector.shape_cast %255 : vector<8xf32> to vector<8x1xf32>
    %257 = tpu.reciprocal %256 {approx = true} : vector<8x1xf32> -> vector<8x1xf32>
    %258 = vector.broadcast %257 : vector<8x1xf32> to vector<8x8xf32>
    %259 = arith.mulf %254, %258 : vector<8x8xf32>
    %cst_144 = arith.constant dense<0.000000e+00> : vector<8x16xf32>
    %260 = tpu.matmul %259, %242, %cst_144 {dimension_numbers = #tpu.dot_dimension_numbers<[1], [0], [0], [1], [0, 0, 1, 1], [], []>} : vector<8x8xf32>, vector<8x16xf32>, vector<8x16xf32> -> vector<8x16xf32>
    %261 = vector.extract_strided_slice %221 {offsets = [0, 0, 0], sizes = [1, 16, 32], strides = [1, 1, 1]} : vector<2x16x32xf32> to vector<1x16x32xf32>
    %262 = vector.shape_cast %261 : vector<1x16x32xf32> to vector<16x32xf32>
    %cst_145 = arith.constant dense<0.000000e+00> : vector<8x32xf32>
    %263 = tpu.matmul %260, %262, %cst_145 {dimension_numbers = #tpu.dot_dimension_numbers<[1], [0], [0], [1], [0, 0, 1, 1], [], []>} : vector<8x16xf32>, vector<16x32xf32>, vector<8x32xf32> -> vector<8x32xf32>
    %264 = vector.extract_strided_slice %209 {offsets = [1, 0, 0], sizes = [1, 32, 16], strides = [1, 1, 1]} : vector<2x32x16xf32> to vector<1x32x16xf32>
    %265 = vector.shape_cast %264 : vector<1x32x16xf32> to vector<32x16xf32>
    %cst_146 = arith.constant dense<0.000000e+00> : vector<8x16xf32>
    %266 = tpu.matmul %207, %265, %cst_146 {dimension_numbers = #tpu.dot_dimension_numbers<[1], [0], [0], [1], [0, 0, 1, 1], [], []>} : vector<8x32xf32>, vector<32x16xf32>, vector<8x16xf32> -> vector<8x16xf32>
    %267 = vector.extract_strided_slice %215 {offsets = [1, 0, 0], sizes = [1, 1, 16], strides = [1, 1, 1]} : vector<2x1x16xf32> to vector<1x1x16xf32>
    %268 = vector.shape_cast %267 : vector<1x1x16xf32> to vector<1x16xf32>
    %269 = vector.broadcast %268 : vector<1x16xf32> to vector<8x16xf32>
    %270 = arith.addf %266, %269 : vector<8x16xf32>
    %271 = vector.extract_strided_slice %211 {offsets = [1, 0, 0], sizes = [1, 32, 16], strides = [1, 1, 1]} : vector<2x32x16xf32> to vector<1x32x16xf32>
    %272 = vector.shape_cast %271 : vector<1x32x16xf32> to vector<32x16xf32>
    %cst_147 = arith.constant dense<0.000000e+00> : vector<8x16xf32>
    %273 = tpu.matmul %207, %272, %cst_147 {dimension_numbers = #tpu.dot_dimension_numbers<[1], [0], [0], [1], [0, 0, 1, 1], [], []>} : vector<8x32xf32>, vector<32x16xf32>, vector<8x16xf32> -> vector<8x16xf32>
    %274 = vector.extract_strided_slice %217 {offsets = [1, 0, 0], sizes = [1, 1, 16], strides = [1, 1, 1]} : vector<2x1x16xf32> to vector<1x1x16xf32>
    %275 = vector.shape_cast %274 : vector<1x1x16xf32> to vector<1x16xf32>
    %276 = vector.broadcast %275 : vector<1x16xf32> to vector<8x16xf32>
    %277 = arith.addf %273, %276 : vector<8x16xf32>
    %278 = vector.extract_strided_slice %213 {offsets = [1, 0, 0], sizes = [1, 32, 16], strides = [1, 1, 1]} : vector<2x32x16xf32> to vector<1x32x16xf32>
    %279 = vector.shape_cast %278 : vector<1x32x16xf32> to vector<32x16xf32>
    %cst_148 = arith.constant dense<0.000000e+00> : vector<8x16xf32>
    %280 = tpu.matmul %207, %279, %cst_148 {dimension_numbers = #tpu.dot_dimension_numbers<[1], [0], [0], [1], [0, 0, 1, 1], [], []>} : vector<8x32xf32>, vector<32x16xf32>, vector<8x16xf32> -> vector<8x16xf32>
    %281 = vector.extract_strided_slice %219 {offsets = [1, 0, 0], sizes = [1, 1, 16], strides = [1, 1, 1]} : vector<2x1x16xf32> to vector<1x1x16xf32>
    %282 = vector.shape_cast %281 : vector<1x1x16xf32> to vector<1x16xf32>
    %283 = vector.broadcast %282 : vector<1x16xf32> to vector<8x16xf32>
    %284 = arith.addf %280, %283 : vector<8x16xf32>
    %cst_149 = arith.constant 2.500000e-01 : f32
    %285 = vector.broadcast %cst_149 : f32 to vector<8x16xf32>
    %286 = arith.mulf %270, %285 : vector<8x16xf32>
    %cst_150 = arith.constant dense<0.000000e+00> : vector<8x8xf32>
    %287 = tpu.matmul %286, %277, %cst_150 {dimension_numbers = #tpu.dot_dimension_numbers<[1], [1], [0], [0], [0, 0, 1, 0], [], []>} : vector<8x16xf32>, vector<8x16xf32>, vector<8x8xf32> -> vector<8x8xf32>
    %cst_151 = arith.constant 5.000000e-01 : f32
    %288 = vector.broadcast %cst_151 : f32 to vector<8x8xf32>
    %289 = arith.cmpf ogt, %3, %288 : vector<8x8xf32>
    %cst_152 = arith.constant -1.70141173E+38 : f32
    %290 = vector.broadcast %cst_152 : f32 to vector<8x8xf32>
    %291 = arith.select %289, %287, %290 : vector<8x8xi1>, vector<8x8xf32>
    %cst_153 = arith.constant dense<0xFF800000> : vector<8xf32>
    %292 = vector.multi_reduction <maximumf>, %291, %cst_153 [1] : vector<8x8xf32> to vector<8xf32>
    %293 = vector.shape_cast %292 : vector<8xf32> to vector<8x1xf32>
    %294 = vector.broadcast %293 : vector<8x1xf32> to vector<8x8xf32>
    %295 = arith.subf %291, %294 : vector<8x8xf32>
    %296 = math.exp %295 : vector<8x8xf32>
    %cst_154 = arith.constant dense<0.000000e+00> : vector<8xf32>
    %297 = vector.multi_reduction <add>, %296, %cst_154 [1] : vector<8x8xf32> to vector<8xf32>
    %298 = vector.shape_cast %297 : vector<8xf32> to vector<8x1xf32>
    %299 = tpu.reciprocal %298 {approx = true} : vector<8x1xf32> -> vector<8x1xf32>
    %300 = vector.broadcast %299 : vector<8x1xf32> to vector<8x8xf32>
    %301 = arith.mulf %296, %300 : vector<8x8xf32>
    %cst_155 = arith.constant dense<0.000000e+00> : vector<8x16xf32>
    %302 = tpu.matmul %301, %284, %cst_155 {dimension_numbers = #tpu.dot_dimension_numbers<[1], [0], [0], [1], [0, 0, 1, 1], [], []>} : vector<8x8xf32>, vector<8x16xf32>, vector<8x16xf32> -> vector<8x16xf32>
    %303 = vector.extract_strided_slice %221 {offsets = [1, 0, 0], sizes = [1, 16, 32], strides = [1, 1, 1]} : vector<2x16x32xf32> to vector<1x16x32xf32>
    %304 = vector.shape_cast %303 : vector<1x16x32xf32> to vector<16x32xf32>
    %cst_156 = arith.constant dense<0.000000e+00> : vector<8x32xf32>
    %305 = tpu.matmul %302, %304, %cst_156 {dimension_numbers = #tpu.dot_dimension_numbers<[1], [0], [0], [1], [0, 0, 1, 1], [], []>} : vector<8x16xf32>, vector<16x32xf32>, vector<8x32xf32> -> vector<8x32xf32>
    %306 = arith.addf %263, %305 : vector<8x32xf32>
    %307 = arith.addf %183, %306 : vector<8x32xf32>
    %c1_157 = arith.constant 1 : index
    %c0_158 = arith.constant 0 : index
    %c0_159 = arith.constant 0 : index
    %308 = vector.load %arg15[%c1_157, %c0_158, %c0_159] : memref<2x1x32xf32, #tpu.memory_space<vmem>>, vector<1x1x32xf32>
    %309 = vector.shape_cast %308 : vector<1x1x32xf32> to vector<1x32xf32>
    %310 = vector.broadcast %309 : vector<1x32xf32> to vector<8x32xf32>
    %311 = arith.addf %307, %310 : vector<8x32xf32>
    %c1_160 = arith.constant 1 : index
    %c0_161 = arith.constant 0 : index
    %c0_162 = arith.constant 0 : index
    %312 = vector.load %arg16[%c1_160, %c0_161, %c0_162] : memref<2x1x32xf32, #tpu.memory_space<vmem>>, vector<1x1x32xf32>
    %313 = vector.shape_cast %312 : vector<1x1x32xf32> to vector<1x32xf32>
    %c1_163 = arith.constant 1 : index
    %c0_164 = arith.constant 0 : index
    %c0_165 = arith.constant 0 : index
    %314 = vector.load %arg17[%c1_163, %c0_164, %c0_165] : memref<2x1x32xf32, #tpu.memory_space<vmem>>, vector<1x1x32xf32>
    %315 = vector.shape_cast %314 : vector<1x1x32xf32> to vector<1x32xf32>
    %cst_166 = arith.constant dense<0.000000e+00> : vector<8xf32>
    %316 = vector.multi_reduction <add>, %311, %cst_166 [1] : vector<8x32xf32> to vector<8xf32>
    %317 = vector.shape_cast %316 : vector<8xf32> to vector<8x1xf32>
    %cst_167 = arith.constant 3.200000e+01 : f32
    %318 = vector.broadcast %cst_167 : f32 to vector<8x1xf32>
    %319 = arith.divf %317, %318 : vector<8x1xf32>
    %320 = vector.broadcast %319 : vector<8x1xf32> to vector<8x32xf32>
    %321 = arith.subf %311, %320 : vector<8x32xf32>
    %322 = arith.mulf %321, %321 : vector<8x32xf32>
    %cst_168 = arith.constant dense<0.000000e+00> : vector<8xf32>
    %323 = vector.multi_reduction <add>, %322, %cst_168 [1] : vector<8x32xf32> to vector<8xf32>
    %324 = vector.shape_cast %323 : vector<8xf32> to vector<8x1xf32>
    %cst_169 = arith.constant 3.200000e+01 : f32
    %325 = vector.broadcast %cst_169 : f32 to vector<8x1xf32>
    %326 = arith.divf %324, %325 : vector<8x1xf32>
    %cst_170 = arith.constant 9.99999974E-6 : f32
    %327 = vector.broadcast %cst_170 : f32 to vector<8x1xf32>
    %328 = arith.addf %326, %327 : vector<8x1xf32>
    %329 = math.rsqrt %328 : vector<8x1xf32>
    %330 = vector.broadcast %329 : vector<8x1xf32> to vector<8x32xf32>
    %331 = arith.mulf %321, %330 : vector<8x32xf32>
    %332 = vector.broadcast %313 : vector<1x32xf32> to vector<8x32xf32>
    %333 = arith.mulf %331, %332 : vector<8x32xf32>
    %334 = vector.broadcast %315 : vector<1x32xf32> to vector<8x32xf32>
    %335 = arith.addf %333, %334 : vector<8x32xf32>
    %c1_171 = arith.constant 1 : index
    %c0_172 = arith.constant 0 : index
    %c0_173 = arith.constant 0 : index
    %336 = vector.load %arg18[%c1_171, %c0_172, %c0_173] : memref<2x32x128xf32, #tpu.memory_space<vmem>>, vector<1x32x128xf32>
    %337 = vector.shape_cast %336 : vector<1x32x128xf32> to vector<32x128xf32>
    %cst_174 = arith.constant dense<0.000000e+00> : vector<8x128xf32>
    %338 = tpu.matmul %335, %337, %cst_174 {dimension_numbers = #tpu.dot_dimension_numbers<[1], [0], [0], [1], [0, 0, 1, 1], [], []>} : vector<8x32xf32>, vector<32x128xf32>, vector<8x128xf32> -> vector<8x128xf32>
    %c1_175 = arith.constant 1 : index
    %c0_176 = arith.constant 0 : index
    %c0_177 = arith.constant 0 : index
    %339 = vector.load %arg19[%c1_175, %c0_176, %c0_177] : memref<2x1x128xf32, #tpu.memory_space<vmem>>, vector<1x1x128xf32>
    %340 = vector.shape_cast %339 : vector<1x1x128xf32> to vector<1x128xf32>
    %341 = vector.broadcast %340 : vector<1x128xf32> to vector<8x128xf32>
    %342 = arith.addf %338, %341 : vector<8x128xf32>
    %343 = arith.mulf %342, %342 : vector<8x128xf32>
    %344 = arith.mulf %342, %343 : vector<8x128xf32>
    %cst_178 = arith.constant 4.471500e-02 : f32
    %345 = vector.broadcast %cst_178 : f32 to vector<8x128xf32>
    %346 = arith.mulf %345, %344 : vector<8x128xf32>
    %347 = arith.addf %342, %346 : vector<8x128xf32>
    %cst_179 = arith.constant 0.797884583 : f32
    %348 = vector.broadcast %cst_179 : f32 to vector<8x128xf32>
    %349 = arith.mulf %348, %347 : vector<8x128xf32>
    %350 = math.tanh %349 : vector<8x128xf32>
    %cst_180 = arith.constant 1.000000e+00 : f32
    %351 = vector.broadcast %cst_180 : f32 to vector<8x128xf32>
    %352 = arith.addf %351, %350 : vector<8x128xf32>
    %cst_181 = arith.constant 5.000000e-01 : f32
    %353 = vector.broadcast %cst_181 : f32 to vector<8x128xf32>
    %354 = arith.mulf %353, %352 : vector<8x128xf32>
    %355 = arith.mulf %342, %354 : vector<8x128xf32>
    %c1_182 = arith.constant 1 : index
    %c0_183 = arith.constant 0 : index
    %c0_184 = arith.constant 0 : index
    %356 = vector.load %arg20[%c1_182, %c0_183, %c0_184] : memref<2x128x32xf32, #tpu.memory_space<vmem>>, vector<1x128x32xf32>
    %357 = vector.shape_cast %356 : vector<1x128x32xf32> to vector<128x32xf32>
    %cst_185 = arith.constant dense<0.000000e+00> : vector<8x32xf32>
    %358 = tpu.matmul %355, %357, %cst_185 {dimension_numbers = #tpu.dot_dimension_numbers<[1], [0], [0], [1], [0, 0, 1, 1], [], []>} : vector<8x128xf32>, vector<128x32xf32>, vector<8x32xf32> -> vector<8x32xf32>
    %c1_186 = arith.constant 1 : index
    %c0_187 = arith.constant 0 : index
    %c0_188 = arith.constant 0 : index
    %359 = vector.load %arg21[%c1_186, %c0_187, %c0_188] : memref<2x1x32xf32, #tpu.memory_space<vmem>>, vector<1x1x32xf32>
    %360 = vector.shape_cast %359 : vector<1x1x32xf32> to vector<1x32xf32>
    %361 = vector.broadcast %360 : vector<1x32xf32> to vector<8x32xf32>
    %362 = arith.addf %358, %361 : vector<8x32xf32>
    %363 = arith.addf %311, %362 : vector<8x32xf32>
    %c0_189 = arith.constant 0 : index
    %c0_190 = arith.constant 0 : index
    %364 = vector.load %arg22[%c0_189, %c0_190] : memref<1x32xf32, #tpu.memory_space<vmem>>, vector<1x32xf32>
    %c0_191 = arith.constant 0 : index
    %c0_192 = arith.constant 0 : index
    %365 = vector.load %arg23[%c0_191, %c0_192] : memref<1x32xf32, #tpu.memory_space<vmem>>, vector<1x32xf32>
    %cst_193 = arith.constant dense<0.000000e+00> : vector<8xf32>
    %366 = vector.multi_reduction <add>, %363, %cst_193 [1] : vector<8x32xf32> to vector<8xf32>
    %367 = vector.shape_cast %366 : vector<8xf32> to vector<8x1xf32>
    %cst_194 = arith.constant 3.200000e+01 : f32
    %368 = vector.broadcast %cst_194 : f32 to vector<8x1xf32>
    %369 = arith.divf %367, %368 : vector<8x1xf32>
    %370 = vector.broadcast %369 : vector<8x1xf32> to vector<8x32xf32>
    %371 = arith.subf %363, %370 : vector<8x32xf32>
    %372 = arith.mulf %371, %371 : vector<8x32xf32>
    %cst_195 = arith.constant dense<0.000000e+00> : vector<8xf32>
    %373 = vector.multi_reduction <add>, %372, %cst_195 [1] : vector<8x32xf32> to vector<8xf32>
    %374 = vector.shape_cast %373 : vector<8xf32> to vector<8x1xf32>
    %cst_196 = arith.constant 3.200000e+01 : f32
    %375 = vector.broadcast %cst_196 : f32 to vector<8x1xf32>
    %376 = arith.divf %374, %375 : vector<8x1xf32>
    %cst_197 = arith.constant 9.99999974E-6 : f32
    %377 = vector.broadcast %cst_197 : f32 to vector<8x1xf32>
    %378 = arith.addf %376, %377 : vector<8x1xf32>
    %379 = math.rsqrt %378 : vector<8x1xf32>
    %380 = vector.broadcast %379 : vector<8x1xf32> to vector<8x32xf32>
    %381 = arith.mulf %371, %380 : vector<8x32xf32>
    %382 = vector.broadcast %364 : vector<1x32xf32> to vector<8x32xf32>
    %383 = arith.mulf %381, %382 : vector<8x32xf32>
    %384 = vector.broadcast %365 : vector<1x32xf32> to vector<8x32xf32>
    %385 = arith.addf %383, %384 : vector<8x32xf32>
    %c0_198 = arith.constant 0 : index
    %c0_199 = arith.constant 0 : index
    %386 = vector.load %arg4[%c0_198, %c0_199] : memref<16x32xf32, #tpu.memory_space<vmem>>, vector<8x32xf32>
    %387 = arith.addf %385, %386 : vector<8x32xf32>
    %c0_200 = arith.constant 0 : index
    %c0_201 = arith.constant 0 : index
    %388 = vector.load %arg43[%c0_200, %c0_201] : memref<16x32xf32, #tpu.memory_space<vmem>>, vector<8x32xf32>
    tpu.vector_store %arg43[%c0_200, %c0_201], %387 {strides = array<i32>} : memref<16x32xf32, #tpu.memory_space<vmem>>, vector<8x32xf32>,
    %c0_202 = arith.constant 0 : index
    %c0_203 = arith.constant 0 : index
    %c0_204 = arith.constant 0 : index
    %389 = vector.load %arg5[%c0_202, %c0_203, %c0_204] : memref<1x8x32xf32, #tpu.memory_space<vmem>>, vector<1x8x32xf32>
    %390 = vector.shape_cast %389 : vector<1x8x32xf32> to vector<8x32xf32>
    %c0_205 = arith.constant 0 : index
    %c0_206 = arith.constant 0 : index
    %c0_207 = arith.constant 0 : index
    %391 = vector.load %arg3[%c0_205, %c0_206, %c0_207] : memref<1x16x16xf32, #tpu.memory_space<vmem>>, vector<1x16x16xf32>
    %392 = vector.shape_cast %391 : vector<1x16x16xf32> to vector<16x16xf32>
    %393 = tpu.iota {dimensions = array<i32: 0>} : vector<8x32xi32>
    %c8 = arith.constant 8 : index
    %c0_208 = arith.constant 0 : index
    %394 = vector.load %arg4[%c8, %c0_208] : memref<16x32xf32, #tpu.memory_space<vmem>>, vector<8x32xf32>
    %395 = arith.addf %390, %394 : vector<8x32xf32>
    %c8_209 = arith.constant 8 : index
    %c0_210 = arith.constant 0 : index
    %396 = vector.load %arg43[%c8_209, %c0_210] : memref<16x32xf32, #tpu.memory_space<vmem>>, vector<8x32xf32>
    tpu.vector_store %arg43[%c8_209, %c0_210], %395 {strides = array<i32>} : memref<16x32xf32, #tpu.memory_space<vmem>>, vector<8x32xf32>,
    %c0_211 = arith.constant 0 : index
    %c0_212 = arith.constant 0 : index
    %397 = vector.load %arg43[%c0_211, %c0_212] : memref<16x32xf32, #tpu.memory_space<vmem>>, vector<16x32xf32>
    %c0_213 = arith.constant 0 : index
    %c0_214 = arith.constant 0 : index
    %c0_215 = arith.constant 0 : index
    %398 = vector.load %arg24[%c0_213, %c0_214, %c0_215] : memref<2x1x32xf32, #tpu.memory_space<vmem>>, vector<1x1x32xf32>
    %399 = vector.shape_cast %398 : vector<1x1x32xf32> to vector<1x32xf32>
    %c0_216 = arith.constant 0 : index
    %c0_217 = arith.constant 0 : index
    %c0_218 = arith.constant 0 : index
    %400 = vector.load %arg25[%c0_216, %c0_217, %c0_218] : memref<2x1x32xf32, #tpu.memory_space<vmem>>, vector<1x1x32xf32>
    %401 = vector.shape_cast %400 : vector<1x1x32xf32> to vector<1x32xf32>
    %cst_219 = arith.constant dense<0.000000e+00> : vector<16xf32>
    %402 = vector.multi_reduction <add>, %397, %cst_219 [1] : vector<16x32xf32> to vector<16xf32>
    %403 = vector.shape_cast %402 : vector<16xf32> to vector<16x1xf32>
    %cst_220 = arith.constant 3.200000e+01 : f32
    %404 = vector.broadcast %cst_220 : f32 to vector<16x1xf32>
    %405 = arith.divf %403, %404 : vector<16x1xf32>
    %406 = vector.broadcast %405 : vector<16x1xf32> to vector<16x32xf32>
    %407 = arith.subf %397, %406 : vector<16x32xf32>
    %408 = arith.mulf %407, %407 : vector<16x32xf32>
    %cst_221 = arith.constant dense<0.000000e+00> : vector<16xf32>
    %409 = vector.multi_reduction <add>, %408, %cst_221 [1] : vector<16x32xf32> to vector<16xf32>
    %410 = vector.shape_cast %409 : vector<16xf32> to vector<16x1xf32>
    %cst_222 = arith.constant 3.200000e+01 : f32
    %411 = vector.broadcast %cst_222 : f32 to vector<16x1xf32>
    %412 = arith.divf %410, %411 : vector<16x1xf32>
    %cst_223 = arith.constant 9.99999974E-6 : f32
    %413 = vector.broadcast %cst_223 : f32 to vector<16x1xf32>
    %414 = arith.addf %412, %413 : vector<16x1xf32>
    %415 = math.rsqrt %414 : vector<16x1xf32>
    %416 = vector.broadcast %415 : vector<16x1xf32> to vector<16x32xf32>
    %417 = arith.mulf %407, %416 : vector<16x32xf32>
    %418 = vector.broadcast %399 : vector<1x32xf32> to vector<16x32xf32>
    %419 = arith.mulf %417, %418 : vector<16x32xf32>
    %420 = vector.broadcast %401 : vector<1x32xf32> to vector<16x32xf32>
    %421 = arith.addf %419, %420 : vector<16x32xf32>
    %c0_224 = arith.constant 0 : index
    %c0_225 = arith.constant 0 : index
    %c0_226 = arith.constant 0 : index
    %c0_227 = arith.constant 0 : index
    %422 = vector.load %arg26[%c0_224, %c0_225, %c0_226, %c0_227] : memref<2x2x32x16xf32, #tpu.memory_space<vmem>>, vector<1x2x32x16xf32>
    %423 = vector.shape_cast %422 : vector<1x2x32x16xf32> to vector<2x32x16xf32>
    %c0_228 = arith.constant 0 : index
    %c0_229 = arith.constant 0 : index
    %c0_230 = arith.constant 0 : index
    %c0_231 = arith.constant 0 : index
    %424 = vector.load %arg28[%c0_228, %c0_229, %c0_230, %c0_231] : memref<2x2x32x16xf32, #tpu.memory_space<vmem>>, vector<1x2x32x16xf32>
    %425 = vector.shape_cast %424 : vector<1x2x32x16xf32> to vector<2x32x16xf32>
    %c0_232 = arith.constant 0 : index
    %c0_233 = arith.constant 0 : index
    %c0_234 = arith.constant 0 : index
    %c0_235 = arith.constant 0 : index
    %426 = vector.load %arg30[%c0_232, %c0_233, %c0_234, %c0_235] : memref<2x2x32x16xf32, #tpu.memory_space<vmem>>, vector<1x2x32x16xf32>
    %427 = vector.shape_cast %426 : vector<1x2x32x16xf32> to vector<2x32x16xf32>
    %c0_236 = arith.constant 0 : index
    %c0_237 = arith.constant 0 : index
    %c0_238 = arith.constant 0 : index
    %c0_239 = arith.constant 0 : index
    %428 = vector.load %arg27[%c0_236, %c0_237, %c0_238, %c0_239] : memref<2x2x1x16xf32, #tpu.memory_space<vmem>>, vector<1x2x1x16xf32>
    %429 = vector.shape_cast %428 : vector<1x2x1x16xf32> to vector<2x1x16xf32>
    %c0_240 = arith.constant 0 : index
    %c0_241 = arith.constant 0 : index
    %c0_242 = arith.constant 0 : index
    %c0_243 = arith.constant 0 : index
    %430 = vector.load %arg29[%c0_240, %c0_241, %c0_242, %c0_243] : memref<2x2x1x16xf32, #tpu.memory_space<vmem>>, vector<1x2x1x16xf32>
    %431 = vector.shape_cast %430 : vector<1x2x1x16xf32> to vector<2x1x16xf32>
    %c0_244 = arith.constant 0 : index
    %c0_245 = arith.constant 0 : index
    %c0_246 = arith.constant 0 : index
    %c0_247 = arith.constant 0 : index
    %432 = vector.load %arg31[%c0_244, %c0_245, %c0_246, %c0_247] : memref<2x2x1x16xf32, #tpu.memory_space<vmem>>, vector<1x2x1x16xf32>
    %433 = vector.shape_cast %432 : vector<1x2x1x16xf32> to vector<2x1x16xf32>
    %c0_248 = arith.constant 0 : index
    %c0_249 = arith.constant 0 : index
    %c0_250 = arith.constant 0 : index
    %c0_251 = arith.constant 0 : index
    %434 = vector.load %arg32[%c0_248, %c0_249, %c0_250, %c0_251] : memref<2x2x16x32xf32, #tpu.memory_space<vmem>>, vector<1x2x16x32xf32>
    %435 = vector.shape_cast %434 : vector<1x2x16x32xf32> to vector<2x16x32xf32>
    %436 = vector.extract_strided_slice %423 {offsets = [0, 0, 0], sizes = [1, 32, 16], strides = [1, 1, 1]} : vector<2x32x16xf32> to vector<1x32x16xf32>
    %437 = vector.shape_cast %436 : vector<1x32x16xf32> to vector<32x16xf32>
    %cst_252 = arith.constant dense<0.000000e+00> : vector<16x16xf32>
    %438 = tpu.matmul %421, %437, %cst_252 {dimension_numbers = #tpu.dot_dimension_numbers<[1], [0], [0], [1], [0, 0, 1, 1], [], []>} : vector<16x32xf32>, vector<32x16xf32>, vector<16x16xf32> -> vector<16x16xf32>
    %439 = vector.extract_strided_slice %429 {offsets = [0, 0, 0], sizes = [1, 1, 16], strides = [1, 1, 1]} : vector<2x1x16xf32> to vector<1x1x16xf32>
    %440 = vector.shape_cast %439 : vector<1x1x16xf32> to vector<1x16xf32>
    %441 = vector.broadcast %440 : vector<1x16xf32> to vector<16x16xf32>
    %442 = arith.addf %438, %441 : vector<16x16xf32>
    %443 = vector.extract_strided_slice %425 {offsets = [0, 0, 0], sizes = [1, 32, 16], strides = [1, 1, 1]} : vector<2x32x16xf32> to vector<1x32x16xf32>
    %444 = vector.shape_cast %443 : vector<1x32x16xf32> to vector<32x16xf32>
    %cst_253 = arith.constant dense<0.000000e+00> : vector<16x16xf32>
    %445 = tpu.matmul %421, %444, %cst_253 {dimension_numbers = #tpu.dot_dimension_numbers<[1], [0], [0], [1], [0, 0, 1, 1], [], []>} : vector<16x32xf32>, vector<32x16xf32>, vector<16x16xf32> -> vector<16x16xf32>
    %446 = vector.extract_strided_slice %431 {offsets = [0, 0, 0], sizes = [1, 1, 16], strides = [1, 1, 1]} : vector<2x1x16xf32> to vector<1x1x16xf32>
    %447 = vector.shape_cast %446 : vector<1x1x16xf32> to vector<1x16xf32>
    %448 = vector.broadcast %447 : vector<1x16xf32> to vector<16x16xf32>
    %449 = arith.addf %445, %448 : vector<16x16xf32>
    %450 = vector.extract_strided_slice %427 {offsets = [0, 0, 0], sizes = [1, 32, 16], strides = [1, 1, 1]} : vector<2x32x16xf32> to vector<1x32x16xf32>
    %451 = vector.shape_cast %450 : vector<1x32x16xf32> to vector<32x16xf32>
    %cst_254 = arith.constant dense<0.000000e+00> : vector<16x16xf32>
    %452 = tpu.matmul %421, %451, %cst_254 {dimension_numbers = #tpu.dot_dimension_numbers<[1], [0], [0], [1], [0, 0, 1, 1], [], []>} : vector<16x32xf32>, vector<32x16xf32>, vector<16x16xf32> -> vector<16x16xf32>
    %453 = vector.extract_strided_slice %433 {offsets = [0, 0, 0], sizes = [1, 1, 16], strides = [1, 1, 1]} : vector<2x1x16xf32> to vector<1x1x16xf32>
    %454 = vector.shape_cast %453 : vector<1x1x16xf32> to vector<1x16xf32>
    %455 = vector.broadcast %454 : vector<1x16xf32> to vector<16x16xf32>
    %456 = arith.addf %452, %455 : vector<16x16xf32>
    %cst_255 = arith.constant 2.500000e-01 : f32
    %457 = vector.broadcast %cst_255 : f32 to vector<16x16xf32>
    %458 = arith.mulf %442, %457 : vector<16x16xf32>
    %cst_256 = arith.constant dense<0.000000e+00> : vector<16x16xf32>
    %459 = tpu.matmul %458, %449, %cst_256 {dimension_numbers = #tpu.dot_dimension_numbers<[1], [1], [0], [0], [0, 0, 1, 0], [], []>} : vector<16x16xf32>, vector<16x16xf32>, vector<16x16xf32> -> vector<16x16xf32>
    %cst_257 = arith.constant 5.000000e-01 : f32
    %460 = vector.broadcast %cst_257 : f32 to vector<16x16xf32>
    %461 = arith.cmpf ogt, %392, %460 : vector<16x16xf32>
    %cst_258 = arith.constant -1.70141173E+38 : f32
    %462 = vector.broadcast %cst_258 : f32 to vector<16x16xf32>
    %463 = arith.select %461, %459, %462 : vector<16x16xi1>, vector<16x16xf32>
    %cst_259 = arith.constant dense<0xFF800000> : vector<16xf32>
    %464 = vector.multi_reduction <maximumf>, %463, %cst_259 [1] : vector<16x16xf32> to vector<16xf32>
    %465 = vector.shape_cast %464 : vector<16xf32> to vector<16x1xf32>
    %466 = vector.broadcast %465 : vector<16x1xf32> to vector<16x16xf32>
    %467 = arith.subf %463, %466 : vector<16x16xf32>
    %468 = math.exp %467 : vector<16x16xf32>
    %cst_260 = arith.constant dense<0.000000e+00> : vector<16xf32>
    %469 = vector.multi_reduction <add>, %468, %cst_260 [1] : vector<16x16xf32> to vector<16xf32>
    %470 = vector.shape_cast %469 : vector<16xf32> to vector<16x1xf32>
    %471 = tpu.reciprocal %470 {approx = true} : vector<16x1xf32> -> vector<16x1xf32>
    %472 = vector.broadcast %471 : vector<16x1xf32> to vector<16x16xf32>
    %473 = arith.mulf %468, %472 : vector<16x16xf32>
    %cst_261 = arith.constant dense<0.000000e+00> : vector<16x16xf32>
    %474 = tpu.matmul %473, %456, %cst_261 {dimension_numbers = #tpu.dot_dimension_numbers<[1], [0], [0], [1], [0, 0, 1, 1], [], []>} : vector<16x16xf32>, vector<16x16xf32>, vector<16x16xf32> -> vector<16x16xf32>
    %475 = vector.extract_strided_slice %435 {offsets = [0, 0, 0], sizes = [1, 16, 32], strides = [1, 1, 1]} : vector<2x16x32xf32> to vector<1x16x32xf32>
    %476 = vector.shape_cast %475 : vector<1x16x32xf32> to vector<16x32xf32>
    %cst_262 = arith.constant dense<0.000000e+00> : vector<16x32xf32>
    %477 = tpu.matmul %474, %476, %cst_262 {dimension_numbers = #tpu.dot_dimension_numbers<[1], [0], [0], [1], [0, 0, 1, 1], [], []>} : vector<16x16xf32>, vector<16x32xf32>, vector<16x32xf32> -> vector<16x32xf32>
    %478 = vector.extract_strided_slice %423 {offsets = [1, 0, 0], sizes = [1, 32, 16], strides = [1, 1, 1]} : vector<2x32x16xf32> to vector<1x32x16xf32>
    %479 = vector.shape_cast %478 : vector<1x32x16xf32> to vector<32x16xf32>
    %cst_263 = arith.constant dense<0.000000e+00> : vector<16x16xf32>
    %480 = tpu.matmul %421, %479, %cst_263 {dimension_numbers = #tpu.dot_dimension_numbers<[1], [0], [0], [1], [0, 0, 1, 1], [], []>} : vector<16x32xf32>, vector<32x16xf32>, vector<16x16xf32> -> vector<16x16xf32>
    %481 = vector.extract_strided_slice %429 {offsets = [1, 0, 0], sizes = [1, 1, 16], strides = [1, 1, 1]} : vector<2x1x16xf32> to vector<1x1x16xf32>
    %482 = vector.shape_cast %481 : vector<1x1x16xf32> to vector<1x16xf32>
    %483 = vector.broadcast %482 : vector<1x16xf32> to vector<16x16xf32>
    %484 = arith.addf %480, %483 : vector<16x16xf32>
    %485 = vector.extract_strided_slice %425 {offsets = [1, 0, 0], sizes = [1, 32, 16], strides = [1, 1, 1]} : vector<2x32x16xf32> to vector<1x32x16xf32>
    %486 = vector.shape_cast %485 : vector<1x32x16xf32> to vector<32x16xf32>
    %cst_264 = arith.constant dense<0.000000e+00> : vector<16x16xf32>
    %487 = tpu.matmul %421, %486, %cst_264 {dimension_numbers = #tpu.dot_dimension_numbers<[1], [0], [0], [1], [0, 0, 1, 1], [], []>} : vector<16x32xf32>, vector<32x16xf32>, vector<16x16xf32> -> vector<16x16xf32>
    %488 = vector.extract_strided_slice %431 {offsets = [1, 0, 0], sizes = [1, 1, 16], strides = [1, 1, 1]} : vector<2x1x16xf32> to vector<1x1x16xf32>
    %489 = vector.shape_cast %488 : vector<1x1x16xf32> to vector<1x16xf32>
    %490 = vector.broadcast %489 : vector<1x16xf32> to vector<16x16xf32>
    %491 = arith.addf %487, %490 : vector<16x16xf32>
    %492 = vector.extract_strided_slice %427 {offsets = [1, 0, 0], sizes = [1, 32, 16], strides = [1, 1, 1]} : vector<2x32x16xf32> to vector<1x32x16xf32>
    %493 = vector.shape_cast %492 : vector<1x32x16xf32> to vector<32x16xf32>
    %cst_265 = arith.constant dense<0.000000e+00> : vector<16x16xf32>
    %494 = tpu.matmul %421, %493, %cst_265 {dimension_numbers = #tpu.dot_dimension_numbers<[1], [0], [0], [1], [0, 0, 1, 1], [], []>} : vector<16x32xf32>, vector<32x16xf32>, vector<16x16xf32> -> vector<16x16xf32>
    %495 = vector.extract_strided_slice %433 {offsets = [1, 0, 0], sizes = [1, 1, 16], strides = [1, 1, 1]} : vector<2x1x16xf32> to vector<1x1x16xf32>
    %496 = vector.shape_cast %495 : vector<1x1x16xf32> to vector<1x16xf32>
    %497 = vector.broadcast %496 : vector<1x16xf32> to vector<16x16xf32>
    %498 = arith.addf %494, %497 : vector<16x16xf32>
    %cst_266 = arith.constant 2.500000e-01 : f32
    %499 = vector.broadcast %cst_266 : f32 to vector<16x16xf32>
    %500 = arith.mulf %484, %499 : vector<16x16xf32>
    %cst_267 = arith.constant dense<0.000000e+00> : vector<16x16xf32>
    %501 = tpu.matmul %500, %491, %cst_267 {dimension_numbers = #tpu.dot_dimension_numbers<[1], [1], [0], [0], [0, 0, 1, 0], [], []>} : vector<16x16xf32>, vector<16x16xf32>, vector<16x16xf32> -> vector<16x16xf32>
    %cst_268 = arith.constant 5.000000e-01 : f32
    %502 = vector.broadcast %cst_268 : f32 to vector<16x16xf32>
    %503 = arith.cmpf ogt, %392, %502 : vector<16x16xf32>
    %cst_269 = arith.constant -1.70141173E+38 : f32
    %504 = vector.broadcast %cst_269 : f32 to vector<16x16xf32>
    %505 = arith.select %503, %501, %504 : vector<16x16xi1>, vector<16x16xf32>
    %cst_270 = arith.constant dense<0xFF800000> : vector<16xf32>
    %506 = vector.multi_reduction <maximumf>, %505, %cst_270 [1] : vector<16x16xf32> to vector<16xf32>
    %507 = vector.shape_cast %506 : vector<16xf32> to vector<16x1xf32>
    %508 = vector.broadcast %507 : vector<16x1xf32> to vector<16x16xf32>
    %509 = arith.subf %505, %508 : vector<16x16xf32>
    %510 = math.exp %509 : vector<16x16xf32>
    %cst_271 = arith.constant dense<0.000000e+00> : vector<16xf32>
    %511 = vector.multi_reduction <add>, %510, %cst_271 [1] : vector<16x16xf32> to vector<16xf32>
    %512 = vector.shape_cast %511 : vector<16xf32> to vector<16x1xf32>
    %513 = tpu.reciprocal %512 {approx = true} : vector<16x1xf32> -> vector<16x1xf32>
    %514 = vector.broadcast %513 : vector<16x1xf32> to vector<16x16xf32>
    %515 = arith.mulf %510, %514 : vector<16x16xf32>
    %cst_272 = arith.constant dense<0.000000e+00> : vector<16x16xf32>
    %516 = tpu.matmul %515, %498, %cst_272 {dimension_numbers = #tpu.dot_dimension_numbers<[1], [0], [0], [1], [0, 0, 1, 1], [], []>} : vector<16x16xf32>, vector<16x16xf32>, vector<16x16xf32> -> vector<16x16xf32>
    %517 = vector.extract_strided_slice %435 {offsets = [1, 0, 0], sizes = [1, 16, 32], strides = [1, 1, 1]} : vector<2x16x32xf32> to vector<1x16x32xf32>
    %518 = vector.shape_cast %517 : vector<1x16x32xf32> to vector<16x32xf32>
    %cst_273 = arith.constant dense<0.000000e+00> : vector<16x32xf32>
    %519 = tpu.matmul %516, %518, %cst_273 {dimension_numbers = #tpu.dot_dimension_numbers<[1], [0], [0], [1], [0, 0, 1, 1], [], []>} : vector<16x16xf32>, vector<16x32xf32>, vector<16x32xf32> -> vector<16x32xf32>
    %520 = arith.addf %477, %519 : vector<16x32xf32>
    %521 = arith.addf %397, %520 : vector<16x32xf32>
    %c0_274 = arith.constant 0 : index
    %c0_275 = arith.constant 0 : index
    %c0_276 = arith.constant 0 : index
    %522 = vector.load %arg33[%c0_274, %c0_275, %c0_276] : memref<2x1x32xf32, #tpu.memory_space<vmem>>, vector<1x1x32xf32>
    %523 = vector.shape_cast %522 : vector<1x1x32xf32> to vector<1x32xf32>
    %524 = vector.broadcast %523 : vector<1x32xf32> to vector<16x32xf32>
    %525 = arith.addf %521, %524 : vector<16x32xf32>
    %c0_277 = arith.constant 0 : index
    %c0_278 = arith.constant 0 : index
    %c0_279 = arith.constant 0 : index
    %526 = vector.load %arg34[%c0_277, %c0_278, %c0_279] : memref<2x1x32xf32, #tpu.memory_space<vmem>>, vector<1x1x32xf32>
    %527 = vector.shape_cast %526 : vector<1x1x32xf32> to vector<1x32xf32>
    %c0_280 = arith.constant 0 : index
    %c0_281 = arith.constant 0 : index
    %c0_282 = arith.constant 0 : index
    %528 = vector.load %arg35[%c0_280, %c0_281, %c0_282] : memref<2x1x32xf32, #tpu.memory_space<vmem>>, vector<1x1x32xf32>
    %529 = vector.shape_cast %528 : vector<1x1x32xf32> to vector<1x32xf32>
    %cst_283 = arith.constant dense<0.000000e+00> : vector<16xf32>
    %530 = vector.multi_reduction <add>, %525, %cst_283 [1] : vector<16x32xf32> to vector<16xf32>
    %531 = vector.shape_cast %530 : vector<16xf32> to vector<16x1xf32>
    %cst_284 = arith.constant 3.200000e+01 : f32
    %532 = vector.broadcast %cst_284 : f32 to vector<16x1xf32>
    %533 = arith.divf %531, %532 : vector<16x1xf32>
    %534 = vector.broadcast %533 : vector<16x1xf32> to vector<16x32xf32>
    %535 = arith.subf %525, %534 : vector<16x32xf32>
    %536 = arith.mulf %535, %535 : vector<16x32xf32>
    %cst_285 = arith.constant dense<0.000000e+00> : vector<16xf32>
    %537 = vector.multi_reduction <add>, %536, %cst_285 [1] : vector<16x32xf32> to vector<16xf32>
    %538 = vector.shape_cast %537 : vector<16xf32> to vector<16x1xf32>
    %cst_286 = arith.constant 3.200000e+01 : f32
    %539 = vector.broadcast %cst_286 : f32 to vector<16x1xf32>
    %540 = arith.divf %538, %539 : vector<16x1xf32>
    %cst_287 = arith.constant 9.99999974E-6 : f32
    %541 = vector.broadcast %cst_287 : f32 to vector<16x1xf32>
    %542 = arith.addf %540, %541 : vector<16x1xf32>
    %543 = math.rsqrt %542 : vector<16x1xf32>
    %544 = vector.broadcast %543 : vector<16x1xf32> to vector<16x32xf32>
    %545 = arith.mulf %535, %544 : vector<16x32xf32>
    %546 = vector.broadcast %527 : vector<1x32xf32> to vector<16x32xf32>
    %547 = arith.mulf %545, %546 : vector<16x32xf32>
    %548 = vector.broadcast %529 : vector<1x32xf32> to vector<16x32xf32>
    %549 = arith.addf %547, %548 : vector<16x32xf32>
    %c0_288 = arith.constant 0 : index
    %c0_289 = arith.constant 0 : index
    %c0_290 = arith.constant 0 : index
    %550 = vector.load %arg36[%c0_288, %c0_289, %c0_290] : memref<2x32x128xf32, #tpu.memory_space<vmem>>, vector<1x32x128xf32>
    %551 = vector.shape_cast %550 : vector<1x32x128xf32> to vector<32x128xf32>
    %cst_291 = arith.constant dense<0.000000e+00> : vector<16x128xf32>
    %552 = tpu.matmul %549, %551, %cst_291 {dimension_numbers = #tpu.dot_dimension_numbers<[1], [0], [0], [1], [0, 0, 1, 1], [], []>} : vector<16x32xf32>, vector<32x128xf32>, vector<16x128xf32> -> vector<16x128xf32>
    %c0_292 = arith.constant 0 : index
    %c0_293 = arith.constant 0 : index
    %c0_294 = arith.constant 0 : index
    %553 = vector.load %arg37[%c0_292, %c0_293, %c0_294] : memref<2x1x128xf32, #tpu.memory_space<vmem>>, vector<1x1x128xf32>
    %554 = vector.shape_cast %553 : vector<1x1x128xf32> to vector<1x128xf32>
    %555 = vector.broadcast %554 : vector<1x128xf32> to vector<16x128xf32>
    %556 = arith.addf %552, %555 : vector<16x128xf32>
    %557 = arith.mulf %556, %556 : vector<16x128xf32>
    %558 = arith.mulf %556, %557 : vector<16x128xf32>
    %cst_295 = arith.constant 4.471500e-02 : f32
    %559 = vector.broadcast %cst_295 : f32 to vector<16x128xf32>
    %560 = arith.mulf %559, %558 : vector<16x128xf32>
    %561 = arith.addf %556, %560 : vector<16x128xf32>
    %cst_296 = arith.constant 0.797884583 : f32
    %562 = vector.broadcast %cst_296 : f32 to vector<16x128xf32>
    %563 = arith.mulf %562, %561 : vector<16x128xf32>
    %564 = math.tanh %563 : vector<16x128xf32>
    %cst_297 = arith.constant 1.000000e+00 : f32
    %565 = vector.broadcast %cst_297 : f32 to vector<16x128xf32>
    %566 = arith.addf %565, %564 : vector<16x128xf32>
    %cst_298 = arith.constant 5.000000e-01 : f32
    %567 = vector.broadcast %cst_298 : f32 to vector<16x128xf32>
    %568 = arith.mulf %567, %566 : vector<16x128xf32>
    %569 = arith.mulf %556, %568 : vector<16x128xf32>
    %c0_299 = arith.constant 0 : index
    %c0_300 = arith.constant 0 : index
    %c0_301 = arith.constant 0 : index
    %570 = vector.load %arg38[%c0_299, %c0_300, %c0_301] : memref<2x128x32xf32, #tpu.memory_space<vmem>>, vector<1x128x32xf32>
    %571 = vector.shape_cast %570 : vector<1x128x32xf32> to vector<128x32xf32>
    %cst_302 = arith.constant dense<0.000000e+00> : vector<16x32xf32>
    %572 = tpu.matmul %569, %571, %cst_302 {dimension_numbers = #tpu.dot_dimension_numbers<[1], [0], [0], [1], [0, 0, 1, 1], [], []>} : vector<16x128xf32>, vector<128x32xf32>, vector<16x32xf32> -> vector<16x32xf32>
    %c0_303 = arith.constant 0 : index
    %c0_304 = arith.constant 0 : index
    %c0_305 = arith.constant 0 : index
    %573 = vector.load %arg39[%c0_303, %c0_304, %c0_305] : memref<2x1x32xf32, #tpu.memory_space<vmem>>, vector<1x1x32xf32>
    %574 = vector.shape_cast %573 : vector<1x1x32xf32> to vector<1x32xf32>
    %575 = vector.broadcast %574 : vector<1x32xf32> to vector<16x32xf32>
    %576 = arith.addf %572, %575 : vector<16x32xf32>
    %577 = arith.addf %525, %576 : vector<16x32xf32>
    %c1_306 = arith.constant 1 : index
    %c0_307 = arith.constant 0 : index
    %c0_308 = arith.constant 0 : index
    %578 = vector.load %arg24[%c1_306, %c0_307, %c0_308] : memref<2x1x32xf32, #tpu.memory_space<vmem>>, vector<1x1x32xf32>
    %579 = vector.shape_cast %578 : vector<1x1x32xf32> to vector<1x32xf32>
    %c1_309 = arith.constant 1 : index
    %c0_310 = arith.constant 0 : index
    %c0_311 = arith.constant 0 : index
    %580 = vector.load %arg25[%c1_309, %c0_310, %c0_311] : memref<2x1x32xf32, #tpu.memory_space<vmem>>, vector<1x1x32xf32>
    %581 = vector.shape_cast %580 : vector<1x1x32xf32> to vector<1x32xf32>
    %cst_312 = arith.constant dense<0.000000e+00> : vector<16xf32>
    %582 = vector.multi_reduction <add>, %577, %cst_312 [1] : vector<16x32xf32> to vector<16xf32>
    %583 = vector.shape_cast %582 : vector<16xf32> to vector<16x1xf32>
    %cst_313 = arith.constant 3.200000e+01 : f32
    %584 = vector.broadcast %cst_313 : f32 to vector<16x1xf32>
    %585 = arith.divf %583, %584 : vector<16x1xf32>
    %586 = vector.broadcast %585 : vector<16x1xf32> to vector<16x32xf32>
    %587 = arith.subf %577, %586 : vector<16x32xf32>
    %588 = arith.mulf %587, %587 : vector<16x32xf32>
    %cst_314 = arith.constant dense<0.000000e+00> : vector<16xf32>
    %589 = vector.multi_reduction <add>, %588, %cst_314 [1] : vector<16x32xf32> to vector<16xf32>
    %590 = vector.shape_cast %589 : vector<16xf32> to vector<16x1xf32>
    %cst_315 = arith.constant 3.200000e+01 : f32
    %591 = vector.broadcast %cst_315 : f32 to vector<16x1xf32>
    %592 = arith.divf %590, %591 : vector<16x1xf32>
    %cst_316 = arith.constant 9.99999974E-6 : f32
    %593 = vector.broadcast %cst_316 : f32 to vector<16x1xf32>
    %594 = arith.addf %592, %593 : vector<16x1xf32>
    %595 = math.rsqrt %594 : vector<16x1xf32>
    %596 = vector.broadcast %595 : vector<16x1xf32> to vector<16x32xf32>
    %597 = arith.mulf %587, %596 : vector<16x32xf32>
    %598 = vector.broadcast %579 : vector<1x32xf32> to vector<16x32xf32>
    %599 = arith.mulf %597, %598 : vector<16x32xf32>
    %600 = vector.broadcast %581 : vector<1x32xf32> to vector<16x32xf32>
    %601 = arith.addf %599, %600 : vector<16x32xf32>
    %c1_317 = arith.constant 1 : index
    %c0_318 = arith.constant 0 : index
    %c0_319 = arith.constant 0 : index
    %c0_320 = arith.constant 0 : index
    %602 = vector.load %arg26[%c1_317, %c0_318, %c0_319, %c0_320] : memref<2x2x32x16xf32, #tpu.memory_space<vmem>>, vector<1x2x32x16xf32>
    %603 = vector.shape_cast %602 : vector<1x2x32x16xf32> to vector<2x32x16xf32>
    %c1_321 = arith.constant 1 : index
    %c0_322 = arith.constant 0 : index
    %c0_323 = arith.constant 0 : index
    %c0_324 = arith.constant 0 : index
    %604 = vector.load %arg28[%c1_321, %c0_322, %c0_323, %c0_324] : memref<2x2x32x16xf32, #tpu.memory_space<vmem>>, vector<1x2x32x16xf32>
    %605 = vector.shape_cast %604 : vector<1x2x32x16xf32> to vector<2x32x16xf32>
    %c1_325 = arith.constant 1 : index
    %c0_326 = arith.constant 0 : index
    %c0_327 = arith.constant 0 : index
    %c0_328 = arith.constant 0 : index
    %606 = vector.load %arg30[%c1_325, %c0_326, %c0_327, %c0_328] : memref<2x2x32x16xf32, #tpu.memory_space<vmem>>, vector<1x2x32x16xf32>
    %607 = vector.shape_cast %606 : vector<1x2x32x16xf32> to vector<2x32x16xf32>
    %c1_329 = arith.constant 1 : index
    %c0_330 = arith.constant 0 : index
    %c0_331 = arith.constant 0 : index
    %c0_332 = arith.constant 0 : index
    %608 = vector.load %arg27[%c1_329, %c0_330, %c0_331, %c0_332] : memref<2x2x1x16xf32, #tpu.memory_space<vmem>>, vector<1x2x1x16xf32>
    %609 = vector.shape_cast %608 : vector<1x2x1x16xf32> to vector<2x1x16xf32>
    %c1_333 = arith.constant 1 : index
    %c0_334 = arith.constant 0 : index
    %c0_335 = arith.constant 0 : index
    %c0_336 = arith.constant 0 : index
    %610 = vector.load %arg29[%c1_333, %c0_334, %c0_335, %c0_336] : memref<2x2x1x16xf32, #tpu.memory_space<vmem>>, vector<1x2x1x16xf32>
    %611 = vector.shape_cast %610 : vector<1x2x1x16xf32> to vector<2x1x16xf32>
    %c1_337 = arith.constant 1 : index
    %c0_338 = arith.constant 0 : index
    %c0_339 = arith.constant 0 : index
    %c0_340 = arith.constant 0 : index
    %612 = vector.load %arg31[%c1_337, %c0_338, %c0_339, %c0_340] : memref<2x2x1x16xf32, #tpu.memory_space<vmem>>, vector<1x2x1x16xf32>
    %613 = vector.shape_cast %612 : vector<1x2x1x16xf32> to vector<2x1x16xf32>
    %c1_341 = arith.constant 1 : index
    %c0_342 = arith.constant 0 : index
    %c0_343 = arith.constant 0 : index
    %c0_344 = arith.constant 0 : index
    %614 = vector.load %arg32[%c1_341, %c0_342, %c0_343, %c0_344] : memref<2x2x16x32xf32, #tpu.memory_space<vmem>>, vector<1x2x16x32xf32>
    %615 = vector.shape_cast %614 : vector<1x2x16x32xf32> to vector<2x16x32xf32>
    %616 = vector.extract_strided_slice %603 {offsets = [0, 0, 0], sizes = [1, 32, 16], strides = [1, 1, 1]} : vector<2x32x16xf32> to vector<1x32x16xf32>
    %617 = vector.shape_cast %616 : vector<1x32x16xf32> to vector<32x16xf32>
    %cst_345 = arith.constant dense<0.000000e+00> : vector<16x16xf32>
    %618 = tpu.matmul %601, %617, %cst_345 {dimension_numbers = #tpu.dot_dimension_numbers<[1], [0], [0], [1], [0, 0, 1, 1], [], []>} : vector<16x32xf32>, vector<32x16xf32>, vector<16x16xf32> -> vector<16x16xf32>
    %619 = vector.extract_strided_slice %609 {offsets = [0, 0, 0], sizes = [1, 1, 16], strides = [1, 1, 1]} : vector<2x1x16xf32> to vector<1x1x16xf32>
    %620 = vector.shape_cast %619 : vector<1x1x16xf32> to vector<1x16xf32>
    %621 = vector.broadcast %620 : vector<1x16xf32> to vector<16x16xf32>
    %622 = arith.addf %618, %621 : vector<16x16xf32>
    %623 = vector.extract_strided_slice %605 {offsets = [0, 0, 0], sizes = [1, 32, 16], strides = [1, 1, 1]} : vector<2x32x16xf32> to vector<1x32x16xf32>
    %624 = vector.shape_cast %623 : vector<1x32x16xf32> to vector<32x16xf32>
    %cst_346 = arith.constant dense<0.000000e+00> : vector<16x16xf32>
    %625 = tpu.matmul %601, %624, %cst_346 {dimension_numbers = #tpu.dot_dimension_numbers<[1], [0], [0], [1], [0, 0, 1, 1], [], []>} : vector<16x32xf32>, vector<32x16xf32>, vector<16x16xf32> -> vector<16x16xf32>
    %626 = vector.extract_strided_slice %611 {offsets = [0, 0, 0], sizes = [1, 1, 16], strides = [1, 1, 1]} : vector<2x1x16xf32> to vector<1x1x16xf32>
    %627 = vector.shape_cast %626 : vector<1x1x16xf32> to vector<1x16xf32>
    %628 = vector.broadcast %627 : vector<1x16xf32> to vector<16x16xf32>
    %629 = arith.addf %625, %628 : vector<16x16xf32>
    %630 = vector.extract_strided_slice %607 {offsets = [0, 0, 0], sizes = [1, 32, 16], strides = [1, 1, 1]} : vector<2x32x16xf32> to vector<1x32x16xf32>
    %631 = vector.shape_cast %630 : vector<1x32x16xf32> to vector<32x16xf32>
    %cst_347 = arith.constant dense<0.000000e+00> : vector<16x16xf32>
    %632 = tpu.matmul %601, %631, %cst_347 {dimension_numbers = #tpu.dot_dimension_numbers<[1], [0], [0], [1], [0, 0, 1, 1], [], []>} : vector<16x32xf32>, vector<32x16xf32>, vector<16x16xf32> -> vector<16x16xf32>
    %633 = vector.extract_strided_slice %613 {offsets = [0, 0, 0], sizes = [1, 1, 16], strides = [1, 1, 1]} : vector<2x1x16xf32> to vector<1x1x16xf32>
    %634 = vector.shape_cast %633 : vector<1x1x16xf32> to vector<1x16xf32>
    %635 = vector.broadcast %634 : vector<1x16xf32> to vector<16x16xf32>
    %636 = arith.addf %632, %635 : vector<16x16xf32>
    %cst_348 = arith.constant 2.500000e-01 : f32
    %637 = vector.broadcast %cst_348 : f32 to vector<16x16xf32>
    %638 = arith.mulf %622, %637 : vector<16x16xf32>
    %cst_349 = arith.constant dense<0.000000e+00> : vector<16x16xf32>
    %639 = tpu.matmul %638, %629, %cst_349 {dimension_numbers = #tpu.dot_dimension_numbers<[1], [1], [0], [0], [0, 0, 1, 0], [], []>} : vector<16x16xf32>, vector<16x16xf32>, vector<16x16xf32> -> vector<16x16xf32>
    %cst_350 = arith.constant 5.000000e-01 : f32
    %640 = vector.broadcast %cst_350 : f32 to vector<16x16xf32>
    %641 = arith.cmpf ogt, %392, %640 : vector<16x16xf32>
    %cst_351 = arith.constant -1.70141173E+38 : f32
    %642 = vector.broadcast %cst_351 : f32 to vector<16x16xf32>
    %643 = arith.select %641, %639, %642 : vector<16x16xi1>, vector<16x16xf32>
    %cst_352 = arith.constant dense<0xFF800000> : vector<16xf32>
    %644 = vector.multi_reduction <maximumf>, %643, %cst_352 [1] : vector<16x16xf32> to vector<16xf32>
    %645 = vector.shape_cast %644 : vector<16xf32> to vector<16x1xf32>
    %646 = vector.broadcast %645 : vector<16x1xf32> to vector<16x16xf32>
    %647 = arith.subf %643, %646 : vector<16x16xf32>
    %648 = math.exp %647 : vector<16x16xf32>
    %cst_353 = arith.constant dense<0.000000e+00> : vector<16xf32>
    %649 = vector.multi_reduction <add>, %648, %cst_353 [1] : vector<16x16xf32> to vector<16xf32>
    %650 = vector.shape_cast %649 : vector<16xf32> to vector<16x1xf32>
    %651 = tpu.reciprocal %650 {approx = true} : vector<16x1xf32> -> vector<16x1xf32>
    %652 = vector.broadcast %651 : vector<16x1xf32> to vector<16x16xf32>
    %653 = arith.mulf %648, %652 : vector<16x16xf32>
    %cst_354 = arith.constant dense<0.000000e+00> : vector<16x16xf32>
    %654 = tpu.matmul %653, %636, %cst_354 {dimension_numbers = #tpu.dot_dimension_numbers<[1], [0], [0], [1], [0, 0, 1, 1], [], []>} : vector<16x16xf32>, vector<16x16xf32>, vector<16x16xf32> -> vector<16x16xf32>
    %655 = vector.extract_strided_slice %615 {offsets = [0, 0, 0], sizes = [1, 16, 32], strides = [1, 1, 1]} : vector<2x16x32xf32> to vector<1x16x32xf32>
    %656 = vector.shape_cast %655 : vector<1x16x32xf32> to vector<16x32xf32>
    %cst_355 = arith.constant dense<0.000000e+00> : vector<16x32xf32>
    %657 = tpu.matmul %654, %656, %cst_355 {dimension_numbers = #tpu.dot_dimension_numbers<[1], [0], [0], [1], [0, 0, 1, 1], [], []>} : vector<16x16xf32>, vector<16x32xf32>, vector<16x32xf32> -> vector<16x32xf32>
    %658 = vector.extract_strided_slice %603 {offsets = [1, 0, 0], sizes = [1, 32, 16], strides = [1, 1, 1]} : vector<2x32x16xf32> to vector<1x32x16xf32>
    %659 = vector.shape_cast %658 : vector<1x32x16xf32> to vector<32x16xf32>
    %cst_356 = arith.constant dense<0.000000e+00> : vector<16x16xf32>
    %660 = tpu.matmul %601, %659, %cst_356 {dimension_numbers = #tpu.dot_dimension_numbers<[1], [0], [0], [1], [0, 0, 1, 1], [], []>} : vector<16x32xf32>, vector<32x16xf32>, vector<16x16xf32> -> vector<16x16xf32>
    %661 = vector.extract_strided_slice %609 {offsets = [1, 0, 0], sizes = [1, 1, 16], strides = [1, 1, 1]} : vector<2x1x16xf32> to vector<1x1x16xf32>
    %662 = vector.shape_cast %661 : vector<1x1x16xf32> to vector<1x16xf32>
    %663 = vector.broadcast %662 : vector<1x16xf32> to vector<16x16xf32>
    %664 = arith.addf %660, %663 : vector<16x16xf32>
    %665 = vector.extract_strided_slice %605 {offsets = [1, 0, 0], sizes = [1, 32, 16], strides = [1, 1, 1]} : vector<2x32x16xf32> to vector<1x32x16xf32>
    %666 = vector.shape_cast %665 : vector<1x32x16xf32> to vector<32x16xf32>
    %cst_357 = arith.constant dense<0.000000e+00> : vector<16x16xf32>
    %667 = tpu.matmul %601, %666, %cst_357 {dimension_numbers = #tpu.dot_dimension_numbers<[1], [0], [0], [1], [0, 0, 1, 1], [], []>} : vector<16x32xf32>, vector<32x16xf32>, vector<16x16xf32> -> vector<16x16xf32>
    %668 = vector.extract_strided_slice %611 {offsets = [1, 0, 0], sizes = [1, 1, 16], strides = [1, 1, 1]} : vector<2x1x16xf32> to vector<1x1x16xf32>
    %669 = vector.shape_cast %668 : vector<1x1x16xf32> to vector<1x16xf32>
    %670 = vector.broadcast %669 : vector<1x16xf32> to vector<16x16xf32>
    %671 = arith.addf %667, %670 : vector<16x16xf32>
    %672 = vector.extract_strided_slice %607 {offsets = [1, 0, 0], sizes = [1, 32, 16], strides = [1, 1, 1]} : vector<2x32x16xf32> to vector<1x32x16xf32>
    %673 = vector.shape_cast %672 : vector<1x32x16xf32> to vector<32x16xf32>
    %cst_358 = arith.constant dense<0.000000e+00> : vector<16x16xf32>
    %674 = tpu.matmul %601, %673, %cst_358 {dimension_numbers = #tpu.dot_dimension_numbers<[1], [0], [0], [1], [0, 0, 1, 1], [], []>} : vector<16x32xf32>, vector<32x16xf32>, vector<16x16xf32> -> vector<16x16xf32>
    %675 = vector.extract_strided_slice %613 {offsets = [1, 0, 0], sizes = [1, 1, 16], strides = [1, 1, 1]} : vector<2x1x16xf32> to vector<1x1x16xf32>
    %676 = vector.shape_cast %675 : vector<1x1x16xf32> to vector<1x16xf32>
    %677 = vector.broadcast %676 : vector<1x16xf32> to vector<16x16xf32>
    %678 = arith.addf %674, %677 : vector<16x16xf32>
    %cst_359 = arith.constant 2.500000e-01 : f32
    %679 = vector.broadcast %cst_359 : f32 to vector<16x16xf32>
    %680 = arith.mulf %664, %679 : vector<16x16xf32>
    %cst_360 = arith.constant dense<0.000000e+00> : vector<16x16xf32>
    %681 = tpu.matmul %680, %671, %cst_360 {dimension_numbers = #tpu.dot_dimension_numbers<[1], [1], [0], [0], [0, 0, 1, 0], [], []>} : vector<16x16xf32>, vector<16x16xf32>, vector<16x16xf32> -> vector<16x16xf32>
    %cst_361 = arith.constant 5.000000e-01 : f32
    %682 = vector.broadcast %cst_361 : f32 to vector<16x16xf32>
    %683 = arith.cmpf ogt, %392, %682 : vector<16x16xf32>
    %cst_362 = arith.constant -1.70141173E+38 : f32
    %684 = vector.broadcast %cst_362 : f32 to vector<16x16xf32>
    %685 = arith.select %683, %681, %684 : vector<16x16xi1>, vector<16x16xf32>
    %cst_363 = arith.constant dense<0xFF800000> : vector<16xf32>
    %686 = vector.multi_reduction <maximumf>, %685, %cst_363 [1] : vector<16x16xf32> to vector<16xf32>
    %687 = vector.shape_cast %686 : vector<16xf32> to vector<16x1xf32>
    %688 = vector.broadcast %687 : vector<16x1xf32> to vector<16x16xf32>
    %689 = arith.subf %685, %688 : vector<16x16xf32>
    %690 = math.exp %689 : vector<16x16xf32>
    %cst_364 = arith.constant dense<0.000000e+00> : vector<16xf32>
    %691 = vector.multi_reduction <add>, %690, %cst_364 [1] : vector<16x16xf32> to vector<16xf32>
    %692 = vector.shape_cast %691 : vector<16xf32> to vector<16x1xf32>
    %693 = tpu.reciprocal %692 {approx = true} : vector<16x1xf32> -> vector<16x1xf32>
    %694 = vector.broadcast %693 : vector<16x1xf32> to vector<16x16xf32>
    %695 = arith.mulf %690, %694 : vector<16x16xf32>
    %cst_365 = arith.constant dense<0.000000e+00> : vector<16x16xf32>
    %696 = tpu.matmul %695, %678, %cst_365 {dimension_numbers = #tpu.dot_dimension_numbers<[1], [0], [0], [1], [0, 0, 1, 1], [], []>} : vector<16x16xf32>, vector<16x16xf32>, vector<16x16xf32> -> vector<16x16xf32>
    %697 = vector.extract_strided_slice %615 {offsets = [1, 0, 0], sizes = [1, 16, 32], strides = [1, 1, 1]} : vector<2x16x32xf32> to vector<1x16x32xf32>
    %698 = vector.shape_cast %697 : vector<1x16x32xf32> to vector<16x32xf32>
    %cst_366 = arith.constant dense<0.000000e+00> : vector<16x32xf32>
    %699 = tpu.matmul %696, %698, %cst_366 {dimension_numbers = #tpu.dot_dimension_numbers<[1], [0], [0], [1], [0, 0, 1, 1], [], []>} : vector<16x16xf32>, vector<16x32xf32>, vector<16x32xf32> -> vector<16x32xf32>
    %700 = arith.addf %657, %699 : vector<16x32xf32>
    %701 = arith.addf %577, %700 : vector<16x32xf32>
    %c1_367 = arith.constant 1 : index
    %c0_368 = arith.constant 0 : index
    %c0_369 = arith.constant 0 : index
    %702 = vector.load %arg33[%c1_367, %c0_368, %c0_369] : memref<2x1x32xf32, #tpu.memory_space<vmem>>, vector<1x1x32xf32>
    %703 = vector.shape_cast %702 : vector<1x1x32xf32> to vector<1x32xf32>
    %704 = vector.broadcast %703 : vector<1x32xf32> to vector<16x32xf32>
    %705 = arith.addf %701, %704 : vector<16x32xf32>
    %c1_370 = arith.constant 1 : index
    %c0_371 = arith.constant 0 : index
    %c0_372 = arith.constant 0 : index
    %706 = vector.load %arg34[%c1_370, %c0_371, %c0_372] : memref<2x1x32xf32, #tpu.memory_space<vmem>>, vector<1x1x32xf32>
    %707 = vector.shape_cast %706 : vector<1x1x32xf32> to vector<1x32xf32>
    %c1_373 = arith.constant 1 : index
    %c0_374 = arith.constant 0 : index
    %c0_375 = arith.constant 0 : index
    %708 = vector.load %arg35[%c1_373, %c0_374, %c0_375] : memref<2x1x32xf32, #tpu.memory_space<vmem>>, vector<1x1x32xf32>
    %709 = vector.shape_cast %708 : vector<1x1x32xf32> to vector<1x32xf32>
    %cst_376 = arith.constant dense<0.000000e+00> : vector<16xf32>
    %710 = vector.multi_reduction <add>, %705, %cst_376 [1] : vector<16x32xf32> to vector<16xf32>
    %711 = vector.shape_cast %710 : vector<16xf32> to vector<16x1xf32>
    %cst_377 = arith.constant 3.200000e+01 : f32
    %712 = vector.broadcast %cst_377 : f32 to vector<16x1xf32>
    %713 = arith.divf %711, %712 : vector<16x1xf32>
    %714 = vector.broadcast %713 : vector<16x1xf32> to vector<16x32xf32>
    %715 = arith.subf %705, %714 : vector<16x32xf32>
    %716 = arith.mulf %715, %715 : vector<16x32xf32>
    %cst_378 = arith.constant dense<0.000000e+00> : vector<16xf32>
    %717 = vector.multi_reduction <add>, %716, %cst_378 [1] : vector<16x32xf32> to vector<16xf32>
    %718 = vector.shape_cast %717 : vector<16xf32> to vector<16x1xf32>
    %cst_379 = arith.constant 3.200000e+01 : f32
    %719 = vector.broadcast %cst_379 : f32 to vector<16x1xf32>
    %720 = arith.divf %718, %719 : vector<16x1xf32>
    %cst_380 = arith.constant 9.99999974E-6 : f32
    %721 = vector.broadcast %cst_380 : f32 to vector<16x1xf32>
    %722 = arith.addf %720, %721 : vector<16x1xf32>
    %723 = math.rsqrt %722 : vector<16x1xf32>
    %724 = vector.broadcast %723 : vector<16x1xf32> to vector<16x32xf32>
    %725 = arith.mulf %715, %724 : vector<16x32xf32>
    %726 = vector.broadcast %707 : vector<1x32xf32> to vector<16x32xf32>
    %727 = arith.mulf %725, %726 : vector<16x32xf32>
    %728 = vector.broadcast %709 : vector<1x32xf32> to vector<16x32xf32>
    %729 = arith.addf %727, %728 : vector<16x32xf32>
    %c1_381 = arith.constant 1 : index
    %c0_382 = arith.constant 0 : index
    %c0_383 = arith.constant 0 : index
    %730 = vector.load %arg36[%c1_381, %c0_382, %c0_383] : memref<2x32x128xf32, #tpu.memory_space<vmem>>, vector<1x32x128xf32>
    %731 = vector.shape_cast %730 : vector<1x32x128xf32> to vector<32x128xf32>
    %cst_384 = arith.constant dense<0.000000e+00> : vector<16x128xf32>
    %732 = tpu.matmul %729, %731, %cst_384 {dimension_numbers = #tpu.dot_dimension_numbers<[1], [0], [0], [1], [0, 0, 1, 1], [], []>} : vector<16x32xf32>, vector<32x128xf32>, vector<16x128xf32> -> vector<16x128xf32>
    %c1_385 = arith.constant 1 : index
    %c0_386 = arith.constant 0 : index
    %c0_387 = arith.constant 0 : index
    %733 = vector.load %arg37[%c1_385, %c0_386, %c0_387] : memref<2x1x128xf32, #tpu.memory_space<vmem>>, vector<1x1x128xf32>
    %734 = vector.shape_cast %733 : vector<1x1x128xf32> to vector<1x128xf32>
    %735 = vector.broadcast %734 : vector<1x128xf32> to vector<16x128xf32>
    %736 = arith.addf %732, %735 : vector<16x128xf32>
    %737 = arith.mulf %736, %736 : vector<16x128xf32>
    %738 = arith.mulf %736, %737 : vector<16x128xf32>
    %cst_388 = arith.constant 4.471500e-02 : f32
    %739 = vector.broadcast %cst_388 : f32 to vector<16x128xf32>
    %740 = arith.mulf %739, %738 : vector<16x128xf32>
    %741 = arith.addf %736, %740 : vector<16x128xf32>
    %cst_389 = arith.constant 0.797884583 : f32
    %742 = vector.broadcast %cst_389 : f32 to vector<16x128xf32>
    %743 = arith.mulf %742, %741 : vector<16x128xf32>
    %744 = math.tanh %743 : vector<16x128xf32>
    %cst_390 = arith.constant 1.000000e+00 : f32
    %745 = vector.broadcast %cst_390 : f32 to vector<16x128xf32>
    %746 = arith.addf %745, %744 : vector<16x128xf32>
    %cst_391 = arith.constant 5.000000e-01 : f32
    %747 = vector.broadcast %cst_391 : f32 to vector<16x128xf32>
    %748 = arith.mulf %747, %746 : vector<16x128xf32>
    %749 = arith.mulf %736, %748 : vector<16x128xf32>
    %c1_392 = arith.constant 1 : index
    %c0_393 = arith.constant 0 : index
    %c0_394 = arith.constant 0 : index
    %750 = vector.load %arg38[%c1_392, %c0_393, %c0_394] : memref<2x128x32xf32, #tpu.memory_space<vmem>>, vector<1x128x32xf32>
    %751 = vector.shape_cast %750 : vector<1x128x32xf32> to vector<128x32xf32>
    %cst_395 = arith.constant dense<0.000000e+00> : vector<16x32xf32>
    %752 = tpu.matmul %749, %751, %cst_395 {dimension_numbers = #tpu.dot_dimension_numbers<[1], [0], [0], [1], [0, 0, 1, 1], [], []>} : vector<16x128xf32>, vector<128x32xf32>, vector<16x32xf32> -> vector<16x32xf32>
    %c1_396 = arith.constant 1 : index
    %c0_397 = arith.constant 0 : index
    %c0_398 = arith.constant 0 : index
    %753 = vector.load %arg39[%c1_396, %c0_397, %c0_398] : memref<2x1x32xf32, #tpu.memory_space<vmem>>, vector<1x1x32xf32>
    %754 = vector.shape_cast %753 : vector<1x1x32xf32> to vector<1x32xf32>
    %755 = vector.broadcast %754 : vector<1x32xf32> to vector<16x32xf32>
    %756 = arith.addf %752, %755 : vector<16x32xf32>
    %757 = arith.addf %705, %756 : vector<16x32xf32>
    %c0_399 = arith.constant 0 : index
    %c0_400 = arith.constant 0 : index
    %758 = vector.load %arg40[%c0_399, %c0_400] : memref<1x32xf32, #tpu.memory_space<vmem>>, vector<1x32xf32>
    %c0_401 = arith.constant 0 : index
    %c0_402 = arith.constant 0 : index
    %759 = vector.load %arg41[%c0_401, %c0_402] : memref<1x32xf32, #tpu.memory_space<vmem>>, vector<1x32xf32>
    %cst_403 = arith.constant dense<0.000000e+00> : vector<16xf32>
    %760 = vector.multi_reduction <add>, %757, %cst_403 [1] : vector<16x32xf32> to vector<16xf32>
    %761 = vector.shape_cast %760 : vector<16xf32> to vector<16x1xf32>
    %cst_404 = arith.constant 3.200000e+01 : f32
    %762 = vector.broadcast %cst_404 : f32 to vector<16x1xf32>
    %763 = arith.divf %761, %762 : vector<16x1xf32>
    %764 = vector.broadcast %763 : vector<16x1xf32> to vector<16x32xf32>
    %765 = arith.subf %757, %764 : vector<16x32xf32>
    %766 = arith.mulf %765, %765 : vector<16x32xf32>
    %cst_405 = arith.constant dense<0.000000e+00> : vector<16xf32>
    %767 = vector.multi_reduction <add>, %766, %cst_405 [1] : vector<16x32xf32> to vector<16xf32>
    %768 = vector.shape_cast %767 : vector<16xf32> to vector<16x1xf32>
    %cst_406 = arith.constant 3.200000e+01 : f32
    %769 = vector.broadcast %cst_406 : f32 to vector<16x1xf32>
    %770 = arith.divf %768, %769 : vector<16x1xf32>
    %cst_407 = arith.constant 9.99999974E-6 : f32
    %771 = vector.broadcast %cst_407 : f32 to vector<16x1xf32>
    %772 = arith.addf %770, %771 : vector<16x1xf32>
    %773 = math.rsqrt %772 : vector<16x1xf32>
    %774 = vector.broadcast %773 : vector<16x1xf32> to vector<16x32xf32>
    %775 = arith.mulf %765, %774 : vector<16x32xf32>
    %776 = vector.broadcast %758 : vector<1x32xf32> to vector<16x32xf32>
    %777 = arith.mulf %775, %776 : vector<16x32xf32>
    %778 = vector.broadcast %759 : vector<1x32xf32> to vector<16x32xf32>
    %779 = arith.addf %777, %778 : vector<16x32xf32>
    %c0_408 = arith.constant 0 : index
    %c0_409 = arith.constant 0 : index
    %780 = vector.load %arg44[%c0_408, %c0_409] : memref<16x32xf32, #tpu.memory_space<vmem>>, vector<16x32xf32>
    tpu.vector_store %arg44[%c0_408, %c0_409], %779 {strides = array<i32>} : memref<16x32xf32, #tpu.memory_space<vmem>>, vector<16x32xf32>,
    %c8_410 = arith.constant 8 : index
    %c0_411 = arith.constant 0 : index
    %781 = vector.load %arg44[%c8_410, %c0_411] : memref<16x32xf32, #tpu.memory_space<vmem>>, vector<8x32xf32>
    %c4_i32 = arith.constant 4 : i32
    %782 = vector.broadcast %c4_i32 : i32 to vector<8x32xi32>
    %783 = arith.cmpi slt, %393, %782 : vector<8x32xi32>
    %784 = arith.select %783, %390, %781 : vector<8x32xi1>, vector<8x32xf32>
    %c0_412 = arith.constant 0 : index
    %c0_413 = arith.constant 0 : index
    %c0_414 = arith.constant 0 : index
    %c0_415 = arith.constant 0 : index
    %785 = vector.load %arg42[%c0_412, %c0_413, %c0_414, %c0_415] : memref<3x1x8x32xf32, #tpu.memory_space<vmem>>, vector<1x1x8x32xf32>
    %786 = vector.shape_cast %785 : vector<1x1x8x32xf32> to vector<8x32xf32>
    %787 = vector.shape_cast %784 : vector<8x32xf32> to vector<1x1x8x32xf32>
    tpu.vector_store %arg42[%c0_412, %c0_413, %c0_414, %c0_415], %787 {strides = array<i32>} : memref<3x1x8x32xf32, #tpu.memory_space<vmem>>, vector<1x1x8x32xf32>,
    %c8_416 = arith.constant 8 : index
    %c0_417 = arith.constant 0 : index
    %788 = vector.load %arg4[%c8_416, %c0_417] : memref<16x32xf32, #tpu.memory_space<vmem>>, vector<8x32xf32>
    %789 = arith.addf %784, %788 : vector<8x32xf32>
    %c8_418 = arith.constant 8 : index
    %c0_419 = arith.constant 0 : index
    %790 = vector.load %arg43[%c8_418, %c0_419] : memref<16x32xf32, #tpu.memory_space<vmem>>, vector<8x32xf32>
    tpu.vector_store %arg43[%c8_418, %c0_419], %789 {strides = array<i32>} : memref<16x32xf32, #tpu.memory_space<vmem>>, vector<8x32xf32>,
    %c0_420 = arith.constant 0 : index
    %c0_421 = arith.constant 0 : index
    %791 = vector.load %arg43[%c0_420, %c0_421] : memref<16x32xf32, #tpu.memory_space<vmem>>, vector<16x32xf32>
    %c0_422 = arith.constant 0 : index
    %c0_423 = arith.constant 0 : index
    %c0_424 = arith.constant 0 : index
    %792 = vector.load %arg24[%c0_422, %c0_423, %c0_424] : memref<2x1x32xf32, #tpu.memory_space<vmem>>, vector<1x1x32xf32>
    %793 = vector.shape_cast %792 : vector<1x1x32xf32> to vector<1x32xf32>
    %c0_425 = arith.constant 0 : index
    %c0_426 = arith.constant 0 : index
    %c0_427 = arith.constant 0 : index
    %794 = vector.load %arg25[%c0_425, %c0_426, %c0_427] : memref<2x1x32xf32, #tpu.memory_space<vmem>>, vector<1x1x32xf32>
    %795 = vector.shape_cast %794 : vector<1x1x32xf32> to vector<1x32xf32>
    %cst_428 = arith.constant dense<0.000000e+00> : vector<16xf32>
    %796 = vector.multi_reduction <add>, %791, %cst_428 [1] : vector<16x32xf32> to vector<16xf32>
    %797 = vector.shape_cast %796 : vector<16xf32> to vector<16x1xf32>
    %cst_429 = arith.constant 3.200000e+01 : f32
    %798 = vector.broadcast %cst_429 : f32 to vector<16x1xf32>
    %799 = arith.divf %797, %798 : vector<16x1xf32>
    %800 = vector.broadcast %799 : vector<16x1xf32> to vector<16x32xf32>
    %801 = arith.subf %791, %800 : vector<16x32xf32>
    %802 = arith.mulf %801, %801 : vector<16x32xf32>
    %cst_430 = arith.constant dense<0.000000e+00> : vector<16xf32>
    %803 = vector.multi_reduction <add>, %802, %cst_430 [1] : vector<16x32xf32> to vector<16xf32>
    %804 = vector.shape_cast %803 : vector<16xf32> to vector<16x1xf32>
    %cst_431 = arith.constant 3.200000e+01 : f32
    %805 = vector.broadcast %cst_431 : f32 to vector<16x1xf32>
    %806 = arith.divf %804, %805 : vector<16x1xf32>
    %cst_432 = arith.constant 9.99999974E-6 : f32
    %807 = vector.broadcast %cst_432 : f32 to vector<16x1xf32>
    %808 = arith.addf %806, %807 : vector<16x1xf32>
    %809 = math.rsqrt %808 : vector<16x1xf32>
    %810 = vector.broadcast %809 : vector<16x1xf32> to vector<16x32xf32>
    %811 = arith.mulf %801, %810 : vector<16x32xf32>
    %812 = vector.broadcast %793 : vector<1x32xf32> to vector<16x32xf32>
    %813 = arith.mulf %811, %812 : vector<16x32xf32>
    %814 = vector.broadcast %795 : vector<1x32xf32> to vector<16x32xf32>
    %815 = arith.addf %813, %814 : vector<16x32xf32>
    %c0_433 = arith.constant 0 : index
    %c0_434 = arith.constant 0 : index
    %c0_435 = arith.constant 0 : index
    %c0_436 = arith.constant 0 : index
    %816 = vector.load %arg26[%c0_433, %c0_434, %c0_435, %c0_436] : memref<2x2x32x16xf32, #tpu.memory_space<vmem>>, vector<1x2x32x16xf32>
    %817 = vector.shape_cast %816 : vector<1x2x32x16xf32> to vector<2x32x16xf32>
    %c0_437 = arith.constant 0 : index
    %c0_438 = arith.constant 0 : index
    %c0_439 = arith.constant 0 : index
    %c0_440 = arith.constant 0 : index
    %818 = vector.load %arg28[%c0_437, %c0_438, %c0_439, %c0_440] : memref<2x2x32x16xf32, #tpu.memory_space<vmem>>, vector<1x2x32x16xf32>
    %819 = vector.shape_cast %818 : vector<1x2x32x16xf32> to vector<2x32x16xf32>
    %c0_441 = arith.constant 0 : index
    %c0_442 = arith.constant 0 : index
    %c0_443 = arith.constant 0 : index
    %c0_444 = arith.constant 0 : index
    %820 = vector.load %arg30[%c0_441, %c0_442, %c0_443, %c0_444] : memref<2x2x32x16xf32, #tpu.memory_space<vmem>>, vector<1x2x32x16xf32>
    %821 = vector.shape_cast %820 : vector<1x2x32x16xf32> to vector<2x32x16xf32>
    %c0_445 = arith.constant 0 : index
    %c0_446 = arith.constant 0 : index
    %c0_447 = arith.constant 0 : index
    %c0_448 = arith.constant 0 : index
    %822 = vector.load %arg27[%c0_445, %c0_446, %c0_447, %c0_448] : memref<2x2x1x16xf32, #tpu.memory_space<vmem>>, vector<1x2x1x16xf32>
    %823 = vector.shape_cast %822 : vector<1x2x1x16xf32> to vector<2x1x16xf32>
    %c0_449 = arith.constant 0 : index
    %c0_450 = arith.constant 0 : index
    %c0_451 = arith.constant 0 : index
    %c0_452 = arith.constant 0 : index
    %824 = vector.load %arg29[%c0_449, %c0_450, %c0_451, %c0_452] : memref<2x2x1x16xf32, #tpu.memory_space<vmem>>, vector<1x2x1x16xf32>
    %825 = vector.shape_cast %824 : vector<1x2x1x16xf32> to vector<2x1x16xf32>
    %c0_453 = arith.constant 0 : index
    %c0_454 = arith.constant 0 : index
    %c0_455 = arith.constant 0 : index
    %c0_456 = arith.constant 0 : index
    %826 = vector.load %arg31[%c0_453, %c0_454, %c0_455, %c0_456] : memref<2x2x1x16xf32, #tpu.memory_space<vmem>>, vector<1x2x1x16xf32>
    %827 = vector.shape_cast %826 : vector<1x2x1x16xf32> to vector<2x1x16xf32>
    %c0_457 = arith.constant 0 : index
    %c0_458 = arith.constant 0 : index
    %c0_459 = arith.constant 0 : index
    %c0_460 = arith.constant 0 : index
    %828 = vector.load %arg32[%c0_457, %c0_458, %c0_459, %c0_460] : memref<2x2x16x32xf32, #tpu.memory_space<vmem>>, vector<1x2x16x32xf32>
    %829 = vector.shape_cast %828 : vector<1x2x16x32xf32> to vector<2x16x32xf32>
    %830 = vector.extract_strided_slice %817 {offsets = [0, 0, 0], sizes = [1, 32, 16], strides = [1, 1, 1]} : vector<2x32x16xf32> to vector<1x32x16xf32>
    %831 = vector.shape_cast %830 : vector<1x32x16xf32> to vector<32x16xf32>
    %cst_461 = arith.constant dense<0.000000e+00> : vector<16x16xf32>
    %832 = tpu.matmul %815, %831, %cst_461 {dimension_numbers = #tpu.dot_dimension_numbers<[1], [0], [0], [1], [0, 0, 1, 1], [], []>} : vector<16x32xf32>, vector<32x16xf32>, vector<16x16xf32> -> vector<16x16xf32>
    %833 = vector.extract_strided_slice %823 {offsets = [0, 0, 0], sizes = [1, 1, 16], strides = [1, 1, 1]} : vector<2x1x16xf32> to vector<1x1x16xf32>
    %834 = vector.shape_cast %833 : vector<1x1x16xf32> to vector<1x16xf32>
    %835 = vector.broadcast %834 : vector<1x16xf32> to vector<16x16xf32>
    %836 = arith.addf %832, %835 : vector<16x16xf32>
    %837 = vector.extract_strided_slice %819 {offsets = [0, 0, 0], sizes = [1, 32, 16], strides = [1, 1, 1]} : vector<2x32x16xf32> to vector<1x32x16xf32>
    %838 = vector.shape_cast %837 : vector<1x32x16xf32> to vector<32x16xf32>
    %cst_462 = arith.constant dense<0.000000e+00> : vector<16x16xf32>
    %839 = tpu.matmul %815, %838, %cst_462 {dimension_numbers = #tpu.dot_dimension_numbers<[1], [0], [0], [1], [0, 0, 1, 1], [], []>} : vector<16x32xf32>, vector<32x16xf32>, vector<16x16xf32> -> vector<16x16xf32>
    %840 = vector.extract_strided_slice %825 {offsets = [0, 0, 0], sizes = [1, 1, 16], strides = [1, 1, 1]} : vector<2x1x16xf32> to vector<1x1x16xf32>
    %841 = vector.shape_cast %840 : vector<1x1x16xf32> to vector<1x16xf32>
    %842 = vector.broadcast %841 : vector<1x16xf32> to vector<16x16xf32>
    %843 = arith.addf %839, %842 : vector<16x16xf32>
    %844 = vector.extract_strided_slice %821 {offsets = [0, 0, 0], sizes = [1, 32, 16], strides = [1, 1, 1]} : vector<2x32x16xf32> to vector<1x32x16xf32>
    %845 = vector.shape_cast %844 : vector<1x32x16xf32> to vector<32x16xf32>
    %cst_463 = arith.constant dense<0.000000e+00> : vector<16x16xf32>
    %846 = tpu.matmul %815, %845, %cst_463 {dimension_numbers = #tpu.dot_dimension_numbers<[1], [0], [0], [1], [0, 0, 1, 1], [], []>} : vector<16x32xf32>, vector<32x16xf32>, vector<16x16xf32> -> vector<16x16xf32>
    %847 = vector.extract_strided_slice %827 {offsets = [0, 0, 0], sizes = [1, 1, 16], strides = [1, 1, 1]} : vector<2x1x16xf32> to vector<1x1x16xf32>
    %848 = vector.shape_cast %847 : vector<1x1x16xf32> to vector<1x16xf32>
    %849 = vector.broadcast %848 : vector<1x16xf32> to vector<16x16xf32>
    %850 = arith.addf %846, %849 : vector<16x16xf32>
    %cst_464 = arith.constant 2.500000e-01 : f32
    %851 = vector.broadcast %cst_464 : f32 to vector<16x16xf32>
    %852 = arith.mulf %836, %851 : vector<16x16xf32>
    %cst_465 = arith.constant dense<0.000000e+00> : vector<16x16xf32>
    %853 = tpu.matmul %852, %843, %cst_465 {dimension_numbers = #tpu.dot_dimension_numbers<[1], [1], [0], [0], [0, 0, 1, 0], [], []>} : vector<16x16xf32>, vector<16x16xf32>, vector<16x16xf32> -> vector<16x16xf32>
    %cst_466 = arith.constant 5.000000e-01 : f32
    %854 = vector.broadcast %cst_466 : f32 to vector<16x16xf32>
    %855 = arith.cmpf ogt, %392, %854 : vector<16x16xf32>
    %cst_467 = arith.constant -1.70141173E+38 : f32
    %856 = vector.broadcast %cst_467 : f32 to vector<16x16xf32>
    %857 = arith.select %855, %853, %856 : vector<16x16xi1>, vector<16x16xf32>
    %cst_468 = arith.constant dense<0xFF800000> : vector<16xf32>
    %858 = vector.multi_reduction <maximumf>, %857, %cst_468 [1] : vector<16x16xf32> to vector<16xf32>
    %859 = vector.shape_cast %858 : vector<16xf32> to vector<16x1xf32>
    %860 = vector.broadcast %859 : vector<16x1xf32> to vector<16x16xf32>
    %861 = arith.subf %857, %860 : vector<16x16xf32>
    %862 = math.exp %861 : vector<16x16xf32>
    %cst_469 = arith.constant dense<0.000000e+00> : vector<16xf32>
    %863 = vector.multi_reduction <add>, %862, %cst_469 [1] : vector<16x16xf32> to vector<16xf32>
    %864 = vector.shape_cast %863 : vector<16xf32> to vector<16x1xf32>
    %865 = tpu.reciprocal %864 {approx = true} : vector<16x1xf32> -> vector<16x1xf32>
    %866 = vector.broadcast %865 : vector<16x1xf32> to vector<16x16xf32>
    %867 = arith.mulf %862, %866 : vector<16x16xf32>
    %cst_470 = arith.constant dense<0.000000e+00> : vector<16x16xf32>
    %868 = tpu.matmul %867, %850, %cst_470 {dimension_numbers = #tpu.dot_dimension_numbers<[1], [0], [0], [1], [0, 0, 1, 1], [], []>} : vector<16x16xf32>, vector<16x16xf32>, vector<16x16xf32> -> vector<16x16xf32>
    %869 = vector.extract_strided_slice %829 {offsets = [0, 0, 0], sizes = [1, 16, 32], strides = [1, 1, 1]} : vector<2x16x32xf32> to vector<1x16x32xf32>
    %870 = vector.shape_cast %869 : vector<1x16x32xf32> to vector<16x32xf32>
    %cst_471 = arith.constant dense<0.000000e+00> : vector<16x32xf32>
    %871 = tpu.matmul %868, %870, %cst_471 {dimension_numbers = #tpu.dot_dimension_numbers<[1], [0], [0], [1], [0, 0, 1, 1], [], []>} : vector<16x16xf32>, vector<16x32xf32>, vector<16x32xf32> -> vector<16x32xf32>
    %872 = vector.extract_strided_slice %817 {offsets = [1, 0, 0], sizes = [1, 32, 16], strides = [1, 1, 1]} : vector<2x32x16xf32> to vector<1x32x16xf32>
    %873 = vector.shape_cast %872 : vector<1x32x16xf32> to vector<32x16xf32>
    %cst_472 = arith.constant dense<0.000000e+00> : vector<16x16xf32>
    %874 = tpu.matmul %815, %873, %cst_472 {dimension_numbers = #tpu.dot_dimension_numbers<[1], [0], [0], [1], [0, 0, 1, 1], [], []>} : vector<16x32xf32>, vector<32x16xf32>, vector<16x16xf32> -> vector<16x16xf32>
    %875 = vector.extract_strided_slice %823 {offsets = [1, 0, 0], sizes = [1, 1, 16], strides = [1, 1, 1]} : vector<2x1x16xf32> to vector<1x1x16xf32>
    %876 = vector.shape_cast %875 : vector<1x1x16xf32> to vector<1x16xf32>
    %877 = vector.broadcast %876 : vector<1x16xf32> to vector<16x16xf32>
    %878 = arith.addf %874, %877 : vector<16x16xf32>
    %879 = vector.extract_strided_slice %819 {offsets = [1, 0, 0], sizes = [1, 32, 16], strides = [1, 1, 1]} : vector<2x32x16xf32> to vector<1x32x16xf32>
    %880 = vector.shape_cast %879 : vector<1x32x16xf32> to vector<32x16xf32>
    %cst_473 = arith.constant dense<0.000000e+00> : vector<16x16xf32>
    %881 = tpu.matmul %815, %880, %cst_473 {dimension_numbers = #tpu.dot_dimension_numbers<[1], [0], [0], [1], [0, 0, 1, 1], [], []>} : vector<16x32xf32>, vector<32x16xf32>, vector<16x16xf32> -> vector<16x16xf32>
    %882 = vector.extract_strided_slice %825 {offsets = [1, 0, 0], sizes = [1, 1, 16], strides = [1, 1, 1]} : vector<2x1x16xf32> to vector<1x1x16xf32>
    %883 = vector.shape_cast %882 : vector<1x1x16xf32> to vector<1x16xf32>
    %884 = vector.broadcast %883 : vector<1x16xf32> to vector<16x16xf32>
    %885 = arith.addf %881, %884 : vector<16x16xf32>
    %886 = vector.extract_strided_slice %821 {offsets = [1, 0, 0], sizes = [1, 32, 16], strides = [1, 1, 1]} : vector<2x32x16xf32> to vector<1x32x16xf32>
    %887 = vector.shape_cast %886 : vector<1x32x16xf32> to vector<32x16xf32>
    %cst_474 = arith.constant dense<0.000000e+00> : vector<16x16xf32>
    %888 = tpu.matmul %815, %887, %cst_474 {dimension_numbers = #tpu.dot_dimension_numbers<[1], [0], [0], [1], [0, 0, 1, 1], [], []>} : vector<16x32xf32>, vector<32x16xf32>, vector<16x16xf32> -> vector<16x16xf32>
    %889 = vector.extract_strided_slice %827 {offsets = [1, 0, 0], sizes = [1, 1, 16], strides = [1, 1, 1]} : vector<2x1x16xf32> to vector<1x1x16xf32>
    %890 = vector.shape_cast %889 : vector<1x1x16xf32> to vector<1x16xf32>
    %891 = vector.broadcast %890 : vector<1x16xf32> to vector<16x16xf32>
    %892 = arith.addf %888, %891 : vector<16x16xf32>
    %cst_475 = arith.constant 2.500000e-01 : f32
    %893 = vector.broadcast %cst_475 : f32 to vector<16x16xf32>
    %894 = arith.mulf %878, %893 : vector<16x16xf32>
    %cst_476 = arith.constant dense<0.000000e+00> : vector<16x16xf32>
    %895 = tpu.matmul %894, %885, %cst_476 {dimension_numbers = #tpu.dot_dimension_numbers<[1], [1], [0], [0], [0, 0, 1, 0], [], []>} : vector<16x16xf32>, vector<16x16xf32>, vector<16x16xf32> -> vector<16x16xf32>
    %cst_477 = arith.constant 5.000000e-01 : f32
    %896 = vector.broadcast %cst_477 : f32 to vector<16x16xf32>
    %897 = arith.cmpf ogt, %392, %896 : vector<16x16xf32>
    %cst_478 = arith.constant -1.70141173E+38 : f32
    %898 = vector.broadcast %cst_478 : f32 to vector<16x16xf32>
    %899 = arith.select %897, %895, %898 : vector<16x16xi1>, vector<16x16xf32>
    %cst_479 = arith.constant dense<0xFF800000> : vector<16xf32>
    %900 = vector.multi_reduction <maximumf>, %899, %cst_479 [1] : vector<16x16xf32> to vector<16xf32>
    %901 = vector.shape_cast %900 : vector<16xf32> to vector<16x1xf32>
    %902 = vector.broadcast %901 : vector<16x1xf32> to vector<16x16xf32>
    %903 = arith.subf %899, %902 : vector<16x16xf32>
    %904 = math.exp %903 : vector<16x16xf32>
    %cst_480 = arith.constant dense<0.000000e+00> : vector<16xf32>
    %905 = vector.multi_reduction <add>, %904, %cst_480 [1] : vector<16x16xf32> to vector<16xf32>
    %906 = vector.shape_cast %905 : vector<16xf32> to vector<16x1xf32>
    %907 = tpu.reciprocal %906 {approx = true} : vector<16x1xf32> -> vector<16x1xf32>
    %908 = vector.broadcast %907 : vector<16x1xf32> to vector<16x16xf32>
    %909 = arith.mulf %904, %908 : vector<16x16xf32>
    %cst_481 = arith.constant dense<0.000000e+00> : vector<16x16xf32>
    %910 = tpu.matmul %909, %892, %cst_481 {dimension_numbers = #tpu.dot_dimension_numbers<[1], [0], [0], [1], [0, 0, 1, 1], [], []>} : vector<16x16xf32>, vector<16x16xf32>, vector<16x16xf32> -> vector<16x16xf32>
    %911 = vector.extract_strided_slice %829 {offsets = [1, 0, 0], sizes = [1, 16, 32], strides = [1, 1, 1]} : vector<2x16x32xf32> to vector<1x16x32xf32>
    %912 = vector.shape_cast %911 : vector<1x16x32xf32> to vector<16x32xf32>
    %cst_482 = arith.constant dense<0.000000e+00> : vector<16x32xf32>
    %913 = tpu.matmul %910, %912, %cst_482 {dimension_numbers = #tpu.dot_dimension_numbers<[1], [0], [0], [1], [0, 0, 1, 1], [], []>} : vector<16x16xf32>, vector<16x32xf32>, vector<16x32xf32> -> vector<16x32xf32>
    %914 = arith.addf %871, %913 : vector<16x32xf32>
    %915 = arith.addf %791, %914 : vector<16x32xf32>
    %c0_483 = arith.constant 0 : index
    %c0_484 = arith.constant 0 : index
    %c0_485 = arith.constant 0 : index
    %916 = vector.load %arg33[%c0_483, %c0_484, %c0_485] : memref<2x1x32xf32, #tpu.memory_space<vmem>>, vector<1x1x32xf32>
    %917 = vector.shape_cast %916 : vector<1x1x32xf32> to vector<1x32xf32>
    %918 = vector.broadcast %917 : vector<1x32xf32> to vector<16x32xf32>
    %919 = arith.addf %915, %918 : vector<16x32xf32>
    %c0_486 = arith.constant 0 : index
    %c0_487 = arith.constant 0 : index
    %c0_488 = arith.constant 0 : index
    %920 = vector.load %arg34[%c0_486, %c0_487, %c0_488] : memref<2x1x32xf32, #tpu.memory_space<vmem>>, vector<1x1x32xf32>
    %921 = vector.shape_cast %920 : vector<1x1x32xf32> to vector<1x32xf32>
    %c0_489 = arith.constant 0 : index
    %c0_490 = arith.constant 0 : index
    %c0_491 = arith.constant 0 : index
    %922 = vector.load %arg35[%c0_489, %c0_490, %c0_491] : memref<2x1x32xf32, #tpu.memory_space<vmem>>, vector<1x1x32xf32>
    %923 = vector.shape_cast %922 : vector<1x1x32xf32> to vector<1x32xf32>
    %cst_492 = arith.constant dense<0.000000e+00> : vector<16xf32>
    %924 = vector.multi_reduction <add>, %919, %cst_492 [1] : vector<16x32xf32> to vector<16xf32>
    %925 = vector.shape_cast %924 : vector<16xf32> to vector<16x1xf32>
    %cst_493 = arith.constant 3.200000e+01 : f32
    %926 = vector.broadcast %cst_493 : f32 to vector<16x1xf32>
    %927 = arith.divf %925, %926 : vector<16x1xf32>
    %928 = vector.broadcast %927 : vector<16x1xf32> to vector<16x32xf32>
    %929 = arith.subf %919, %928 : vector<16x32xf32>
    %930 = arith.mulf %929, %929 : vector<16x32xf32>
    %cst_494 = arith.constant dense<0.000000e+00> : vector<16xf32>
    %931 = vector.multi_reduction <add>, %930, %cst_494 [1] : vector<16x32xf32> to vector<16xf32>
    %932 = vector.shape_cast %931 : vector<16xf32> to vector<16x1xf32>
    %cst_495 = arith.constant 3.200000e+01 : f32
    %933 = vector.broadcast %cst_495 : f32 to vector<16x1xf32>
    %934 = arith.divf %932, %933 : vector<16x1xf32>
    %cst_496 = arith.constant 9.99999974E-6 : f32
    %935 = vector.broadcast %cst_496 : f32 to vector<16x1xf32>
    %936 = arith.addf %934, %935 : vector<16x1xf32>
    %937 = math.rsqrt %936 : vector<16x1xf32>
    %938 = vector.broadcast %937 : vector<16x1xf32> to vector<16x32xf32>
    %939 = arith.mulf %929, %938 : vector<16x32xf32>
    %940 = vector.broadcast %921 : vector<1x32xf32> to vector<16x32xf32>
    %941 = arith.mulf %939, %940 : vector<16x32xf32>
    %942 = vector.broadcast %923 : vector<1x32xf32> to vector<16x32xf32>
    %943 = arith.addf %941, %942 : vector<16x32xf32>
    %c0_497 = arith.constant 0 : index
    %c0_498 = arith.constant 0 : index
    %c0_499 = arith.constant 0 : index
    %944 = vector.load %arg36[%c0_497, %c0_498, %c0_499] : memref<2x32x128xf32, #tpu.memory_space<vmem>>, vector<1x32x128xf32>
    %945 = vector.shape_cast %944 : vector<1x32x128xf32> to vector<32x128xf32>
    %cst_500 = arith.constant dense<0.000000e+00> : vector<16x128xf32>
    %946 = tpu.matmul %943, %945, %cst_500 {dimension_numbers = #tpu.dot_dimension_numbers<[1], [0], [0], [1], [0, 0, 1, 1], [], []>} : vector<16x32xf32>, vector<32x128xf32>, vector<16x128xf32> -> vector<16x128xf32>
    %c0_501 = arith.constant 0 : index
    %c0_502 = arith.constant 0 : index
    %c0_503 = arith.constant 0 : index
    %947 = vector.load %arg37[%c0_501, %c0_502, %c0_503] : memref<2x1x128xf32, #tpu.memory_space<vmem>>, vector<1x1x128xf32>
    %948 = vector.shape_cast %947 : vector<1x1x128xf32> to vector<1x128xf32>
    %949 = vector.broadcast %948 : vector<1x128xf32> to vector<16x128xf32>
    %950 = arith.addf %946, %949 : vector<16x128xf32>
    %951 = arith.mulf %950, %950 : vector<16x128xf32>
    %952 = arith.mulf %950, %951 : vector<16x128xf32>
    %cst_504 = arith.constant 4.471500e-02 : f32
    %953 = vector.broadcast %cst_504 : f32 to vector<16x128xf32>
    %954 = arith.mulf %953, %952 : vector<16x128xf32>
    %955 = arith.addf %950, %954 : vector<16x128xf32>
    %cst_505 = arith.constant 0.797884583 : f32
    %956 = vector.broadcast %cst_505 : f32 to vector<16x128xf32>
    %957 = arith.mulf %956, %955 : vector<16x128xf32>
    %958 = math.tanh %957 : vector<16x128xf32>
    %cst_506 = arith.constant 1.000000e+00 : f32
    %959 = vector.broadcast %cst_506 : f32 to vector<16x128xf32>
    %960 = arith.addf %959, %958 : vector<16x128xf32>
    %cst_507 = arith.constant 5.000000e-01 : f32
    %961 = vector.broadcast %cst_507 : f32 to vector<16x128xf32>
    %962 = arith.mulf %961, %960 : vector<16x128xf32>
    %963 = arith.mulf %950, %962 : vector<16x128xf32>
    %c0_508 = arith.constant 0 : index
    %c0_509 = arith.constant 0 : index
    %c0_510 = arith.constant 0 : index
    %964 = vector.load %arg38[%c0_508, %c0_509, %c0_510] : memref<2x128x32xf32, #tpu.memory_space<vmem>>, vector<1x128x32xf32>
    %965 = vector.shape_cast %964 : vector<1x128x32xf32> to vector<128x32xf32>
    %cst_511 = arith.constant dense<0.000000e+00> : vector<16x32xf32>
    %966 = tpu.matmul %963, %965, %cst_511 {dimension_numbers = #tpu.dot_dimension_numbers<[1], [0], [0], [1], [0, 0, 1, 1], [], []>} : vector<16x128xf32>, vector<128x32xf32>, vector<16x32xf32> -> vector<16x32xf32>
    %c0_512 = arith.constant 0 : index
    %c0_513 = arith.constant 0 : index
    %c0_514 = arith.constant 0 : index
    %967 = vector.load %arg39[%c0_512, %c0_513, %c0_514] : memref<2x1x32xf32, #tpu.memory_space<vmem>>, vector<1x1x32xf32>
    %968 = vector.shape_cast %967 : vector<1x1x32xf32> to vector<1x32xf32>
    %969 = vector.broadcast %968 : vector<1x32xf32> to vector<16x32xf32>
    %970 = arith.addf %966, %969 : vector<16x32xf32>
    %971 = arith.addf %919, %970 : vector<16x32xf32>
    %c1_515 = arith.constant 1 : index
    %c0_516 = arith.constant 0 : index
    %c0_517 = arith.constant 0 : index
    %972 = vector.load %arg24[%c1_515, %c0_516, %c0_517] : memref<2x1x32xf32, #tpu.memory_space<vmem>>, vector<1x1x32xf32>
    %973 = vector.shape_cast %972 : vector<1x1x32xf32> to vector<1x32xf32>
    %c1_518 = arith.constant 1 : index
    %c0_519 = arith.constant 0 : index
    %c0_520 = arith.constant 0 : index
    %974 = vector.load %arg25[%c1_518, %c0_519, %c0_520] : memref<2x1x32xf32, #tpu.memory_space<vmem>>, vector<1x1x32xf32>
    %975 = vector.shape_cast %974 : vector<1x1x32xf32> to vector<1x32xf32>
    %cst_521 = arith.constant dense<0.000000e+00> : vector<16xf32>
    %976 = vector.multi_reduction <add>, %971, %cst_521 [1] : vector<16x32xf32> to vector<16xf32>
    %977 = vector.shape_cast %976 : vector<16xf32> to vector<16x1xf32>
    %cst_522 = arith.constant 3.200000e+01 : f32
    %978 = vector.broadcast %cst_522 : f32 to vector<16x1xf32>
    %979 = arith.divf %977, %978 : vector<16x1xf32>
    %980 = vector.broadcast %979 : vector<16x1xf32> to vector<16x32xf32>
    %981 = arith.subf %971, %980 : vector<16x32xf32>
    %982 = arith.mulf %981, %981 : vector<16x32xf32>
    %cst_523 = arith.constant dense<0.000000e+00> : vector<16xf32>
    %983 = vector.multi_reduction <add>, %982, %cst_523 [1] : vector<16x32xf32> to vector<16xf32>
    %984 = vector.shape_cast %983 : vector<16xf32> to vector<16x1xf32>
    %cst_524 = arith.constant 3.200000e+01 : f32
    %985 = vector.broadcast %cst_524 : f32 to vector<16x1xf32>
    %986 = arith.divf %984, %985 : vector<16x1xf32>
    %cst_525 = arith.constant 9.99999974E-6 : f32
    %987 = vector.broadcast %cst_525 : f32 to vector<16x1xf32>
    %988 = arith.addf %986, %987 : vector<16x1xf32>
    %989 = math.rsqrt %988 : vector<16x1xf32>
    %990 = vector.broadcast %989 : vector<16x1xf32> to vector<16x32xf32>
    %991 = arith.mulf %981, %990 : vector<16x32xf32>
    %992 = vector.broadcast %973 : vector<1x32xf32> to vector<16x32xf32>
    %993 = arith.mulf %991, %992 : vector<16x32xf32>
    %994 = vector.broadcast %975 : vector<1x32xf32> to vector<16x32xf32>
    %995 = arith.addf %993, %994 : vector<16x32xf32>
    %c1_526 = arith.constant 1 : index
    %c0_527 = arith.constant 0 : index
    %c0_528 = arith.constant 0 : index
    %c0_529 = arith.constant 0 : index
    %996 = vector.load %arg26[%c1_526, %c0_527, %c0_528, %c0_529] : memref<2x2x32x16xf32, #tpu.memory_space<vmem>>, vector<1x2x32x16xf32>
    %997 = vector.shape_cast %996 : vector<1x2x32x16xf32> to vector<2x32x16xf32>
    %c1_530 = arith.constant 1 : index
    %c0_531 = arith.constant 0 : index
    %c0_532 = arith.constant 0 : index
    %c0_533 = arith.constant 0 : index
    %998 = vector.load %arg28[%c1_530, %c0_531, %c0_532, %c0_533] : memref<2x2x32x16xf32, #tpu.memory_space<vmem>>, vector<1x2x32x16xf32>
    %999 = vector.shape_cast %998 : vector<1x2x32x16xf32> to vector<2x32x16xf32>
    %c1_534 = arith.constant 1 : index
    %c0_535 = arith.constant 0 : index
    %c0_536 = arith.constant 0 : index
    %c0_537 = arith.constant 0 : index
    %1000 = vector.load %arg30[%c1_534, %c0_535, %c0_536, %c0_537] : memref<2x2x32x16xf32, #tpu.memory_space<vmem>>, vector<1x2x32x16xf32>
    %1001 = vector.shape_cast %1000 : vector<1x2x32x16xf32> to vector<2x32x16xf32>
    %c1_538 = arith.constant 1 : index
    %c0_539 = arith.constant 0 : index
    %c0_540 = arith.constant 0 : index
    %c0_541 = arith.constant 0 : index
    %1002 = vector.load %arg27[%c1_538, %c0_539, %c0_540, %c0_541] : memref<2x2x1x16xf32, #tpu.memory_space<vmem>>, vector<1x2x1x16xf32>
    %1003 = vector.shape_cast %1002 : vector<1x2x1x16xf32> to vector<2x1x16xf32>
    %c1_542 = arith.constant 1 : index
    %c0_543 = arith.constant 0 : index
    %c0_544 = arith.constant 0 : index
    %c0_545 = arith.constant 0 : index
    %1004 = vector.load %arg29[%c1_542, %c0_543, %c0_544, %c0_545] : memref<2x2x1x16xf32, #tpu.memory_space<vmem>>, vector<1x2x1x16xf32>
    %1005 = vector.shape_cast %1004 : vector<1x2x1x16xf32> to vector<2x1x16xf32>
    %c1_546 = arith.constant 1 : index
    %c0_547 = arith.constant 0 : index
    %c0_548 = arith.constant 0 : index
    %c0_549 = arith.constant 0 : index
    %1006 = vector.load %arg31[%c1_546, %c0_547, %c0_548, %c0_549] : memref<2x2x1x16xf32, #tpu.memory_space<vmem>>, vector<1x2x1x16xf32>
    %1007 = vector.shape_cast %1006 : vector<1x2x1x16xf32> to vector<2x1x16xf32>
    %c1_550 = arith.constant 1 : index
    %c0_551 = arith.constant 0 : index
    %c0_552 = arith.constant 0 : index
    %c0_553 = arith.constant 0 : index
    %1008 = vector.load %arg32[%c1_550, %c0_551, %c0_552, %c0_553] : memref<2x2x16x32xf32, #tpu.memory_space<vmem>>, vector<1x2x16x32xf32>
    %1009 = vector.shape_cast %1008 : vector<1x2x16x32xf32> to vector<2x16x32xf32>
    %1010 = vector.extract_strided_slice %997 {offsets = [0, 0, 0], sizes = [1, 32, 16], strides = [1, 1, 1]} : vector<2x32x16xf32> to vector<1x32x16xf32>
    %1011 = vector.shape_cast %1010 : vector<1x32x16xf32> to vector<32x16xf32>
    %cst_554 = arith.constant dense<0.000000e+00> : vector<16x16xf32>
    %1012 = tpu.matmul %995, %1011, %cst_554 {dimension_numbers = #tpu.dot_dimension_numbers<[1], [0], [0], [1], [0, 0, 1, 1], [], []>} : vector<16x32xf32>, vector<32x16xf32>, vector<16x16xf32> -> vector<16x16xf32>
    %1013 = vector.extract_strided_slice %1003 {offsets = [0, 0, 0], sizes = [1, 1, 16], strides = [1, 1, 1]} : vector<2x1x16xf32> to vector<1x1x16xf32>
    %1014 = vector.shape_cast %1013 : vector<1x1x16xf32> to vector<1x16xf32>
    %1015 = vector.broadcast %1014 : vector<1x16xf32> to vector<16x16xf32>
    %1016 = arith.addf %1012, %1015 : vector<16x16xf32>
    %1017 = vector.extract_strided_slice %999 {offsets = [0, 0, 0], sizes = [1, 32, 16], strides = [1, 1, 1]} : vector<2x32x16xf32> to vector<1x32x16xf32>
    %1018 = vector.shape_cast %1017 : vector<1x32x16xf32> to vector<32x16xf32>
    %cst_555 = arith.constant dense<0.000000e+00> : vector<16x16xf32>
    %1019 = tpu.matmul %995, %1018, %cst_555 {dimension_numbers = #tpu.dot_dimension_numbers<[1], [0], [0], [1], [0, 0, 1, 1], [], []>} : vector<16x32xf32>, vector<32x16xf32>, vector<16x16xf32> -> vector<16x16xf32>
    %1020 = vector.extract_strided_slice %1005 {offsets = [0, 0, 0], sizes = [1, 1, 16], strides = [1, 1, 1]} : vector<2x1x16xf32> to vector<1x1x16xf32>
    %1021 = vector.shape_cast %1020 : vector<1x1x16xf32> to vector<1x16xf32>
    %1022 = vector.broadcast %1021 : vector<1x16xf32> to vector<16x16xf32>
    %1023 = arith.addf %1019, %1022 : vector<16x16xf32>
    %1024 = vector.extract_strided_slice %1001 {offsets = [0, 0, 0], sizes = [1, 32, 16], strides = [1, 1, 1]} : vector<2x32x16xf32> to vector<1x32x16xf32>
    %1025 = vector.shape_cast %1024 : vector<1x32x16xf32> to vector<32x16xf32>
    %cst_556 = arith.constant dense<0.000000e+00> : vector<16x16xf32>
    %1026 = tpu.matmul %995, %1025, %cst_556 {dimension_numbers = #tpu.dot_dimension_numbers<[1], [0], [0], [1], [0, 0, 1, 1], [], []>} : vector<16x32xf32>, vector<32x16xf32>, vector<16x16xf32> -> vector<16x16xf32>
    %1027 = vector.extract_strided_slice %1007 {offsets = [0, 0, 0], sizes = [1, 1, 16], strides = [1, 1, 1]} : vector<2x1x16xf32> to vector<1x1x16xf32>
    %1028 = vector.shape_cast %1027 : vector<1x1x16xf32> to vector<1x16xf32>
    %1029 = vector.broadcast %1028 : vector<1x16xf32> to vector<16x16xf32>
    %1030 = arith.addf %1026, %1029 : vector<16x16xf32>
    %cst_557 = arith.constant 2.500000e-01 : f32
    %1031 = vector.broadcast %cst_557 : f32 to vector<16x16xf32>
    %1032 = arith.mulf %1016, %1031 : vector<16x16xf32>
    %cst_558 = arith.constant dense<0.000000e+00> : vector<16x16xf32>
    %1033 = tpu.matmul %1032, %1023, %cst_558 {dimension_numbers = #tpu.dot_dimension_numbers<[1], [1], [0], [0], [0, 0, 1, 0], [], []>} : vector<16x16xf32>, vector<16x16xf32>, vector<16x16xf32> -> vector<16x16xf32>
    %cst_559 = arith.constant 5.000000e-01 : f32
    %1034 = vector.broadcast %cst_559 : f32 to vector<16x16xf32>
    %1035 = arith.cmpf ogt, %392, %1034 : vector<16x16xf32>
    %cst_560 = arith.constant -1.70141173E+38 : f32
    %1036 = vector.broadcast %cst_560 : f32 to vector<16x16xf32>
    %1037 = arith.select %1035, %1033, %1036 : vector<16x16xi1>, vector<16x16xf32>
    %cst_561 = arith.constant dense<0xFF800000> : vector<16xf32>
    %1038 = vector.multi_reduction <maximumf>, %1037, %cst_561 [1] : vector<16x16xf32> to vector<16xf32>
    %1039 = vector.shape_cast %1038 : vector<16xf32> to vector<16x1xf32>
    %1040 = vector.broadcast %1039 : vector<16x1xf32> to vector<16x16xf32>
    %1041 = arith.subf %1037, %1040 : vector<16x16xf32>
    %1042 = math.exp %1041 : vector<16x16xf32>
    %cst_562 = arith.constant dense<0.000000e+00> : vector<16xf32>
    %1043 = vector.multi_reduction <add>, %1042, %cst_562 [1] : vector<16x16xf32> to vector<16xf32>
    %1044 = vector.shape_cast %1043 : vector<16xf32> to vector<16x1xf32>
    %1045 = tpu.reciprocal %1044 {approx = true} : vector<16x1xf32> -> vector<16x1xf32>
    %1046 = vector.broadcast %1045 : vector<16x1xf32> to vector<16x16xf32>
    %1047 = arith.mulf %1042, %1046 : vector<16x16xf32>
    %cst_563 = arith.constant dense<0.000000e+00> : vector<16x16xf32>
    %1048 = tpu.matmul %1047, %1030, %cst_563 {dimension_numbers = #tpu.dot_dimension_numbers<[1], [0], [0], [1], [0, 0, 1, 1], [], []>} : vector<16x16xf32>, vector<16x16xf32>, vector<16x16xf32> -> vector<16x16xf32>
    %1049 = vector.extract_strided_slice %1009 {offsets = [0, 0, 0], sizes = [1, 16, 32], strides = [1, 1, 1]} : vector<2x16x32xf32> to vector<1x16x32xf32>
    %1050 = vector.shape_cast %1049 : vector<1x16x32xf32> to vector<16x32xf32>
    %cst_564 = arith.constant dense<0.000000e+00> : vector<16x32xf32>
    %1051 = tpu.matmul %1048, %1050, %cst_564 {dimension_numbers = #tpu.dot_dimension_numbers<[1], [0], [0], [1], [0, 0, 1, 1], [], []>} : vector<16x16xf32>, vector<16x32xf32>, vector<16x32xf32> -> vector<16x32xf32>
    %1052 = vector.extract_strided_slice %997 {offsets = [1, 0, 0], sizes = [1, 32, 16], strides = [1, 1, 1]} : vector<2x32x16xf32> to vector<1x32x16xf32>
    %1053 = vector.shape_cast %1052 : vector<1x32x16xf32> to vector<32x16xf32>
    %cst_565 = arith.constant dense<0.000000e+00> : vector<16x16xf32>
    %1054 = tpu.matmul %995, %1053, %cst_565 {dimension_numbers = #tpu.dot_dimension_numbers<[1], [0], [0], [1], [0, 0, 1, 1], [], []>} : vector<16x32xf32>, vector<32x16xf32>, vector<16x16xf32> -> vector<16x16xf32>
    %1055 = vector.extract_strided_slice %1003 {offsets = [1, 0, 0], sizes = [1, 1, 16], strides = [1, 1, 1]} : vector<2x1x16xf32> to vector<1x1x16xf32>
    %1056 = vector.shape_cast %1055 : vector<1x1x16xf32> to vector<1x16xf32>
    %1057 = vector.broadcast %1056 : vector<1x16xf32> to vector<16x16xf32>
    %1058 = arith.addf %1054, %1057 : vector<16x16xf32>
    %1059 = vector.extract_strided_slice %999 {offsets = [1, 0, 0], sizes = [1, 32, 16], strides = [1, 1, 1]} : vector<2x32x16xf32> to vector<1x32x16xf32>
    %1060 = vector.shape_cast %1059 : vector<1x32x16xf32> to vector<32x16xf32>
    %cst_566 = arith.constant dense<0.000000e+00> : vector<16x16xf32>
    %1061 = tpu.matmul %995, %1060, %cst_566 {dimension_numbers = #tpu.dot_dimension_numbers<[1], [0], [0], [1], [0, 0, 1, 1], [], []>} : vector<16x32xf32>, vector<32x16xf32>, vector<16x16xf32> -> vector<16x16xf32>
    %1062 = vector.extract_strided_slice %1005 {offsets = [1, 0, 0], sizes = [1, 1, 16], strides = [1, 1, 1]} : vector<2x1x16xf32> to vector<1x1x16xf32>
    %1063 = vector.shape_cast %1062 : vector<1x1x16xf32> to vector<1x16xf32>
    %1064 = vector.broadcast %1063 : vector<1x16xf32> to vector<16x16xf32>
    %1065 = arith.addf %1061, %1064 : vector<16x16xf32>
    %1066 = vector.extract_strided_slice %1001 {offsets = [1, 0, 0], sizes = [1, 32, 16], strides = [1, 1, 1]} : vector<2x32x16xf32> to vector<1x32x16xf32>
    %1067 = vector.shape_cast %1066 : vector<1x32x16xf32> to vector<32x16xf32>
    %cst_567 = arith.constant dense<0.000000e+00> : vector<16x16xf32>
    %1068 = tpu.matmul %995, %1067, %cst_567 {dimension_numbers = #tpu.dot_dimension_numbers<[1], [0], [0], [1], [0, 0, 1, 1], [], []>} : vector<16x32xf32>, vector<32x16xf32>, vector<16x16xf32> -> vector<16x16xf32>
    %1069 = vector.extract_strided_slice %1007 {offsets = [1, 0, 0], sizes = [1, 1, 16], strides = [1, 1, 1]} : vector<2x1x16xf32> to vector<1x1x16xf32>
    %1070 = vector.shape_cast %1069 : vector<1x1x16xf32> to vector<1x16xf32>
    %1071 = vector.broadcast %1070 : vector<1x16xf32> to vector<16x16xf32>
    %1072 = arith.addf %1068, %1071 : vector<16x16xf32>
    %cst_568 = arith.constant 2.500000e-01 : f32
    %1073 = vector.broadcast %cst_568 : f32 to vector<16x16xf32>
    %1074 = arith.mulf %1058, %1073 : vector<16x16xf32>
    %cst_569 = arith.constant dense<0.000000e+00> : vector<16x16xf32>
    %1075 = tpu.matmul %1074, %1065, %cst_569 {dimension_numbers = #tpu.dot_dimension_numbers<[1], [1], [0], [0], [0, 0, 1, 0], [], []>} : vector<16x16xf32>, vector<16x16xf32>, vector<16x16xf32> -> vector<16x16xf32>
    %cst_570 = arith.constant 5.000000e-01 : f32
    %1076 = vector.broadcast %cst_570 : f32 to vector<16x16xf32>
    %1077 = arith.cmpf ogt, %392, %1076 : vector<16x16xf32>
    %cst_571 = arith.constant -1.70141173E+38 : f32
    %1078 = vector.broadcast %cst_571 : f32 to vector<16x16xf32>
    %1079 = arith.select %1077, %1075, %1078 : vector<16x16xi1>, vector<16x16xf32>
    %cst_572 = arith.constant dense<0xFF800000> : vector<16xf32>
    %1080 = vector.multi_reduction <maximumf>, %1079, %cst_572 [1] : vector<16x16xf32> to vector<16xf32>
    %1081 = vector.shape_cast %1080 : vector<16xf32> to vector<16x1xf32>
    %1082 = vector.broadcast %1081 : vector<16x1xf32> to vector<16x16xf32>
    %1083 = arith.subf %1079, %1082 : vector<16x16xf32>
    %1084 = math.exp %1083 : vector<16x16xf32>
    %cst_573 = arith.constant dense<0.000000e+00> : vector<16xf32>
    %1085 = vector.multi_reduction <add>, %1084, %cst_573 [1] : vector<16x16xf32> to vector<16xf32>
    %1086 = vector.shape_cast %1085 : vector<16xf32> to vector<16x1xf32>
    %1087 = tpu.reciprocal %1086 {approx = true} : vector<16x1xf32> -> vector<16x1xf32>
    %1088 = vector.broadcast %1087 : vector<16x1xf32> to vector<16x16xf32>
    %1089 = arith.mulf %1084, %1088 : vector<16x16xf32>
    %cst_574 = arith.constant dense<0.000000e+00> : vector<16x16xf32>
    %1090 = tpu.matmul %1089, %1072, %cst_574 {dimension_numbers = #tpu.dot_dimension_numbers<[1], [0], [0], [1], [0, 0, 1, 1], [], []>} : vector<16x16xf32>, vector<16x16xf32>, vector<16x16xf32> -> vector<16x16xf32>
    %1091 = vector.extract_strided_slice %1009 {offsets = [1, 0, 0], sizes = [1, 16, 32], strides = [1, 1, 1]} : vector<2x16x32xf32> to vector<1x16x32xf32>
    %1092 = vector.shape_cast %1091 : vector<1x16x32xf32> to vector<16x32xf32>
    %cst_575 = arith.constant dense<0.000000e+00> : vector<16x32xf32>
    %1093 = tpu.matmul %1090, %1092, %cst_575 {dimension_numbers = #tpu.dot_dimension_numbers<[1], [0], [0], [1], [0, 0, 1, 1], [], []>} : vector<16x16xf32>, vector<16x32xf32>, vector<16x32xf32> -> vector<16x32xf32>
    %1094 = arith.addf %1051, %1093 : vector<16x32xf32>
    %1095 = arith.addf %971, %1094 : vector<16x32xf32>
    %c1_576 = arith.constant 1 : index
    %c0_577 = arith.constant 0 : index
    %c0_578 = arith.constant 0 : index
    %1096 = vector.load %arg33[%c1_576, %c0_577, %c0_578] : memref<2x1x32xf32, #tpu.memory_space<vmem>>, vector<1x1x32xf32>
    %1097 = vector.shape_cast %1096 : vector<1x1x32xf32> to vector<1x32xf32>
    %1098 = vector.broadcast %1097 : vector<1x32xf32> to vector<16x32xf32>
    %1099 = arith.addf %1095, %1098 : vector<16x32xf32>
    %c1_579 = arith.constant 1 : index
    %c0_580 = arith.constant 0 : index
    %c0_581 = arith.constant 0 : index
    %1100 = vector.load %arg34[%c1_579, %c0_580, %c0_581] : memref<2x1x32xf32, #tpu.memory_space<vmem>>, vector<1x1x32xf32>
    %1101 = vector.shape_cast %1100 : vector<1x1x32xf32> to vector<1x32xf32>
    %c1_582 = arith.constant 1 : index
    %c0_583 = arith.constant 0 : index
    %c0_584 = arith.constant 0 : index
    %1102 = vector.load %arg35[%c1_582, %c0_583, %c0_584] : memref<2x1x32xf32, #tpu.memory_space<vmem>>, vector<1x1x32xf32>
    %1103 = vector.shape_cast %1102 : vector<1x1x32xf32> to vector<1x32xf32>
    %cst_585 = arith.constant dense<0.000000e+00> : vector<16xf32>
    %1104 = vector.multi_reduction <add>, %1099, %cst_585 [1] : vector<16x32xf32> to vector<16xf32>
    %1105 = vector.shape_cast %1104 : vector<16xf32> to vector<16x1xf32>
    %cst_586 = arith.constant 3.200000e+01 : f32
    %1106 = vector.broadcast %cst_586 : f32 to vector<16x1xf32>
    %1107 = arith.divf %1105, %1106 : vector<16x1xf32>
    %1108 = vector.broadcast %1107 : vector<16x1xf32> to vector<16x32xf32>
    %1109 = arith.subf %1099, %1108 : vector<16x32xf32>
    %1110 = arith.mulf %1109, %1109 : vector<16x32xf32>
    %cst_587 = arith.constant dense<0.000000e+00> : vector<16xf32>
    %1111 = vector.multi_reduction <add>, %1110, %cst_587 [1] : vector<16x32xf32> to vector<16xf32>
    %1112 = vector.shape_cast %1111 : vector<16xf32> to vector<16x1xf32>
    %cst_588 = arith.constant 3.200000e+01 : f32
    %1113 = vector.broadcast %cst_588 : f32 to vector<16x1xf32>
    %1114 = arith.divf %1112, %1113 : vector<16x1xf32>
    %cst_589 = arith.constant 9.99999974E-6 : f32
    %1115 = vector.broadcast %cst_589 : f32 to vector<16x1xf32>
    %1116 = arith.addf %1114, %1115 : vector<16x1xf32>
    %1117 = math.rsqrt %1116 : vector<16x1xf32>
    %1118 = vector.broadcast %1117 : vector<16x1xf32> to vector<16x32xf32>
    %1119 = arith.mulf %1109, %1118 : vector<16x32xf32>
    %1120 = vector.broadcast %1101 : vector<1x32xf32> to vector<16x32xf32>
    %1121 = arith.mulf %1119, %1120 : vector<16x32xf32>
    %1122 = vector.broadcast %1103 : vector<1x32xf32> to vector<16x32xf32>
    %1123 = arith.addf %1121, %1122 : vector<16x32xf32>
    %c1_590 = arith.constant 1 : index
    %c0_591 = arith.constant 0 : index
    %c0_592 = arith.constant 0 : index
    %1124 = vector.load %arg36[%c1_590, %c0_591, %c0_592] : memref<2x32x128xf32, #tpu.memory_space<vmem>>, vector<1x32x128xf32>
    %1125 = vector.shape_cast %1124 : vector<1x32x128xf32> to vector<32x128xf32>
    %cst_593 = arith.constant dense<0.000000e+00> : vector<16x128xf32>
    %1126 = tpu.matmul %1123, %1125, %cst_593 {dimension_numbers = #tpu.dot_dimension_numbers<[1], [0], [0], [1], [0, 0, 1, 1], [], []>} : vector<16x32xf32>, vector<32x128xf32>, vector<16x128xf32> -> vector<16x128xf32>
    %c1_594 = arith.constant 1 : index
    %c0_595 = arith.constant 0 : index
    %c0_596 = arith.constant 0 : index
    %1127 = vector.load %arg37[%c1_594, %c0_595, %c0_596] : memref<2x1x128xf32, #tpu.memory_space<vmem>>, vector<1x1x128xf32>
    %1128 = vector.shape_cast %1127 : vector<1x1x128xf32> to vector<1x128xf32>
    %1129 = vector.broadcast %1128 : vector<1x128xf32> to vector<16x128xf32>
    %1130 = arith.addf %1126, %1129 : vector<16x128xf32>
    %1131 = arith.mulf %1130, %1130 : vector<16x128xf32>
    %1132 = arith.mulf %1130, %1131 : vector<16x128xf32>
    %cst_597 = arith.constant 4.471500e-02 : f32
    %1133 = vector.broadcast %cst_597 : f32 to vector<16x128xf32>
    %1134 = arith.mulf %1133, %1132 : vector<16x128xf32>
    %1135 = arith.addf %1130, %1134 : vector<16x128xf32>
    %cst_598 = arith.constant 0.797884583 : f32
    %1136 = vector.broadcast %cst_598 : f32 to vector<16x128xf32>
    %1137 = arith.mulf %1136, %1135 : vector<16x128xf32>
    %1138 = math.tanh %1137 : vector<16x128xf32>
    %cst_599 = arith.constant 1.000000e+00 : f32
    %1139 = vector.broadcast %cst_599 : f32 to vector<16x128xf32>
    %1140 = arith.addf %1139, %1138 : vector<16x128xf32>
    %cst_600 = arith.constant 5.000000e-01 : f32
    %1141 = vector.broadcast %cst_600 : f32 to vector<16x128xf32>
    %1142 = arith.mulf %1141, %1140 : vector<16x128xf32>
    %1143 = arith.mulf %1130, %1142 : vector<16x128xf32>
    %c1_601 = arith.constant 1 : index
    %c0_602 = arith.constant 0 : index
    %c0_603 = arith.constant 0 : index
    %1144 = vector.load %arg38[%c1_601, %c0_602, %c0_603] : memref<2x128x32xf32, #tpu.memory_space<vmem>>, vector<1x128x32xf32>
    %1145 = vector.shape_cast %1144 : vector<1x128x32xf32> to vector<128x32xf32>
    %cst_604 = arith.constant dense<0.000000e+00> : vector<16x32xf32>
    %1146 = tpu.matmul %1143, %1145, %cst_604 {dimension_numbers = #tpu.dot_dimension_numbers<[1], [0], [0], [1], [0, 0, 1, 1], [], []>} : vector<16x128xf32>, vector<128x32xf32>, vector<16x32xf32> -> vector<16x32xf32>
    %c1_605 = arith.constant 1 : index
    %c0_606 = arith.constant 0 : index
    %c0_607 = arith.constant 0 : index
    %1147 = vector.load %arg39[%c1_605, %c0_606, %c0_607] : memref<2x1x32xf32, #tpu.memory_space<vmem>>, vector<1x1x32xf32>
    %1148 = vector.shape_cast %1147 : vector<1x1x32xf32> to vector<1x32xf32>
    %1149 = vector.broadcast %1148 : vector<1x32xf32> to vector<16x32xf32>
    %1150 = arith.addf %1146, %1149 : vector<16x32xf32>
    %1151 = arith.addf %1099, %1150 : vector<16x32xf32>
    %c0_608 = arith.constant 0 : index
    %c0_609 = arith.constant 0 : index
    %1152 = vector.load %arg40[%c0_608, %c0_609] : memref<1x32xf32, #tpu.memory_space<vmem>>, vector<1x32xf32>
    %c0_610 = arith.constant 0 : index
    %c0_611 = arith.constant 0 : index
    %1153 = vector.load %arg41[%c0_610, %c0_611] : memref<1x32xf32, #tpu.memory_space<vmem>>, vector<1x32xf32>
    %cst_612 = arith.constant dense<0.000000e+00> : vector<16xf32>
    %1154 = vector.multi_reduction <add>, %1151, %cst_612 [1] : vector<16x32xf32> to vector<16xf32>
    %1155 = vector.shape_cast %1154 : vector<16xf32> to vector<16x1xf32>
    %cst_613 = arith.constant 3.200000e+01 : f32
    %1156 = vector.broadcast %cst_613 : f32 to vector<16x1xf32>
    %1157 = arith.divf %1155, %1156 : vector<16x1xf32>
    %1158 = vector.broadcast %1157 : vector<16x1xf32> to vector<16x32xf32>
    %1159 = arith.subf %1151, %1158 : vector<16x32xf32>
    %1160 = arith.mulf %1159, %1159 : vector<16x32xf32>
    %cst_614 = arith.constant dense<0.000000e+00> : vector<16xf32>
    %1161 = vector.multi_reduction <add>, %1160, %cst_614 [1] : vector<16x32xf32> to vector<16xf32>
    %1162 = vector.shape_cast %1161 : vector<16xf32> to vector<16x1xf32>
    %cst_615 = arith.constant 3.200000e+01 : f32
    %1163 = vector.broadcast %cst_615 : f32 to vector<16x1xf32>
    %1164 = arith.divf %1162, %1163 : vector<16x1xf32>
    %cst_616 = arith.constant 9.99999974E-6 : f32
    %1165 = vector.broadcast %cst_616 : f32 to vector<16x1xf32>
    %1166 = arith.addf %1164, %1165 : vector<16x1xf32>
    %1167 = math.rsqrt %1166 : vector<16x1xf32>
    %1168 = vector.broadcast %1167 : vector<16x1xf32> to vector<16x32xf32>
    %1169 = arith.mulf %1159, %1168 : vector<16x32xf32>
    %1170 = vector.broadcast %1152 : vector<1x32xf32> to vector<16x32xf32>
    %1171 = arith.mulf %1169, %1170 : vector<16x32xf32>
    %1172 = vector.broadcast %1153 : vector<1x32xf32> to vector<16x32xf32>
    %1173 = arith.addf %1171, %1172 : vector<16x32xf32>
    %c0_617 = arith.constant 0 : index
    %c0_618 = arith.constant 0 : index
    %1174 = vector.load %arg44[%c0_617, %c0_618] : memref<16x32xf32, #tpu.memory_space<vmem>>, vector<16x32xf32>
    tpu.vector_store %arg44[%c0_617, %c0_618], %1173 {strides = array<i32>} : memref<16x32xf32, #tpu.memory_space<vmem>>, vector<16x32xf32>,
    %c8_619 = arith.constant 8 : index
    %c0_620 = arith.constant 0 : index
    %1175 = vector.load %arg44[%c8_619, %c0_620] : memref<16x32xf32, #tpu.memory_space<vmem>>, vector<8x32xf32>
    %c4_i32_621 = arith.constant 4 : i32
    %1176 = vector.broadcast %c4_i32_621 : i32 to vector<8x32xi32>
    %1177 = arith.cmpi slt, %393, %1176 : vector<8x32xi32>
    %1178 = arith.select %1177, %390, %1175 : vector<8x32xi1>, vector<8x32xf32>
    %c1_622 = arith.constant 1 : index
    %c0_623 = arith.constant 0 : index
    %c0_624 = arith.constant 0 : index
    %c0_625 = arith.constant 0 : index
    %1179 = vector.load %arg42[%c1_622, %c0_623, %c0_624, %c0_625] : memref<3x1x8x32xf32, #tpu.memory_space<vmem>>, vector<1x1x8x32xf32>
    %1180 = vector.shape_cast %1179 : vector<1x1x8x32xf32> to vector<8x32xf32>
    %1181 = vector.shape_cast %1178 : vector<8x32xf32> to vector<1x1x8x32xf32>
    tpu.vector_store %arg42[%c1_622, %c0_623, %c0_624, %c0_625], %1181 {strides = array<i32>} : memref<3x1x8x32xf32, #tpu.memory_space<vmem>>, vector<1x1x8x32xf32>,
    %c8_626 = arith.constant 8 : index
    %c0_627 = arith.constant 0 : index
    %1182 = vector.load %arg4[%c8_626, %c0_627] : memref<16x32xf32, #tpu.memory_space<vmem>>, vector<8x32xf32>
    %1183 = arith.addf %1178, %1182 : vector<8x32xf32>
    %c8_628 = arith.constant 8 : index
    %c0_629 = arith.constant 0 : index
    %1184 = vector.load %arg43[%c8_628, %c0_629] : memref<16x32xf32, #tpu.memory_space<vmem>>, vector<8x32xf32>
    tpu.vector_store %arg43[%c8_628, %c0_629], %1183 {strides = array<i32>} : memref<16x32xf32, #tpu.memory_space<vmem>>, vector<8x32xf32>,
    %c0_630 = arith.constant 0 : index
    %c0_631 = arith.constant 0 : index
    %1185 = vector.load %arg43[%c0_630, %c0_631] : memref<16x32xf32, #tpu.memory_space<vmem>>, vector<16x32xf32>
    %c0_632 = arith.constant 0 : index
    %c0_633 = arith.constant 0 : index
    %c0_634 = arith.constant 0 : index
    %1186 = vector.load %arg24[%c0_632, %c0_633, %c0_634] : memref<2x1x32xf32, #tpu.memory_space<vmem>>, vector<1x1x32xf32>
    %1187 = vector.shape_cast %1186 : vector<1x1x32xf32> to vector<1x32xf32>
    %c0_635 = arith.constant 0 : index
    %c0_636 = arith.constant 0 : index
    %c0_637 = arith.constant 0 : index
    %1188 = vector.load %arg25[%c0_635, %c0_636, %c0_637] : memref<2x1x32xf32, #tpu.memory_space<vmem>>, vector<1x1x32xf32>
    %1189 = vector.shape_cast %1188 : vector<1x1x32xf32> to vector<1x32xf32>
    %cst_638 = arith.constant dense<0.000000e+00> : vector<16xf32>
    %1190 = vector.multi_reduction <add>, %1185, %cst_638 [1] : vector<16x32xf32> to vector<16xf32>
    %1191 = vector.shape_cast %1190 : vector<16xf32> to vector<16x1xf32>
    %cst_639 = arith.constant 3.200000e+01 : f32
    %1192 = vector.broadcast %cst_639 : f32 to vector<16x1xf32>
    %1193 = arith.divf %1191, %1192 : vector<16x1xf32>
    %1194 = vector.broadcast %1193 : vector<16x1xf32> to vector<16x32xf32>
    %1195 = arith.subf %1185, %1194 : vector<16x32xf32>
    %1196 = arith.mulf %1195, %1195 : vector<16x32xf32>
    %cst_640 = arith.constant dense<0.000000e+00> : vector<16xf32>
    %1197 = vector.multi_reduction <add>, %1196, %cst_640 [1] : vector<16x32xf32> to vector<16xf32>
    %1198 = vector.shape_cast %1197 : vector<16xf32> to vector<16x1xf32>
    %cst_641 = arith.constant 3.200000e+01 : f32
    %1199 = vector.broadcast %cst_641 : f32 to vector<16x1xf32>
    %1200 = arith.divf %1198, %1199 : vector<16x1xf32>
    %cst_642 = arith.constant 9.99999974E-6 : f32
    %1201 = vector.broadcast %cst_642 : f32 to vector<16x1xf32>
    %1202 = arith.addf %1200, %1201 : vector<16x1xf32>
    %1203 = math.rsqrt %1202 : vector<16x1xf32>
    %1204 = vector.broadcast %1203 : vector<16x1xf32> to vector<16x32xf32>
    %1205 = arith.mulf %1195, %1204 : vector<16x32xf32>
    %1206 = vector.broadcast %1187 : vector<1x32xf32> to vector<16x32xf32>
    %1207 = arith.mulf %1205, %1206 : vector<16x32xf32>
    %1208 = vector.broadcast %1189 : vector<1x32xf32> to vector<16x32xf32>
    %1209 = arith.addf %1207, %1208 : vector<16x32xf32>
    %c0_643 = arith.constant 0 : index
    %c0_644 = arith.constant 0 : index
    %c0_645 = arith.constant 0 : index
    %c0_646 = arith.constant 0 : index
    %1210 = vector.load %arg26[%c0_643, %c0_644, %c0_645, %c0_646] : memref<2x2x32x16xf32, #tpu.memory_space<vmem>>, vector<1x2x32x16xf32>
    %1211 = vector.shape_cast %1210 : vector<1x2x32x16xf32> to vector<2x32x16xf32>
    %c0_647 = arith.constant 0 : index
    %c0_648 = arith.constant 0 : index
    %c0_649 = arith.constant 0 : index
    %c0_650 = arith.constant 0 : index
    %1212 = vector.load %arg28[%c0_647, %c0_648, %c0_649, %c0_650] : memref<2x2x32x16xf32, #tpu.memory_space<vmem>>, vector<1x2x32x16xf32>
    %1213 = vector.shape_cast %1212 : vector<1x2x32x16xf32> to vector<2x32x16xf32>
    %c0_651 = arith.constant 0 : index
    %c0_652 = arith.constant 0 : index
    %c0_653 = arith.constant 0 : index
    %c0_654 = arith.constant 0 : index
    %1214 = vector.load %arg30[%c0_651, %c0_652, %c0_653, %c0_654] : memref<2x2x32x16xf32, #tpu.memory_space<vmem>>, vector<1x2x32x16xf32>
    %1215 = vector.shape_cast %1214 : vector<1x2x32x16xf32> to vector<2x32x16xf32>
    %c0_655 = arith.constant 0 : index
    %c0_656 = arith.constant 0 : index
    %c0_657 = arith.constant 0 : index
    %c0_658 = arith.constant 0 : index
    %1216 = vector.load %arg27[%c0_655, %c0_656, %c0_657, %c0_658] : memref<2x2x1x16xf32, #tpu.memory_space<vmem>>, vector<1x2x1x16xf32>
    %1217 = vector.shape_cast %1216 : vector<1x2x1x16xf32> to vector<2x1x16xf32>
    %c0_659 = arith.constant 0 : index
    %c0_660 = arith.constant 0 : index
    %c0_661 = arith.constant 0 : index
    %c0_662 = arith.constant 0 : index
    %1218 = vector.load %arg29[%c0_659, %c0_660, %c0_661, %c0_662] : memref<2x2x1x16xf32, #tpu.memory_space<vmem>>, vector<1x2x1x16xf32>
    %1219 = vector.shape_cast %1218 : vector<1x2x1x16xf32> to vector<2x1x16xf32>
    %c0_663 = arith.constant 0 : index
    %c0_664 = arith.constant 0 : index
    %c0_665 = arith.constant 0 : index
    %c0_666 = arith.constant 0 : index
    %1220 = vector.load %arg31[%c0_663, %c0_664, %c0_665, %c0_666] : memref<2x2x1x16xf32, #tpu.memory_space<vmem>>, vector<1x2x1x16xf32>
    %1221 = vector.shape_cast %1220 : vector<1x2x1x16xf32> to vector<2x1x16xf32>
    %c0_667 = arith.constant 0 : index
    %c0_668 = arith.constant 0 : index
    %c0_669 = arith.constant 0 : index
    %c0_670 = arith.constant 0 : index
    %1222 = vector.load %arg32[%c0_667, %c0_668, %c0_669, %c0_670] : memref<2x2x16x32xf32, #tpu.memory_space<vmem>>, vector<1x2x16x32xf32>
    %1223 = vector.shape_cast %1222 : vector<1x2x16x32xf32> to vector<2x16x32xf32>
    %1224 = vector.extract_strided_slice %1211 {offsets = [0, 0, 0], sizes = [1, 32, 16], strides = [1, 1, 1]} : vector<2x32x16xf32> to vector<1x32x16xf32>
    %1225 = vector.shape_cast %1224 : vector<1x32x16xf32> to vector<32x16xf32>
    %cst_671 = arith.constant dense<0.000000e+00> : vector<16x16xf32>
    %1226 = tpu.matmul %1209, %1225, %cst_671 {dimension_numbers = #tpu.dot_dimension_numbers<[1], [0], [0], [1], [0, 0, 1, 1], [], []>} : vector<16x32xf32>, vector<32x16xf32>, vector<16x16xf32> -> vector<16x16xf32>
    %1227 = vector.extract_strided_slice %1217 {offsets = [0, 0, 0], sizes = [1, 1, 16], strides = [1, 1, 1]} : vector<2x1x16xf32> to vector<1x1x16xf32>
    %1228 = vector.shape_cast %1227 : vector<1x1x16xf32> to vector<1x16xf32>
    %1229 = vector.broadcast %1228 : vector<1x16xf32> to vector<16x16xf32>
    %1230 = arith.addf %1226, %1229 : vector<16x16xf32>
    %1231 = vector.extract_strided_slice %1213 {offsets = [0, 0, 0], sizes = [1, 32, 16], strides = [1, 1, 1]} : vector<2x32x16xf32> to vector<1x32x16xf32>
    %1232 = vector.shape_cast %1231 : vector<1x32x16xf32> to vector<32x16xf32>
    %cst_672 = arith.constant dense<0.000000e+00> : vector<16x16xf32>
    %1233 = tpu.matmul %1209, %1232, %cst_672 {dimension_numbers = #tpu.dot_dimension_numbers<[1], [0], [0], [1], [0, 0, 1, 1], [], []>} : vector<16x32xf32>, vector<32x16xf32>, vector<16x16xf32> -> vector<16x16xf32>
    %1234 = vector.extract_strided_slice %1219 {offsets = [0, 0, 0], sizes = [1, 1, 16], strides = [1, 1, 1]} : vector<2x1x16xf32> to vector<1x1x16xf32>
    %1235 = vector.shape_cast %1234 : vector<1x1x16xf32> to vector<1x16xf32>
    %1236 = vector.broadcast %1235 : vector<1x16xf32> to vector<16x16xf32>
    %1237 = arith.addf %1233, %1236 : vector<16x16xf32>
    %1238 = vector.extract_strided_slice %1215 {offsets = [0, 0, 0], sizes = [1, 32, 16], strides = [1, 1, 1]} : vector<2x32x16xf32> to vector<1x32x16xf32>
    %1239 = vector.shape_cast %1238 : vector<1x32x16xf32> to vector<32x16xf32>
    %cst_673 = arith.constant dense<0.000000e+00> : vector<16x16xf32>
    %1240 = tpu.matmul %1209, %1239, %cst_673 {dimension_numbers = #tpu.dot_dimension_numbers<[1], [0], [0], [1], [0, 0, 1, 1], [], []>} : vector<16x32xf32>, vector<32x16xf32>, vector<16x16xf32> -> vector<16x16xf32>
    %1241 = vector.extract_strided_slice %1221 {offsets = [0, 0, 0], sizes = [1, 1, 16], strides = [1, 1, 1]} : vector<2x1x16xf32> to vector<1x1x16xf32>
    %1242 = vector.shape_cast %1241 : vector<1x1x16xf32> to vector<1x16xf32>
    %1243 = vector.broadcast %1242 : vector<1x16xf32> to vector<16x16xf32>
    %1244 = arith.addf %1240, %1243 : vector<16x16xf32>
    %cst_674 = arith.constant 2.500000e-01 : f32
    %1245 = vector.broadcast %cst_674 : f32 to vector<16x16xf32>
    %1246 = arith.mulf %1230, %1245 : vector<16x16xf32>
    %cst_675 = arith.constant dense<0.000000e+00> : vector<16x16xf32>
    %1247 = tpu.matmul %1246, %1237, %cst_675 {dimension_numbers = #tpu.dot_dimension_numbers<[1], [1], [0], [0], [0, 0, 1, 0], [], []>} : vector<16x16xf32>, vector<16x16xf32>, vector<16x16xf32> -> vector<16x16xf32>
    %cst_676 = arith.constant 5.000000e-01 : f32
    %1248 = vector.broadcast %cst_676 : f32 to vector<16x16xf32>
    %1249 = arith.cmpf ogt, %392, %1248 : vector<16x16xf32>
    %cst_677 = arith.constant -1.70141173E+38 : f32
    %1250 = vector.broadcast %cst_677 : f32 to vector<16x16xf32>
    %1251 = arith.select %1249, %1247, %1250 : vector<16x16xi1>, vector<16x16xf32>
    %cst_678 = arith.constant dense<0xFF800000> : vector<16xf32>
    %1252 = vector.multi_reduction <maximumf>, %1251, %cst_678 [1] : vector<16x16xf32> to vector<16xf32>
    %1253 = vector.shape_cast %1252 : vector<16xf32> to vector<16x1xf32>
    %1254 = vector.broadcast %1253 : vector<16x1xf32> to vector<16x16xf32>
    %1255 = arith.subf %1251, %1254 : vector<16x16xf32>
    %1256 = math.exp %1255 : vector<16x16xf32>
    %cst_679 = arith.constant dense<0.000000e+00> : vector<16xf32>
    %1257 = vector.multi_reduction <add>, %1256, %cst_679 [1] : vector<16x16xf32> to vector<16xf32>
    %1258 = vector.shape_cast %1257 : vector<16xf32> to vector<16x1xf32>
    %1259 = tpu.reciprocal %1258 {approx = true} : vector<16x1xf32> -> vector<16x1xf32>
    %1260 = vector.broadcast %1259 : vector<16x1xf32> to vector<16x16xf32>
    %1261 = arith.mulf %1256, %1260 : vector<16x16xf32>
    %cst_680 = arith.constant dense<0.000000e+00> : vector<16x16xf32>
    %1262 = tpu.matmul %1261, %1244, %cst_680 {dimension_numbers = #tpu.dot_dimension_numbers<[1], [0], [0], [1], [0, 0, 1, 1], [], []>} : vector<16x16xf32>, vector<16x16xf32>, vector<16x16xf32> -> vector<16x16xf32>
    %1263 = vector.extract_strided_slice %1223 {offsets = [0, 0, 0], sizes = [1, 16, 32], strides = [1, 1, 1]} : vector<2x16x32xf32> to vector<1x16x32xf32>
    %1264 = vector.shape_cast %1263 : vector<1x16x32xf32> to vector<16x32xf32>
    %cst_681 = arith.constant dense<0.000000e+00> : vector<16x32xf32>
    %1265 = tpu.matmul %1262, %1264, %cst_681 {dimension_numbers = #tpu.dot_dimension_numbers<[1], [0], [0], [1], [0, 0, 1, 1], [], []>} : vector<16x16xf32>, vector<16x32xf32>, vector<16x32xf32> -> vector<16x32xf32>
    %1266 = vector.extract_strided_slice %1211 {offsets = [1, 0, 0], sizes = [1, 32, 16], strides = [1, 1, 1]} : vector<2x32x16xf32> to vector<1x32x16xf32>
    %1267 = vector.shape_cast %1266 : vector<1x32x16xf32> to vector<32x16xf32>
    %cst_682 = arith.constant dense<0.000000e+00> : vector<16x16xf32>
    %1268 = tpu.matmul %1209, %1267, %cst_682 {dimension_numbers = #tpu.dot_dimension_numbers<[1], [0], [0], [1], [0, 0, 1, 1], [], []>} : vector<16x32xf32>, vector<32x16xf32>, vector<16x16xf32> -> vector<16x16xf32>
    %1269 = vector.extract_strided_slice %1217 {offsets = [1, 0, 0], sizes = [1, 1, 16], strides = [1, 1, 1]} : vector<2x1x16xf32> to vector<1x1x16xf32>
    %1270 = vector.shape_cast %1269 : vector<1x1x16xf32> to vector<1x16xf32>
    %1271 = vector.broadcast %1270 : vector<1x16xf32> to vector<16x16xf32>
    %1272 = arith.addf %1268, %1271 : vector<16x16xf32>
    %1273 = vector.extract_strided_slice %1213 {offsets = [1, 0, 0], sizes = [1, 32, 16], strides = [1, 1, 1]} : vector<2x32x16xf32> to vector<1x32x16xf32>
    %1274 = vector.shape_cast %1273 : vector<1x32x16xf32> to vector<32x16xf32>
    %cst_683 = arith.constant dense<0.000000e+00> : vector<16x16xf32>
    %1275 = tpu.matmul %1209, %1274, %cst_683 {dimension_numbers = #tpu.dot_dimension_numbers<[1], [0], [0], [1], [0, 0, 1, 1], [], []>} : vector<16x32xf32>, vector<32x16xf32>, vector<16x16xf32> -> vector<16x16xf32>
    %1276 = vector.extract_strided_slice %1219 {offsets = [1, 0, 0], sizes = [1, 1, 16], strides = [1, 1, 1]} : vector<2x1x16xf32> to vector<1x1x16xf32>
    %1277 = vector.shape_cast %1276 : vector<1x1x16xf32> to vector<1x16xf32>
    %1278 = vector.broadcast %1277 : vector<1x16xf32> to vector<16x16xf32>
    %1279 = arith.addf %1275, %1278 : vector<16x16xf32>
    %1280 = vector.extract_strided_slice %1215 {offsets = [1, 0, 0], sizes = [1, 32, 16], strides = [1, 1, 1]} : vector<2x32x16xf32> to vector<1x32x16xf32>
    %1281 = vector.shape_cast %1280 : vector<1x32x16xf32> to vector<32x16xf32>
    %cst_684 = arith.constant dense<0.000000e+00> : vector<16x16xf32>
    %1282 = tpu.matmul %1209, %1281, %cst_684 {dimension_numbers = #tpu.dot_dimension_numbers<[1], [0], [0], [1], [0, 0, 1, 1], [], []>} : vector<16x32xf32>, vector<32x16xf32>, vector<16x16xf32> -> vector<16x16xf32>
    %1283 = vector.extract_strided_slice %1221 {offsets = [1, 0, 0], sizes = [1, 1, 16], strides = [1, 1, 1]} : vector<2x1x16xf32> to vector<1x1x16xf32>
    %1284 = vector.shape_cast %1283 : vector<1x1x16xf32> to vector<1x16xf32>
    %1285 = vector.broadcast %1284 : vector<1x16xf32> to vector<16x16xf32>
    %1286 = arith.addf %1282, %1285 : vector<16x16xf32>
    %cst_685 = arith.constant 2.500000e-01 : f32
    %1287 = vector.broadcast %cst_685 : f32 to vector<16x16xf32>
    %1288 = arith.mulf %1272, %1287 : vector<16x16xf32>
    %cst_686 = arith.constant dense<0.000000e+00> : vector<16x16xf32>
    %1289 = tpu.matmul %1288, %1279, %cst_686 {dimension_numbers = #tpu.dot_dimension_numbers<[1], [1], [0], [0], [0, 0, 1, 0], [], []>} : vector<16x16xf32>, vector<16x16xf32>, vector<16x16xf32> -> vector<16x16xf32>
    %cst_687 = arith.constant 5.000000e-01 : f32
    %1290 = vector.broadcast %cst_687 : f32 to vector<16x16xf32>
    %1291 = arith.cmpf ogt, %392, %1290 : vector<16x16xf32>
    %cst_688 = arith.constant -1.70141173E+38 : f32
    %1292 = vector.broadcast %cst_688 : f32 to vector<16x16xf32>
    %1293 = arith.select %1291, %1289, %1292 : vector<16x16xi1>, vector<16x16xf32>
    %cst_689 = arith.constant dense<0xFF800000> : vector<16xf32>
    %1294 = vector.multi_reduction <maximumf>, %1293, %cst_689 [1] : vector<16x16xf32> to vector<16xf32>
    %1295 = vector.shape_cast %1294 : vector<16xf32> to vector<16x1xf32>
    %1296 = vector.broadcast %1295 : vector<16x1xf32> to vector<16x16xf32>
    %1297 = arith.subf %1293, %1296 : vector<16x16xf32>
    %1298 = math.exp %1297 : vector<16x16xf32>
    %cst_690 = arith.constant dense<0.000000e+00> : vector<16xf32>
    %1299 = vector.multi_reduction <add>, %1298, %cst_690 [1] : vector<16x16xf32> to vector<16xf32>
    %1300 = vector.shape_cast %1299 : vector<16xf32> to vector<16x1xf32>
    %1301 = tpu.reciprocal %1300 {approx = true} : vector<16x1xf32> -> vector<16x1xf32>
    %1302 = vector.broadcast %1301 : vector<16x1xf32> to vector<16x16xf32>
    %1303 = arith.mulf %1298, %1302 : vector<16x16xf32>
    %cst_691 = arith.constant dense<0.000000e+00> : vector<16x16xf32>
    %1304 = tpu.matmul %1303, %1286, %cst_691 {dimension_numbers = #tpu.dot_dimension_numbers<[1], [0], [0], [1], [0, 0, 1, 1], [], []>} : vector<16x16xf32>, vector<16x16xf32>, vector<16x16xf32> -> vector<16x16xf32>
    %1305 = vector.extract_strided_slice %1223 {offsets = [1, 0, 0], sizes = [1, 16, 32], strides = [1, 1, 1]} : vector<2x16x32xf32> to vector<1x16x32xf32>
    %1306 = vector.shape_cast %1305 : vector<1x16x32xf32> to vector<16x32xf32>
    %cst_692 = arith.constant dense<0.000000e+00> : vector<16x32xf32>
    %1307 = tpu.matmul %1304, %1306, %cst_692 {dimension_numbers = #tpu.dot_dimension_numbers<[1], [0], [0], [1], [0, 0, 1, 1], [], []>} : vector<16x16xf32>, vector<16x32xf32>, vector<16x32xf32> -> vector<16x32xf32>
    %1308 = arith.addf %1265, %1307 : vector<16x32xf32>
    %1309 = arith.addf %1185, %1308 : vector<16x32xf32>
    %c0_693 = arith.constant 0 : index
    %c0_694 = arith.constant 0 : index
    %c0_695 = arith.constant 0 : index
    %1310 = vector.load %arg33[%c0_693, %c0_694, %c0_695] : memref<2x1x32xf32, #tpu.memory_space<vmem>>, vector<1x1x32xf32>
    %1311 = vector.shape_cast %1310 : vector<1x1x32xf32> to vector<1x32xf32>
    %1312 = vector.broadcast %1311 : vector<1x32xf32> to vector<16x32xf32>
    %1313 = arith.addf %1309, %1312 : vector<16x32xf32>
    %c0_696 = arith.constant 0 : index
    %c0_697 = arith.constant 0 : index
    %c0_698 = arith.constant 0 : index
    %1314 = vector.load %arg34[%c0_696, %c0_697, %c0_698] : memref<2x1x32xf32, #tpu.memory_space<vmem>>, vector<1x1x32xf32>
    %1315 = vector.shape_cast %1314 : vector<1x1x32xf32> to vector<1x32xf32>
    %c0_699 = arith.constant 0 : index
    %c0_700 = arith.constant 0 : index
    %c0_701 = arith.constant 0 : index
    %1316 = vector.load %arg35[%c0_699, %c0_700, %c0_701] : memref<2x1x32xf32, #tpu.memory_space<vmem>>, vector<1x1x32xf32>
    %1317 = vector.shape_cast %1316 : vector<1x1x32xf32> to vector<1x32xf32>
    %cst_702 = arith.constant dense<0.000000e+00> : vector<16xf32>
    %1318 = vector.multi_reduction <add>, %1313, %cst_702 [1] : vector<16x32xf32> to vector<16xf32>
    %1319 = vector.shape_cast %1318 : vector<16xf32> to vector<16x1xf32>
    %cst_703 = arith.constant 3.200000e+01 : f32
    %1320 = vector.broadcast %cst_703 : f32 to vector<16x1xf32>
    %1321 = arith.divf %1319, %1320 : vector<16x1xf32>
    %1322 = vector.broadcast %1321 : vector<16x1xf32> to vector<16x32xf32>
    %1323 = arith.subf %1313, %1322 : vector<16x32xf32>
    %1324 = arith.mulf %1323, %1323 : vector<16x32xf32>
    %cst_704 = arith.constant dense<0.000000e+00> : vector<16xf32>
    %1325 = vector.multi_reduction <add>, %1324, %cst_704 [1] : vector<16x32xf32> to vector<16xf32>
    %1326 = vector.shape_cast %1325 : vector<16xf32> to vector<16x1xf32>
    %cst_705 = arith.constant 3.200000e+01 : f32
    %1327 = vector.broadcast %cst_705 : f32 to vector<16x1xf32>
    %1328 = arith.divf %1326, %1327 : vector<16x1xf32>
    %cst_706 = arith.constant 9.99999974E-6 : f32
    %1329 = vector.broadcast %cst_706 : f32 to vector<16x1xf32>
    %1330 = arith.addf %1328, %1329 : vector<16x1xf32>
    %1331 = math.rsqrt %1330 : vector<16x1xf32>
    %1332 = vector.broadcast %1331 : vector<16x1xf32> to vector<16x32xf32>
    %1333 = arith.mulf %1323, %1332 : vector<16x32xf32>
    %1334 = vector.broadcast %1315 : vector<1x32xf32> to vector<16x32xf32>
    %1335 = arith.mulf %1333, %1334 : vector<16x32xf32>
    %1336 = vector.broadcast %1317 : vector<1x32xf32> to vector<16x32xf32>
    %1337 = arith.addf %1335, %1336 : vector<16x32xf32>
    %c0_707 = arith.constant 0 : index
    %c0_708 = arith.constant 0 : index
    %c0_709 = arith.constant 0 : index
    %1338 = vector.load %arg36[%c0_707, %c0_708, %c0_709] : memref<2x32x128xf32, #tpu.memory_space<vmem>>, vector<1x32x128xf32>
    %1339 = vector.shape_cast %1338 : vector<1x32x128xf32> to vector<32x128xf32>
    %cst_710 = arith.constant dense<0.000000e+00> : vector<16x128xf32>
    %1340 = tpu.matmul %1337, %1339, %cst_710 {dimension_numbers = #tpu.dot_dimension_numbers<[1], [0], [0], [1], [0, 0, 1, 1], [], []>} : vector<16x32xf32>, vector<32x128xf32>, vector<16x128xf32> -> vector<16x128xf32>
    %c0_711 = arith.constant 0 : index
    %c0_712 = arith.constant 0 : index
    %c0_713 = arith.constant 0 : index
    %1341 = vector.load %arg37[%c0_711, %c0_712, %c0_713] : memref<2x1x128xf32, #tpu.memory_space<vmem>>, vector<1x1x128xf32>
    %1342 = vector.shape_cast %1341 : vector<1x1x128xf32> to vector<1x128xf32>
    %1343 = vector.broadcast %1342 : vector<1x128xf32> to vector<16x128xf32>
    %1344 = arith.addf %1340, %1343 : vector<16x128xf32>
    %1345 = arith.mulf %1344, %1344 : vector<16x128xf32>
    %1346 = arith.mulf %1344, %1345 : vector<16x128xf32>
    %cst_714 = arith.constant 4.471500e-02 : f32
    %1347 = vector.broadcast %cst_714 : f32 to vector<16x128xf32>
    %1348 = arith.mulf %1347, %1346 : vector<16x128xf32>
    %1349 = arith.addf %1344, %1348 : vector<16x128xf32>
    %cst_715 = arith.constant 0.797884583 : f32
    %1350 = vector.broadcast %cst_715 : f32 to vector<16x128xf32>
    %1351 = arith.mulf %1350, %1349 : vector<16x128xf32>
    %1352 = math.tanh %1351 : vector<16x128xf32>
    %cst_716 = arith.constant 1.000000e+00 : f32
    %1353 = vector.broadcast %cst_716 : f32 to vector<16x128xf32>
    %1354 = arith.addf %1353, %1352 : vector<16x128xf32>
    %cst_717 = arith.constant 5.000000e-01 : f32
    %1355 = vector.broadcast %cst_717 : f32 to vector<16x128xf32>
    %1356 = arith.mulf %1355, %1354 : vector<16x128xf32>
    %1357 = arith.mulf %1344, %1356 : vector<16x128xf32>
    %c0_718 = arith.constant 0 : index
    %c0_719 = arith.constant 0 : index
    %c0_720 = arith.constant 0 : index
    %1358 = vector.load %arg38[%c0_718, %c0_719, %c0_720] : memref<2x128x32xf32, #tpu.memory_space<vmem>>, vector<1x128x32xf32>
    %1359 = vector.shape_cast %1358 : vector<1x128x32xf32> to vector<128x32xf32>
    %cst_721 = arith.constant dense<0.000000e+00> : vector<16x32xf32>
    %1360 = tpu.matmul %1357, %1359, %cst_721 {dimension_numbers = #tpu.dot_dimension_numbers<[1], [0], [0], [1], [0, 0, 1, 1], [], []>} : vector<16x128xf32>, vector<128x32xf32>, vector<16x32xf32> -> vector<16x32xf32>
    %c0_722 = arith.constant 0 : index
    %c0_723 = arith.constant 0 : index
    %c0_724 = arith.constant 0 : index
    %1361 = vector.load %arg39[%c0_722, %c0_723, %c0_724] : memref<2x1x32xf32, #tpu.memory_space<vmem>>, vector<1x1x32xf32>
    %1362 = vector.shape_cast %1361 : vector<1x1x32xf32> to vector<1x32xf32>
    %1363 = vector.broadcast %1362 : vector<1x32xf32> to vector<16x32xf32>
    %1364 = arith.addf %1360, %1363 : vector<16x32xf32>
    %1365 = arith.addf %1313, %1364 : vector<16x32xf32>
    %c1_725 = arith.constant 1 : index
    %c0_726 = arith.constant 0 : index
    %c0_727 = arith.constant 0 : index
    %1366 = vector.load %arg24[%c1_725, %c0_726, %c0_727] : memref<2x1x32xf32, #tpu.memory_space<vmem>>, vector<1x1x32xf32>
    %1367 = vector.shape_cast %1366 : vector<1x1x32xf32> to vector<1x32xf32>
    %c1_728 = arith.constant 1 : index
    %c0_729 = arith.constant 0 : index
    %c0_730 = arith.constant 0 : index
    %1368 = vector.load %arg25[%c1_728, %c0_729, %c0_730] : memref<2x1x32xf32, #tpu.memory_space<vmem>>, vector<1x1x32xf32>
    %1369 = vector.shape_cast %1368 : vector<1x1x32xf32> to vector<1x32xf32>
    %cst_731 = arith.constant dense<0.000000e+00> : vector<16xf32>
    %1370 = vector.multi_reduction <add>, %1365, %cst_731 [1] : vector<16x32xf32> to vector<16xf32>
    %1371 = vector.shape_cast %1370 : vector<16xf32> to vector<16x1xf32>
    %cst_732 = arith.constant 3.200000e+01 : f32
    %1372 = vector.broadcast %cst_732 : f32 to vector<16x1xf32>
    %1373 = arith.divf %1371, %1372 : vector<16x1xf32>
    %1374 = vector.broadcast %1373 : vector<16x1xf32> to vector<16x32xf32>
    %1375 = arith.subf %1365, %1374 : vector<16x32xf32>
    %1376 = arith.mulf %1375, %1375 : vector<16x32xf32>
    %cst_733 = arith.constant dense<0.000000e+00> : vector<16xf32>
    %1377 = vector.multi_reduction <add>, %1376, %cst_733 [1] : vector<16x32xf32> to vector<16xf32>
    %1378 = vector.shape_cast %1377 : vector<16xf32> to vector<16x1xf32>
    %cst_734 = arith.constant 3.200000e+01 : f32
    %1379 = vector.broadcast %cst_734 : f32 to vector<16x1xf32>
    %1380 = arith.divf %1378, %1379 : vector<16x1xf32>
    %cst_735 = arith.constant 9.99999974E-6 : f32
    %1381 = vector.broadcast %cst_735 : f32 to vector<16x1xf32>
    %1382 = arith.addf %1380, %1381 : vector<16x1xf32>
    %1383 = math.rsqrt %1382 : vector<16x1xf32>
    %1384 = vector.broadcast %1383 : vector<16x1xf32> to vector<16x32xf32>
    %1385 = arith.mulf %1375, %1384 : vector<16x32xf32>
    %1386 = vector.broadcast %1367 : vector<1x32xf32> to vector<16x32xf32>
    %1387 = arith.mulf %1385, %1386 : vector<16x32xf32>
    %1388 = vector.broadcast %1369 : vector<1x32xf32> to vector<16x32xf32>
    %1389 = arith.addf %1387, %1388 : vector<16x32xf32>
    %c1_736 = arith.constant 1 : index
    %c0_737 = arith.constant 0 : index
    %c0_738 = arith.constant 0 : index
    %c0_739 = arith.constant 0 : index
    %1390 = vector.load %arg26[%c1_736, %c0_737, %c0_738, %c0_739] : memref<2x2x32x16xf32, #tpu.memory_space<vmem>>, vector<1x2x32x16xf32>
    %1391 = vector.shape_cast %1390 : vector<1x2x32x16xf32> to vector<2x32x16xf32>
    %c1_740 = arith.constant 1 : index
    %c0_741 = arith.constant 0 : index
    %c0_742 = arith.constant 0 : index
    %c0_743 = arith.constant 0 : index
    %1392 = vector.load %arg28[%c1_740, %c0_741, %c0_742, %c0_743] : memref<2x2x32x16xf32, #tpu.memory_space<vmem>>, vector<1x2x32x16xf32>
    %1393 = vector.shape_cast %1392 : vector<1x2x32x16xf32> to vector<2x32x16xf32>
    %c1_744 = arith.constant 1 : index
    %c0_745 = arith.constant 0 : index
    %c0_746 = arith.constant 0 : index
    %c0_747 = arith.constant 0 : index
    %1394 = vector.load %arg30[%c1_744, %c0_745, %c0_746, %c0_747] : memref<2x2x32x16xf32, #tpu.memory_space<vmem>>, vector<1x2x32x16xf32>
    %1395 = vector.shape_cast %1394 : vector<1x2x32x16xf32> to vector<2x32x16xf32>
    %c1_748 = arith.constant 1 : index
    %c0_749 = arith.constant 0 : index
    %c0_750 = arith.constant 0 : index
    %c0_751 = arith.constant 0 : index
    %1396 = vector.load %arg27[%c1_748, %c0_749, %c0_750, %c0_751] : memref<2x2x1x16xf32, #tpu.memory_space<vmem>>, vector<1x2x1x16xf32>
    %1397 = vector.shape_cast %1396 : vector<1x2x1x16xf32> to vector<2x1x16xf32>
    %c1_752 = arith.constant 1 : index
    %c0_753 = arith.constant 0 : index
    %c0_754 = arith.constant 0 : index
    %c0_755 = arith.constant 0 : index
    %1398 = vector.load %arg29[%c1_752, %c0_753, %c0_754, %c0_755] : memref<2x2x1x16xf32, #tpu.memory_space<vmem>>, vector<1x2x1x16xf32>
    %1399 = vector.shape_cast %1398 : vector<1x2x1x16xf32> to vector<2x1x16xf32>
    %c1_756 = arith.constant 1 : index
    %c0_757 = arith.constant 0 : index
    %c0_758 = arith.constant 0 : index
    %c0_759 = arith.constant 0 : index
    %1400 = vector.load %arg31[%c1_756, %c0_757, %c0_758, %c0_759] : memref<2x2x1x16xf32, #tpu.memory_space<vmem>>, vector<1x2x1x16xf32>
    %1401 = vector.shape_cast %1400 : vector<1x2x1x16xf32> to vector<2x1x16xf32>
    %c1_760 = arith.constant 1 : index
    %c0_761 = arith.constant 0 : index
    %c0_762 = arith.constant 0 : index
    %c0_763 = arith.constant 0 : index
    %1402 = vector.load %arg32[%c1_760, %c0_761, %c0_762, %c0_763] : memref<2x2x16x32xf32, #tpu.memory_space<vmem>>, vector<1x2x16x32xf32>
    %1403 = vector.shape_cast %1402 : vector<1x2x16x32xf32> to vector<2x16x32xf32>
    %1404 = vector.extract_strided_slice %1391 {offsets = [0, 0, 0], sizes = [1, 32, 16], strides = [1, 1, 1]} : vector<2x32x16xf32> to vector<1x32x16xf32>
    %1405 = vector.shape_cast %1404 : vector<1x32x16xf32> to vector<32x16xf32>
    %cst_764 = arith.constant dense<0.000000e+00> : vector<16x16xf32>
    %1406 = tpu.matmul %1389, %1405, %cst_764 {dimension_numbers = #tpu.dot_dimension_numbers<[1], [0], [0], [1], [0, 0, 1, 1], [], []>} : vector<16x32xf32>, vector<32x16xf32>, vector<16x16xf32> -> vector<16x16xf32>
    %1407 = vector.extract_strided_slice %1397 {offsets = [0, 0, 0], sizes = [1, 1, 16], strides = [1, 1, 1]} : vector<2x1x16xf32> to vector<1x1x16xf32>
    %1408 = vector.shape_cast %1407 : vector<1x1x16xf32> to vector<1x16xf32>
    %1409 = vector.broadcast %1408 : vector<1x16xf32> to vector<16x16xf32>
    %1410 = arith.addf %1406, %1409 : vector<16x16xf32>
    %1411 = vector.extract_strided_slice %1393 {offsets = [0, 0, 0], sizes = [1, 32, 16], strides = [1, 1, 1]} : vector<2x32x16xf32> to vector<1x32x16xf32>
    %1412 = vector.shape_cast %1411 : vector<1x32x16xf32> to vector<32x16xf32>
    %cst_765 = arith.constant dense<0.000000e+00> : vector<16x16xf32>
    %1413 = tpu.matmul %1389, %1412, %cst_765 {dimension_numbers = #tpu.dot_dimension_numbers<[1], [0], [0], [1], [0, 0, 1, 1], [], []>} : vector<16x32xf32>, vector<32x16xf32>, vector<16x16xf32> -> vector<16x16xf32>
    %1414 = vector.extract_strided_slice %1399 {offsets = [0, 0, 0], sizes = [1, 1, 16], strides = [1, 1, 1]} : vector<2x1x16xf32> to vector<1x1x16xf32>
    %1415 = vector.shape_cast %1414 : vector<1x1x16xf32> to vector<1x16xf32>
    %1416 = vector.broadcast %1415 : vector<1x16xf32> to vector<16x16xf32>
    %1417 = arith.addf %1413, %1416 : vector<16x16xf32>
    %1418 = vector.extract_strided_slice %1395 {offsets = [0, 0, 0], sizes = [1, 32, 16], strides = [1, 1, 1]} : vector<2x32x16xf32> to vector<1x32x16xf32>
    %1419 = vector.shape_cast %1418 : vector<1x32x16xf32> to vector<32x16xf32>
    %cst_766 = arith.constant dense<0.000000e+00> : vector<16x16xf32>
    %1420 = tpu.matmul %1389, %1419, %cst_766 {dimension_numbers = #tpu.dot_dimension_numbers<[1], [0], [0], [1], [0, 0, 1, 1], [], []>} : vector<16x32xf32>, vector<32x16xf32>, vector<16x16xf32> -> vector<16x16xf32>
    %1421 = vector.extract_strided_slice %1401 {offsets = [0, 0, 0], sizes = [1, 1, 16], strides = [1, 1, 1]} : vector<2x1x16xf32> to vector<1x1x16xf32>
    %1422 = vector.shape_cast %1421 : vector<1x1x16xf32> to vector<1x16xf32>
    %1423 = vector.broadcast %1422 : vector<1x16xf32> to vector<16x16xf32>
    %1424 = arith.addf %1420, %1423 : vector<16x16xf32>
    %cst_767 = arith.constant 2.500000e-01 : f32
    %1425 = vector.broadcast %cst_767 : f32 to vector<16x16xf32>
    %1426 = arith.mulf %1410, %1425 : vector<16x16xf32>
    %cst_768 = arith.constant dense<0.000000e+00> : vector<16x16xf32>
    %1427 = tpu.matmul %1426, %1417, %cst_768 {dimension_numbers = #tpu.dot_dimension_numbers<[1], [1], [0], [0], [0, 0, 1, 0], [], []>} : vector<16x16xf32>, vector<16x16xf32>, vector<16x16xf32> -> vector<16x16xf32>
    %cst_769 = arith.constant 5.000000e-01 : f32
    %1428 = vector.broadcast %cst_769 : f32 to vector<16x16xf32>
    %1429 = arith.cmpf ogt, %392, %1428 : vector<16x16xf32>
    %cst_770 = arith.constant -1.70141173E+38 : f32
    %1430 = vector.broadcast %cst_770 : f32 to vector<16x16xf32>
    %1431 = arith.select %1429, %1427, %1430 : vector<16x16xi1>, vector<16x16xf32>
    %cst_771 = arith.constant dense<0xFF800000> : vector<16xf32>
    %1432 = vector.multi_reduction <maximumf>, %1431, %cst_771 [1] : vector<16x16xf32> to vector<16xf32>
    %1433 = vector.shape_cast %1432 : vector<16xf32> to vector<16x1xf32>
    %1434 = vector.broadcast %1433 : vector<16x1xf32> to vector<16x16xf32>
    %1435 = arith.subf %1431, %1434 : vector<16x16xf32>
    %1436 = math.exp %1435 : vector<16x16xf32>
    %cst_772 = arith.constant dense<0.000000e+00> : vector<16xf32>
    %1437 = vector.multi_reduction <add>, %1436, %cst_772 [1] : vector<16x16xf32> to vector<16xf32>
    %1438 = vector.shape_cast %1437 : vector<16xf32> to vector<16x1xf32>
    %1439 = tpu.reciprocal %1438 {approx = true} : vector<16x1xf32> -> vector<16x1xf32>
    %1440 = vector.broadcast %1439 : vector<16x1xf32> to vector<16x16xf32>
    %1441 = arith.mulf %1436, %1440 : vector<16x16xf32>
    %cst_773 = arith.constant dense<0.000000e+00> : vector<16x16xf32>
    %1442 = tpu.matmul %1441, %1424, %cst_773 {dimension_numbers = #tpu.dot_dimension_numbers<[1], [0], [0], [1], [0, 0, 1, 1], [], []>} : vector<16x16xf32>, vector<16x16xf32>, vector<16x16xf32> -> vector<16x16xf32>
    %1443 = vector.extract_strided_slice %1403 {offsets = [0, 0, 0], sizes = [1, 16, 32], strides = [1, 1, 1]} : vector<2x16x32xf32> to vector<1x16x32xf32>
    %1444 = vector.shape_cast %1443 : vector<1x16x32xf32> to vector<16x32xf32>
    %cst_774 = arith.constant dense<0.000000e+00> : vector<16x32xf32>
    %1445 = tpu.matmul %1442, %1444, %cst_774 {dimension_numbers = #tpu.dot_dimension_numbers<[1], [0], [0], [1], [0, 0, 1, 1], [], []>} : vector<16x16xf32>, vector<16x32xf32>, vector<16x32xf32> -> vector<16x32xf32>
    %1446 = vector.extract_strided_slice %1391 {offsets = [1, 0, 0], sizes = [1, 32, 16], strides = [1, 1, 1]} : vector<2x32x16xf32> to vector<1x32x16xf32>
    %1447 = vector.shape_cast %1446 : vector<1x32x16xf32> to vector<32x16xf32>
    %cst_775 = arith.constant dense<0.000000e+00> : vector<16x16xf32>
    %1448 = tpu.matmul %1389, %1447, %cst_775 {dimension_numbers = #tpu.dot_dimension_numbers<[1], [0], [0], [1], [0, 0, 1, 1], [], []>} : vector<16x32xf32>, vector<32x16xf32>, vector<16x16xf32> -> vector<16x16xf32>
    %1449 = vector.extract_strided_slice %1397 {offsets = [1, 0, 0], sizes = [1, 1, 16], strides = [1, 1, 1]} : vector<2x1x16xf32> to vector<1x1x16xf32>
    %1450 = vector.shape_cast %1449 : vector<1x1x16xf32> to vector<1x16xf32>
    %1451 = vector.broadcast %1450 : vector<1x16xf32> to vector<16x16xf32>
    %1452 = arith.addf %1448, %1451 : vector<16x16xf32>
    %1453 = vector.extract_strided_slice %1393 {offsets = [1, 0, 0], sizes = [1, 32, 16], strides = [1, 1, 1]} : vector<2x32x16xf32> to vector<1x32x16xf32>
    %1454 = vector.shape_cast %1453 : vector<1x32x16xf32> to vector<32x16xf32>
    %cst_776 = arith.constant dense<0.000000e+00> : vector<16x16xf32>
    %1455 = tpu.matmul %1389, %1454, %cst_776 {dimension_numbers = #tpu.dot_dimension_numbers<[1], [0], [0], [1], [0, 0, 1, 1], [], []>} : vector<16x32xf32>, vector<32x16xf32>, vector<16x16xf32> -> vector<16x16xf32>
    %1456 = vector.extract_strided_slice %1399 {offsets = [1, 0, 0], sizes = [1, 1, 16], strides = [1, 1, 1]} : vector<2x1x16xf32> to vector<1x1x16xf32>
    %1457 = vector.shape_cast %1456 : vector<1x1x16xf32> to vector<1x16xf32>
    %1458 = vector.broadcast %1457 : vector<1x16xf32> to vector<16x16xf32>
    %1459 = arith.addf %1455, %1458 : vector<16x16xf32>
    %1460 = vector.extract_strided_slice %1395 {offsets = [1, 0, 0], sizes = [1, 32, 16], strides = [1, 1, 1]} : vector<2x32x16xf32> to vector<1x32x16xf32>
    %1461 = vector.shape_cast %1460 : vector<1x32x16xf32> to vector<32x16xf32>
    %cst_777 = arith.constant dense<0.000000e+00> : vector<16x16xf32>
    %1462 = tpu.matmul %1389, %1461, %cst_777 {dimension_numbers = #tpu.dot_dimension_numbers<[1], [0], [0], [1], [0, 0, 1, 1], [], []>} : vector<16x32xf32>, vector<32x16xf32>, vector<16x16xf32> -> vector<16x16xf32>
    %1463 = vector.extract_strided_slice %1401 {offsets = [1, 0, 0], sizes = [1, 1, 16], strides = [1, 1, 1]} : vector<2x1x16xf32> to vector<1x1x16xf32>
    %1464 = vector.shape_cast %1463 : vector<1x1x16xf32> to vector<1x16xf32>
    %1465 = vector.broadcast %1464 : vector<1x16xf32> to vector<16x16xf32>
    %1466 = arith.addf %1462, %1465 : vector<16x16xf32>
    %cst_778 = arith.constant 2.500000e-01 : f32
    %1467 = vector.broadcast %cst_778 : f32 to vector<16x16xf32>
    %1468 = arith.mulf %1452, %1467 : vector<16x16xf32>
    %cst_779 = arith.constant dense<0.000000e+00> : vector<16x16xf32>
    %1469 = tpu.matmul %1468, %1459, %cst_779 {dimension_numbers = #tpu.dot_dimension_numbers<[1], [1], [0], [0], [0, 0, 1, 0], [], []>} : vector<16x16xf32>, vector<16x16xf32>, vector<16x16xf32> -> vector<16x16xf32>
    %cst_780 = arith.constant 5.000000e-01 : f32
    %1470 = vector.broadcast %cst_780 : f32 to vector<16x16xf32>
    %1471 = arith.cmpf ogt, %392, %1470 : vector<16x16xf32>
    %cst_781 = arith.constant -1.70141173E+38 : f32
    %1472 = vector.broadcast %cst_781 : f32 to vector<16x16xf32>
    %1473 = arith.select %1471, %1469, %1472 : vector<16x16xi1>, vector<16x16xf32>
    %cst_782 = arith.constant dense<0xFF800000> : vector<16xf32>
    %1474 = vector.multi_reduction <maximumf>, %1473, %cst_782 [1] : vector<16x16xf32> to vector<16xf32>
    %1475 = vector.shape_cast %1474 : vector<16xf32> to vector<16x1xf32>
    %1476 = vector.broadcast %1475 : vector<16x1xf32> to vector<16x16xf32>
    %1477 = arith.subf %1473, %1476 : vector<16x16xf32>
    %1478 = math.exp %1477 : vector<16x16xf32>
    %cst_783 = arith.constant dense<0.000000e+00> : vector<16xf32>
    %1479 = vector.multi_reduction <add>, %1478, %cst_783 [1] : vector<16x16xf32> to vector<16xf32>
    %1480 = vector.shape_cast %1479 : vector<16xf32> to vector<16x1xf32>
    %1481 = tpu.reciprocal %1480 {approx = true} : vector<16x1xf32> -> vector<16x1xf32>
    %1482 = vector.broadcast %1481 : vector<16x1xf32> to vector<16x16xf32>
    %1483 = arith.mulf %1478, %1482 : vector<16x16xf32>
    %cst_784 = arith.constant dense<0.000000e+00> : vector<16x16xf32>
    %1484 = tpu.matmul %1483, %1466, %cst_784 {dimension_numbers = #tpu.dot_dimension_numbers<[1], [0], [0], [1], [0, 0, 1, 1], [], []>} : vector<16x16xf32>, vector<16x16xf32>, vector<16x16xf32> -> vector<16x16xf32>
    %1485 = vector.extract_strided_slice %1403 {offsets = [1, 0, 0], sizes = [1, 16, 32], strides = [1, 1, 1]} : vector<2x16x32xf32> to vector<1x16x32xf32>
    %1486 = vector.shape_cast %1485 : vector<1x16x32xf32> to vector<16x32xf32>
    %cst_785 = arith.constant dense<0.000000e+00> : vector<16x32xf32>
    %1487 = tpu.matmul %1484, %1486, %cst_785 {dimension_numbers = #tpu.dot_dimension_numbers<[1], [0], [0], [1], [0, 0, 1, 1], [], []>} : vector<16x16xf32>, vector<16x32xf32>, vector<16x32xf32> -> vector<16x32xf32>
    %1488 = arith.addf %1445, %1487 : vector<16x32xf32>
    %1489 = arith.addf %1365, %1488 : vector<16x32xf32>
    %c1_786 = arith.constant 1 : index
    %c0_787 = arith.constant 0 : index
    %c0_788 = arith.constant 0 : index
    %1490 = vector.load %arg33[%c1_786, %c0_787, %c0_788] : memref<2x1x32xf32, #tpu.memory_space<vmem>>, vector<1x1x32xf32>
    %1491 = vector.shape_cast %1490 : vector<1x1x32xf32> to vector<1x32xf32>
    %1492 = vector.broadcast %1491 : vector<1x32xf32> to vector<16x32xf32>
    %1493 = arith.addf %1489, %1492 : vector<16x32xf32>
    %c1_789 = arith.constant 1 : index
    %c0_790 = arith.constant 0 : index
    %c0_791 = arith.constant 0 : index
    %1494 = vector.load %arg34[%c1_789, %c0_790, %c0_791] : memref<2x1x32xf32, #tpu.memory_space<vmem>>, vector<1x1x32xf32>
    %1495 = vector.shape_cast %1494 : vector<1x1x32xf32> to vector<1x32xf32>
    %c1_792 = arith.constant 1 : index
    %c0_793 = arith.constant 0 : index
    %c0_794 = arith.constant 0 : index
    %1496 = vector.load %arg35[%c1_792, %c0_793, %c0_794] : memref<2x1x32xf32, #tpu.memory_space<vmem>>, vector<1x1x32xf32>
    %1497 = vector.shape_cast %1496 : vector<1x1x32xf32> to vector<1x32xf32>
    %cst_795 = arith.constant dense<0.000000e+00> : vector<16xf32>
    %1498 = vector.multi_reduction <add>, %1493, %cst_795 [1] : vector<16x32xf32> to vector<16xf32>
    %1499 = vector.shape_cast %1498 : vector<16xf32> to vector<16x1xf32>
    %cst_796 = arith.constant 3.200000e+01 : f32
    %1500 = vector.broadcast %cst_796 : f32 to vector<16x1xf32>
    %1501 = arith.divf %1499, %1500 : vector<16x1xf32>
    %1502 = vector.broadcast %1501 : vector<16x1xf32> to vector<16x32xf32>
    %1503 = arith.subf %1493, %1502 : vector<16x32xf32>
    %1504 = arith.mulf %1503, %1503 : vector<16x32xf32>
    %cst_797 = arith.constant dense<0.000000e+00> : vector<16xf32>
    %1505 = vector.multi_reduction <add>, %1504, %cst_797 [1] : vector<16x32xf32> to vector<16xf32>
    %1506 = vector.shape_cast %1505 : vector<16xf32> to vector<16x1xf32>
    %cst_798 = arith.constant 3.200000e+01 : f32
    %1507 = vector.broadcast %cst_798 : f32 to vector<16x1xf32>
    %1508 = arith.divf %1506, %1507 : vector<16x1xf32>
    %cst_799 = arith.constant 9.99999974E-6 : f32
    %1509 = vector.broadcast %cst_799 : f32 to vector<16x1xf32>
    %1510 = arith.addf %1508, %1509 : vector<16x1xf32>
    %1511 = math.rsqrt %1510 : vector<16x1xf32>
    %1512 = vector.broadcast %1511 : vector<16x1xf32> to vector<16x32xf32>
    %1513 = arith.mulf %1503, %1512 : vector<16x32xf32>
    %1514 = vector.broadcast %1495 : vector<1x32xf32> to vector<16x32xf32>
    %1515 = arith.mulf %1513, %1514 : vector<16x32xf32>
    %1516 = vector.broadcast %1497 : vector<1x32xf32> to vector<16x32xf32>
    %1517 = arith.addf %1515, %1516 : vector<16x32xf32>
    %c1_800 = arith.constant 1 : index
    %c0_801 = arith.constant 0 : index
    %c0_802 = arith.constant 0 : index
    %1518 = vector.load %arg36[%c1_800, %c0_801, %c0_802] : memref<2x32x128xf32, #tpu.memory_space<vmem>>, vector<1x32x128xf32>
    %1519 = vector.shape_cast %1518 : vector<1x32x128xf32> to vector<32x128xf32>
    %cst_803 = arith.constant dense<0.000000e+00> : vector<16x128xf32>
    %1520 = tpu.matmul %1517, %1519, %cst_803 {dimension_numbers = #tpu.dot_dimension_numbers<[1], [0], [0], [1], [0, 0, 1, 1], [], []>} : vector<16x32xf32>, vector<32x128xf32>, vector<16x128xf32> -> vector<16x128xf32>
    %c1_804 = arith.constant 1 : index
    %c0_805 = arith.constant 0 : index
    %c0_806 = arith.constant 0 : index
    %1521 = vector.load %arg37[%c1_804, %c0_805, %c0_806] : memref<2x1x128xf32, #tpu.memory_space<vmem>>, vector<1x1x128xf32>
    %1522 = vector.shape_cast %1521 : vector<1x1x128xf32> to vector<1x128xf32>
    %1523 = vector.broadcast %1522 : vector<1x128xf32> to vector<16x128xf32>
    %1524 = arith.addf %1520, %1523 : vector<16x128xf32>
    %1525 = arith.mulf %1524, %1524 : vector<16x128xf32>
    %1526 = arith.mulf %1524, %1525 : vector<16x128xf32>
    %cst_807 = arith.constant 4.471500e-02 : f32
    %1527 = vector.broadcast %cst_807 : f32 to vector<16x128xf32>
    %1528 = arith.mulf %1527, %1526 : vector<16x128xf32>
    %1529 = arith.addf %1524, %1528 : vector<16x128xf32>
    %cst_808 = arith.constant 0.797884583 : f32
    %1530 = vector.broadcast %cst_808 : f32 to vector<16x128xf32>
    %1531 = arith.mulf %1530, %1529 : vector<16x128xf32>
    %1532 = math.tanh %1531 : vector<16x128xf32>
    %cst_809 = arith.constant 1.000000e+00 : f32
    %1533 = vector.broadcast %cst_809 : f32 to vector<16x128xf32>
    %1534 = arith.addf %1533, %1532 : vector<16x128xf32>
    %cst_810 = arith.constant 5.000000e-01 : f32
    %1535 = vector.broadcast %cst_810 : f32 to vector<16x128xf32>
    %1536 = arith.mulf %1535, %1534 : vector<16x128xf32>
    %1537 = arith.mulf %1524, %1536 : vector<16x128xf32>
    %c1_811 = arith.constant 1 : index
    %c0_812 = arith.constant 0 : index
    %c0_813 = arith.constant 0 : index
    %1538 = vector.load %arg38[%c1_811, %c0_812, %c0_813] : memref<2x128x32xf32, #tpu.memory_space<vmem>>, vector<1x128x32xf32>
    %1539 = vector.shape_cast %1538 : vector<1x128x32xf32> to vector<128x32xf32>
    %cst_814 = arith.constant dense<0.000000e+00> : vector<16x32xf32>
    %1540 = tpu.matmul %1537, %1539, %cst_814 {dimension_numbers = #tpu.dot_dimension_numbers<[1], [0], [0], [1], [0, 0, 1, 1], [], []>} : vector<16x128xf32>, vector<128x32xf32>, vector<16x32xf32> -> vector<16x32xf32>
    %c1_815 = arith.constant 1 : index
    %c0_816 = arith.constant 0 : index
    %c0_817 = arith.constant 0 : index
    %1541 = vector.load %arg39[%c1_815, %c0_816, %c0_817] : memref<2x1x32xf32, #tpu.memory_space<vmem>>, vector<1x1x32xf32>
    %1542 = vector.shape_cast %1541 : vector<1x1x32xf32> to vector<1x32xf32>
    %1543 = vector.broadcast %1542 : vector<1x32xf32> to vector<16x32xf32>
    %1544 = arith.addf %1540, %1543 : vector<16x32xf32>
    %1545 = arith.addf %1493, %1544 : vector<16x32xf32>
    %c0_818 = arith.constant 0 : index
    %c0_819 = arith.constant 0 : index
    %1546 = vector.load %arg40[%c0_818, %c0_819] : memref<1x32xf32, #tpu.memory_space<vmem>>, vector<1x32xf32>
    %c0_820 = arith.constant 0 : index
    %c0_821 = arith.constant 0 : index
    %1547 = vector.load %arg41[%c0_820, %c0_821] : memref<1x32xf32, #tpu.memory_space<vmem>>, vector<1x32xf32>
    %cst_822 = arith.constant dense<0.000000e+00> : vector<16xf32>
    %1548 = vector.multi_reduction <add>, %1545, %cst_822 [1] : vector<16x32xf32> to vector<16xf32>
    %1549 = vector.shape_cast %1548 : vector<16xf32> to vector<16x1xf32>
    %cst_823 = arith.constant 3.200000e+01 : f32
    %1550 = vector.broadcast %cst_823 : f32 to vector<16x1xf32>
    %1551 = arith.divf %1549, %1550 : vector<16x1xf32>
    %1552 = vector.broadcast %1551 : vector<16x1xf32> to vector<16x32xf32>
    %1553 = arith.subf %1545, %1552 : vector<16x32xf32>
    %1554 = arith.mulf %1553, %1553 : vector<16x32xf32>
    %cst_824 = arith.constant dense<0.000000e+00> : vector<16xf32>
    %1555 = vector.multi_reduction <add>, %1554, %cst_824 [1] : vector<16x32xf32> to vector<16xf32>
    %1556 = vector.shape_cast %1555 : vector<16xf32> to vector<16x1xf32>
    %cst_825 = arith.constant 3.200000e+01 : f32
    %1557 = vector.broadcast %cst_825 : f32 to vector<16x1xf32>
    %1558 = arith.divf %1556, %1557 : vector<16x1xf32>
    %cst_826 = arith.constant 9.99999974E-6 : f32
    %1559 = vector.broadcast %cst_826 : f32 to vector<16x1xf32>
    %1560 = arith.addf %1558, %1559 : vector<16x1xf32>
    %1561 = math.rsqrt %1560 : vector<16x1xf32>
    %1562 = vector.broadcast %1561 : vector<16x1xf32> to vector<16x32xf32>
    %1563 = arith.mulf %1553, %1562 : vector<16x32xf32>
    %1564 = vector.broadcast %1546 : vector<1x32xf32> to vector<16x32xf32>
    %1565 = arith.mulf %1563, %1564 : vector<16x32xf32>
    %1566 = vector.broadcast %1547 : vector<1x32xf32> to vector<16x32xf32>
    %1567 = arith.addf %1565, %1566 : vector<16x32xf32>
    %c0_827 = arith.constant 0 : index
    %c0_828 = arith.constant 0 : index
    %1568 = vector.load %arg44[%c0_827, %c0_828] : memref<16x32xf32, #tpu.memory_space<vmem>>, vector<16x32xf32>
    tpu.vector_store %arg44[%c0_827, %c0_828], %1567 {strides = array<i32>} : memref<16x32xf32, #tpu.memory_space<vmem>>, vector<16x32xf32>,
    %c8_829 = arith.constant 8 : index
    %c0_830 = arith.constant 0 : index
    %1569 = vector.load %arg44[%c8_829, %c0_830] : memref<16x32xf32, #tpu.memory_space<vmem>>, vector<8x32xf32>
    %c4_i32_831 = arith.constant 4 : i32
    %1570 = vector.broadcast %c4_i32_831 : i32 to vector<8x32xi32>
    %1571 = arith.cmpi slt, %393, %1570 : vector<8x32xi32>
    %1572 = arith.select %1571, %390, %1569 : vector<8x32xi1>, vector<8x32xf32>
    %c2 = arith.constant 2 : index
    %c0_832 = arith.constant 0 : index
    %c0_833 = arith.constant 0 : index
    %c0_834 = arith.constant 0 : index
    %1573 = vector.load %arg42[%c2, %c0_832, %c0_833, %c0_834] : memref<3x1x8x32xf32, #tpu.memory_space<vmem>>, vector<1x1x8x32xf32>
    %1574 = vector.shape_cast %1573 : vector<1x1x8x32xf32> to vector<8x32xf32>
    %1575 = vector.shape_cast %1572 : vector<8x32xf32> to vector<1x1x8x32xf32>
    tpu.vector_store %arg42[%c2, %c0_832, %c0_833, %c0_834], %1575 {strides = array<i32>} : memref<3x1x8x32xf32, #tpu.memory_space<vmem>>, vector<1x1x8x32xf32>,
    return
  }
  func.func @transform_0(%arg0: i32) -> (i32, i32, i32) {
    %c0_i32 = arith.constant 0 : i32
    %c0_i32_0 = arith.constant 0 : i32
    %c0_i32_1 = arith.constant 0 : i32
    return %arg0, %c0_i32, %c0_i32_0 : i32, i32, i32
  }
  func.func @transform_1(%arg0: i32) -> (i32, i32, i32) {
    %c0_i32 = arith.constant 0 : i32
    %c0_i32_0 = arith.constant 0 : i32
    %c0_i32_1 = arith.constant 0 : i32
    return %arg0, %c0_i32, %c0_i32_0 : i32, i32, i32
  }
  func.func @transform_2(%arg0: i32) -> (i32, i32, i32) {
    %c0_i32 = arith.constant 0 : i32
    %c0_i32_0 = arith.constant 0 : i32
    %c0_i32_1 = arith.constant 0 : i32
    return %arg0, %c0_i32, %c0_i32_0 : i32, i32, i32
  }
  func.func @transform_3(%arg0: i32) -> (i32, i32) {
    %c0_i32 = arith.constant 0 : i32
    %c0_i32_0 = arith.constant 0 : i32
    %c0_i32_1 = arith.constant 0 : i32
    return %c0_i32, %c0_i32_0 : i32, i32
  }
  func.func @transform_4(%arg0: i32) -> (i32, i32, i32) {
    %c0_i32 = arith.constant 0 : i32
    %c0_i32_0 = arith.constant 0 : i32
    %c0_i32_1 = arith.constant 0 : i32
    return %arg0, %c0_i32, %c0_i32_0 : i32, i32, i32
  }
  func.func @transform_5(%arg0: i32) -> (i32, i32, i32) {
    %c0_i32 = arith.constant 0 : i32
    %c0_i32_0 = arith.constant 0 : i32
    %c0_i32_1 = arith.constant 0 : i32
    %c0_i32_2 = arith.constant 0 : i32
    return %c0_i32, %c0_i32_0, %c0_i32_1 : i32, i32, i32
  }
  func.func @transform_6(%arg0: i32) -> (i32, i32, i32) {
    %c0_i32 = arith.constant 0 : i32
    %c0_i32_0 = arith.constant 0 : i32
    %c0_i32_1 = arith.constant 0 : i32
    %c0_i32_2 = arith.constant 0 : i32
    return %c0_i32, %c0_i32_0, %c0_i32_1 : i32, i32, i32
  }
  func.func @transform_7(%arg0: i32) -> (i32, i32, i32, i32) {
    %c0_i32 = arith.constant 0 : i32
    %c0_i32_0 = arith.constant 0 : i32
    %c0_i32_1 = arith.constant 0 : i32
    %c0_i32_2 = arith.constant 0 : i32
    %c0_i32_3 = arith.constant 0 : i32
    return %c0_i32, %c0_i32_0, %c0_i32_1, %c0_i32_2 : i32, i32, i32, i32
  }
  func.func @transform_8(%arg0: i32) -> (i32, i32, i32, i32) {
    %c0_i32 = arith.constant 0 : i32
    %c0_i32_0 = arith.constant 0 : i32
    %c0_i32_1 = arith.constant 0 : i32
    %c0_i32_2 = arith.constant 0 : i32
    %c0_i32_3 = arith.constant 0 : i32
    return %c0_i32, %c0_i32_0, %c0_i32_1, %c0_i32_2 : i32, i32, i32, i32
  }
  func.func @transform_9(%arg0: i32) -> (i32, i32, i32, i32) {
    %c0_i32 = arith.constant 0 : i32
    %c0_i32_0 = arith.constant 0 : i32
    %c0_i32_1 = arith.constant 0 : i32
    %c0_i32_2 = arith.constant 0 : i32
    %c0_i32_3 = arith.constant 0 : i32
    return %c0_i32, %c0_i32_0, %c0_i32_1, %c0_i32_2 : i32, i32, i32, i32
  }
  func.func @transform_10(%arg0: i32) -> (i32, i32, i32, i32) {
    %c0_i32 = arith.constant 0 : i32
    %c0_i32_0 = arith.constant 0 : i32
    %c0_i32_1 = arith.constant 0 : i32
    %c0_i32_2 = arith.constant 0 : i32
    %c0_i32_3 = arith.constant 0 : i32
    return %c0_i32, %c0_i32_0, %c0_i32_1, %c0_i32_2 : i32, i32, i32, i32
  }
  func.func @transform_11(%arg0: i32) -> (i32, i32, i32, i32) {
    %c0_i32 = arith.constant 0 : i32
    %c0_i32_0 = arith.constant 0 : i32
    %c0_i32_1 = arith.constant 0 : i32
    %c0_i32_2 = arith.constant 0 : i32
    %c0_i32_3 = arith.constant 0 : i32
    return %c0_i32, %c0_i32_0, %c0_i32_1, %c0_i32_2 : i32, i32, i32, i32
  }
  func.func @transform_12(%arg0: i32) -> (i32, i32, i32, i32) {
    %c0_i32 = arith.constant 0 : i32
    %c0_i32_0 = arith.constant 0 : i32
    %c0_i32_1 = arith.constant 0 : i32
    %c0_i32_2 = arith.constant 0 : i32
    %c0_i32_3 = arith.constant 0 : i32
    return %c0_i32, %c0_i32_0, %c0_i32_1, %c0_i32_2 : i32, i32, i32, i32
  }
  func.func @transform_13(%arg0: i32) -> (i32, i32, i32, i32) {
    %c0_i32 = arith.constant 0 : i32
    %c0_i32_0 = arith.constant 0 : i32
    %c0_i32_1 = arith.constant 0 : i32
    %c0_i32_2 = arith.constant 0 : i32
    %c0_i32_3 = arith.constant 0 : i32
    return %c0_i32, %c0_i32_0, %c0_i32_1, %c0_i32_2 : i32, i32, i32, i32
  }
  func.func @transform_14(%arg0: i32) -> (i32, i32, i32) {
    %c0_i32 = arith.constant 0 : i32
    %c0_i32_0 = arith.constant 0 : i32
    %c0_i32_1 = arith.constant 0 : i32
    %c0_i32_2 = arith.constant 0 : i32
    return %c0_i32, %c0_i32_0, %c0_i32_1 : i32, i32, i32
  }
  func.func @transform_15(%arg0: i32) -> (i32, i32, i32) {
    %c0_i32 = arith.constant 0 : i32
    %c0_i32_0 = arith.constant 0 : i32
    %c0_i32_1 = arith.constant 0 : i32
    %c0_i32_2 = arith.constant 0 : i32
    return %c0_i32, %c0_i32_0, %c0_i32_1 : i32, i32, i32
  }
  func.func @transform_16(%arg0: i32) -> (i32, i32, i32) {
    %c0_i32 = arith.constant 0 : i32
    %c0_i32_0 = arith.constant 0 : i32
    %c0_i32_1 = arith.constant 0 : i32
    %c0_i32_2 = arith.constant 0 : i32
    return %c0_i32, %c0_i32_0, %c0_i32_1 : i32, i32, i32
  }
  func.func @transform_17(%arg0: i32) -> (i32, i32, i32) {
    %c0_i32 = arith.constant 0 : i32
    %c0_i32_0 = arith.constant 0 : i32
    %c0_i32_1 = arith.constant 0 : i32
    %c0_i32_2 = arith.constant 0 : i32
    return %c0_i32, %c0_i32_0, %c0_i32_1 : i32, i32, i32
  }
  func.func @transform_18(%arg0: i32) -> (i32, i32, i32) {
    %c0_i32 = arith.constant 0 : i32
    %c0_i32_0 = arith.constant 0 : i32
    %c0_i32_1 = arith.constant 0 : i32
    %c0_i32_2 = arith.constant 0 : i32
    return %c0_i32, %c0_i32_0, %c0_i32_1 : i32, i32, i32
  }
  func.func @transform_19(%arg0: i32) -> (i32, i32, i32) {
    %c0_i32 = arith.constant 0 : i32
    %c0_i32_0 = arith.constant 0 : i32
    %c0_i32_1 = arith.constant 0 : i32
    %c0_i32_2 = arith.constant 0 : i32
    return %c0_i32, %c0_i32_0, %c0_i32_1 : i32, i32, i32
  }
  func.func @transform_20(%arg0: i32) -> (i32, i32, i32) {
    %c0_i32 = arith.constant 0 : i32
    %c0_i32_0 = arith.constant 0 : i32
    %c0_i32_1 = arith.constant 0 : i32
    %c0_i32_2 = arith.constant 0 : i32
    return %c0_i32, %c0_i32_0, %c0_i32_1 : i32, i32, i32
  }
  func.func @transform_21(%arg0: i32) -> (i32, i32) {
    %c0_i32 = arith.constant 0 : i32
    %c0_i32_0 = arith.constant 0 : i32
    %c0_i32_1 = arith.constant 0 : i32
    return %c0_i32, %c0_i32_0 : i32, i32
  }
  func.func @transform_22(%arg0: i32) -> (i32, i32) {
    %c0_i32 = arith.constant 0 : i32
    %c0_i32_0 = arith.constant 0 : i32
    %c0_i32_1 = arith.constant 0 : i32
    return %c0_i32, %c0_i32_0 : i32, i32
  }
  func.func @transform_23(%arg0: i32) -> (i32, i32, i32) {
    %c0_i32 = arith.constant 0 : i32
    %c0_i32_0 = arith.constant 0 : i32
    %c0_i32_1 = arith.constant 0 : i32
    %c0_i32_2 = arith.constant 0 : i32
    return %c0_i32, %c0_i32_0, %c0_i32_1 : i32, i32, i32
  }
  func.func @transform_24(%arg0: i32) -> (i32, i32, i32) {
    %c0_i32 = arith.constant 0 : i32
    %c0_i32_0 = arith.constant 0 : i32
    %c0_i32_1 = arith.constant 0 : i32
    %c0_i32_2 = arith.constant 0 : i32
    return %c0_i32, %c0_i32_0, %c0_i32_1 : i32, i32, i32
  }
  func.func @transform_25(%arg0: i32) -> (i32, i32, i32, i32) {
    %c0_i32 = arith.constant 0 : i32
    %c0_i32_0 = arith.constant 0 : i32
    %c0_i32_1 = arith.constant 0 : i32
    %c0_i32_2 = arith.constant 0 : i32
    %c0_i32_3 = arith.constant 0 : i32
    return %c0_i32, %c0_i32_0, %c0_i32_1, %c0_i32_2 : i32, i32, i32, i32
  }
  func.func @transform_26(%arg0: i32) -> (i32, i32, i32, i32) {
    %c0_i32 = arith.constant 0 : i32
    %c0_i32_0 = arith.constant 0 : i32
    %c0_i32_1 = arith.constant 0 : i32
    %c0_i32_2 = arith.constant 0 : i32
    %c0_i32_3 = arith.constant 0 : i32
    return %c0_i32, %c0_i32_0, %c0_i32_1, %c0_i32_2 : i32, i32, i32, i32
  }
  func.func @transform_27(%arg0: i32) -> (i32, i32, i32, i32) {
    %c0_i32 = arith.constant 0 : i32
    %c0_i32_0 = arith.constant 0 : i32
    %c0_i32_1 = arith.constant 0 : i32
    %c0_i32_2 = arith.constant 0 : i32
    %c0_i32_3 = arith.constant 0 : i32
    return %c0_i32, %c0_i32_0, %c0_i32_1, %c0_i32_2 : i32, i32, i32, i32
  }
  func.func @transform_28(%arg0: i32) -> (i32, i32, i32, i32) {
    %c0_i32 = arith.constant 0 : i32
    %c0_i32_0 = arith.constant 0 : i32
    %c0_i32_1 = arith.constant 0 : i32
    %c0_i32_2 = arith.constant 0 : i32
    %c0_i32_3 = arith.constant 0 : i32
    return %c0_i32, %c0_i32_0, %c0_i32_1, %c0_i32_2 : i32, i32, i32, i32
  }
  func.func @transform_29(%arg0: i32) -> (i32, i32, i32, i32) {
    %c0_i32 = arith.constant 0 : i32
    %c0_i32_0 = arith.constant 0 : i32
    %c0_i32_1 = arith.constant 0 : i32
    %c0_i32_2 = arith.constant 0 : i32
    %c0_i32_3 = arith.constant 0 : i32
    return %c0_i32, %c0_i32_0, %c0_i32_1, %c0_i32_2 : i32, i32, i32, i32
  }
  func.func @transform_30(%arg0: i32) -> (i32, i32, i32, i32) {
    %c0_i32 = arith.constant 0 : i32
    %c0_i32_0 = arith.constant 0 : i32
    %c0_i32_1 = arith.constant 0 : i32
    %c0_i32_2 = arith.constant 0 : i32
    %c0_i32_3 = arith.constant 0 : i32
    return %c0_i32, %c0_i32_0, %c0_i32_1, %c0_i32_2 : i32, i32, i32, i32
  }
  func.func @transform_31(%arg0: i32) -> (i32, i32, i32, i32) {
    %c0_i32 = arith.constant 0 : i32
    %c0_i32_0 = arith.constant 0 : i32
    %c0_i32_1 = arith.constant 0 : i32
    %c0_i32_2 = arith.constant 0 : i32
    %c0_i32_3 = arith.constant 0 : i32
    return %c0_i32, %c0_i32_0, %c0_i32_1, %c0_i32_2 : i32, i32, i32, i32
  }
  func.func @transform_32(%arg0: i32) -> (i32, i32, i32) {
    %c0_i32 = arith.constant 0 : i32
    %c0_i32_0 = arith.constant 0 : i32
    %c0_i32_1 = arith.constant 0 : i32
    %c0_i32_2 = arith.constant 0 : i32
    return %c0_i32, %c0_i32_0, %c0_i32_1 : i32, i32, i32
  }
  func.func @transform_33(%arg0: i32) -> (i32, i32, i32) {
    %c0_i32 = arith.constant 0 : i32
    %c0_i32_0 = arith.constant 0 : i32
    %c0_i32_1 = arith.constant 0 : i32
    %c0_i32_2 = arith.constant 0 : i32
    return %c0_i32, %c0_i32_0, %c0_i32_1 : i32, i32, i32
  }
  func.func @transform_34(%arg0: i32) -> (i32, i32, i32) {
    %c0_i32 = arith.constant 0 : i32
    %c0_i32_0 = arith.constant 0 : i32
    %c0_i32_1 = arith.constant 0 : i32
    %c0_i32_2 = arith.constant 0 : i32
    return %c0_i32, %c0_i32_0, %c0_i32_1 : i32, i32, i32
  }
  func.func @transform_35(%arg0: i32) -> (i32, i32, i32) {
    %c0_i32 = arith.constant 0 : i32
    %c0_i32_0 = arith.constant 0 : i32
    %c0_i32_1 = arith.constant 0 : i32
    %c0_i32_2 = arith.constant 0 : i32
    return %c0_i32, %c0_i32_0, %c0_i32_1 : i32, i32, i32
  }
  func.func @transform_36(%arg0: i32) -> (i32, i32, i32) {
    %c0_i32 = arith.constant 0 : i32
    %c0_i32_0 = arith.constant 0 : i32
    %c0_i32_1 = arith.constant 0 : i32
    %c0_i32_2 = arith.constant 0 : i32
    return %c0_i32, %c0_i32_0, %c0_i32_1 : i32, i32, i32
  }
  func.func @transform_37(%arg0: i32) -> (i32, i32, i32) {
    %c0_i32 = arith.constant 0 : i32
    %c0_i32_0 = arith.constant 0 : i32
    %c0_i32_1 = arith.constant 0 : i32
    %c0_i32_2 = arith.constant 0 : i32
    return %c0_i32, %c0_i32_0, %c0_i32_1 : i32, i32, i32
  }
  func.func @transform_38(%arg0: i32) -> (i32, i32, i32) {
    %c0_i32 = arith.constant 0 : i32
    %c0_i32_0 = arith.constant 0 : i32
    %c0_i32_1 = arith.constant 0 : i32
    %c0_i32_2 = arith.constant 0 : i32
    return %c0_i32, %c0_i32_0, %c0_i32_1 : i32, i32, i32
  }
  func.func @transform_39(%arg0: i32) -> (i32, i32) {
    %c0_i32 = arith.constant 0 : i32
    %c0_i32_0 = arith.constant 0 : i32
    %c0_i32_1 = arith.constant 0 : i32
    return %c0_i32, %c0_i32_0 : i32, i32
  }
  func.func @transform_40(%arg0: i32) -> (i32, i32) {
    %c0_i32 = arith.constant 0 : i32
    %c0_i32_0 = arith.constant 0 : i32
    %c0_i32_1 = arith.constant 0 : i32
    return %c0_i32, %c0_i32_0 : i32, i32
  }
  func.func @transform_41(%arg0: i32) -> (i32, i32, i32, i32) {
    %c0_i32 = arith.constant 0 : i32
    %c0_i32_0 = arith.constant 0 : i32
    %c0_i32_1 = arith.constant 0 : i32
    %c0_i32_2 = arith.constant 0 : i32
    return %c0_i32, %arg0, %c0_i32_0, %c0_i32_1 : i32, i32, i32, i32
  }
}

</mosaic_0001>

<bundles_post_ra>
// kernel: model_forward.1
= control target key start
LH: loop header
LB: loop body
LE: loop exit
PB: predicated region body
PF: predicated region fallthrough
CT: control target
= control target key end

     0   :  { %s15193_s6 = smov 1   ;;  %s15194_s10 = smov 2   ;;  %s16892_s0 = inlined_call_operand.smem [shape: u32[42], index: -1, kind: input, shape index: {}] }
   0x1   :  { %s15244_s5 = sld [smem:[%s16892_s0]]   ;;  %s15195_s14 = smov 3  }
   0x2   :  { %s15249_s9 = sld [smem:[%s16892_s0 + %s15193_s6]]   ;;  %s15196_s18 = smov 4  }
   0x3   :  { %s15254_s13 = sld [smem:[%s16892_s0 + %s15194_s10]]   ;;  %s15197_s22 = smov 5  }
   0x4   :  { %s15259_s17 = sld [smem:[%s16892_s0 + %s15195_s14]]   ;;  %s15198_s26 = smov 6  }
   0x5   :  { %s15264_s21 = sld [smem:[%s16892_s0 + %s15196_s18]]   ;;  %s15199_s30 = smov 7  }
   0x6   :  { %s15269_s25 = sld [smem:[%s16892_s0 + %s15197_s22]]   ;;  %s15200_s4 = smov 8  }
   0x7   :  { %16928 = sst [smem:[#allocation5_spill]] %s15244_s5  ;;  %s15201_s10 = smov 9  }
   0x8   :  { %16929 = sst [smem:[#allocation6_spill]] %s15249_s9  ;;  %s15202_s15 = smov 10  }
   0x9   :  { %16930 = sst [smem:[#allocation7_spill]] %s15254_s13  ;;  %s15203_s20 = smov 11  }
   0xa   :  { %s15274_s29 = sld [smem:[%s16892_s0 + %s15198_s26]]   ;;  %s15204_s26 = smov 12  }
   0xb   :  { %16931 = sst [smem:[#allocation8_spill]] %s15264_s21  ;;  %s15205_s1 = smov 13  }
   0xc   :  { %16932 = sst [smem:[#allocation9_spill]] %s15269_s25  ;;  %s15206_s7 = smov 14  }
   0xd   :  { %s15279_s3 = sld [smem:[%s16892_s0 + %s15199_s30]]   ;;  %s15208_s22 = smov 16  }
   0xe   :  { %s15284_s8 = sld [smem:[%s16892_s0 + %s15200_s4]]   ;;  %s15209_s28 = smov 17  }
   0xf   :  { %s15289_s14 = sld [smem:[%s16892_s0 + %s15201_s10]]  }
  0x10   :  { %s15294_s19 = sld [smem:[%s16892_s0 + %s15202_s15]]   ;;  %s15207_s15 = smov 15  }
  0x11   :  { %s15299_s24 = sld [smem:[%s16892_s0 + %s15203_s20]]  }
  0x12   :  { %s15304_s30 = sld [smem:[%s16892_s0 + %s15204_s26]]  }
  0x13   :  { %16933 = sst [smem:[#allocation10_spill]] %s15279_s3 }
  0x14   :  { %16934 = sst [smem:[#allocation11_spill]] %s15284_s8 }
  0x15   :  { %16935 = sst [smem:[#allocation12_spill]] %s15289_s14 }
  0x16   :  { %16936 = sst [smem:[#allocation13_spill]] %s15294_s19 }
  0x17   :  { %16937 = sst [smem:[#allocation14_spill]] %s15299_s24 }
  0x18   :  { %s15309_s6 = sld [smem:[%s16892_s0 + %s15205_s1]]  }
  0x19   :  { %s15314_s12 = sld [smem:[%s16892_s0 + %s15206_s7]]   ;;  %s15210_s7 = smov 18  }
  0x1a   :  { %s15319_s20 = sld [smem:[%s16892_s0 + %s15207_s15]]   ;;  %s15211_s15 = smov 19  }
  0x1b   :  { %s15324_s27 = sld [smem:[%s16892_s0 + %s15208_s22]]   ;;  %s15212_s22 = smov 20  }
  0x1c   :  { %s15329_s4 = sld [smem:[%s16892_s0 + %s15209_s28]]   ;;  %s15213_s28 = smov 21  }
  0x1d   :  { %s15334_s13 = sld [smem:[%s16892_s0 + %s15210_s7]]   ;;  %s15214_s7 = smov 22  }
  0x1e   :  { %16938 = sst [smem:[#allocation15_spill]] %s15309_s6 }
  0x1f   :  { %16939 = sst [smem:[#allocation16_spill]] %s15314_s12 }
  0x20   :  { %16940 = sst [smem:[#allocation17_spill]] %s15319_s20 }
  0x21   :  { %16941 = sst [smem:[#allocation18_spill]] %s15324_s27 }
  0x22   :  { %16942 = sst [smem:[#allocation19_spill]] %s15329_s4 }
  0x23   :  { %16943 = sst [smem:[#allocation20_spill]] %s15334_s13 }
  0x24   :  { %s15339_s20 = sld [smem:[%s16892_s0 + %s15211_s15]]   ;;  %s15215_s15 = smov 23  }
  0x25   :  { %s15344_s27 = sld [smem:[%s16892_s0 + %s15212_s22]]   ;;  %s15216_s22 = smov 24  }
  0x26   :  { %s15349_s4 = sld [smem:[%s16892_s0 + %s15213_s28]]   ;;  %s15217_s28 = smov 25  }
  0x27   :  { %s15354_s13 = sld [smem:[%s16892_s0 + %s15214_s7]]   ;;  %s15218_s7 = smov 26  }
  0x2a   :  { %16944 = sst [smem:[#allocation21_spill]] %s15339_s20 }
  0x2b   :  { %16945 = sst [smem:[#allocation22_spill]] %s15344_s27 }
  0x2c   :  { %16946 = sst [smem:[#allocation23_spill]] %s15349_s4 }
  0x2d   :  { %16947 = sst [smem:[#allocation24_spill]] %s15354_s13 }
  0x2e   :  { %s15359_s20 = sld [smem:[%s16892_s0 + %s15215_s15]]   ;;  %s15219_s15 = smov 27  }
  0x2f   :  { %s15364_s27 = sld [smem:[%s16892_s0 + %s15216_s22]]   ;;  %s15220_s22 = smov 28  }
  0x30   :  { %s15369_s4 = sld [smem:[%s16892_s0 + %s15217_s28]]   ;;  %s15221_s28 = smov 29  }
  0x31   :  { %s15374_s13 = sld [smem:[%s16892_s0 + %s15218_s7]]   ;;  %s15222_s7 = smov 30  }
  0x34   :  { %16948 = sst [smem:[#allocation25_spill]] %s15359_s20 }
  0x35   :  { %16949 = sst [smem:[#allocation26_spill]] %s15364_s27 }
  0x36   :  { %16950 = sst [smem:[#allocation27_spill]] %s15369_s4 }
  0x37   :  { %16951 = sst [smem:[#allocation28_spill]] %s15374_s13 }
  0x38   :  { %s15379_s20 = sld [smem:[%s16892_s0 + %s15219_s15]]   ;;  %s15223_s15 = smov 31  }
  0x39   :  { %s15384_s27 = sld [smem:[%s16892_s0 + %s15220_s22]]   ;;  %s15224_s22 = smov 32  }
  0x3a   :  { %s15389_s4 = sld [smem:[%s16892_s0 + %s15221_s28]]   ;;  %s15225_s28 = smov 33  }
  0x3b   :  { %s15394_s13 = sld [smem:[%s16892_s0 + %s15222_s7]]   ;;  %s15226_s7 = smov 34  }
  0x3e   :  { %16952 = sst [smem:[#allocation29_spill]] %s15379_s20 }
  0x3f   :  { %16953 = sst [smem:[#allocation30_spill]] %s15384_s27 }
  0x40   :  { %16954 = sst [smem:[#allocation31_spill]] %s15389_s4 }
  0x41   :  { %16955 = sst [smem:[#allocation32_spill]] %s15394_s13 }
  0x42   :  { %s15399_s20 = sld [smem:[%s16892_s0 + %s15223_s15]]   ;;  %s15227_s15 = smov 35  }
  0x43   :  { %s15404_s27 = sld [smem:[%s16892_s0 + %s15224_s22]]   ;;  %s15228_s22 = smov 36  }
  0x44   :  { %s15409_s4 = sld [smem:[%s16892_s0 + %s15225_s28]]   ;;  %s15229_s28 = smov 37  }
  0x45   :  { %s15414_s13 = sld [smem:[%s16892_s0 + %s15226_s7]]   ;;  %s15230_s7 = smov 38  }
  0x48   :  { %16956 = sst [smem:[#allocation33_spill]] %s15399_s20 }
  0x49   :  { %16957 = sst [smem:[#allocation34_spill]] %s15404_s27 }
  0x4a   :  { %16958 = sst [smem:[#allocation35_spill]] %s15409_s4 }
  0x4b   :  { %16959 = sst [smem:[#allocation36_spill]] %s15414_s13 }
  0x4c   :  { %s15419_s20 = sld [smem:[%s16892_s0 + %s15227_s15]]   ;;  %s15231_s15 = smov 39  }
  0x4d   :  { %s15424_s27 = sld [smem:[%s16892_s0 + %s15228_s22]]   ;;  %s15232_s22 = smov 40  }
  0x4e   :  { %s15429_s4 = sld [smem:[%s16892_s0 + %s15229_s28]]   ;;  %s15233_s28 = smov 41  }
  0x4f   :  { %s15434_s13 = sld [smem:[%s16892_s0 + %s15230_s7]]  }
  0x52   :  { %16960 = sst [smem:[#allocation37_spill]] %s15419_s20 }
  0x53   :  { %16961 = sst [smem:[#allocation38_spill]] %s15424_s27 }
  0x54   :  { %16962 = sst [smem:[#allocation39_spill]] %s15429_s4 }
  0x55   :  { %s15439_s20 = sld [smem:[%s16892_s0 + %s15231_s15]]  }
  0x56   :  { %s15444_s27 = sld [smem:[%s16892_s0 + %s15232_s22]]  }
  0x57   :  { %s15449_s4 = sld [smem:[%s16892_s0 + %s15233_s28]]  }
  0x58   :  { %s15451_s7 = smov 0   ;;  %s15453_s10 = smov 0  }
  0x59   :  { %s15455_s11 = smov 0  }
  0x5a LB: > { %s16963_s25 = sld [smem:[#allocation9_spill]]  ;;  %s15464_s0 = sadd.s32 4294967295, %s15191_s11   ;;  %s15187_s10 = sphi %s15453_s10, %s17005_s10   ;;  %s15183_s7 = sphi %s15451_s7, %s17004_s7   ;;  %s15191_s11 = sphi %s15455_s11, %s17006_s11  }
  0x5b   : > { %s16964_s24 = sld [smem:[#allocation14_spill]]  ;;  %s15466_s15 = sadd.s32 1, %s15191_s11  }
  0x5c   : > { %s16965_s19 = sld [smem:[#allocation13_spill]]  ;;  %s978_s16 = ssub.s32 %s15191_s11, %s15466_s15 }
  0x5d   : > { %s16966_s14 = sld [smem:[#allocation12_spill]]  ;;  %s981_s18 = sadd.s32 1, %s15187_s10 }
  0x5e   : > { %s16967_s12 = sld [smem:[#allocation16_spill]]  ;;  %p979_p0 = scmp.eq.s32.totalorder %s978_s16, 0 }
  0x5f   : > { %s16968_s8 = sld [smem:[#allocation11_spill]]  ;;  %p991_p1 = scmp.ne.s32.totalorder %s15187_s10, %s15183_s7 }
  0x60   : > { %s16969_s6 = sld [smem:[#allocation15_spill]]  ;;  %p992_p2 = scmp.eq.s32.totalorder %s15464_s0, 1 }
  0x61   : > { %s16970_s3 = sld [smem:[#allocation10_spill]]  ;;  %p12452_p3 = scmp.ge.s32.totalorder %s15191_s11, 1 }
  0x62   : > { %s15474_s22 = scalar_select %p979_p0, %s15187_s10, %s981_s18  }
  0x63   : > { %p15476_p4 = por %p992_p2, %p991_p1  ;;  %p1156_p5 = scmp.lt.s32.totalorder %s15191_s11, 3 }
  0x65   : > { %p1157_p6 = pnand %p12452_p3, %p1156_p5 }
  0x66   : > { %s16972_s5 = sld [smem:[#allocation5_spill]] (!%p1157_p6)  ;;  %p1267_p7 = scmp.lt.s32.totalorder (!%p1157_p6), %s15464_s0, 1 }
  0x67   : > { %1160 = sbr.rel (%p1157_p6) target bundleno = 24385 (0x5f41), region = 184  ;;  %s16973_s21 = sld [smem:[#allocation8_spill]] (!%p1157_p6) }
  0x68   : > { %s16974_s9 = sld [smem:[#allocation6_spill]] (!%p1157_p6) }
  0x69   : > { %s16975_s16 = sld [smem:[#allocation19_spill]] (!%p1157_p6) }
  0x6a   : > { %s16976_s18 = sld [smem:[#allocation17_spill]] (!%p1157_p6) }
  0x6c   : > { %s15482_s26 = scalar_select %p1267_p7, %s15464_s0, 1  ;;  %vm1288_vm0 = vcmask 261120   ;;  %v3778_v0 = vld [vmem:[%s15259_s17 + $0x8] sm:$0xff]  ;;  %v15234_v10 = vmov 0.0   ;;  %v1320_v11 = vld [vmem:[%s16970_s3 + $0x18] sm:$0xff]  ;;  %v1319_v12 = vld [vmem:[%s16970_s3 + $0x10] sm:$0xff] }
  0x6d   : > { %13666 = vmatprep.subr.mxu0 %v15234_v10  ;;  %13704 = vmatprep.subr.mxu1 %v15234_v10  ;;  %v1318_v13 = vld [vmem:[%s16970_s3 + $0x8] sm:$0xff]  ;;  %v1317_v14 = vld [vmem:[%s16970_s3] sm:$0xff]  ;;  %vm15235_vm1 = vmmov 0   ;;  %v1328_v24 = vld [vmem:[%s16966_s14 + $0x18] sm:$0xff]  ;;  %vm1583_vm2 = vcmask 130048   ;;  %vm1662_vm4 = vcmask 64512  }
  0x6e   : > { %s15485_s28 = sshll.u32 %s15482_s26, 3  ;;  %13667 = vmatpush3.msra.mxu0 %v1320_v11  ;;  %13674 = vmatprep.mubr.msk.f32.mxu0 %vm15235_vm1, %v15234_v10  ;;  %v12458_v19 = vld [vmem:[%s16963_s25] ss:$0 sm:$0xff]  ;;  %v1327_v25 = vld [vmem:[%s16966_s14 + $0x10] sm:$0xff]  ;;  %v1326_v26 = vld [vmem:[%s16966_s14 + $0x8] sm:$0xff] }
  0x6f   : > { %s1270_s1 = scalar_lea.vmem %s16972_s5, %s15485_s28  ;;  %s15492_s2 = scalar_lea.vmem %s16973_s21, %s15485_s28  ;;  %13668 = vmatprep.subr.mxu0 %v15234_v10  ;;  %13706 = vmatprep.mubr.msk.f32.mxu1 %vm15235_vm1, %v15234_v10  ;;  %v12459_v21 = vld [vmem:[%s15274_s29] ss:$0 sm:$0xff]  ;;  %v1336_v28 = vld [vmem:[%s16964_s24 + $0x18] sm:$0xff]  ;;  %v1335_v29 = vld [vmem:[%s16964_s24 + $0x10] sm:$0xff] }
  0x70   : > { %v15494_v1 = vld [vmem:[%s1270_s1] sm:$0xff]  ;;  %13669 = vmatpush3.msra.mxu0 %v1319_v12  ;;  %v1334_v30 = vld [vmem:[%s16964_s24 + $0x8] sm:$0xff]  ;;  %v1324_v41 = vld [vmem:[%s16970_s3 + $0x38] sm:$0xff]  ;;  %s1274_s11 = scalar_lea.vmem %s16974_s9, %s15485_s28  ;;  %s16977_s28 = sld [smem:[#allocation18_spill]] }
  0x71   : > { %v1289_v2 = vsel %vm1288_vm0, %v15494_v1, 0.0  ;;  %v3773_v3 = vld [vmem:[%s15492_s2] sm:$0xff]  ;;  %13670 = vmatprep.subr.mxu0 %v15234_v10  ;;  %v1323_v43 = vld [vmem:[%s16970_s3 + $0x30] sm:$0xff]  ;;  %v1322_v45 = vld [vmem:[%s16970_s3 + $0x28] sm:$0xff]  ;;  %s16978_s1 = sld [smem:[#allocation21_spill]] }
  0x72   : > { %v3779_v4 = vadd.f32 %v3778_v0, %v3773_v3  ;;  %1290 = vadd.xlane.f32.xlu0 %v1289_v2  ;;  %13671 = vmatpush3.msra.mxu0 %v1318_v13  ;;  %v1325_v27 = vld [vmem:[%s16966_s14] sm:$0xff]  ;;  %v1340_v49 = vld [vmem:[%s16964_s24 + $0x38] sm:$0xff]  ;;  %v1339_v50 = vld [vmem:[%s16964_s24 + $0x30] sm:$0xff]  ;;  %s16981_s9 = sld [smem:[#allocation22_spill]] }
  0x73   : > { %13672 = vmatprep.subr.mxu0 %v15234_v10  ;;  %v1333_v31 = vld [vmem:[%s16964_s24] sm:$0xff]  ;;  %v1338_v51 = vld [vmem:[%s16964_s24 + $0x28] sm:$0xff]  ;;  %s17000_s21 = sld [smem:[#allocation36_spill]] }
  0x74   : > { %3780 = vst.msk [vmem:[#allocation2 + $0x8] sm:$0xff] %vm1288_vm0, %v3779_v4  ;;  %13673 = vmatpush3.msra.mxu0 %v1317_v14  ;;  %v12460_v34 = vld [vmem:[%s16968_s8] ss:$0 sm:$0xff]  ;;  %v12469_v14 = vld [vmem:[%s16968_s8 + $0x1] ss:$0 sm:$0xff] }
  0x75   : > { %13677 = vmatprep.subr.mxu0 %v15234_v10  ;;  %v12462_v35 = vld [vmem:[%s16965_s19] ss:$0 sm:$0xff] }
  0x76   : > { %v12464_v42 = vld [vmem:[%s15304_s30] ss:$0 sm:$0xff] }
  0x77   : > { %v1321_v48 = vld [vmem:[%s16970_s3 + $0x20] sm:$0xff] }
  0x78   : > { %v1337_v52 = vld [vmem:[%s16964_s24 + $0x20] sm:$0xff] }
  0x79   : > { %v15583_v53 = vld [vmem:[%s1274_s11] sm:$0xff]  ;;  %s16979_s11 = sld [smem:[#allocation20_spill]] }
  0x7a   : > { %vm1660_vm3 = vcmp.gt.f32.partialorder %v15583_v53, 0.5  ;;  %v1329_v11 = vld [vmem:[%s16966_s14 + $0x20] sm:$0xff] }
  0x7f   : > { %s16980_s5 = smov %s16979_s11 }
  0xfb   : > { %v1291_v5 = vpop.xlane.xlu0 %1290 }
  0xfc   : > { %v1293_v6 = vmul.f32 0.03125, %v1291_v5 }
  0xfe   : > { %v1294_v7 = vsub.f32 %v15494_v1, %v1293_v6 }
 0x100   : > { %v1295_v8 = vmul.f32 %v1294_v7, %v1294_v7 }
 0x102   : > { %v1296_v9 = vsel %vm1288_vm0, %v1295_v8, 0.0  ;;  %v1331_v8 = vld [vmem:[%s16966_s14 + $0x30] sm:$0xff] }
 0x103   : > { %1297 = vadd.xlane.f32.xlu0 %v1296_v9  ;;  %v1330_v9 = vld [vmem:[%s16966_s14 + $0x28] sm:$0xff] }
 0x18c   : > { %v1298_v15 = vpop.xlane.xlu0 %1297 }
 0x18d   : > { %v1299_v16 = vmul.f32 0.03125, %v1298_v15  ;;  %v12471_v15 = vld [vmem:[%s16965_s19 + $0x1] ss:$0 sm:$0xff] }
 0x18f   : > { %v1300_v17 = vadd.f32 1e-05, %v1299_v16 }
 0x191   : > { %14950 = vrsqrt.f32 %v1300_v17 }
 0x19e   : > { %v14951_v18 = vpop.eup %14950 }
 0x19f   : > { %v1302_v20 = vmul.f32 %v14951_v18, %v1294_v7  ;;  %v1332_v7 = vld [vmem:[%s16966_s14 + $0x38] sm:$0xff] }
 0x1a1   : > { %v1309_v22 = vmul.f32 %v12458_v19, %v1302_v20  ;;  %v12473_v19 = vld [vmem:[%s15304_s30 + $0x1] ss:$0 sm:$0xff] }
 0x1a3   : > { %v15518_v23 = vadd.f32 %v12459_v21, %v1309_v22 }
 0x1a5   : > { %13675 = vmatmul.mubr.msk.f32.vlgmr.msra.gmra.mxu0 %vm1288_vm0, %v15518_v23 }
 0x1a6   : > { %13678 = vmatpush3.msra.mxu0 %v1328_v24  ;;  %13685 = vmatprep.mubr.msk.f32.mxu0 %vm15235_vm1, %v15234_v10 }
 0x1a7   : > { %13679 = vmatprep.subr.mxu0 %v15234_v10 }
 0x1a8   : > { %13680 = vmatpush3.msra.mxu0 %v1327_v25 }
 0x1a9   : > { %13681 = vmatprep.subr.mxu0 %v15234_v10 }
 0x1aa   : > { %13682 = vmatpush3.msra.mxu0 %v1326_v26 }
 0x1ab   : > { %13683 = vmatprep.subr.mxu0 %v15234_v10 }
 0x1ac   : > { %13684 = vmatpush3.msra.mxu0 %v1325_v27 }
 0x1ad   : > { %13686 = vmatmul.mubr.msk.f32.vlgmr.msra.gmra.mxu0 %vm1288_vm0, %v15518_v23  ;;  %13688 = vmatprep.subr.mxu0 %v15234_v10 }
 0x1ae   : > { %13689 = vmatpush3.msra.mxu0 %v1336_v28  ;;  %13696 = vmatprep.mubr.msk.f32.mxu0 %vm15235_vm1, %v15234_v10 }
 0x1af   : > { %13690 = vmatprep.subr.mxu0 %v15234_v10 }
 0x1b0   : > { %13691 = vmatpush3.msra.mxu0 %v1335_v29 }
 0x1b1   : > { %13692 = vmatprep.subr.mxu0 %v15234_v10 }
 0x1b2   : > { %13693 = vmatpush3.msra.mxu0 %v1334_v30 }
 0x1b3   : > { %13694 = vmatprep.subr.mxu0 %v15234_v10 }
 0x1b4   : > { %13695 = vmatpush3.msra.mxu0 %v1333_v31 }
 0x1b5   : > { %13697 = vmatmul.mubr.msk.f32.vlgmr.msra.gmra.mxu0 %vm1288_vm0, %v15518_v23  ;;  %13699 = vmatprep.subr.mxu0 %v15234_v10 }
 0x1b6   : > { %13701 = vmatprep.mubr.msk.f32.mxu0 %vm15235_vm1, %v15234_v10 }
 0x265   : > { %v1426_v32 = vpop.f32.mrf.mxu0 }
 0x266   : > { %v1427_v36 = vadd.f32 %v12460_v34, %v1426_v32  ;;  %v1350_v32 = vld [vmem:[%s16969_s6 + $0x18] sm:$0xff] }
 0x267   : > { %v13676_v33 = vpop.f32.mrf.mxu0 }
 0x268   : > { %v1582_v40 = vmul.f32 0.25, %v1427_v36  ;;  %v1348_v36 = vld [vmem:[%s16969_s6 + $0x8] sm:$0xff] }
 0x26d   : > { %v1502_v37 = vpop.f32.mrf.mxu0 }
 0x26e   : > { %v1503_v38 = vadd.f32 %v12462_v35, %v1502_v37  ;;  %v1347_v37 = vld [vmem:[%s16969_s6] sm:$0xff] }
 0x26f   : > { %v13687_v39 = vpop.f32.mrf.mxu0 }
 0x270   : > { %13700 = vmatpush3.xpose.msk.msra.mxu0 %vm1583_vm2, %v1503_v38  ;;  %v1349_v38 = vld [vmem:[%s16969_s6 + $0x10] sm:$0xff] }
 0x271   : > { %13709 = vmatprep.subr.mxu0 %v15234_v10 }
 0x273   : > { %13702 = vmatmul.mubr.msk.f32.vlgmr.msra.gmra.mxu0 %vm1583_vm2, %v1582_v40 }
 0x274   : > { %13710 = vmatpush3.msra.mxu0 %v1324_v41  ;;  %13717 = vmatprep.mubr.msk.f32.mxu0 %vm15235_vm1, %v15234_v10 }
 0x275   : > { %v1578_v44 = vpop.f32.mrf.mxu0  ;;  %13711 = vmatprep.subr.mxu0 %v15234_v10 }
 0x276   : > { %v1579_v46 = vadd.f32 %v12464_v42, %v1578_v44  ;;  %13712 = vmatpush3.msra.mxu0 %v1323_v43 }
 0x277   : > { %v13698_v47 = vpop.f32.mrf.mxu0  ;;  %13713 = vmatprep.subr.mxu0 %v15234_v10 }
 0x278   : > { %13705 = vmatpush3.msra.mxu1 %v1579_v46  ;;  %13714 = vmatpush3.msra.mxu0 %v1322_v45  ;;  %v12480_v45 = vld [vmem:[%s16967_s12] ss:$0 sm:$0xff] }
 0x279   : > { %13715 = vmatprep.subr.mxu0 %v15234_v10  ;;  %13720 = vmatprep.subr.mxu1 %v15234_v10 }
 0x27a   : > { %13716 = vmatpush3.msra.mxu0 %v1321_v48 }
 0x27b   : > { %13718 = vmatmul.mubr.msk.f32.vlgmr.msra.gmra.mxu0 %vm1288_vm0, %v15518_v23  ;;  %13731 = vmatprep.subr.mxu0 %v15234_v10 }
 0x27c   : > { %13732 = vmatpush3.msra.mxu0 %v1340_v49  ;;  %13739 = vmatprep.mubr.msk.f32.mxu0 %vm15235_vm1, %v15234_v10 }
 0x27d   : > { %13733 = vmatprep.subr.mxu0 %v15234_v10 }
 0x27e   : > { %13734 = vmatpush3.msra.mxu0 %v1339_v50 }
 0x27f   : > { %13735 = vmatprep.subr.mxu0 %v15234_v10 }
 0x280   : > { %13736 = vmatpush3.msra.mxu0 %v1338_v51 }
 0x281   : > { %13737 = vmatprep.subr.mxu0 %v15234_v10 }
 0x282   : > { %13738 = vmatpush3.msra.mxu0 %v1337_v52 }
 0x283   : > { %13740 = vmatmul.mubr.msk.f32.vlgmr.msra.gmra.mxu0 %vm1288_vm0, %v15518_v23  ;;  %13752 = vmatprep.subr.mxu0 %v15234_v10 }
 0x284   : > { %13756 = vmatprep.mubr.msk.f32.mxu0 %vm15235_vm1, %v15234_v10  ;;  %13753 = vmatpush3.msra.mxu0 %v1350_v32 }
 0x285   : > { %13754 = vmatprep.subr.mxu0 %v15234_v10 }
 0x286   : > { %13755 = vmatpush3.msra.mxu0 %v1349_v38 }
 0x287   : > { %13766 = vmatprep.subr.mxu0 %v15234_v10 }
 0x333   : > { %v1656_v54 = vpop.f32.mrf.mxu0 }
 0x334   : > { %v1661_v55 = vsel %vm1660_vm3, %v1656_v54, -1.7014117e+38 }
 0x335   : > { %v13703_v56 = vpop.f32.mrf.mxu0  ;;  %v1663_v57 = vsel %vm1662_vm4, %v1661_v55, -inf }
 0x336   : > { %1664 = vmax.xlane.f32.xlu1 %v1663_v57  ;;  %v2324_v56 = vld [vmem:[%s16975_s16 + $0x18] sm:$0xff]  ;;  %v2323_v57 = vld [vmem:[%s16975_s16 + $0x10] sm:$0xff] }
 0x33b   : > { %v1819_v58 = vpop.f32.mrf.mxu0 }
 0x33c   : > { %v1820_v16 = vadd.f32 %v12469_v14, %v1819_v58  ;;  %v2321_v58 = vld [vmem:[%s16975_s16] sm:$0xff]  ;;  %v2421_v14 = vld [vmem:[%s16978_s1 + $0x38] sm:$0xff] }
 0x33d   : > { %v13719_v59 = vpop.f32.mrf.mxu0 }
 0x33e   : > { %v1975_v21 = vmul.f32 0.25, %v1820_v16  ;;  %v2419_v16 = vld [vmem:[%s16978_s1 + $0x28] sm:$0xff] }
 0x343   : > { %v1971_v60 = vpop.f32.mrf.mxu0 }
 0x344   : > { %v1972_v22 = vadd.f32 %v12473_v19, %v1971_v60  ;;  %v2416_v19 = vld [vmem:[%s16978_s1 + $0x10] sm:$0xff] }
 0x345   : > { %v13741_v61 = vpop.f32.mrf.mxu0 }
 0x3bf   : > { %v1665_v62 = vpop.xlane.xlu1 %1664 }
 0x3c0   : > { %v1666_v63 = vsub.f32 %v1661_v55, %v1665_v62 }
 0x3c2   : > { %v1667_v0 = vmul.f32 1.442695, %v1666_v63  ;;  %v12481_v63 = vld [vmem:[%s16976_s18] ss:$0 sm:$0xff] }
 0x3c4   : > { %14952 = vpow2.f32 %v1667_v0 }
 0x3d1   : > { %v14953_v2 = vpop.eup %14952 }
 0x3d2   : > { %v1669_v3 = vsel %vm1662_vm4, %v14953_v2, 0.0 }
 0x3d3   : > { %1670 = vadd.xlane.f32.xlu1 %v1669_v3 }
 0x45c   : > { %v1671_v4 = vpop.xlane.xlu1 %1670 }
 0x45d   : > { %14954 = vrcp.f32 %v1671_v4 }
 0x46a   : > { %v14955_v5 = vpop.eup %14954 }
 0x46b   : > { %v1673_v6 = vmul.f32 %v14955_v5, %v14953_v2  ;;  %v12482_v2 = vld [vmem:[%s16977_s28] ss:$0 sm:$0xff]  ;;  %v2429_v5 = vld [vmem:[%s16978_s1 + $0x78] sm:$0xff] }
 0x46d   : > { %13707 = vmatmul.mubr.msk.f32.vlgmr.msra.gmra.mxu1 %vm1662_vm4, %v1673_v6  ;;  %v2428_v6 = vld [vmem:[%s16978_s1 + $0x70] sm:$0xff] }
 0x46e   : > { %13721 = vmatpush3.msra.mxu1 %v1332_v7  ;;  %13728 = vmatprep.mubr.msk.f32.mxu1 %vm15235_vm1, %v15234_v10  ;;  %v2427_v7 = vld [vmem:[%s16978_s1 + $0x68] sm:$0xff] }
 0x46f   : > { %13722 = vmatprep.subr.mxu1 %v15234_v10 }
 0x470   : > { %13723 = vmatpush3.msra.mxu1 %v1331_v8  ;;  %v2426_v8 = vld [vmem:[%s16978_s1 + $0x60] sm:$0xff] }
 0x471   : > { %13724 = vmatprep.subr.mxu1 %v15234_v10 }
 0x472   : > { %13725 = vmatpush3.msra.mxu1 %v1330_v9  ;;  %v2425_v9 = vld [vmem:[%s16978_s1 + $0x58] sm:$0xff] }
 0x473   : > { %13726 = vmatprep.subr.mxu1 %v15234_v10 }
 0x474   : > { %13727 = vmatpush3.msra.mxu1 %v1329_v11  ;;  %v2424_v11 = vld [vmem:[%s16978_s1 + $0x50] sm:$0xff] }
 0x475   : > { %13729 = vmatmul.mubr.msk.f32.vlgmr.msra.gmra.mxu1 %vm1288_vm0, %v15518_v23  ;;  %13742 = vmatprep.subr.mxu1 %v15234_v10 }
 0x476   : > { %13744 = vmatprep.mubr.msk.f32.mxu1 %vm15235_vm1, %v15234_v10 }
 0x52d   : > { %v1743_v12 = vpop.f32.mrf.mxu1 }
 0x52f   : > { %v13708_v13 = vpop.f32.mrf.mxu1 }
 0x530   : > { %v2422_v13 = vld [vmem:[%s16978_s1 + $0x40] sm:$0xff] }
 0x535   : > { %v1895_v17 = vpop.f32.mrf.mxu1 }
 0x536   : > { %v1896_v18 = vadd.f32 %v12471_v15, %v1895_v17  ;;  %v2420_v15 = vld [vmem:[%s16978_s1 + $0x30] sm:$0xff]  ;;  %v2418_v17 = vld [vmem:[%s16978_s1 + $0x20] sm:$0xff] }
 0x537   : > { %v13730_v20 = vpop.f32.mrf.mxu1 }
 0x538   : > { %13743 = vmatpush3.xpose.msk.msra.mxu1 %vm1583_vm2, %v1896_v18  ;;  %v2417_v18 = vld [vmem:[%s16978_s1 + $0x18] sm:$0xff]  ;;  %v2415_v20 = vld [vmem:[%s16978_s1 + $0x8] sm:$0xff] }
 0x539   : > { %13747 = vmatprep.subr.mxu1 %v15234_v10 }
 0x53b   : > { %13745 = vmatmul.mubr.msk.f32.vlgmr.msra.gmra.mxu1 %vm1583_vm2, %v1975_v21  ;;  %v2414_v21 = vld [vmem:[%s16978_s1] sm:$0xff] }
 0x53c   : > { %13748 = vmatpush3.msra.mxu1 %v1972_v22  ;;  %13749 = vmatprep.mubr.msk.f32.mxu1 %vm15235_vm1, %v15234_v10  ;;  %v12483_v22 = vld [vmem:[%s16979_s11] ss:$0 sm:$0xff]  ;;  %s16982_s11 = sld [smem:[#allocation23_spill]] }
 0x53d   : > { %13759 = vmatprep.subr.mxu1 %v15234_v10 }
 0x5fb   : > { %v2048_v23 = vpop.f32.mrf.mxu1 }
 0x5fc   : > { %v2052_v24 = vsel %vm1660_vm3, %v2048_v23, -1.7014117e+38 }
 0x5fd   : > { %v13746_v25 = vpop.f32.mrf.mxu1  ;;  %v2053_v26 = vsel %vm1662_vm4, %v2052_v24, -inf }
 0x5fe   : > { %2054 = vmax.xlane.f32.xlu0 %v2053_v26 }
 0x687   : > { %v2055_v27 = vpop.xlane.xlu0 %2054 }
 0x688   : > { %v2056_v28 = vsub.f32 %v2052_v24, %v2055_v27 }
 0x68a   : > { %v2057_v29 = vmul.f32 1.442695, %v2056_v28 }
 0x68c   : > { %14956 = vpow2.f32 %v2057_v29 }
 0x699   : > { %v14957_v30 = vpop.eup %14956 }
 0x69a   : > { %v2059_v31 = vsel %vm1662_vm4, %v14957_v30, 0.0 }
 0x69b   : > { %2060 = vadd.xlane.f32.xlu1 %v2059_v31 }
 0x724   : > { %v2061_v33 = vpop.xlane.xlu1 %2060 }
 0x725   : > { %14958 = vrcp.f32 %v2061_v33 }
 0x732   : > { %v14959_v34 = vpop.eup %14958 }
 0x733   : > { %v2063_v35 = vmul.f32 %v14959_v34, %v14957_v30 }
 0x735   : > { %13750 = vmatmul.mubr.msk.f32.vlgmr.msra.gmra.mxu1 %vm1662_vm4, %v2063_v35  ;;  %v12485_v35 = vld [vmem:[%s16981_s9] ss:$0 sm:$0xff] }
 0x736   : > { %13760 = vmatpush3.msra.mxu1 %v1348_v36  ;;  %13763 = vmatprep.mubr.msk.f32.mxu1 %vm15235_vm1, %v15234_v10 }
 0x737   : > { %13761 = vmatprep.subr.mxu1 %v15234_v10 }
 0x738   : > { %13762 = vmatpush3.msra.mxu1 %v1347_v37 }
 0x739   : > { %13764 = vmatmul.mubr.msk.f32.vlgmr.msra.gmra.mxu1 %vm1583_vm2, %v1743_v12  ;;  %13777 = vmatprep.subr.mxu1 %v15234_v10  ;;  %v2423_v12 = vld [vmem:[%s16978_s1 + $0x48] sm:$0xff] }
 0x73a   : > { %13809 = vmatprep.mubr.msk.f32.mxu1 %vm15235_vm1, %v15234_v10  ;;  %13778 = vmatpush3.msra.mxu1 %v2429_v5 }
 0x73b   : > { %13779 = vmatprep.subr.mxu1 %v15234_v10 }
 0x73c   : > { %13780 = vmatpush3.msra.mxu1 %v2428_v6  ;;  %v12524_v6 = vld [vmem:[%s16968_s8 + $0x2] ss:$0 sm:$0xff] }
 0x73d   : > { %13781 = vmatprep.subr.mxu1 %v15234_v10 }
 0x73e   : > { %13782 = vmatpush3.msra.mxu1 %v2427_v7  ;;  %v12526_v7 = vld [vmem:[%s16965_s19 + $0x2] ss:$0 sm:$0xff] }
 0x73f   : > { %13783 = vmatprep.subr.mxu1 %v15234_v10 }
 0x740   : > { %13784 = vmatpush3.msra.mxu1 %v2426_v8 }
 0x741   : > { %13785 = vmatprep.subr.mxu1 %v15234_v10 }
 0x742   : > { %13786 = vmatpush3.msra.mxu1 %v2425_v9 }
 0x743   : > { %13787 = vmatprep.subr.mxu1 %v15234_v10 }
 0x744   : > { %13788 = vmatpush3.msra.mxu1 %v2424_v11 }
 0x745   : > { %13789 = vmatprep.subr.mxu1 %v15234_v10 }
 0x746   : > { %13790 = vmatpush3.msra.mxu1 %v2423_v12 }
 0x747   : > { %13791 = vmatprep.subr.mxu1 %v15234_v10 }
 0x748   : > { %13792 = vmatpush3.msra.mxu1 %v2422_v13 }
 0x749   : > { %13793 = vmatprep.subr.mxu1 %v15234_v10 }
 0x74a   : > { %13794 = vmatpush3.msra.mxu1 %v2421_v14  ;;  %v12497_v14 = vld [vmem:[%s16970_s3 + $0x78] sm:$0xff] }
 0x74b   : > { %13795 = vmatprep.subr.mxu1 %v15234_v10 }
 0x74c   : > { %13796 = vmatpush3.msra.mxu1 %v2420_v15  ;;  %v12528_v15 = vld [vmem:[%s15304_s30 + $0x2] ss:$0 sm:$0xff] }
 0x74d   : > { %13797 = vmatprep.subr.mxu1 %v15234_v10 }
 0x74e   : > { %13798 = vmatpush3.msra.mxu1 %v2419_v16  ;;  %v12496_v16 = vld [vmem:[%s16970_s3 + $0x70] sm:$0xff] }
 0x74f   : > { %13799 = vmatprep.subr.mxu1 %v15234_v10 }
 0x750   : > { %13800 = vmatpush3.msra.mxu1 %v2418_v17 }
 0x751   : > { %13801 = vmatprep.subr.mxu1 %v15234_v10 }
 0x752   : > { %13802 = vmatpush3.msra.mxu1 %v2417_v18  ;;  %v12495_v18 = vld [vmem:[%s16970_s3 + $0x68] sm:$0xff] }
 0x753   : > { %13803 = vmatprep.subr.mxu1 %v15234_v10 }
 0x754   : > { %13804 = vmatpush3.msra.mxu1 %v2416_v19 }
 0x755   : > { %13805 = vmatprep.subr.mxu1 %v15234_v10 }
 0x756   : > { %13806 = vmatpush3.msra.mxu1 %v2415_v20 }
 0x757   : > { %13807 = vmatprep.subr.mxu1 %v15234_v10 }
 0x758   : > { %13808 = vmatpush3.msra.mxu1 %v2414_v21  ;;  %v12494_v21 = vld [vmem:[%s16970_s3 + $0x60] sm:$0xff] }
 0x759   : > { %13850 = vmatprep.subr.mxu1 %v15234_v10 }
 0x7f5   : > { %v2133_v39 = vpop.f32.mrf.mxu1 }
 0x7f6   : > { %13757 = vmatmul.mubr.msk.f32.vlgmr.msra.gmra.mxu0 %vm1583_vm2, %v2133_v39 }
 0x7f7   : > { %v13751_v40 = vpop.f32.mrf.mxu1  ;;  %13774 = vmatprep.mubr.msk.f32.mxu0 %vm15235_vm1, %v15234_v10  ;;  %13767 = vmatpush3.msra.mxu0 %v2324_v56 }
 0x7f8   : > { %13768 = vmatprep.subr.mxu0 %v15234_v10 }
 0x7f9   : > { %v2279_v41 = vpop.f32.mrf.mxu1  ;;  %13769 = vmatpush3.msra.mxu0 %v2323_v57  ;;  %v12489_v57 = vld [vmem:[%s15274_s29 + $0x1] ss:$0 sm:$0xff] }
 0x7fa   : > { %13770 = vmatprep.subr.mxu0 %v15234_v10 }
 0x7fb   : > { %v13765_v42 = vpop.f32.mrf.mxu1 }
 0x8b6   : > { %v2206_v43 = vpop.f32.mrf.mxu0 }
 0x8b7   : > { %v2280_v44 = vadd.f32 %v2279_v41, %v2206_v43 }
 0x8b8   : > { %v13758_v46 = vpop.f32.mrf.mxu0 }
 0x8b9   : > { %v2283_v47 = vadd.f32 %v2280_v44, %v15494_v1  ;;  %v2322_v1 = vld [vmem:[%s16975_s16 + $0x8] sm:$0xff]  ;;  %v12493_v46 = vld [vmem:[%s16970_s3 + $0x58] sm:$0xff] }
 0x8ba   : > { %13771 = vmatpush3.msra.mxu0 %v2322_v1 }
 0x8bb   : > { %v15637_v48 = vadd.f32 %v12480_v45, %v2283_v47  ;;  %13772 = vmatprep.subr.mxu0 %v15234_v10  ;;  %v12492_v47 = vld [vmem:[%s16970_s3 + $0x50] sm:$0xff] }
 0x8bc   : > { %13773 = vmatpush3.msra.mxu0 %v2321_v58 }
 0x8bd   : > { %v2294_v49 = vsel %vm1288_vm0, %v15637_v48, 0.0  ;;  %13812 = vmatprep.subr.mxu0 %v15234_v10 }
 0x8be   : > { %2295 = vadd.xlane.f32.xlu0 %v2294_v49  ;;  %v12490_v49 = vld [vmem:[%s16970_s3 + $0x40] sm:$0xff] }
 0x947   : > { %v2296_v50 = vpop.xlane.xlu0 %2295 }
 0x948   : > { %v2297_v51 = vmul.f32 0.03125, %v2296_v50 }
 0x94a   : > { %v2298_v52 = vsub.f32 %v15637_v48, %v2297_v51 }
 0x94c   : > { %v2299_v54 = vmul.f32 %v2298_v52, %v2298_v52 }
 0x94e   : > { %v2300_v55 = vsel %vm1288_vm0, %v2299_v54, 0.0 }
 0x94f   : > { %2301 = vadd.xlane.f32.xlu1 %v2300_v55  ;;  %v12488_v55 = vld [vmem:[%s16963_s25 + $0x1] ss:$0 sm:$0xff] }
 0x9d8   : > { %v2302_v59 = vpop.xlane.xlu1 %2301 }
 0x9d9   : > { %v2303_v60 = vmul.f32 0.03125, %v2302_v59  ;;  %v12501_v59 = vld [vmem:[%s16966_s14 + $0x58] sm:$0xff] }
 0x9db   : > { %v2304_v61 = vadd.f32 1e-05, %v2303_v60  ;;  %v12500_v60 = vld [vmem:[%s16966_s14 + $0x50] sm:$0xff] }
 0x9dd   : > { %14960 = vrsqrt.f32 %v2304_v61  ;;  %v12499_v61 = vld [vmem:[%s16966_s14 + $0x48] sm:$0xff] }
 0x9ea   : > { %v14961_v62 = vpop.eup %14960 }
 0x9eb   : > { %v2306_v0 = vmul.f32 %v14961_v62, %v2298_v52  ;;  %v12498_v62 = vld [vmem:[%s16966_s14 + $0x40] sm:$0xff] }
 0x9ed   : > { %v2313_v3 = vmul.f32 %v12481_v63, %v2306_v0  ;;  %v12509_v63 = vld [vmem:[%s16964_s24 + $0x58] sm:$0xff]  ;;  %v12508_v0 = vld [vmem:[%s16964_s24 + $0x50] sm:$0xff] }
 0x9ef   : > { %v2320_v4 = vadd.f32 %v12482_v2, %v2313_v3  ;;  %v12507_v2 = vld [vmem:[%s16964_s24 + $0x48] sm:$0xff]  ;;  %v12506_v3 = vld [vmem:[%s16964_s24 + $0x40] sm:$0xff] }
 0x9f1   : > { %13775 = vmatmul.mubr.msk.f32.vlgmr.msra.gmra.mxu0 %vm1288_vm0, %v2320_v4 }
 0x9f2   : > { %13820 = vmatprep.mubr.msk.f32.mxu0 %vm15235_vm1, %v15234_v10  ;;  %13813 = vmatpush3.msra.mxu0 %v12493_v46  ;;  %v12502_v46 = vld [vmem:[%s16966_s14 + $0x60] sm:$0xff] }
 0x9f3   : > { %13814 = vmatprep.subr.mxu0 %v15234_v10 }
 0x9f4   : > { %13815 = vmatpush3.msra.mxu0 %v12492_v47 }
 0x9f5   : > { %13816 = vmatprep.subr.mxu0 %v15234_v10 }
 0xab1   : > { %v2401_v23 = vpop.f32.mrf.mxu0 }
 0xab2   : > { %v2402_v24 = vadd.f32 %v12483_v22, %v2401_v23  ;;  %v12513_v22 = vld [vmem:[%s16964_s24 + $0x78] sm:$0xff]  ;;  %v12512_v23 = vld [vmem:[%s16964_s24 + $0x70] sm:$0xff] }
 0xab3   : > { %v13776_v25 = vpop.f32.mrf.mxu0 }
 0xab4   : > { %v2405_v26 = vmul.f32 %v2402_v24, %v2402_v24  ;;  %v12510_v25 = vld [vmem:[%s16964_s24 + $0x60] sm:$0xff] }
 0xab6   : > { %v2406_v27 = vmul.f32 %v2405_v26, %v2402_v24 }
 0xab8   : > { %v2407_v28 = vmul.f32 0.044715, %v2406_v27 }
 0xaba   : > { %v2408_v29 = vadd.f32 %v2407_v28, %v2402_v24 }
 0xabc   : > { %v2409_v30 = vmul.f32 0.7978846, %v2408_v29 }
 0xabe   : > { %14962 = vtanh.f32 %v2409_v30 }
 0xacb   : > { %v14963_v31 = vpop.eup %14962 }
 0xacc   : > { %v2411_v32 = vadd.f32 1.0, %v14963_v31 }
 0xace   : > { %v2412_v33 = vmul.f32 0.5, %v2411_v32 }
 0xad0   : > { %v2413_v34 = vmul.f32 %v2412_v33, %v2402_v24  ;;  %v12511_v24 = vld [vmem:[%s16964_s24 + $0x68] sm:$0xff]  ;;  %s17001_s24 = sld [smem:[#allocation39_spill]] }
 0xad2   : > { %13810 = vmatmul.mubr.f32.vlgmr.msra.gmra.mxu1 %v2413_v34 }
 0xad3   : > { %13852 = vmatprep.mubr.msk.f32.mxu1 %vm15235_vm1, %v15234_v10 }
 0xb92   : > { %v2503_v36 = vpop.f32.mrf.mxu1 }
 0xb93   : > { %v2504_v37 = vadd.f32 %v12485_v35, %v2503_v36 }
 0xb94   : > { %v13811_v38 = vpop.f32.mrf.mxu1 }
 0xb95   : > { %v15693_v39 = vadd.f32 %v2504_v37, %v15637_v48  ;;  %v12491_v48 = vld [vmem:[%s16970_s3 + $0x48] sm:$0xff]  ;;  %s16984_s3 = sld [smem:[#allocation27_spill]] }
 0xb96   : > { %13817 = vmatpush3.msra.mxu0 %v12491_v48 }
 0xb97   : > { %v2512_v40 = vsel %vm1288_vm0, %v15693_v39, 0.0  ;;  %13818 = vmatprep.subr.mxu0 %v15234_v10 }
 0xb98   : > { %2513 = vadd.xlane.f32.xlu0 %v2512_v40  ;;  %13819 = vmatpush3.msra.mxu0 %v12490_v49  ;;  %v12533_v49 = vld [vmem:[%s16968_s8 + $0x3] ss:$0 sm:$0xff]  ;;  %s16989_s8 = sld [smem:[#allocation31_spill]] }
 0xb99   : > { %13823 = vmatprep.subr.mxu0 %v15234_v10 }
 0xc21   : > { %v2514_v41 = vpop.xlane.xlu0 %2513 }
 0xc22   : > { %v2515_v42 = vmul.f32 0.03125, %v2514_v41 }
 0xc24   : > { %v2516_v43 = vsub.f32 %v15693_v39, %v2515_v42 }
 0xc26   : > { %v2517_v44 = vmul.f32 %v2516_v43, %v2516_v43 }
 0xc28   : > { %v2518_v45 = vsel %vm1288_vm0, %v2517_v44, 0.0  ;;  %v12504_v44 = vld [vmem:[%s16966_s14 + $0x70] sm:$0xff] }
 0xc29   : > { %2519 = vadd.xlane.f32.xlu1 %v2518_v45  ;;  %v12503_v45 = vld [vmem:[%s16966_s14 + $0x68] sm:$0xff] }
 0xcb2   : > { %v2520_v50 = vpop.xlane.xlu1 %2519 }
 0xcb3   : > { %v2521_v51 = vmul.f32 0.03125, %v2520_v50  ;;  %v12535_v50 = vld [vmem:[%s16965_s19 + $0x3] ss:$0 sm:$0xff] }
 0xcb5   : > { %v2522_v52 = vadd.f32 1e-05, %v2521_v51 }
 0xcb7   : > { %14964 = vrsqrt.f32 %v2522_v52 }
 0xcc4   : > { %v14965_v54 = vpop.eup %14964 }
 0xcc5   : > { %v2524_v56 = vmul.f32 %v14965_v54, %v2516_v43  ;;  %v12505_v43 = vld [vmem:[%s16966_s14 + $0x78] sm:$0xff]  ;;  %s16993_s14 = sld [smem:[#allocation32_spill]] }
 0xcc7   : > { %v2531_v1 = vmul.f32 %v12488_v55, %v2524_v56  ;;  %v12537_v55 = vld [vmem:[%s15304_s30 + $0x3] ss:$0 sm:$0xff] }
 0xcc9   : > { %v15709_v58 = vadd.f32 %v12489_v57, %v2531_v1 }
 0xccb   : > { %13821 = vmatmul.mubr.msk.f32.vlgmr.msra.gmra.mxu0 %vm1288_vm0, %v15709_v58 }
 0xccc   : > { %13824 = vmatpush3.msra.mxu0 %v12501_v59  ;;  %13831 = vmatprep.mubr.msk.f32.mxu0 %vm15235_vm1, %v15234_v10 }
 0xccd   : > { %13825 = vmatprep.subr.mxu0 %v15234_v10 }
 0xcce   : > { %13826 = vmatpush3.msra.mxu0 %v12500_v60 }
 0xccf   : > { %13827 = vmatprep.subr.mxu0 %v15234_v10 }
 0xcd0   : > { %13828 = vmatpush3.msra.mxu0 %v12499_v61 }
 0xcd1   : > { %13829 = vmatprep.subr.mxu0 %v15234_v10 }
 0xcd2   : > { %13830 = vmatpush3.msra.mxu0 %v12498_v62 }
 0xcd3   : > { %13832 = vmatmul.mubr.msk.f32.vlgmr.msra.gmra.mxu0 %vm1288_vm0, %v15709_v58  ;;  %13834 = vmatprep.subr.mxu0 %v15234_v10 }
 0xcd4   : > { %13835 = vmatpush3.msra.mxu0 %v12509_v63  ;;  %13842 = vmatprep.mubr.msk.f32.mxu0 %vm15235_vm1, %v15234_v10 }
 0xcd5   : > { %13836 = vmatprep.subr.mxu0 %v15234_v10 }
 0xcd6   : > { %13837 = vmatpush3.msra.mxu0 %v12508_v0 }
 0xcd7   : > { %13838 = vmatprep.subr.mxu0 %v15234_v10 }
 0xcd8   : > { %13839 = vmatpush3.msra.mxu0 %v12507_v2 }
 0xcd9   : > { %13840 = vmatprep.subr.mxu0 %v15234_v10 }
 0xcda   : > { %13841 = vmatpush3.msra.mxu0 %v12506_v3 }
 0xcdb   : > { %13843 = vmatmul.mubr.msk.f32.vlgmr.msra.gmra.mxu0 %vm1288_vm0, %v15709_v58  ;;  %13845 = vmatprep.subr.mxu0 %v15234_v10 }
 0xcdc   : > { %13847 = vmatprep.mubr.msk.f32.mxu0 %vm15235_vm1, %v15234_v10 }
 0xd8b   : > { %v2655_v4 = vpop.f32.mrf.mxu0 }
 0xd8c   : > { %v2656_v8 = vadd.f32 %v12524_v6, %v2655_v4  ;;  %v12523_v4 = vld [vmem:[%s16969_s6 + $0x38] sm:$0xff] }
 0xd8d   : > { %v13822_v5 = vpop.f32.mrf.mxu0 }
 0xd8e   : > { %v2811_v13 = vmul.f32 0.25, %v2656_v8  ;;  %v12520_v8 = vld [vmem:[%s16969_s6 + $0x20] sm:$0xff] }
 0xd93   : > { %v2731_v9 = vpop.f32.mrf.mxu0 }
 0xd94   : > { %v2732_v11 = vadd.f32 %v12526_v7, %v2731_v9  ;;  %v12521_v7 = vld [vmem:[%s16969_s6 + $0x28] sm:$0xff]  ;;  %v12522_v9 = vld [vmem:[%s16969_s6 + $0x30] sm:$0xff]  ;;  %s16988_s6 = sld [smem:[#allocation26_spill]] }
 0xd95   : > { %v13833_v12 = vpop.f32.mrf.mxu0 }
 0xd96   : > { %13846 = vmatpush3.xpose.msk.msra.mxu0 %vm1583_vm2, %v2732_v11 }
 0xd97   : > { %13855 = vmatprep.subr.mxu0 %v15234_v10 }
 0xd99   : > { %13848 = vmatmul.mubr.msk.f32.vlgmr.msra.gmra.mxu0 %vm1583_vm2, %v2811_v13 }
 0xd9a   : > { %13856 = vmatpush3.msra.mxu0 %v12497_v14  ;;  %13863 = vmatprep.mubr.msk.f32.mxu0 %vm15235_vm1, %v15234_v10 }
 0xd9b   : > { %v2807_v17 = vpop.f32.mrf.mxu0  ;;  %13857 = vmatprep.subr.mxu0 %v15234_v10 }
 0xd9c   : > { %v2808_v19 = vadd.f32 %v12528_v15, %v2807_v17  ;;  %13858 = vmatpush3.msra.mxu0 %v12496_v16  ;;  %v12545_v17 = vld [vmem:[%s16967_s12 + $0x1] ss:$0 sm:$0xff]  ;;  %s16992_s12 = sld [smem:[#allocation30_spill]] }
 0xd9d   : > { %v13844_v20 = vpop.f32.mrf.mxu0  ;;  %13859 = vmatprep.subr.mxu0 %v15234_v10 }
 0xd9e   : > { %13851 = vmatpush3.msra.mxu1 %v2808_v19  ;;  %13860 = vmatpush3.msra.mxu0 %v12495_v18 }
 0xd9f   : > { %13861 = vmatprep.subr.mxu0 %v15234_v10  ;;  %13866 = vmatprep.subr.mxu1 %v15234_v10 }
 0xda0   : > { %13862 = vmatpush3.msra.mxu0 %v12494_v21 }
 0xda1   : > { %13864 = vmatmul.mubr.msk.f32.vlgmr.msra.gmra.mxu0 %vm1288_vm0, %v15709_v58  ;;  %13877 = vmatprep.subr.mxu0 %v15234_v10 }
 0xda2   : > { %13878 = vmatpush3.msra.mxu0 %v12513_v22  ;;  %13885 = vmatprep.mubr.msk.f32.mxu0 %vm15235_vm1, %v15234_v10 }
 0xda3   : > { %13879 = vmatprep.subr.mxu0 %v15234_v10 }
 0xda4   : > { %13880 = vmatpush3.msra.mxu0 %v12512_v23 }
 0xda5   : > { %13881 = vmatprep.subr.mxu0 %v15234_v10 }
 0xda6   : > { %13882 = vmatpush3.msra.mxu0 %v12511_v24 }
 0xda7   : > { %13883 = vmatprep.subr.mxu0 %v15234_v10 }
 0xda8   : > { %13884 = vmatpush3.msra.mxu0 %v12510_v25 }
 0xda9   : > { %13886 = vmatmul.mubr.msk.f32.vlgmr.msra.gmra.mxu0 %vm1288_vm0, %v15709_v58  ;;  %13898 = vmatprep.subr.mxu0 %v15234_v10 }
 0xdaa   : > { %13902 = vmatprep.mubr.msk.f32.mxu0 %vm15235_vm1, %v15234_v10  ;;  %13899 = vmatpush3.msra.mxu0 %v12523_v4 }
 0xdab   : > { %13900 = vmatprep.subr.mxu0 %v15234_v10 }
 0xdac   : > { %13901 = vmatpush3.msra.mxu0 %v12522_v9 }
 0xdad   : > { %13912 = vmatprep.subr.mxu0 %v15234_v10 }
 0xe59   : > { %v2884_v26 = vpop.f32.mrf.mxu0 }
 0xe5a   : > { %v2888_v27 = vsel %vm1660_vm3, %v2884_v26, -1.7014117e+38 }
 0xe5b   : > { %v13849_v28 = vpop.f32.mrf.mxu0  ;;  %v2889_v29 = vsel %vm1662_vm4, %v2888_v27, -inf }
 0xe5c   : > { %2890 = vmax.xlane.f32.xlu0 %v2889_v29  ;;  %v12552_v28 = vld [vmem:[%s16975_s16 + $0x30] sm:$0xff]  ;;  %v12550_v29 = vld [vmem:[%s16975_s16 + $0x20] sm:$0xff] }
 0xe61   : > { %v3045_v30 = vpop.f32.mrf.mxu0 }
 0xe62   : > { %v3046_v51 = vadd.f32 %v12533_v49, %v3045_v30  ;;  %v12563_v49 = vld [vmem:[%s16978_s1 + $0xb0] sm:$0xff] }
 0xe63   : > { %v13865_v31 = vpop.f32.mrf.mxu0 }
 0xe64   : > { %v3201_v57 = vmul.f32 0.25, %v3046_v51  ;;  %v12561_v51 = vld [vmem:[%s16978_s1 + $0xa0] sm:$0xff] }
 0xe69   : > { %v3197_v32 = vpop.f32.mrf.mxu0 }
 0xe6a   : > { %v3198_v1 = vadd.f32 %v12537_v55, %v3197_v32  ;;  %v12558_v55 = vld [vmem:[%s16978_s1 + $0x88] sm:$0xff] }
 0xe6b   : > { %v13887_v33 = vpop.f32.mrf.mxu0 }
 0xee5   : > { %v2891_v34 = vpop.xlane.xlu0 %2890 }
 0xee6   : > { %v2892_v35 = vsub.f32 %v2888_v27, %v2891_v34  ;;  %v12553_v27 = vld [vmem:[%s16975_s16 + $0x38] sm:$0xff]  ;;  %v12548_v34 = vld [vmem:[%s16976_s18 + $0x1] ss:$0 sm:$0xff] }
 0xee8   : > { %v2893_v36 = vmul.f32 1.442695, %v2892_v35 }
 0xeea   : > { %14966 = vpow2.f32 %v2893_v36  ;;  %v12549_v36 = vld [vmem:[%s16977_s28 + $0x1] ss:$0 sm:$0xff] }
 0xef7   : > { %v14967_v37 = vpop.eup %14966 }
 0xef8   : > { %v2895_v38 = vsel %vm1662_vm4, %v14967_v37, 0.0 }
 0xef9   : > { %2896 = vadd.xlane.f32.xlu1 %v2895_v38 }
 0xf82   : > { %v2897_v40 = vpop.xlane.xlu1 %2896 }
 0xf83   : > { %14968 = vrcp.f32 %v2897_v40  ;;  %v12572_v40 = vld [vmem:[%s16978_s1 + $0xf8] sm:$0xff] }
 0xf90   : > { %v14969_v41 = vpop.eup %14968 }
 0xf91   : > { %v2899_v42 = vmul.f32 %v14969_v41, %v14967_v37  ;;  %v12571_v41 = vld [vmem:[%s16978_s1 + $0xf0] sm:$0xff] }
 0xf93   : > { %13853 = vmatmul.mubr.msk.f32.vlgmr.msra.gmra.mxu1 %vm1662_vm4, %v2899_v42  ;;  %v12570_v42 = vld [vmem:[%s16978_s1 + $0xe8] sm:$0xff] }
 0xf94   : > { %13867 = vmatpush3.msra.mxu1 %v12505_v43  ;;  %13874 = vmatprep.mubr.msk.f32.mxu1 %vm15235_vm1, %v15234_v10  ;;  %v12569_v43 = vld [vmem:[%s16978_s1 + $0xe0] sm:$0xff] }
 0xf95   : > { %13868 = vmatprep.subr.mxu1 %v15234_v10 }
 0xf96   : > { %13869 = vmatpush3.msra.mxu1 %v12504_v44  ;;  %v12568_v44 = vld [vmem:[%s16978_s1 + $0xd8] sm:$0xff] }
 0xf97   : > { %13870 = vmatprep.subr.mxu1 %v15234_v10 }
 0xf98   : > { %13871 = vmatpush3.msra.mxu1 %v12503_v45  ;;  %v12567_v45 = vld [vmem:[%s16978_s1 + $0xd0] sm:$0xff] }
 0xf99   : > { %13872 = vmatprep.subr.mxu1 %v15234_v10 }
 0xf9a   : > { %13873 = vmatpush3.msra.mxu1 %v12502_v46  ;;  %v12566_v46 = vld [vmem:[%s16978_s1 + $0xc8] sm:$0xff] }
 0xf9b   : > { %13875 = vmatmul.mubr.msk.f32.vlgmr.msra.gmra.mxu1 %vm1288_vm0, %v15709_v58  ;;  %13888 = vmatprep.subr.mxu1 %v15234_v10 }
 0xf9c   : > { %13890 = vmatprep.mubr.msk.f32.mxu1 %vm15235_vm1, %v15234_v10 }
0x1053   : > { %v2969_v47 = vpop.f32.mrf.mxu1 }
0x1055   : > { %v13854_v48 = vpop.f32.mrf.mxu1 }
0x1056   : > { %v12564_v48 = vld [vmem:[%s16978_s1 + $0xb8] sm:$0xff] }
0x105b   : > { %v3121_v52 = vpop.f32.mrf.mxu1 }
0x105c   : > { %v3122_v54 = vadd.f32 %v12535_v50, %v3121_v52  ;;  %v12562_v50 = vld [vmem:[%s16978_s1 + $0xa8] sm:$0xff]  ;;  %v12560_v52 = vld [vmem:[%s16978_s1 + $0x98] sm:$0xff] }
0x105d   : > { %v13876_v56 = vpop.f32.mrf.mxu1 }
0x105e   : > { %13889 = vmatpush3.xpose.msk.msra.mxu1 %vm1583_vm2, %v3122_v54  ;;  %v12559_v54 = vld [vmem:[%s16978_s1 + $0x90] sm:$0xff]  ;;  %v12557_v56 = vld [vmem:[%s16978_s1 + $0x80] sm:$0xff] }
0x105f   : > { %13893 = vmatprep.subr.mxu1 %v15234_v10 }
0x1061   : > { %13891 = vmatmul.mubr.msk.f32.vlgmr.msra.gmra.mxu1 %vm1583_vm2, %v3201_v57  ;;  %v12555_v57 = vld [vmem:[%s16980_s5 + $0x1] ss:$0 sm:$0xff] }
0x1062   : > { %13894 = vmatpush3.msra.mxu1 %v3198_v1  ;;  %13895 = vmatprep.mubr.msk.f32.mxu1 %vm15235_vm1, %v15234_v10 }
0x1063   : > { %13905 = vmatprep.subr.mxu1 %v15234_v10 }
0x1121   : > { %v3274_v58 = vpop.f32.mrf.mxu1 }
0x1122   : > { %v3278_v59 = vsel %vm1660_vm3, %v3274_v58, -1.7014117e+38 }
0x1123   : > { %v13892_v60 = vpop.f32.mrf.mxu1  ;;  %v3279_v61 = vsel %vm1662_vm4, %v3278_v59, -inf }
0x1124   : > { %3280 = vmax.xlane.f32.xlu0 %v3279_v61 }
0x11ad   : > { %v3281_v62 = vpop.xlane.xlu0 %3280 }
0x11ae   : > { %v3282_v63 = vsub.f32 %v3278_v59, %v3281_v62 }
0x11b0   : > { %v3283_v0 = vmul.f32 1.442695, %v3282_v63 }
0x11b2   : > { %14970 = vpow2.f32 %v3283_v0 }
0x11bf   : > { %v14971_v2 = vpop.eup %14970 }
0x11c0   : > { %v3285_v3 = vsel %vm1662_vm4, %v14971_v2, 0.0 }
0x11c1   : > { %3286 = vadd.xlane.f32.xlu1 %v3285_v3 }
0x124a   : > { %v3287_v53 = vpop.xlane.xlu1 %3286 }
0x124b   : > { %14972 = vrcp.f32 %v3287_v53 }
0x1258   : > { %v14973_v5 = vpop.eup %14972 }
0x1259   : > { %v3289_v6 = vmul.f32 %v14973_v5, %v14971_v2  ;;  %v12574_v5 = vld [vmem:[%s16981_s9 + $0x1] ss:$0 sm:$0xff] }
0x125b   : > { %13896 = vmatmul.mubr.msk.f32.vlgmr.msra.gmra.mxu1 %vm1662_vm4, %v3289_v6 }
0x125c   : > { %13906 = vmatpush3.msra.mxu1 %v12521_v7  ;;  %13909 = vmatprep.mubr.msk.f32.mxu1 %vm15235_vm1, %v15234_v10 }
0x125d   : > { %13907 = vmatprep.subr.mxu1 %v15234_v10 }
0x125e   : > { %13908 = vmatpush3.msra.mxu1 %v12520_v8 }
0x125f   : > { %13910 = vmatmul.mubr.msk.f32.vlgmr.msra.gmra.mxu1 %vm1583_vm2, %v2969_v47  ;;  %13923 = vmatprep.subr.mxu1 %v15234_v10  ;;  %v12565_v47 = vld [vmem:[%s16978_s1 + $0xc0] sm:$0xff]  ;;  %s16983_s1 = sld [smem:[#allocation24_spill]] }
0x1260   : > { %13955 = vmatprep.mubr.msk.f32.mxu1 %vm15235_vm1, %v15234_v10  ;;  %13924 = vmatpush3.msra.mxu1 %v12572_v40 }
0x1261   : > { %13925 = vmatprep.subr.mxu1 %v15234_v10 }
0x1262   : > { %13926 = vmatpush3.msra.mxu1 %v12571_v41  ;;  %v3830_v41 = vld [vmem:[%s16984_s3 + $0x18] sm:$0xff] }
0x1263   : > { %13927 = vmatprep.subr.mxu1 %v15234_v10 }
0x1264   : > { %13928 = vmatpush3.msra.mxu1 %v12570_v42  ;;  %v3829_v42 = vld [vmem:[%s16984_s3 + $0x10] sm:$0xff] }
0x1265   : > { %13929 = vmatprep.subr.mxu1 %v15234_v10 }
0x1266   : > { %13930 = vmatpush3.msra.mxu1 %v12569_v43  ;;  %v3828_v43 = vld [vmem:[%s16984_s3 + $0x8] sm:$0xff] }
0x1267   : > { %13931 = vmatprep.subr.mxu1 %v15234_v10 }
0x1268   : > { %13932 = vmatpush3.msra.mxu1 %v12568_v44  ;;  %v3827_v44 = vld [vmem:[%s16984_s3] sm:$0xff] }
0x1269   : > { %13933 = vmatprep.subr.mxu1 %v15234_v10 }
0x126a   : > { %13934 = vmatpush3.msra.mxu1 %v12567_v45 }
0x126b   : > { %13935 = vmatprep.subr.mxu1 %v15234_v10 }
0x126c   : > { %13936 = vmatpush3.msra.mxu1 %v12566_v46 }
0x126d   : > { %13937 = vmatprep.subr.mxu1 %v15234_v10 }
0x126e   : > { %13938 = vmatpush3.msra.mxu1 %v12565_v47 }
0x126f   : > { %13939 = vmatprep.subr.mxu1 %v15234_v10 }
0x1270   : > { %13940 = vmatpush3.msra.mxu1 %v12564_v48 }
0x1271   : > { %13941 = vmatprep.subr.mxu1 %v15234_v10 }
0x1272   : > { %13942 = vmatpush3.msra.mxu1 %v12563_v49 }
0x1273   : > { %13943 = vmatprep.subr.mxu1 %v15234_v10 }
0x1274   : > { %13944 = vmatpush3.msra.mxu1 %v12562_v50 }
0x1275   : > { %13945 = vmatprep.subr.mxu1 %v15234_v10 }
0x1276   : > { %13946 = vmatpush3.msra.mxu1 %v12561_v51 }
0x1277   : > { %13947 = vmatprep.subr.mxu1 %v15234_v10 }
0x1278   : > { %13948 = vmatpush3.msra.mxu1 %v12560_v52 }
0x1279   : > { %13949 = vmatprep.subr.mxu1 %v15234_v10 }
0x127a   : > { %13950 = vmatpush3.msra.mxu1 %v12559_v54 }
0x127b   : > { %13951 = vmatprep.subr.mxu1 %v15234_v10 }
0x127c   : > { %13952 = vmatpush3.msra.mxu1 %v12558_v55 }
0x127d   : > { %13953 = vmatprep.subr.mxu1 %v15234_v10 }
0x127e   : > { %13954 = vmatpush3.msra.mxu1 %v12557_v56 }
0x131b   : > { %v3359_v11 = vpop.f32.mrf.mxu1 }
0x131c   : > { %13903 = vmatmul.mubr.msk.f32.vlgmr.msra.gmra.mxu0 %vm1583_vm2, %v3359_v11 }
0x131d   : > { %v13897_v12 = vpop.f32.mrf.mxu1  ;;  %13920 = vmatprep.mubr.msk.f32.mxu0 %vm15235_vm1, %v15234_v10  ;;  %13913 = vmatpush3.msra.mxu0 %v12553_v27  ;;  %v12575_v27 = vld [vmem:[%s16982_s11] ss:$0 sm:$0xff]  ;;  %s16986_s11 = sld [smem:[#allocation25_spill]] }
0x131e   : > { %13914 = vmatprep.subr.mxu0 %v15234_v10 }
0x131f   : > { %v3505_v13 = vpop.f32.mrf.mxu1  ;;  %13915 = vmatpush3.msra.mxu0 %v12552_v28 }
0x1320   : > { %13916 = vmatprep.subr.mxu0 %v15234_v10 }
0x1321   : > { %v13911_v14 = vpop.f32.mrf.mxu1 }
0x1323   : > { %s16987_s5 = smov %s16986_s11  ;;  %v12577_v55 = vld [vmem:[%s16986_s11] ss:$0 sm:$0xff]  ;;  %s16990_s11 = sld [smem:[#allocation28_spill]] }
0x1329   : > { %s16991_s9 = smov %s16990_s11 }
0x13dc   : > { %v3432_v15 = vpop.f32.mrf.mxu0 }
0x13dd   : > { %v3506_v16 = vadd.f32 %v3505_v13, %v3432_v15  ;;  %v15874_v15 = vld [vmem:[#allocation2 + $0x8] sm:$0xff] }
0x13de   : > { %v13904_v18 = vpop.f32.mrf.mxu0 }
0x13df   : > { %v3509_v19 = vadd.f32 %v3506_v16, %v15693_v39  ;;  %v12551_v39 = vld [vmem:[%s16975_s16 + $0x28] sm:$0xff]  ;;  %s13029_s16 = sshll.u32 %s15482_s26, 4  ;;  %s16995_s26 = sld [smem:[#allocation33_spill]] }
0x13e0   : > { %13917 = vmatpush3.msra.mxu0 %v12551_v39  ;;  %v12576_v39 = vld [vmem:[%s16983_s1] ss:$0 sm:$0xff]  ;;  %s16985_s1 = sld [smem:[#allocation29_spill]] }
0x13e1   : > { %v15823_v20 = vadd.f32 %v12545_v17, %v3509_v19  ;;  %13918 = vmatprep.subr.mxu0 %v15234_v10  ;;  %v3788_v17 = vsel %vm1288_vm0, %v15874_v15, 0.0 }
0x13e2   : > { %13919 = vmatpush3.msra.mxu0 %v12550_v29 }
0x13e3   : > { %v3523_v21 = vsel %vm1288_vm0, %v15823_v20, 0.0  ;;  %13958 = vmatprep.subr.mxu0 %v3830_v41 }
0x13e4   : > { %3524 = vadd.xlane.f32.xlu0 %v3523_v21 }
0x13e6   : > { %v3838_v45 = vld [vmem:[%s16985_s1 + $0x18] sm:$0xff] }
0x146d   : > { %v3525_v22 = vpop.xlane.xlu0 %3524 }
0x146e   : > { %v3526_v23 = vmul.f32 0.03125, %v3525_v22 }
0x1470   : > { %v3527_v24 = vsub.f32 %v15823_v20, %v3526_v23 }
0x1472   : > { %v3528_v25 = vmul.f32 %v3527_v24, %v3527_v24 }
0x1474   : > { %v3529_v26 = vsel %vm1288_vm0, %v3528_v25, 0.0 }
0x1475   : > { %3530 = vadd.xlane.f32.xlu1 %v3529_v26 }
0x14fe   : > { %v3531_v30 = vpop.xlane.xlu1 %3530 }
0x14ff   : > { %v3532_v31 = vmul.f32 0.03125, %v3531_v30  ;;  %v3770_v30 = vld [vmem:[%s15259_s17] sm:$0xff] }
0x1501   : > { %v3533_v32 = vadd.f32 1e-05, %v3532_v31 }
0x1503   : > { %14974 = vrsqrt.f32 %v3533_v32 }
0x1510   : > { %v14975_v33 = vpop.eup %14974 }
0x1511   : > { %v3535_v35 = vmul.f32 %v14975_v33, %v3527_v24 }
0x1513   : > { %v3542_v37 = vmul.f32 %v12548_v34, %v3535_v35 }
0x1515   : > { %v3549_v38 = vadd.f32 %v12549_v36, %v3542_v37 }
0x1517   : > { %13921 = vmatmul.mubr.msk.f32.vlgmr.msra.gmra.mxu0 %vm1288_vm0, %v3549_v38 }
0x1518   : > { %13959 = vmatpush3.msra.mxu0 %v3830_v41 }
0x1519   : > { %13960 = vmatprep.subr.mxu0 %v3829_v42 }
0x151a   : > { %13961 = vmatpush3.msra.mxu0 %v3829_v42 }
0x151b   : > { %13962 = vmatprep.subr.mxu0 %v3828_v43 }
0x151c   : > { %13963 = vmatpush3.msra.mxu0 %v3828_v43 }
0x151d   : > { %13964 = vmatprep.subr.mxu0 %v3827_v44 }
0x151e   : > { %13965 = vmatpush3.msra.mxu0 %v3827_v44 }
0x151f   : > { %13969 = vmatprep.subr.mxu0 %v3838_v45 }
0x15d7   : > { %v3632_v1 = vpop.f32.mrf.mxu0 }
0x15d8   : > { %v3633_v58 = vadd.f32 %v12555_v57, %v3632_v1 }
0x15d9   : > { %v13922_v59 = vpop.f32.mrf.mxu0 }
0x15da   : > { %v3636_v60 = vmul.f32 %v3633_v58, %v3633_v58  ;;  %v12578_v59 = vld [vmem:[%s16988_s6] ss:$0 sm:$0xff] }
0x15dc   : > { %v3637_v61 = vmul.f32 %v3636_v60, %v3633_v58 }
0x15de   : > { %v3638_v62 = vmul.f32 0.044715, %v3637_v61 }
0x15e0   : > { %v3639_v63 = vadd.f32 %v3638_v62, %v3633_v58  ;;  %v3837_v62 = vld [vmem:[%s16985_s1 + $0x10] sm:$0xff] }
0x15e2   : > { %v3640_v0 = vmul.f32 0.7978846, %v3639_v63  ;;  %v3836_v63 = vld [vmem:[%s16985_s1 + $0x8] sm:$0xff] }
0x15e4   : > { %14976 = vtanh.f32 %v3640_v0  ;;  %v3835_v0 = vld [vmem:[%s16985_s1] sm:$0xff] }
0x15f1   : > { %v14977_v2 = vpop.eup %14976 }
0x15f2   : > { %v3642_v3 = vadd.f32 1.0, %v14977_v2  ;;  %v3846_v2 = vld [vmem:[%s16989_s8 + $0x18] sm:$0xff] }
0x15f4   : > { %v3643_v4 = vmul.f32 0.5, %v3642_v3  ;;  %v3845_v3 = vld [vmem:[%s16989_s8 + $0x10] sm:$0xff] }
0x15f6   : > { %v3644_v53 = vmul.f32 %v3643_v4, %v3633_v58  ;;  %v3844_v4 = vld [vmem:[%s16989_s8 + $0x8] sm:$0xff] }
0x15f8   : > { %13956 = vmatmul.mubr.f32.vlgmr.msra.gmra.mxu1 %v3644_v53  ;;  %v3843_v53 = vld [vmem:[%s16989_s8] sm:$0xff] }
0x16b8   : > { %v3736_v6 = vpop.f32.mrf.mxu1 }
0x16b9   : > { %v3737_v10 = vadd.f32 %v12574_v5, %v3736_v6  ;;  %v12579_v6 = vld [vmem:[%s16990_s11] ss:$0 sm:$0xff]  ;;  %s16994_s11 = sld [smem:[#allocation7_spill]] }
0x16ba   : > { %v13957_v7 = vpop.f32.mrf.mxu1 }
0x16bb   : > { %v3740_v8 = vadd.f32 %v3737_v10, %v15823_v20 }
0x16bd   : > { %v3743_v9 = vsel %vm1288_vm0, %v3740_v8, 0.0 }
0x16be   : > { %3744 = vadd.xlane.f32.xlu0 %v3743_v9  ;;  %v12582_v9 = vld [vmem:[%s16992_s12] ss:$0 sm:$0xff] }
0x16bf   : > { %s1279_s18 = scalar_lea.vmem %s16994_s11, %s13029_s16  ;;  %s16996_s16 = sld [smem:[#allocation34_spill]] }
0x16c0   : > { %s16998_s11 = sld [smem:[#allocation35_spill]] }
0x16c6   : > { %s16999_s19 = smov %s16998_s11 }
0x1747   : > { %v3745_v11 = vpop.xlane.xlu0 %3744 }
0x1748   : > { %v3746_v12 = vmul.f32 0.03125, %v3745_v11 }
0x174a   : > { %v3747_v13 = vsub.f32 %v3740_v8, %v3746_v12 }
0x174c   : > { %v3748_v14 = vmul.f32 %v3747_v13, %v3747_v13 }
0x174e   : > { %v3749_v16 = vsel %vm1288_vm0, %v3748_v14, 0.0 }
0x174f   : > { %3750 = vadd.xlane.f32.xlu1 %v3749_v16 }
0x1753   : > { %3789 = vadd.xlane.f32.xlu1 %v3788_v17  ;;  %v12585_v17 = vld [vmem:[%s16993_s14] ss:$0 sm:$0xff] }
0x17d8   : > { %v3751_v18 = vpop.xlane.xlu1 %3750 }
0x17d9   : > { %v3752_v19 = vmul.f32 0.03125, %v3751_v18  ;;  %v3842_v18 = vld [vmem:[%s16985_s1 + $0x38] sm:$0xff] }
0x17db   : > { %v3753_v20 = vadd.f32 1e-05, %v3752_v19 }
0x17dc   : > { %v3790_v21 = vpop.xlane.xlu1 %3789 }
0x17dd   : > { %14978 = vrsqrt.f32 %v3753_v20  ;;  %v3792_v22 = vmul.f32 0.03125, %v3790_v21 }
0x17df   : > { %v3794_v23 = vsub.f32 %v15874_v15, %v3792_v22 }
0x17e1   : > { %v3796_v24 = vmul.f32 %v3794_v23, %v3794_v23 }
0x17e3   : > { %v3800_v25 = vsel %vm1288_vm0, %v3796_v24, 0.0  ;;  %v3841_v24 = vld [vmem:[%s16985_s1 + $0x30] sm:$0xff] }
0x17e4   : > { %3801 = vadd.xlane.f32.xlu1 %v3800_v25  ;;  %v3840_v25 = vld [vmem:[%s16985_s1 + $0x28] sm:$0xff] }
0x17ea   : > { %v14979_v26 = vpop.eup %14978 }
0x17eb   : > { %v3755_v28 = vmul.f32 %v14979_v26, %v3747_v13  ;;  %v3839_v26 = vld [vmem:[%s16985_s1 + $0x20] sm:$0xff] }
0x17ed   : > { %v3762_v29 = vmul.f32 %v12575_v27, %v3755_v28  ;;  %v15940_v27 = vld [vmem:[%s1279_s18 + $0x8] sm:$0xff]  ;;  %v15942_v28 = vld [vmem:[%s1279_s18] sm:$0xff]  ;;  %s16997_s18 = sld [smem:[#allocation37_spill]] }
0x17ee   : > { %vm4200_vm5 = vcmp.gt.f32.partialorder %v15940_v27, 0.5  ;;  %vm4199_vm6 = vcmp.gt.f32.partialorder %v15942_v28, 0.5 }
0x17ef   : > { %v3769_v31 = vadd.f32 %v12576_v39, %v3762_v29 }
0x17f1   : > { %v3771_v32 = vadd.f32 %v3770_v30, %v3769_v31 }
0x17f3   : > { %3772 = vst.msk [vmem:[#allocation2] sm:$0xff] %vm1288_vm0, %v3771_v32 }
0x17fa   : > { %v15885_v33 = vld [vmem:[#allocation2] sm:$0xff] }
0x17fb   : > { %v3785_v34 = vsel %vm1288_vm0, %v15885_v33, 0.0 }
0x17fc   : > { %3786 = vadd.xlane.f32.xlu0 %v3785_v34 }
0x186d   : > { %v3802_v46 = vpop.xlane.xlu1 %3801 }
0x186e   : > { %v3804_v47 = vmul.f32 0.03125, %v3802_v46 }
0x1870   : > { %v3806_v48 = vadd.f32 1e-05, %v3804_v47 }
0x1872   : > { %14980 = vrsqrt.f32 %v3806_v48 }
0x187f   : > { %v14981_v52 = vpop.eup %14980 }
0x1880   : > { %v3810_v54 = vmul.f32 %v14981_v52, %v3794_v23 }
0x1882   : > { %v3818_v1 = vmul.f32 %v12577_v55, %v3810_v54 }
0x1884   : > { %v15900_v61 = vadd.f32 %v12578_v59, %v3818_v1 }
0x1885   : > { %v3787_v35 = vpop.xlane.xlu0 %3786 }
0x1886   : > { %v3791_v36 = vmul.f32 0.03125, %v3787_v35  ;;  %v12597_v35 = vld [vmem:[%s16992_s12 + $0x1] ss:$0 sm:$0xff] }
0x1888   : > { %v3793_v37 = vsub.f32 %v15885_v33, %v3791_v36 }
0x188a   : > { %v3795_v38 = vmul.f32 %v3793_v37, %v3793_v37 }
0x188c   : > { %v3797_v40 = vsel %vm1288_vm0, %v3795_v38, 0.0 }
0x188d   : > { %3798 = vadd.xlane.f32.xlu0 %v3797_v40 }
0x1916   : > { %v3799_v49 = vpop.xlane.xlu0 %3798 }
0x1917   : > { %v3803_v50 = vmul.f32 0.03125, %v3799_v49 }
0x1919   : > { %v3805_v51 = vadd.f32 1e-05, %v3803_v50 }
0x191b   : > { %14982 = vrsqrt.f32 %v3805_v51  ;;  %v3834_v51 = vld [vmem:[%s16984_s3 + $0x38] sm:$0xff] }
0x1928   : > { %v14983_v56 = vpop.eup %14982 }
0x1929   : > { %v3809_v57 = vmul.f32 %v14983_v56, %v3793_v37 }
0x192b   : > { %v3817_v58 = vmul.f32 %v12577_v55, %v3809_v57 }
0x192d   : > { %v15898_v60 = vadd.f32 %v12578_v59, %v3817_v58  ;;  %v3833_v58 = vld [vmem:[%s16984_s3 + $0x30] sm:$0xff]  ;;  %v3832_v59 = vld [vmem:[%s16984_s3 + $0x28] sm:$0xff] }
0x192f   : > { %13966 = vmatprep.mubr.msk.f32.mxu0 %vm1288_vm0, %v15898_v60 }
0x1930   : > { %13967 = vmatmul.mubr.msk.f32.vlgmr.msra.gmra.mxu0 %vm1288_vm0, %v15900_v61 }
0x1931   : > { %13970 = vmatpush3.msra.mxu0 %v3838_v45  ;;  %13977 = vmatprep.mubr.msk.f32.mxu0 %vm1288_vm0, %v15898_v60 }
0x1932   : > { %13971 = vmatprep.subr.mxu0 %v3837_v62 }
0x1933   : > { %13972 = vmatpush3.msra.mxu0 %v3837_v62  ;;  %v3831_v62 = vld [vmem:[%s16984_s3 + $0x20] sm:$0xff] }
0x1934   : > { %13973 = vmatprep.subr.mxu0 %v3836_v63 }
0x1935   : > { %13974 = vmatpush3.msra.mxu0 %v3836_v63  ;;  %v3850_v63 = vld [vmem:[%s16989_s8 + $0x38] sm:$0xff] }
0x1936   : > { %13975 = vmatprep.subr.mxu0 %v3835_v0 }
0x1937   : > { %13976 = vmatpush3.msra.mxu0 %v3835_v0  ;;  %v3849_v0 = vld [vmem:[%s16989_s8 + $0x30] sm:$0xff] }
0x1938   : > { %13978 = vmatmul.mubr.msk.f32.vlgmr.msra.gmra.mxu0 %vm1288_vm0, %v15900_v61  ;;  %13980 = vmatprep.subr.mxu0 %v3846_v2 }
0x1939   : > { %13981 = vmatpush3.msra.mxu0 %v3846_v2  ;;  %13988 = vmatprep.mubr.msk.f32.mxu0 %vm1288_vm0, %v15898_v60  ;;  %v3848_v2 = vld [vmem:[%s16989_s8 + $0x28] sm:$0xff] }
0x193a   : > { %13982 = vmatprep.subr.mxu0 %v3845_v3 }
0x193b   : > { %13983 = vmatpush3.msra.mxu0 %v3845_v3  ;;  %v3847_v3 = vld [vmem:[%s16989_s8 + $0x20] sm:$0xff] }
0x193c   : > { %13984 = vmatprep.subr.mxu0 %v3844_v4 }
0x193d   : > { %13985 = vmatpush3.msra.mxu0 %v3844_v4 }
0x193e   : > { %13986 = vmatprep.subr.mxu0 %v3843_v53 }
0x193f   : > { %13987 = vmatpush3.msra.mxu0 %v3843_v53 }
0x1940   : > { %13989 = vmatmul.mubr.msk.f32.vlgmr.msra.gmra.mxu0 %vm1288_vm0, %v15900_v61 }
0x19f0   : > { %v13968_v5 = vpop.f32.mrf.mxu0 }
0x19f1   : > { %v3945_v16 = vadd.f32 %v13968_v5, %v12579_v6  ;;  %v12594_v5 = vld [vmem:[%s16991_s9 + $0x1] ss:$0 sm:$0xff] }
0x19f2   : > { %v3939_v10 = vpop.f32.mrf.mxu0 }
0x19f3   : > { %v3940_v7 = vadd.f32 %v12579_v6, %v3939_v10  ;;  %v4111_v20 = vmul.f32 0.25, %v3945_v16 }
0x19f5   : > { %v4110_v8 = vmul.f32 0.25, %v3940_v7 }
0x19f7   : > { %13995 = vmatprep.mubr.msk.f32.mxu0 %vm1583_vm2, %v4110_v8 }
0x19f8   : > { %v13979_v11 = vpop.f32.mrf.mxu0 }
0x19f9   : > { %v4026_v12 = vadd.f32 %v13979_v11, %v12582_v9  ;;  %v12600_v11 = vld [vmem:[%s16993_s14 + $0x1] ss:$0 sm:$0xff] }
0x19fa   : > { %v4020_v13 = vpop.f32.mrf.mxu0 }
0x19fb   : > { %v4021_v14 = vadd.f32 %v12582_v9, %v4020_v13  ;;  %13991 = vmatprep.subr.msk.mxu0 %vm1583_vm2, %v4026_v12 }
0x19fc   : > { %13992 = vmatpush3.xpose.msk.msra.mxu0 %vm1583_vm2, %v4026_v12 }
0x19fd   : > { %13993 = vmatprep.subr.msk.mxu0 %vm1583_vm2, %v4021_v14 }
0x1a00   : > { %v13990_v19 = vpop.f32.mrf.mxu0  ;;  %13994 = vmatpush3.xpose.msk.msra.mxu0 %vm1583_vm2, %v4021_v14 }
0x1a01   : > { %v4107_v21 = vadd.f32 %v13990_v19, %v12585_v17  ;;  %14016 = vmatprep.subr.mxu0 %v3842_v18 }
0x1a02   : > { %v4101_v22 = vpop.f32.mrf.mxu0 }
0x1a03   : > { %v4102_v23 = vadd.f32 %v12585_v17, %v4101_v22  ;;  %13996 = vmatmul.mubr.msk.f32.vlgmr.msra.gmra.mxu0 %vm1583_vm2, %v4111_v20  ;;  %13998 = vmatprep.subr.mxu1 %v4107_v21 }
0x1a04   : > { %13999 = vmatpush3.msra.mxu1 %v4107_v21  ;;  %14017 = vmatpush3.msra.mxu0 %v3842_v18 }
0x1a05   : > { %14024 = vmatprep.mubr.msk.f32.mxu0 %vm1288_vm0, %v15898_v60  ;;  %14000 = vmatprep.subr.mxu1 %v4102_v23 }
0x1a06   : > { %14018 = vmatprep.subr.mxu0 %v3841_v24  ;;  %14001 = vmatpush3.msra.mxu1 %v4102_v23 }
0x1a07   : > { %14019 = vmatpush3.msra.mxu0 %v3841_v24  ;;  %14005 = vmatprep.subr.mxu1 %v3834_v51 }
0x1a08   : > { %14020 = vmatprep.subr.mxu0 %v3840_v25 }
0x1a09   : > { %14021 = vmatpush3.msra.mxu0 %v3840_v25 }
0x1a0a   : > { %14022 = vmatprep.subr.mxu0 %v3839_v26 }
0x1a0b   : > { %14023 = vmatpush3.msra.mxu0 %v3839_v26 }
0x1a0c   : > { %14025 = vmatmul.mubr.msk.f32.vlgmr.msra.gmra.mxu0 %vm1288_vm0, %v15900_v61 }
0x1ac3   : > { %v13997_v39 = vpop.f32.mrf.mxu0 }
0x1ac4   : > { %v4202_v29 = vsel %vm4200_vm5, %v13997_v39, -1.7014117e+38 }
0x1ac5   : > { %v4190_v30 = vpop.f32.mrf.mxu0  ;;  %v4206_v31 = vsel %vm1583_vm2, %v4202_v29, -inf }
0x1ac6   : > { %v4201_v32 = vsel %vm4199_vm6, %v4190_v30, -1.7014117e+38  ;;  %4207 = vmax.xlane.f32.xlu1 %v4206_v31 }
0x1ac7   : > { %v4203_v34 = vsel %vm1583_vm2, %v4201_v32, -inf }
0x1ac8   : > { %4204 = vmax.xlane.f32.xlu0 %v4203_v34  ;;  %v3858_v34 = vld [vmem:[%s16995_s26 + $0x8] sm:$0xff] }
0x1acc   : > { %v14026_v36 = vpop.f32.mrf.mxu0 }
0x1acd   : > { %v4465_v37 = vadd.f32 %v14026_v36, %v12597_v35 }
0x1ace   : > { %v4459_v38 = vpop.f32.mrf.mxu0 }
0x1acf   : > { %v4460_v40 = vadd.f32 %v12597_v35, %v4459_v38  ;;  %14038 = vmatprep.subr.msk.mxu0 %vm1583_vm2, %v4465_v37 }
0x1ad0   : > { %14039 = vmatpush3.xpose.msk.msra.mxu0 %vm1583_vm2, %v4465_v37 }
0x1ad1   : > { %14040 = vmatprep.subr.msk.mxu0 %vm1583_vm2, %v4460_v40 }
0x1ad4   : > { %14041 = vmatpush3.xpose.msk.msra.mxu0 %vm1583_vm2, %v4460_v40 }
0x1b4f   : > { %v4208_v41 = vpop.xlane.xlu1 %4207 }
0x1b50   : > { %v4210_v42 = vsub.f32 %v4202_v29, %v4208_v41 }
0x1b51   : > { %v4205_v43 = vpop.xlane.xlu0 %4204 }
0x1b52   : > { %v4213_v44 = vmul.f32 1.442695, %v4210_v42  ;;  %v4209_v45 = vsub.f32 %v4201_v32, %v4205_v43  ;;  %v3857_v42 = vld [vmem:[%s16995_s26] sm:$0xff]  ;;  %v3860_v43 = vld [vmem:[%s16995_s26 + $0x18] sm:$0xff] }
0x1b53   : > { %14052 = vmatprep.subr.mxu0 %v3860_v43 }
0x1b54   : > { %14984 = vpow2.f32 %v4213_v44  ;;  %v4211_v46 = vmul.f32 1.442695, %v4209_v45  ;;  %v3859_v44 = vld [vmem:[%s16995_s26 + $0x10] sm:$0xff] }
0x1b56   : > { %14986 = vpow2.f32 %v4211_v46 }
0x1b61   : > { %v14985_v47 = vpop.eup %14984 }
0x1b62   : > { %v4218_v48 = vsel %vm1583_vm2, %v14985_v47, 0.0 }
0x1b63   : > { %v14987_v49 = vpop.eup %14986  ;;  %4219 = vadd.xlane.f32.xlu1 %v4218_v48 }
0x1b64   : > { %v4215_v50 = vsel %vm1583_vm2, %v14987_v49, 0.0 }
0x1b65   : > { %4216 = vadd.xlane.f32.xlu0 %v4215_v50 }
0x1bec   : > { %v4220_v52 = vpop.xlane.xlu1 %4219 }
0x1bed   : > { %14988 = vrcp.f32 %v4220_v52 }
0x1bee   : > { %v4217_v54 = vpop.xlane.xlu0 %4216 }
0x1bef   : > { %14990 = vrcp.f32 %v4217_v54 }
0x1bfa   : > { %v14989_v55 = vpop.eup %14988 }
0x1bfb   : > { %v4224_v1 = vmul.f32 %v14989_v55, %v14985_v47 }
0x1bfc   : > { %v14991_v56 = vpop.eup %14990 }
0x1bfd   : > { %v4223_v57 = vmul.f32 %v14991_v56, %v14987_v49 }
0x1bff   : > { %14002 = vmatprep.mubr.msk.f32.mxu1 %vm1583_vm2, %v4223_v57 }
0x1c00   : > { %14003 = vmatmul.mubr.msk.f32.vlgmr.msra.gmra.mxu1 %vm1583_vm2, %v4224_v1 }
0x1c01   : > { %14006 = vmatpush3.msra.mxu1 %v3834_v51  ;;  %14013 = vmatprep.mubr.msk.f32.mxu1 %vm1288_vm0, %v15898_v60  ;;  %v12613_v51 = vld [vmem:[%s16996_s16] ss:$0 sm:$0xff] }
0x1c02   : > { %14007 = vmatprep.subr.mxu1 %v3833_v58 }
0x1c03   : > { %14008 = vmatpush3.msra.mxu1 %v3833_v58 }
0x1c04   : > { %14009 = vmatprep.subr.mxu1 %v3832_v59 }
0x1c05   : > { %14010 = vmatpush3.msra.mxu1 %v3832_v59 }
0x1c06   : > { %14011 = vmatprep.subr.mxu1 %v3831_v62 }
0x1c07   : > { %14012 = vmatpush3.msra.mxu1 %v3831_v62 }
0x1c08   : > { %14014 = vmatmul.mubr.msk.f32.vlgmr.msra.gmra.mxu1 %vm1288_vm0, %v15900_v61  ;;  %14027 = vmatprep.subr.mxu1 %v3850_v63 }
0x1c09   : > { %14028 = vmatpush3.msra.mxu1 %v3850_v63  ;;  %14035 = vmatprep.mubr.msk.f32.mxu1 %vm1288_vm0, %v15898_v60 }
0x1c0a   : > { %14029 = vmatprep.subr.mxu1 %v3849_v0 }
0x1c0b   : > { %14030 = vmatpush3.msra.mxu1 %v3849_v0 }
0x1c0c   : > { %14031 = vmatprep.subr.mxu1 %v3848_v2 }
0x1c0d   : > { %14032 = vmatpush3.msra.mxu1 %v3848_v2 }
0x1c0e   : > { %14033 = vmatprep.subr.mxu1 %v3847_v3 }
0x1c0f   : > { %14034 = vmatpush3.msra.mxu1 %v3847_v3 }
0x1c10   : > { %14036 = vmatmul.mubr.msk.f32.vlgmr.msra.gmra.mxu1 %vm1288_vm0, %v15900_v61 }
0x1cc0   : > { %v14004_v4 = vpop.f32.mrf.mxu1 }
0x1cc2   : > { %v4297_v53 = vpop.f32.mrf.mxu1 }
0x1cc8   : > { %v14015_v6 = vpop.f32.mrf.mxu1 }
0x1cc9   : > { %v4384_v10 = vadd.f32 %v14015_v6, %v12594_v5  ;;  %v4963_v6 = vld [vmem:[%s16997_s18 + $0x18] sm:$0xff] }
0x1cca   : > { %v4378_v7 = vpop.f32.mrf.mxu1 }
0x1ccb   : > { %v4379_v8 = vadd.f32 %v12594_v5, %v4378_v7  ;;  %v4550_v9 = vmul.f32 0.25, %v4384_v10  ;;  %v4962_v10 = vld [vmem:[%s16997_s18 + $0x10] sm:$0xff]  ;;  %v4961_v7 = vld [vmem:[%s16997_s18 + $0x8] sm:$0xff] }
0x1ccd   : > { %v4549_v60 = vmul.f32 0.25, %v4379_v8  ;;  %v4960_v8 = vld [vmem:[%s16997_s18] sm:$0xff] }
0x1ccf   : > { %14042 = vmatprep.mubr.msk.f32.mxu0 %vm1583_vm2, %v4549_v60 }
0x1cd0   : > { %v14037_v12 = vpop.f32.mrf.mxu1  ;;  %14043 = vmatmul.mubr.msk.f32.vlgmr.msra.gmra.mxu0 %vm1583_vm2, %v4550_v9 }
0x1cd1   : > { %v4546_v13 = vadd.f32 %v14037_v12, %v12600_v11  ;;  %14053 = vmatpush3.msra.mxu0 %v3860_v43  ;;  %v5070_v43 = vld [vmem:[%s17001_s24] sm:$0xff] }
0x1cd2   : > { %v4540_v14 = vpop.f32.mrf.mxu1  ;;  %14054 = vmatprep.subr.mxu0 %v3859_v44 }
0x1cd3   : > { %v4541_v16 = vadd.f32 %v12600_v11, %v4540_v14  ;;  %14045 = vmatprep.subr.mxu1 %v4546_v13  ;;  %14055 = vmatpush3.msra.mxu0 %v3859_v44 }
0x1cd4   : > { %14046 = vmatpush3.msra.mxu1 %v4546_v13  ;;  %14066 = vmatprep.subr.mxu0 %v4963_v6 }
0x1cd5   : > { %14047 = vmatprep.subr.mxu1 %v4541_v16 }
0x1cd6   : > { %14048 = vmatpush3.msra.mxu1 %v4541_v16 }
0x1cd7   : > { %14059 = vmatprep.subr.mxu1 %v3858_v34 }
0x1d90   : > { %v14044_v61 = vpop.f32.mrf.mxu0 }
0x1d91   : > { %v4639_v17 = vsel %vm4200_vm5, %v14044_v61, -1.7014117e+38  ;;  %v12614_v61 = vld [vmem:[%s16998_s11] ss:$0 sm:$0xff]  ;;  %s17002_s11 = sld [smem:[#allocation38_spill]] }
0x1d92   : > { %v4629_v18 = vpop.f32.mrf.mxu0  ;;  %v4643_v19 = vsel %vm1583_vm2, %v4639_v17, -inf }
0x1d93   : > { %v4638_v20 = vsel %vm4199_vm6, %v4629_v18, -1.7014117e+38  ;;  %4644 = vmax.xlane.f32.xlu1 %v4643_v19 }
0x1d94   : > { %v4640_v21 = vsel %vm1583_vm2, %v4638_v20, -inf }
0x1d95   : > { %4641 = vmax.xlane.f32.xlu0 %v4640_v21  ;;  %v12615_v21 = vld [vmem:[%s17000_s21] ss:$0 sm:$0xff] }
0x1d97   : > { %s17003_s25 = smov %s17002_s11  ;;  %v12616_v44 = vld [vmem:[%s17002_s11] ss:$0 sm:$0xff]  ;;  %s1264_s11 = sand.u32 1, %s15183_s7  }
0x1d98   : > { %s14882_s28 = smul.u32 24, %s1264_s11 }
0x1d9a   : > { %s16221_s7 = scalar_lea.vmem [#allocation4], %s14882_s28  ;;  %s13026_s28 = sshll.u32 (%p15476_p4), %s15464_s0, 3 }
0x1d9b   : > { %s12279_s11 = scalar_lea.vmem (%p15476_p4), %s15449_s4, %s13026_s28 }
0x1e1c   : > { %v4645_v22 = vpop.xlane.xlu1 %4644 }
0x1e1d   : > { %v4647_v23 = vsub.f32 %v4639_v17, %v4645_v22 }
0x1e1e   : > { %v4642_v24 = vpop.xlane.xlu0 %4641 }
0x1e1f   : > { %v4650_v25 = vmul.f32 1.442695, %v4647_v23  ;;  %v4646_v26 = vsub.f32 %v4638_v20, %v4642_v24 }
0x1e21   : > { %14992 = vpow2.f32 %v4650_v25  ;;  %v4648_v39 = vmul.f32 1.442695, %v4646_v26  ;;  %v5085_v25 = vld [vmem:[%s17001_s24 + $0x78] sm:$0xff]  ;;  %v5084_v26 = vld [vmem:[%s17001_s24 + $0x70] sm:$0xff] }
0x1e23   : > { %14994 = vpow2.f32 %v4648_v39  ;;  %v5083_v39 = vld [vmem:[%s17001_s24 + $0x68] sm:$0xff] }
0x1e2e   : > { %v14993_v29 = vpop.eup %14992 }
0x1e2f   : > { %v4655_v30 = vsel %vm1583_vm2, %v14993_v29, 0.0 }
0x1e30   : > { %v14995_v31 = vpop.eup %14994  ;;  %4656 = vadd.xlane.f32.xlu1 %v4655_v30  ;;  %v5081_v30 = vld [vmem:[%s17001_s24 + $0x58] sm:$0xff] }
0x1e31   : > { %v4652_v32 = vsel %vm1583_vm2, %v14995_v31, 0.0 }
0x1e32   : > { %4653 = vadd.xlane.f32.xlu0 %v4652_v32  ;;  %v5079_v32 = vld [vmem:[%s17001_s24 + $0x48] sm:$0xff] }
0x1eb9   : > { %v4657_v35 = vpop.xlane.xlu1 %4656 }
0x1eba   : > { %14996 = vrcp.f32 %v4657_v35  ;;  %v5077_v35 = vld [vmem:[%s17001_s24 + $0x38] sm:$0xff] }
0x1ebb   : > { %v4654_v36 = vpop.xlane.xlu0 %4653 }
0x1ebc   : > { %14998 = vrcp.f32 %v4654_v36  ;;  %v5076_v36 = vld [vmem:[%s17001_s24 + $0x30] sm:$0xff] }
0x1ec7   : > { %v14997_v37 = vpop.eup %14996 }
0x1ec8   : > { %v4661_v41 = vmul.f32 %v14997_v37, %v14993_v29  ;;  %v5082_v29 = vld [vmem:[%s17001_s24 + $0x60] sm:$0xff]  ;;  %v5075_v37 = vld [vmem:[%s17001_s24 + $0x28] sm:$0xff] }
0x1ec9   : > { %v14999_v38 = vpop.eup %14998 }
0x1eca   : > { %v4660_v40 = vmul.f32 %v14999_v38, %v14995_v31  ;;  %v5080_v31 = vld [vmem:[%s17001_s24 + $0x50] sm:$0xff]  ;;  %v5074_v38 = vld [vmem:[%s17001_s24 + $0x20] sm:$0xff] }
0x1ecc   : > { %14049 = vmatprep.mubr.msk.f32.mxu1 %vm1583_vm2, %v4660_v40  ;;  %v5073_v40 = vld [vmem:[%s17001_s24 + $0x18] sm:$0xff] }
0x1ecd   : > { %14050 = vmatmul.mubr.msk.f32.vlgmr.msra.gmra.mxu1 %vm1583_vm2, %v4661_v41  ;;  %v5072_v41 = vld [vmem:[%s17001_s24 + $0x10] sm:$0xff] }
0x1ece   : > { %14060 = vmatpush3.msra.mxu1 %v3858_v34  ;;  %14063 = vmatprep.mubr.msk.f32.mxu1 %vm1583_vm2, %v4297_v53  ;;  %v5078_v34 = vld [vmem:[%s17001_s24 + $0x40] sm:$0xff] }
0x1ecf   : > { %14061 = vmatprep.subr.mxu1 %v3857_v42 }
0x1ed0   : > { %14062 = vmatpush3.msra.mxu1 %v3857_v42  ;;  %v5071_v42 = vld [vmem:[%s17001_s24 + $0x8] sm:$0xff] }
0x1ed1   : > { %14064 = vmatmul.mubr.msk.f32.vlgmr.msra.gmra.mxu1 %vm1583_vm2, %v14004_v4  ;;  %14077 = vmatprep.subr.mxu1 %v5085_v25 }
0x1ed2   : > { %14078 = vmatpush3.msra.mxu1 %v5085_v25  ;;  %v12635_v25 = vld [vmem:[%s16985_s1 + $0x58] sm:$0xff] }
0x1ed3   : > { %14079 = vmatprep.subr.mxu1 %v5084_v26 }
0x1ed4   : > { %14080 = vmatpush3.msra.mxu1 %v5084_v26 }
0x1ed5   : > { %14081 = vmatprep.subr.mxu1 %v5083_v39 }
0x1ed6   : > { %14082 = vmatpush3.msra.mxu1 %v5083_v39 }
0x1ed7   : > { %14083 = vmatprep.subr.mxu1 %v5082_v29 }
0x1ed8   : > { %14084 = vmatpush3.msra.mxu1 %v5082_v29 }
0x1ed9   : > { %14085 = vmatprep.subr.mxu1 %v5081_v30 }
0x1eda   : > { %14086 = vmatpush3.msra.mxu1 %v5081_v30 }
0x1edb   : > { %14087 = vmatprep.subr.mxu1 %v5080_v31 }
0x1edc   : > { %14088 = vmatpush3.msra.mxu1 %v5080_v31 }
0x1edd   : > { %14089 = vmatprep.subr.mxu1 %v5079_v32 }
0x1ede   : > { %14090 = vmatpush3.msra.mxu1 %v5079_v32 }
0x1edf   : > { %14091 = vmatprep.subr.mxu1 %v5078_v34 }
0x1ee0   : > { %14092 = vmatpush3.msra.mxu1 %v5078_v34 }
0x1ee1   : > { %14093 = vmatprep.subr.mxu1 %v5077_v35 }
0x1ee2   : > { %14094 = vmatpush3.msra.mxu1 %v5077_v35  ;;  %v12622_v35 = vld [vmem:[%s16987_s5 + $0x1] ss:$0 sm:$0xff] }
0x1ee3   : > { %14095 = vmatprep.subr.mxu1 %v5076_v36 }
0x1ee4   : > { %14096 = vmatpush3.msra.mxu1 %v5076_v36 }
0x1ee5   : > { %14097 = vmatprep.subr.mxu1 %v5075_v37 }
0x1ee6   : > { %14098 = vmatpush3.msra.mxu1 %v5075_v37 }
0x1ee7   : > { %14099 = vmatprep.subr.mxu1 %v5074_v38 }
0x1ee8   : > { %14100 = vmatpush3.msra.mxu1 %v5074_v38 }
0x1ee9   : > { %14101 = vmatprep.subr.mxu1 %v5073_v40 }
0x1eea   : > { %14102 = vmatpush3.msra.mxu1 %v5073_v40 }
0x1eeb   : > { %14103 = vmatprep.subr.mxu1 %v5072_v41 }
0x1eec   : > { %14104 = vmatpush3.msra.mxu1 %v5072_v41 }
0x1eed   : > { %14105 = vmatprep.subr.mxu1 %v5071_v42 }
0x1eee   : > { %14106 = vmatpush3.msra.mxu1 %v5071_v42  ;;  %v12623_v42 = vld [vmem:[%s16988_s6 + $0x1] ss:$0 sm:$0xff] }
0x1eef   : > { %14107 = vmatprep.subr.mxu1 %v5070_v43 }
0x1ef0   : > { %14108 = vmatpush3.msra.mxu1 %v5070_v43 }
0x1f8d   : > { %v14051_v45 = vpop.f32.mrf.mxu1 }
0x1f8f   : > { %v4734_v46 = vpop.f32.mrf.mxu1 }
0x1f90   : > { %14056 = vmatprep.mubr.msk.f32.mxu0 %vm1583_vm2, %v4734_v46 }
0x1f91   : > { %14057 = vmatmul.mubr.msk.f32.vlgmr.msra.gmra.mxu0 %vm1583_vm2, %v14051_v45  ;;  %v14065_v47 = vpop.f32.mrf.mxu1 }
0x1f92   : > { %14067 = vmatpush3.msra.mxu0 %v4963_v6 }
0x1f93   : > { %v4896_v50 = vpop.f32.mrf.mxu1  ;;  %14068 = vmatprep.subr.mxu0 %v4962_v10 }
0x1f94   : > { %14069 = vmatpush3.msra.mxu0 %v4962_v10 }
0x1f95   : > { %14070 = vmatprep.subr.mxu0 %v4961_v7 }
0x1f96   : > { %14071 = vmatpush3.msra.mxu0 %v4961_v7 }
0x1f97   : > { %14072 = vmatprep.subr.mxu0 %v4960_v8 }
0x1f98   : > { %14073 = vmatpush3.msra.mxu0 %v4960_v8 }
0x2051   : > { %v14058_v48 = vpop.f32.mrf.mxu0 }
0x2052   : > { %v4902_v49 = vadd.f32 %v14065_v47, %v14058_v48 }
0x2053   : > { %v4815_v52 = vpop.f32.mrf.mxu0 }
0x2054   : > { %v4906_v54 = vadd.f32 %v4902_v49, %v15874_v15  ;;  %v4897_v55 = vadd.f32 %v4896_v50, %v4815_v52 }
0x2056   : > { %v16001_v56 = vadd.f32 %v12613_v51, %v4906_v54  ;;  %v4905_v57 = vadd.f32 %v4897_v55, %v15885_v33 }
0x2058   : > { %v16004_v1 = vadd.f32 %v12613_v51, %v4905_v57  ;;  %v4921_v58 = vsel %vm1288_vm0, %v16001_v56, 0.0 }
0x2059   : > { %4922 = vadd.xlane.f32.xlu1 %v4921_v58 }
0x205a   : > { %v4918_v59 = vsel %vm1288_vm0, %v16004_v1, 0.0 }
0x205b   : > { %4919 = vadd.xlane.f32.xlu0 %v4918_v59 }
0x20e2   : > { %v4923_v62 = vpop.xlane.xlu1 %4922 }
0x20e3   : > { %v4925_v15 = vmul.f32 0.03125, %v4923_v62 }
0x20e4   : > { %v4920_v63 = vpop.xlane.xlu0 %4919 }
0x20e5   : > { %v4927_v0 = vsub.f32 %v16001_v56, %v4925_v15  ;;  %v4924_v33 = vmul.f32 0.03125, %v4920_v63 }
0x20e7   : > { %v4926_v2 = vsub.f32 %v16004_v1, %v4924_v33  ;;  %v4929_v3 = vmul.f32 %v4927_v0, %v4927_v0 }
0x20e9   : > { %v4933_v4 = vsel %vm1288_vm0, %v4929_v3, 0.0  ;;  %v4928_v53 = vmul.f32 %v4926_v2, %v4926_v2 }
0x20ea   : > { %4934 = vadd.xlane.f32.xlu1 %v4933_v4 }
0x20eb   : > { %v4930_v5 = vsel %vm1288_vm0, %v4928_v53, 0.0 }
0x20ec   : > { %4931 = vadd.xlane.f32.xlu0 %v4930_v5  ;;  %v12619_v5 = vld [vmem:[%s15434_s13] ss:$0 sm:$0xff] }
0x2173   : > { %v4935_v60 = vpop.xlane.xlu1 %4934 }
0x2174   : > { %v4937_v9 = vmul.f32 0.03125, %v4935_v60 }
0x2175   : > { %v4932_v11 = vpop.xlane.xlu0 %4931 }
0x2176   : > { %v4939_v12 = vadd.f32 1e-05, %v4937_v9  ;;  %v4936_v13 = vmul.f32 0.03125, %v4932_v11 }
0x2178   : > { %15000 = vrsqrt.f32 %v4939_v12  ;;  %v4938_v14 = vadd.f32 1e-05, %v4936_v13 }
0x217a   : > { %15002 = vrsqrt.f32 %v4938_v14 }
0x2185   : > { %v15001_v16 = vpop.eup %15000 }
0x2186   : > { %v4943_v17 = vmul.f32 %v15001_v16, %v4927_v0 }
0x2187   : > { %v15003_v18 = vpop.eup %15002 }
0x2188   : > { %v4942_v19 = vmul.f32 %v15003_v18, %v4926_v2  ;;  %v4951_v20 = vmul.f32 %v12614_v61, %v4943_v17 }
0x218a   : > { %v4950_v22 = vmul.f32 %v12614_v61, %v4942_v19  ;;  %v4959_v24 = vadd.f32 %v12615_v21, %v4951_v20 }
0x218c   : > { %v4958_v23 = vadd.f32 %v12615_v21, %v4950_v22  ;;  %v12627_v21 = vld [vmem:[%s16984_s3 + $0x58] sm:$0xff]  ;;  %v12626_v22 = vld [vmem:[%s16984_s3 + $0x50] sm:$0xff] }
0x218d   : > { %14112 = vmatprep.subr.mxu0 %v12627_v21 }
0x218e   : > { %14074 = vmatprep.mubr.msk.f32.mxu0 %vm1288_vm0, %v4958_v23  ;;  %v12625_v23 = vld [vmem:[%s16984_s3 + $0x48] sm:$0xff] }
0x218f   : > { %14075 = vmatmul.mubr.msk.f32.vlgmr.msra.gmra.mxu0 %vm1288_vm0, %v4959_v24  ;;  %v12624_v24 = vld [vmem:[%s16984_s3 + $0x40] sm:$0xff] }
0x2190   : > { %14113 = vmatpush3.msra.mxu0 %v12627_v21 }
0x2191   : > { %14114 = vmatprep.subr.mxu0 %v12626_v22 }
0x2192   : > { %14115 = vmatpush3.msra.mxu0 %v12626_v22 }
0x2193   : > { %14116 = vmatprep.subr.mxu0 %v12625_v23 }
0x2194   : > { %14117 = vmatpush3.msra.mxu0 %v12625_v23 }
0x2195   : > { %14118 = vmatprep.subr.mxu0 %v12624_v24 }
0x2196   : > { %14119 = vmatpush3.msra.mxu0 %v12624_v24 }
0x2197   : > { %14123 = vmatprep.subr.mxu0 %v12635_v25 }
0x224f   : > { %v14076_v45 = vpop.f32.mrf.mxu0 }
0x2250   : > { %v5049_v46 = vadd.f32 %v14076_v45, %v12616_v44  ;;  %v12634_v45 = vld [vmem:[%s16985_s1 + $0x50] sm:$0xff] }
0x2251   : > { %v5043_v47 = vpop.f32.mrf.mxu0 }
0x2252   : > { %v5053_v48 = vmul.f32 %v5049_v46, %v5049_v46  ;;  %v5044_v49 = vadd.f32 %v12616_v44, %v5043_v47  ;;  %v12632_v47 = vld [vmem:[%s16985_s1 + $0x40] sm:$0xff] }
0x2254   : > { %v5055_v50 = vmul.f32 %v5053_v48, %v5049_v46  ;;  %v5052_v51 = vmul.f32 %v5044_v49, %v5044_v49  ;;  %v12643_v48 = vld [vmem:[%s16989_s8 + $0x58] sm:$0xff] }
0x2256   : > { %v5057_v52 = vmul.f32 0.044715, %v5055_v50  ;;  %v5054_v54 = vmul.f32 %v5052_v51, %v5044_v49  ;;  %v12641_v50 = vld [vmem:[%s16989_s8 + $0x48] sm:$0xff]  ;;  %v12640_v51 = vld [vmem:[%s16989_s8 + $0x40] sm:$0xff] }
0x2258   : > { %v5059_v55 = vadd.f32 %v5057_v52, %v5049_v46  ;;  %v5056_v57 = vmul.f32 0.044715, %v5054_v54  ;;  %v12658_v54 = vld [vmem:[%s16991_s9 + $0x2] ss:$0 sm:$0xff] }
0x225a   : > { %v5061_v58 = vmul.f32 0.7978846, %v5059_v55  ;;  %v5058_v59 = vadd.f32 %v5056_v57, %v5044_v49 }
0x225c   : > { %15004 = vtanh.f32 %v5061_v58  ;;  %v5060_v62 = vmul.f32 0.7978846, %v5058_v59  ;;  %v12661_v59 = vld [vmem:[%s16992_s12 + $0x2] ss:$0 sm:$0xff] }
0x225e   : > { %15006 = vtanh.f32 %v5060_v62 }
0x2269   : > { %v15005_v15 = vpop.eup %15004 }
0x226a   : > { %v5065_v63 = vadd.f32 1.0, %v15005_v15 }
0x226b   : > { %v15007_v0 = vpop.eup %15006 }
0x226c   : > { %v5064_v33 = vadd.f32 1.0, %v15007_v0  ;;  %v5067_v2 = vmul.f32 0.5, %v5065_v63 }
0x226e   : > { %v5066_v3 = vmul.f32 0.5, %v5064_v33  ;;  %v5069_v53 = vmul.f32 %v5067_v2, %v5049_v46  ;;  %v12633_v46 = vld [vmem:[%s16985_s1 + $0x48] sm:$0xff]  ;;  %v12664_v2 = vld [vmem:[%s16993_s14 + $0x2] ss:$0 sm:$0xff] }
0x2270   : > { %v5068_v4 = vmul.f32 %v5066_v3, %v5044_v49  ;;  %v12642_v49 = vld [vmem:[%s16989_s8 + $0x50] sm:$0xff]  ;;  %v12639_v3 = vld [vmem:[%s16985_s1 + $0x78] sm:$0xff] }
0x2272   : > { %14109 = vmatprep.mubr.f32.mxu1 %v5068_v4 }
0x2273   : > { %14110 = vmatmul.mubr.f32.vlgmr.msra.gmra.mxu1 %v5069_v53 }
0x2333   : > { %v14111_v6 = vpop.f32.mrf.mxu1 }
0x2334   : > { %v5165_v10 = vadd.f32 %v14111_v6, %v12619_v5 }
0x2335   : > { %v5159_v7 = vpop.f32.mrf.mxu1 }
0x2336   : > { %v16041_v8 = vadd.f32 %v5165_v10, %v16001_v56  ;;  %v5160_v60 = vadd.f32 %v12619_v5, %v5159_v7  ;;  %v12638_v7 = vld [vmem:[%s16985_s1 + $0x70] sm:$0xff] }
0x2338   : > { %v16044_v9 = vadd.f32 %v5160_v60, %v16004_v1  ;;  %v5177_v11 = vsel %vm1288_vm0, %v16041_v8, 0.0  ;;  %v12637_v60 = vld [vmem:[%s16985_s1 + $0x68] sm:$0xff] }
0x2339   : > { %5178 = vadd.xlane.f32.xlu1 %v5177_v11  ;;  %v12636_v11 = vld [vmem:[%s16985_s1 + $0x60] sm:$0xff] }
0x233a   : > { %v5174_v12 = vsel %vm1288_vm0, %v16044_v9, 0.0 }
0x233b   : > { %5175 = vadd.xlane.f32.xlu0 %v5174_v12 }
0x23c2   : > { %v5179_v13 = vpop.xlane.xlu1 %5178 }
0x23c3   : > { %v5181_v14 = vmul.f32 0.03125, %v5179_v13 }
0x23c4   : > { %v5176_v16 = vpop.xlane.xlu0 %5175 }
0x23c5   : > { %v5183_v56 = vsub.f32 %v16041_v8, %v5181_v14  ;;  %v5180_v61 = vmul.f32 0.03125, %v5176_v16 }
0x23c7   : > { %v5182_v1 = vsub.f32 %v16044_v9, %v5180_v61  ;;  %v5185_v17 = vmul.f32 %v5183_v56, %v5183_v56 }
0x23c9   : > { %v5189_v18 = vsel %vm1288_vm0, %v5185_v17, 0.0  ;;  %v5184_v19 = vmul.f32 %v5182_v1, %v5182_v1 }
0x23ca   : > { %5190 = vadd.xlane.f32.xlu1 %v5189_v18 }
0x23cb   : > { %v5186_v20 = vsel %vm1288_vm0, %v5184_v19, 0.0 }
0x23cc   : > { %5187 = vadd.xlane.f32.xlu0 %v5186_v20 }
0x2453   : > { %v5191_v26 = vpop.xlane.xlu1 %5190 }
0x2454   : > { %v5193_v39 = vmul.f32 0.03125, %v5191_v26 }
0x2455   : > { %v5188_v29 = vpop.xlane.xlu0 %5187 }
0x2456   : > { %v5195_v30 = vadd.f32 1e-05, %v5193_v39  ;;  %v5192_v31 = vmul.f32 0.03125, %v5188_v29 }
0x2458   : > { %15008 = vrsqrt.f32 %v5195_v30  ;;  %v5194_v32 = vadd.f32 1e-05, %v5192_v31 }
0x245a   : > { %15010 = vrsqrt.f32 %v5194_v32  ;;  %v12631_v32 = vld [vmem:[%s16984_s3 + $0x78] sm:$0xff] }
0x2465   : > { %v15009_v34 = vpop.eup %15008 }
0x2466   : > { %v5199_v36 = vmul.f32 %v15009_v34, %v5183_v56 }
0x2467   : > { %v15011_v37 = vpop.eup %15010 }
0x2468   : > { %v5198_v38 = vmul.f32 %v15011_v37, %v5182_v1  ;;  %v5207_v40 = vmul.f32 %v12622_v35, %v5199_v36  ;;  %v12676_v1 = vld [vmem:[%s16992_s12 + $0x3] ss:$0 sm:$0xff] }
0x246a   : > { %v5206_v41 = vmul.f32 %v12622_v35, %v5198_v38  ;;  %v16063_v44 = vadd.f32 %v12623_v42, %v5207_v40 }
0x246c   : > { %v16061_v43 = vadd.f32 %v12623_v42, %v5206_v41  ;;  %v12630_v41 = vld [vmem:[%s16984_s3 + $0x70] sm:$0xff]  ;;  %v12629_v42 = vld [vmem:[%s16984_s3 + $0x68] sm:$0xff] }
0x246e   : > { %14120 = vmatprep.mubr.msk.f32.mxu0 %vm1288_vm0, %v16061_v43 }
0x246f   : > { %14121 = vmatmul.mubr.msk.f32.vlgmr.msra.gmra.mxu0 %vm1288_vm0, %v16063_v44 }
0x2470   : > { %14124 = vmatpush3.msra.mxu0 %v12635_v25  ;;  %14131 = vmatprep.mubr.msk.f32.mxu0 %vm1288_vm0, %v16061_v43 }
0x2471   : > { %14125 = vmatprep.subr.mxu0 %v12634_v45 }
0x2472   : > { %14126 = vmatpush3.msra.mxu0 %v12634_v45  ;;  %v12628_v45 = vld [vmem:[%s16984_s3 + $0x60] sm:$0xff] }
0x2473   : > { %14127 = vmatprep.subr.mxu0 %v12633_v46 }
0x2474   : > { %14128 = vmatpush3.msra.mxu0 %v12633_v46  ;;  %v12647_v46 = vld [vmem:[%s16989_s8 + $0x78] sm:$0xff] }
0x2475   : > { %14129 = vmatprep.subr.mxu0 %v12632_v47 }
0x2476   : > { %14130 = vmatpush3.msra.mxu0 %v12632_v47  ;;  %v12646_v47 = vld [vmem:[%s16989_s8 + $0x70] sm:$0xff] }
0x2477   : > { %14132 = vmatmul.mubr.msk.f32.vlgmr.msra.gmra.mxu0 %vm1288_vm0, %v16063_v44  ;;  %14134 = vmatprep.subr.mxu0 %v12643_v48 }
0x2478   : > { %14135 = vmatpush3.msra.mxu0 %v12643_v48  ;;  %14142 = vmatprep.mubr.msk.f32.mxu0 %vm1288_vm0, %v16061_v43  ;;  %v12645_v48 = vld [vmem:[%s16989_s8 + $0x68] sm:$0xff] }
0x2479   : > { %14136 = vmatprep.subr.mxu0 %v12642_v49 }
0x247a   : > { %14137 = vmatpush3.msra.mxu0 %v12642_v49  ;;  %v12644_v49 = vld [vmem:[%s16989_s8 + $0x60] sm:$0xff] }
0x247b   : > { %14138 = vmatprep.subr.mxu0 %v12641_v50 }
0x247c   : > { %14139 = vmatpush3.msra.mxu0 %v12641_v50 }
0x247d   : > { %14140 = vmatprep.subr.mxu0 %v12640_v51 }
0x247e   : > { %14141 = vmatpush3.msra.mxu0 %v12640_v51 }
0x247f   : > { %14143 = vmatmul.mubr.msk.f32.vlgmr.msra.gmra.mxu0 %vm1288_vm0, %v16063_v44 }
0x252f   : > { %v14122_v52 = vpop.f32.mrf.mxu0 }
0x2530   : > { %v5341_v33 = vadd.f32 %v14122_v52, %v12658_v54  ;;  %v12673_v52 = vld [vmem:[%s16991_s9 + $0x3] ss:$0 sm:$0xff] }
0x2531   : > { %v5335_v55 = vpop.f32.mrf.mxu0 }
0x2532   : > { %v5336_v57 = vadd.f32 %v12658_v54, %v5335_v55  ;;  %v5507_v53 = vmul.f32 0.25, %v5341_v33 }
0x2534   : > { %v5506_v58 = vmul.f32 0.25, %v5336_v57 }
0x2536   : > { %14149 = vmatprep.mubr.msk.f32.mxu0 %vm1583_vm2, %v5506_v58 }
0x2537   : > { %v14133_v62 = vpop.f32.mrf.mxu0 }
0x2538   : > { %v5422_v15 = vadd.f32 %v14133_v62, %v12661_v59  ;;  %v12679_v62 = vld [vmem:[%s16993_s14 + $0x3] ss:$0 sm:$0xff] }
0x2539   : > { %v5416_v63 = vpop.f32.mrf.mxu0 }
0x253a   : > { %v5417_v0 = vadd.f32 %v12661_v59, %v5416_v63  ;;  %14145 = vmatprep.subr.msk.mxu0 %vm1583_vm2, %v5422_v15 }
0x253b   : > { %14146 = vmatpush3.xpose.msk.msra.mxu0 %vm1583_vm2, %v5422_v15 }
0x253c   : > { %14147 = vmatprep.subr.msk.mxu0 %vm1583_vm2, %v5417_v0 }
0x253f   : > { %v14144_v4 = vpop.f32.mrf.mxu0  ;;  %14148 = vmatpush3.xpose.msk.msra.mxu0 %vm1583_vm2, %v5417_v0 }
0x2540   : > { %v5503_v5 = vadd.f32 %v14144_v4, %v12664_v2  ;;  %14170 = vmatprep.subr.mxu0 %v12639_v3 }
0x2541   : > { %v5497_v6 = vpop.f32.mrf.mxu0 }
0x2542   : > { %v5498_v10 = vadd.f32 %v12664_v2, %v5497_v6  ;;  %14150 = vmatmul.mubr.msk.f32.vlgmr.msra.gmra.mxu0 %vm1583_vm2, %v5507_v53  ;;  %14152 = vmatprep.subr.mxu1 %v5503_v5 }
0x2543   : > { %14153 = vmatpush3.msra.mxu1 %v5503_v5  ;;  %14171 = vmatpush3.msra.mxu0 %v12639_v3 }
0x2544   : > { %14178 = vmatprep.mubr.msk.f32.mxu0 %vm1288_vm0, %v16061_v43  ;;  %14154 = vmatprep.subr.mxu1 %v5498_v10 }
0x2545   : > { %14172 = vmatprep.subr.mxu0 %v12638_v7  ;;  %14155 = vmatpush3.msra.mxu1 %v5498_v10 }
0x2546   : > { %14173 = vmatpush3.msra.mxu0 %v12638_v7  ;;  %14159 = vmatprep.subr.mxu1 %v12631_v32 }
0x2547   : > { %14174 = vmatprep.subr.mxu0 %v12637_v60 }
0x2548   : > { %14175 = vmatpush3.msra.mxu0 %v12637_v60 }
0x2549   : > { %14176 = vmatprep.subr.mxu0 %v12636_v11 }
0x254a   : > { %14177 = vmatpush3.msra.mxu0 %v12636_v11 }
0x254b   : > { %14179 = vmatmul.mubr.msk.f32.vlgmr.msra.gmra.mxu0 %vm1288_vm0, %v16063_v44 }
0x2602   : > { %v14151_v12 = vpop.f32.mrf.mxu0 }
0x2603   : > { %v5596_v13 = vsel %vm4200_vm5, %v14151_v12, -1.7014117e+38 }
0x2604   : > { %v5586_v14 = vpop.f32.mrf.mxu0  ;;  %v5600_v16 = vsel %vm1583_vm2, %v5596_v13, -inf }
0x2605   : > { %v5595_v56 = vsel %vm4199_vm6, %v5586_v14, -1.7014117e+38  ;;  %5601 = vmax.xlane.f32.xlu1 %v5600_v16 }
0x2606   : > { %v5597_v61 = vsel %vm1583_vm2, %v5595_v56, -inf }
0x2607   : > { %5598 = vmax.xlane.f32.xlu0 %v5597_v61  ;;  %v12655_v61 = vld [vmem:[%s16995_s26 + $0x28] sm:$0xff] }
0x260b   : > { %v14180_v17 = vpop.f32.mrf.mxu0 }
0x260c   : > { %v5859_v18 = vadd.f32 %v14180_v17, %v12676_v1 }
0x260d   : > { %v5853_v19 = vpop.f32.mrf.mxu0 }
0x260e   : > { %v5854_v20 = vadd.f32 %v12676_v1, %v5853_v19  ;;  %14192 = vmatprep.subr.msk.mxu0 %vm1583_vm2, %v5859_v18 }
0x260f   : > { %14193 = vmatpush3.xpose.msk.msra.mxu0 %vm1583_vm2, %v5859_v18 }
0x2610   : > { %14194 = vmatprep.subr.msk.mxu0 %vm1583_vm2, %v5854_v20 }
0x2613   : > { %14195 = vmatpush3.xpose.msk.msra.mxu0 %vm1583_vm2, %v5854_v20 }
0x268e   : > { %v5602_v21 = vpop.xlane.xlu1 %5601 }
0x268f   : > { %v5604_v22 = vsub.f32 %v5596_v13, %v5602_v21 }
0x2690   : > { %v5599_v23 = vpop.xlane.xlu0 %5598 }
0x2691   : > { %v5607_v24 = vmul.f32 1.442695, %v5604_v22  ;;  %v5603_v25 = vsub.f32 %v5595_v56, %v5599_v23  ;;  %v12654_v22 = vld [vmem:[%s16995_s26 + $0x20] sm:$0xff]  ;;  %v12657_v23 = vld [vmem:[%s16995_s26 + $0x38] sm:$0xff] }
0x2692   : > { %14206 = vmatprep.subr.mxu0 %v12657_v23 }
0x2693   : > { %15012 = vpow2.f32 %v5607_v24  ;;  %v5605_v26 = vmul.f32 1.442695, %v5603_v25  ;;  %v12656_v24 = vld [vmem:[%s16995_s26 + $0x30] sm:$0xff] }
0x2695   : > { %15014 = vpow2.f32 %v5605_v26 }
0x26a0   : > { %v15013_v39 = vpop.eup %15012 }
0x26a1   : > { %v5612_v29 = vsel %vm1583_vm2, %v15013_v39, 0.0 }
0x26a2   : > { %v15015_v30 = vpop.eup %15014  ;;  %5613 = vadd.xlane.f32.xlu1 %v5612_v29 }
0x26a3   : > { %v5609_v31 = vsel %vm1583_vm2, %v15015_v30, 0.0 }
0x26a4   : > { %5610 = vadd.xlane.f32.xlu0 %v5609_v31 }
0x272b   : > { %v5614_v34 = vpop.xlane.xlu1 %5613 }
0x272c   : > { %15016 = vrcp.f32 %v5614_v34 }
0x272d   : > { %v5611_v35 = vpop.xlane.xlu0 %5610 }
0x272e   : > { %15018 = vrcp.f32 %v5611_v35 }
0x2739   : > { %v15017_v36 = vpop.eup %15016 }
0x273a   : > { %v5618_v40 = vmul.f32 %v15017_v36, %v15013_v39 }
0x273b   : > { %v15019_v37 = vpop.eup %15018 }
0x273c   : > { %v5617_v38 = vmul.f32 %v15019_v37, %v15015_v30 }
0x273e   : > { %14156 = vmatprep.mubr.msk.f32.mxu1 %vm1583_vm2, %v5617_v38 }
0x273f   : > { %14157 = vmatmul.mubr.msk.f32.vlgmr.msra.gmra.mxu1 %vm1583_vm2, %v5618_v40 }
0x2740   : > { %14160 = vmatpush3.msra.mxu1 %v12631_v32  ;;  %14167 = vmatprep.mubr.msk.f32.mxu1 %vm1288_vm0, %v16061_v43  ;;  %v12693_v32 = vld [vmem:[%s16996_s16 + $0x1] ss:$0 sm:$0xff] }
0x2741   : > { %14161 = vmatprep.subr.mxu1 %v12630_v41 }
0x2742   : > { %14162 = vmatpush3.msra.mxu1 %v12630_v41 }
0x2743   : > { %14163 = vmatprep.subr.mxu1 %v12629_v42 }
0x2744   : > { %14164 = vmatpush3.msra.mxu1 %v12629_v42 }
0x2745   : > { %14165 = vmatprep.subr.mxu1 %v12628_v45 }
0x2746   : > { %14166 = vmatpush3.msra.mxu1 %v12628_v45 }
0x2747   : > { %14168 = vmatmul.mubr.msk.f32.vlgmr.msra.gmra.mxu1 %vm1288_vm0, %v16063_v44  ;;  %14181 = vmatprep.subr.mxu1 %v12647_v46 }
0x2748   : > { %14182 = vmatpush3.msra.mxu1 %v12647_v46  ;;  %14189 = vmatprep.mubr.msk.f32.mxu1 %vm1288_vm0, %v16061_v43 }
0x2749   : > { %14183 = vmatprep.subr.mxu1 %v12646_v47 }
0x274a   : > { %14184 = vmatpush3.msra.mxu1 %v12646_v47 }
0x274b   : > { %14185 = vmatprep.subr.mxu1 %v12645_v48 }
0x274c   : > { %14186 = vmatpush3.msra.mxu1 %v12645_v48 }
0x274d   : > { %14187 = vmatprep.subr.mxu1 %v12644_v49 }
0x274e   : > { %14188 = vmatpush3.msra.mxu1 %v12644_v49 }
0x274f   : > { %14190 = vmatmul.mubr.msk.f32.vlgmr.msra.gmra.mxu1 %vm1288_vm0, %v16063_v44 }
0x27ff   : > { %v14158_v50 = vpop.f32.mrf.mxu1 }
0x2801   : > { %v5691_v51 = vpop.f32.mrf.mxu1 }
0x2807   : > { %v14169_v54 = vpop.f32.mrf.mxu1 }
0x2808   : > { %v5778_v55 = vadd.f32 %v14169_v54, %v12673_v52  ;;  %v12701_v54 = vld [vmem:[%s16997_s18 + $0x38] sm:$0xff] }
0x2809   : > { %v5772_v57 = vpop.f32.mrf.mxu1 }
0x280a   : > { %v5773_v58 = vadd.f32 %v12673_v52, %v5772_v57  ;;  %v5944_v59 = vmul.f32 0.25, %v5778_v55  ;;  %v12700_v55 = vld [vmem:[%s16997_s18 + $0x30] sm:$0xff]  ;;  %v12699_v57 = vld [vmem:[%s16997_s18 + $0x28] sm:$0xff] }
0x280c   : > { %v5943_v43 = vmul.f32 0.25, %v5773_v58  ;;  %v12698_v58 = vld [vmem:[%s16997_s18 + $0x20] sm:$0xff] }
0x280e   : > { %14196 = vmatprep.mubr.msk.f32.mxu0 %vm1583_vm2, %v5943_v43 }
0x280f   : > { %v14191_v15 = vpop.f32.mrf.mxu1  ;;  %14197 = vmatmul.mubr.msk.f32.vlgmr.msra.gmra.mxu0 %vm1583_vm2, %v5944_v59 }
0x2810   : > { %v5940_v63 = vadd.f32 %v14191_v15, %v12679_v62  ;;  %14207 = vmatpush3.msra.mxu0 %v12657_v23  ;;  %v12706_v23 = vld [vmem:[%s17001_s24 + $0x80] sm:$0xff] }
0x2811   : > { %v5934_v0 = vpop.f32.mrf.mxu1  ;;  %14208 = vmatprep.subr.mxu0 %v12656_v24 }
0x2812   : > { %v5935_v33 = vadd.f32 %v12679_v62, %v5934_v0  ;;  %14199 = vmatprep.subr.mxu1 %v5940_v63  ;;  %14209 = vmatpush3.msra.mxu0 %v12656_v24  ;;  %v12703_v24 = vld [vmem:[%s17003_s25 + $0x1] ss:$0 sm:$0xff] }
0x2813   : > { %14200 = vmatpush3.msra.mxu1 %v5940_v63  ;;  %14220 = vmatprep.subr.mxu0 %v12701_v54 }
0x2814   : > { %14201 = vmatprep.subr.mxu1 %v5935_v33 }
0x2815   : > { %14202 = vmatpush3.msra.mxu1 %v5935_v33 }
0x2816   : > { %14213 = vmatprep.subr.mxu1 %v12655_v61 }
0x28cf   : > { %v14198_v44 = vpop.f32.mrf.mxu0 }
0x28d0   : > { %v6033_v2 = vsel %vm4200_vm5, %v14198_v44, -1.7014117e+38  ;;  %v12696_v44 = vld [vmem:[%s16999_s19 + $0x1] ss:$0 sm:$0xff] }
0x28d1   : > { %v6023_v3 = vpop.f32.mrf.mxu0  ;;  %v6037_v4 = vsel %vm1583_vm2, %v6033_v2, -inf }
0x28d2   : > { %v6032_v53 = vsel %vm4199_vm6, %v6023_v3, -1.7014117e+38  ;;  %6038 = vmax.xlane.f32.xlu1 %v6037_v4 }
0x28d3   : > { %v6034_v5 = vsel %vm1583_vm2, %v6032_v53, -inf }
0x28d4   : > { %6035 = vmax.xlane.f32.xlu0 %v6034_v5  ;;  %v12697_v5 = vld [vmem:[%s17000_s21 + $0x1] ss:$0 sm:$0xff] }
0x295b   : > { %v6039_v6 = vpop.xlane.xlu1 %6038 }
0x295c   : > { %v6041_v10 = vsub.f32 %v6033_v2, %v6039_v6 }
0x295d   : > { %v6036_v7 = vpop.xlane.xlu0 %6035 }
0x295e   : > { %v6044_v60 = vmul.f32 1.442695, %v6041_v10  ;;  %v6040_v11 = vsub.f32 %v6032_v53, %v6036_v7 }
0x2960   : > { %15020 = vpow2.f32 %v6044_v60  ;;  %v6042_v12 = vmul.f32 1.442695, %v6040_v11  ;;  %v12721_v60 = vld [vmem:[%s17001_s24 + $0xf8] sm:$0xff]  ;;  %v12720_v11 = vld [vmem:[%s17001_s24 + $0xf0] sm:$0xff] }
0x2962   : > { %15022 = vpow2.f32 %v6042_v12  ;;  %v12719_v12 = vld [vmem:[%s17001_s24 + $0xe8] sm:$0xff] }
0x296d   : > { %v15021_v13 = vpop.eup %15020 }
0x296e   : > { %v6049_v14 = vsel %vm1583_vm2, %v15021_v13, 0.0 }
0x296f   : > { %v15023_v16 = vpop.eup %15022  ;;  %6050 = vadd.xlane.f32.xlu1 %v6049_v14  ;;  %v12717_v14 = vld [vmem:[%s17001_s24 + $0xd8] sm:$0xff] }
0x2970   : > { %v6046_v56 = vsel %vm1583_vm2, %v15023_v16, 0.0 }
0x2971   : > { %6047 = vadd.xlane.f32.xlu0 %v6046_v56  ;;  %v12715_v56 = vld [vmem:[%s17001_s24 + $0xc8] sm:$0xff] }
0x29f8   : > { %v6051_v1 = vpop.xlane.xlu1 %6050 }
0x29f9   : > { %15024 = vrcp.f32 %v6051_v1  ;;  %v12713_v1 = vld [vmem:[%s17001_s24 + $0xb8] sm:$0xff] }
0x29fa   : > { %v6048_v17 = vpop.xlane.xlu0 %6047 }
0x29fb   : > { %15026 = vrcp.f32 %v6048_v17  ;;  %v12712_v17 = vld [vmem:[%s17001_s24 + $0xb0] sm:$0xff] }
0x2a06   : > { %v15025_v18 = vpop.eup %15024 }
0x2a07   : > { %v6055_v21 = vmul.f32 %v15025_v18, %v15021_v13  ;;  %v12718_v13 = vld [vmem:[%s17001_s24 + $0xe0] sm:$0xff]  ;;  %v12711_v18 = vld [vmem:[%s17001_s24 + $0xa8] sm:$0xff] }
0x2a08   : > { %v15027_v19 = vpop.eup %15026 }
0x2a09   : > { %v6054_v20 = vmul.f32 %v15027_v19, %v15023_v16  ;;  %v12716_v16 = vld [vmem:[%s17001_s24 + $0xd0] sm:$0xff]  ;;  %v12710_v19 = vld [vmem:[%s17001_s24 + $0xa0] sm:$0xff] }
0x2a0b   : > { %14203 = vmatprep.mubr.msk.f32.mxu1 %vm1583_vm2, %v6054_v20  ;;  %v12709_v20 = vld [vmem:[%s17001_s24 + $0x98] sm:$0xff] }
0x2a0c   : > { %14204 = vmatmul.mubr.msk.f32.vlgmr.msra.gmra.mxu1 %vm1583_vm2, %v6055_v21  ;;  %v12708_v21 = vld [vmem:[%s17001_s24 + $0x90] sm:$0xff] }
0x2a0d   : > { %14214 = vmatpush3.msra.mxu1 %v12655_v61  ;;  %14217 = vmatprep.mubr.msk.f32.mxu1 %vm1583_vm2, %v5691_v51  ;;  %v12714_v61 = vld [vmem:[%s17001_s24 + $0xc0] sm:$0xff] }
0x2a0e   : > { %14215 = vmatprep.subr.mxu1 %v12654_v22 }
0x2a0f   : > { %14216 = vmatpush3.msra.mxu1 %v12654_v22  ;;  %v12707_v22 = vld [vmem:[%s17001_s24 + $0x88] sm:$0xff] }
0x2a10   : > { %14218 = vmatmul.mubr.msk.f32.vlgmr.msra.gmra.mxu1 %vm1583_vm2, %v14158_v50  ;;  %14231 = vmatprep.subr.mxu1 %v12721_v60 }
0x2a11   : > { %14232 = vmatpush3.msra.mxu1 %v12721_v60 }
0x2a12   : > { %14233 = vmatprep.subr.mxu1 %v12720_v11 }
0x2a13   : > { %14234 = vmatpush3.msra.mxu1 %v12720_v11 }
0x2a14   : > { %14235 = vmatprep.subr.mxu1 %v12719_v12 }
0x2a15   : > { %14236 = vmatpush3.msra.mxu1 %v12719_v12  ;;  %v12724_v12 = vld [vmem:[%s15439_s20] ss:$0 sm:$0xff] }
0x2a16   : > { %14237 = vmatprep.subr.mxu1 %v12718_v13 }
0x2a17   : > { %14238 = vmatpush3.msra.mxu1 %v12718_v13 }
0x2a18   : > { %14239 = vmatprep.subr.mxu1 %v12717_v14 }
0x2a19   : > { %14240 = vmatpush3.msra.mxu1 %v12717_v14  ;;  %v12725_v14 = vld [vmem:[%s15444_s27] ss:$0 sm:$0xff] }
0x2a1a   : > { %14241 = vmatprep.subr.mxu1 %v12716_v16 }
0x2a1b   : > { %14242 = vmatpush3.msra.mxu1 %v12716_v16 }
0x2a1c   : > { %14243 = vmatprep.subr.mxu1 %v12715_v56 }
0x2a1d   : > { %14244 = vmatpush3.msra.mxu1 %v12715_v56 }
0x2a1e   : > { %14245 = vmatprep.subr.mxu1 %v12714_v61 }
0x2a1f   : > { %14246 = vmatpush3.msra.mxu1 %v12714_v61  ;;  %v12726_v61 = vld [vmem:[%s16987_s5] ss:$0 sm:$0xff] }
0x2a20   : > { %14247 = vmatprep.subr.mxu1 %v12713_v1 }
0x2a21   : > { %14248 = vmatpush3.msra.mxu1 %v12713_v1  ;;  %v3776_v1 = vlaneseq }
0x2a22   : > { %14249 = vmatprep.subr.mxu1 %v12712_v17 }
0x2a23   : > { %14250 = vmatpush3.msra.mxu1 %v12712_v17 }
0x2a24   : > { %14251 = vmatprep.subr.mxu1 %v12711_v18 }
0x2a25   : > { %14252 = vmatpush3.msra.mxu1 %v12711_v18 }
0x2a26   : > { %14253 = vmatprep.subr.mxu1 %v12710_v19 }
0x2a27   : > { %14254 = vmatpush3.msra.mxu1 %v12710_v19  ;;  %v12727_v19 = vld [vmem:[%s16988_s6] ss:$0 sm:$0xff] }
0x2a28   : > { %14255 = vmatprep.subr.mxu1 %v12709_v20 }
0x2a29   : > { %14256 = vmatpush3.msra.mxu1 %v12709_v20 }
0x2a2a   : > { %14257 = vmatprep.subr.mxu1 %v12708_v21 }
0x2a2b   : > { %14258 = vmatpush3.msra.mxu1 %v12708_v21  ;;  %v16210_v21 = vshrl.u32 %v3776_v1, 7 }
0x2a2c   : > { %14259 = vmatprep.subr.mxu1 %v12707_v22 }
0x2a2d   : > { %14260 = vmatpush3.msra.mxu1 %v12707_v22  ;;  %vm6618_vm7 = vcmp.lt.s32.totalorder %v16210_v21, 4 }
0x2a2e   : > { %14261 = vmatprep.subr.mxu1 %v12706_v23 }
0x2a2f   : > { %14262 = vmatpush3.msra.mxu1 %v12706_v23  ;;  %v6621_v23 = vld [vmem:[%s15259_s17 + $0x8] sm:$0xff] }
0x2acc   : > { %v14205_v25 = vpop.f32.mrf.mxu1 }
0x2ace   : > { %v6128_v26 = vpop.f32.mrf.mxu1 }
0x2acf   : > { %14210 = vmatprep.mubr.msk.f32.mxu0 %vm1583_vm2, %v6128_v26 }
0x2ad0   : > { %14211 = vmatmul.mubr.msk.f32.vlgmr.msra.gmra.mxu0 %vm1583_vm2, %v14205_v25  ;;  %v14219_v39 = vpop.f32.mrf.mxu1 }
0x2ad1   : > { %14221 = vmatpush3.msra.mxu0 %v12701_v54 }
0x2ad2   : > { %v6290_v31 = vpop.f32.mrf.mxu1  ;;  %14222 = vmatprep.subr.mxu0 %v12700_v55 }
0x2ad3   : > { %14223 = vmatpush3.msra.mxu0 %v12700_v55 }
0x2ad4   : > { %14224 = vmatprep.subr.mxu0 %v12699_v57 }
0x2ad5   : > { %14225 = vmatpush3.msra.mxu0 %v12699_v57 }
0x2ad6   : > { %14226 = vmatprep.subr.mxu0 %v12698_v58 }
0x2ad7   : > { %14227 = vmatpush3.msra.mxu0 %v12698_v58 }
0x2b90   : > { %v14212_v29 = vpop.f32.mrf.mxu0 }
0x2b91   : > { %v6296_v30 = vadd.f32 %v14219_v39, %v14212_v29 }
0x2b92   : > { %v6209_v34 = vpop.f32.mrf.mxu0 }
0x2b93   : > { %v6300_v35 = vadd.f32 %v6296_v30, %v16041_v8  ;;  %v6291_v36 = vadd.f32 %v6290_v31, %v6209_v34 }
0x2b95   : > { %v16156_v37 = vadd.f32 %v12693_v32, %v6300_v35  ;;  %v6299_v38 = vadd.f32 %v6291_v36, %v16044_v9 }
0x2b97   : > { %v16159_v40 = vadd.f32 %v12693_v32, %v6299_v38  ;;  %v6318_v41 = vsel %vm1288_vm0, %v16156_v37, 0.0 }
0x2b98   : > { %6319 = vadd.xlane.f32.xlu1 %v6318_v41 }
0x2b99   : > { %v6315_v42 = vsel %vm1288_vm0, %v16159_v40, 0.0 }
0x2b9a   : > { %6316 = vadd.xlane.f32.xlu0 %v6315_v42 }
0x2c21   : > { %v6320_v45 = vpop.xlane.xlu1 %6319 }
0x2c22   : > { %v6322_v8 = vmul.f32 0.03125, %v6320_v45 }
0x2c23   : > { %v6317_v46 = vpop.xlane.xlu0 %6316 }
0x2c24   : > { %v6324_v47 = vsub.f32 %v16156_v37, %v6322_v8  ;;  %v6321_v9 = vmul.f32 0.03125, %v6317_v46 }
0x2c26   : > { %v6323_v48 = vsub.f32 %v16159_v40, %v6321_v9  ;;  %v6326_v49 = vmul.f32 %v6324_v47, %v6324_v47 }
0x2c28   : > { %v6330_v50 = vsel %vm1288_vm0, %v6326_v49, 0.0  ;;  %v6325_v51 = vmul.f32 %v6323_v48, %v6323_v48 }
0x2c29   : > { %6331 = vadd.xlane.f32.xlu1 %v6330_v50 }
0x2c2a   : > { %v6327_v52 = vsel %vm1288_vm0, %v6325_v51, 0.0 }
0x2c2b   : > { %6328 = vadd.xlane.f32.xlu0 %v6327_v52  ;;  %v12723_v52 = vld [vmem:[%s15434_s13 + $0x1] ss:$0 sm:$0xff] }
0x2cb2   : > { %v6332_v43 = vpop.xlane.xlu1 %6331 }
0x2cb3   : > { %v6334_v59 = vmul.f32 0.03125, %v6332_v43  ;;  %v16197_v43 = vld [vmem:[#allocation2] sm:$0xff] }
0x2cb4   : > { %v6329_v62 = vpop.xlane.xlu0 %6328 }
0x2cb5   : > { %v6336_v15 = vadd.f32 1e-05, %v6334_v59  ;;  %v6333_v63 = vmul.f32 0.03125, %v6329_v62  ;;  %v6628_v59 = vsel %vm1288_vm0, %v16197_v43, 0.0 }
0x2cb7   : > { %15028 = vrsqrt.f32 %v6336_v15  ;;  %v6335_v0 = vadd.f32 1e-05, %v6333_v63 }
0x2cb9   : > { %15030 = vrsqrt.f32 %v6335_v0 }
0x2cc4   : > { %v15029_v33 = vpop.eup %15028 }
0x2cc5   : > { %v6340_v2 = vmul.f32 %v15029_v33, %v6324_v47 }
0x2cc6   : > { %v15031_v3 = vpop.eup %15030 }
0x2cc7   : > { %v6339_v4 = vmul.f32 %v15031_v3, %v6323_v48  ;;  %v6348_v53 = vmul.f32 %v12696_v44, %v6340_v2 }
0x2cc9   : > { %v6347_v6 = vmul.f32 %v12696_v44, %v6339_v4  ;;  %v6356_v7 = vadd.f32 %v12697_v5, %v6348_v53 }
0x2ccb   : > { %v6355_v10 = vadd.f32 %v12697_v5, %v6347_v6 }
0x2ccd   : > { %14228 = vmatprep.mubr.msk.f32.mxu0 %vm1288_vm0, %v6355_v10 }
0x2cce   : > { %14229 = vmatmul.mubr.msk.f32.vlgmr.msra.gmra.mxu0 %vm1288_vm0, %v6356_v7 }
0x2d8e   : > { %v14230_v25 = vpop.f32.mrf.mxu0 }
0x2d8f   : > { %v6448_v26 = vadd.f32 %v14230_v25, %v12703_v24  ;;  %v15160_v25 = vld [vmem:[%s15492_s2] sm:$0xff] }
0x2d90   : > { %v6442_v39 = vpop.f32.mrf.mxu0 }
0x2d91   : > { %v6452_v29 = vmul.f32 %v6448_v26, %v6448_v26  ;;  %v6443_v30 = vadd.f32 %v12703_v24, %v6442_v39 }
0x2d93   : > { %v6454_v31 = vmul.f32 %v6452_v29, %v6448_v26  ;;  %v6451_v32 = vmul.f32 %v6443_v30, %v6443_v30 }
0x2d95   : > { %v6456_v34 = vmul.f32 0.044715, %v6454_v31  ;;  %v6453_v35 = vmul.f32 %v6451_v32, %v6443_v30 }
0x2d97   : > { %v6458_v36 = vadd.f32 %v6456_v34, %v6448_v26  ;;  %v6455_v38 = vmul.f32 0.044715, %v6453_v35 }
0x2d99   : > { %v6460_v41 = vmul.f32 0.7978846, %v6458_v36  ;;  %v6457_v42 = vadd.f32 %v6455_v38, %v6443_v30  ;;  %v6673_v38 = vld [vmem:[%s16984_s3 + $0x18] sm:$0xff] }
0x2d9a   : > { %14266 = vmatprep.subr.mxu0 %v6673_v38 }
0x2d9b   : > { %15032 = vtanh.f32 %v6460_v41  ;;  %v6459_v45 = vmul.f32 0.7978846, %v6457_v42  ;;  %14267 = vmatpush3.msra.mxu0 %v6673_v38  ;;  %v6672_v41 = vld [vmem:[%s16984_s3 + $0x10] sm:$0xff]  ;;  %v6671_v42 = vld [vmem:[%s16984_s3 + $0x8] sm:$0xff] }
0x2d9c   : > { %14268 = vmatprep.subr.mxu0 %v6672_v41 }
0x2d9d   : > { %15034 = vtanh.f32 %v6459_v45  ;;  %14269 = vmatpush3.msra.mxu0 %v6672_v41  ;;  %v6670_v45 = vld [vmem:[%s16984_s3] sm:$0xff] }
0x2d9e   : > { %14270 = vmatprep.subr.mxu0 %v6671_v42 }
0x2d9f   : > { %14271 = vmatpush3.msra.mxu0 %v6671_v42 }
0x2da0   : > { %14272 = vmatprep.subr.mxu0 %v6670_v45 }
0x2da1   : > { %14273 = vmatpush3.msra.mxu0 %v6670_v45 }
0x2da8   : > { %v15033_v8 = vpop.eup %15032 }
0x2da9   : > { %v6464_v46 = vadd.f32 1.0, %v15033_v8  ;;  %v6681_v8 = vld [vmem:[%s16985_s1 + $0x18] sm:$0xff] }
0x2daa   : > { %v15035_v47 = vpop.eup %15034  ;;  %14277 = vmatprep.subr.mxu0 %v6681_v8 }
0x2dab   : > { %v6463_v9 = vadd.f32 1.0, %v15035_v47  ;;  %v6466_v48 = vmul.f32 0.5, %v6464_v46 }
0x2dad   : > { %v6465_v49 = vmul.f32 0.5, %v6463_v9  ;;  %v6468_v51 = vmul.f32 %v6466_v48, %v6448_v26 }
0x2daf   : > { %v6467_v50 = vmul.f32 %v6465_v49, %v6443_v30 }
0x2db1   : > { %14263 = vmatprep.mubr.f32.mxu1 %v6467_v50 }
0x2db2   : > { %14264 = vmatmul.mubr.f32.vlgmr.msra.gmra.mxu1 %v6468_v51 }
0x2e72   : > { %v14265_v54 = vpop.f32.mrf.mxu1 }
0x2e73   : > { %v6566_v55 = vadd.f32 %v14265_v54, %v12723_v52  ;;  %v6680_v52 = vld [vmem:[%s16985_s1 + $0x10] sm:$0xff]  ;;  %v6679_v54 = vld [vmem:[%s16985_s1 + $0x8] sm:$0xff] }
0x2e75   : > { %v6570_v57 = vadd.f32 %v6566_v55, %v16156_v37  ;;  %v6678_v55 = vld [vmem:[%s16985_s1] sm:$0xff] }
0x2e77   : > { %v6576_v58 = vsel %vm1288_vm0, %v6570_v57, 0.0 }
0x2e78   : > { %6577 = vadd.xlane.f32.xlu0 %v6576_v58  ;;  %v6688_v58 = vld [vmem:[%s16989_s8 + $0x10] sm:$0xff] }
0x2e7c   : > { %6629 = vadd.xlane.f32.xlu0 %v6628_v59  ;;  %v6687_v59 = vld [vmem:[%s16989_s8 + $0x8] sm:$0xff] }
0x2f01   : > { %v6578_v62 = vpop.xlane.xlu0 %6577 }
0x2f02   : > { %v6580_v15 = vmul.f32 0.03125, %v6578_v62  ;;  %v6686_v62 = vld [vmem:[%s16989_s8] sm:$0xff] }
0x2f04   : > { %v6582_v63 = vsub.f32 %v6570_v57, %v6580_v15  ;;  %v6689_v57 = vld [vmem:[%s16989_s8 + $0x18] sm:$0xff] }
0x2f05   : > { %v6630_v0 = vpop.xlane.xlu0 %6629 }
0x2f06   : > { %v6634_v33 = vmul.f32 0.03125, %v6630_v0  ;;  %v6584_v44 = vmul.f32 %v6582_v63, %v6582_v63 }
0x2f08   : > { %v6636_v2 = vsub.f32 %v16197_v43, %v6634_v33  ;;  %v6588_v37 = vsel %vm1288_vm0, %v6584_v44, 0.0 }
0x2f09   : > { %6589 = vadd.xlane.f32.xlu1 %v6588_v37 }
0x2f0a   : > { %v6638_v3 = vmul.f32 %v6636_v2, %v6636_v2 }
0x2f0c   : > { %v6640_v4 = vsel %vm1288_vm0, %v6638_v3, 0.0 }
0x2f0d   : > { %6641 = vadd.xlane.f32.xlu0 %v6640_v4 }
0x2f92   : > { %v6590_v53 = vpop.xlane.xlu1 %6589 }
0x2f93   : > { %v6592_v5 = vmul.f32 0.03125, %v6590_v53 }
0x2f95   : > { %v6594_v6 = vadd.f32 1e-05, %v6592_v5 }
0x2f96   : > { %v6642_v10 = vpop.xlane.xlu0 %6641 }
0x2f97   : > { %15036 = vrsqrt.f32 %v6594_v6  ;;  %v6646_v7 = vmul.f32 0.03125, %v6642_v10  ;;  %v12734_v6 = vld [vmem:[%s16993_s14] ss:$0 sm:$0xff]  ;;  %v6685_v10 = vld [vmem:[%s16985_s1 + $0x38] sm:$0xff] }
0x2f99   : > { %v6648_v60 = vadd.f32 1e-05, %v6646_v7 }
0x2f9b   : > { %15038 = vrsqrt.f32 %v6648_v60 }
0x2fa4   : > { %v15037_v11 = vpop.eup %15036 }
0x2fa5   : > { %v6598_v13 = vmul.f32 %v15037_v11, %v6582_v63  ;;  %v12728_v63 = vld [vmem:[%s16991_s9] ss:$0 sm:$0xff] }
0x2fa7   : > { %v6606_v16 = vmul.f32 %v12724_v12, %v6598_v13 }
0x2fa8   : > { %v15039_v56 = vpop.eup %15038 }
0x2fa9   : > { %v6614_v17 = vadd.f32 %v12725_v14, %v6606_v16  ;;  %v6652_v18 = vmul.f32 %v15039_v56, %v6636_v2  ;;  %v12731_v2 = vld [vmem:[%s16992_s12] ss:$0 sm:$0xff]  ;;  %v6684_v14 = vld [vmem:[%s16985_s1 + $0x30] sm:$0xff]  ;;  %v6683_v16 = vld [vmem:[%s16985_s1 + $0x28] sm:$0xff] }
0x2faa   : > { %v6682_v56 = vld [vmem:[%s16985_s1 + $0x20] sm:$0xff] }
0x2fab   : > { %6616 = vst.msk [vmem:[#allocation3 + $0x8] sm:$0xff] %vm1288_vm0, %v6614_v17  ;;  %v6660_v20 = vmul.f32 %v12726_v61, %v6652_v18 }
0x2fad   : > { %v16212_v22 = vadd.f32 %v12727_v19, %v6660_v20 }
0x2faf   : > { %14274 = vmatprep.mubr.msk.f32.mxu0 %vm1288_vm0, %v16212_v22 }
0x2fb2   : > { %v6617_v24 = vld [vmem:[#allocation3 + $0x8] sm:$0xff] }
0x2fb3   : > { %v6619_v26 = vsel %vm6618_vm7, %v15160_v25, %v6617_v24 }
0x2fb4   : > { %v6622_v39 = vadd.f32 %v6621_v23, %v6619_v26  ;;  %6620 = vst.msk [vmem:[%s16221_s7] sm:$0xff] %vm1288_vm0, %v6619_v26  ;;  %v12746_v23 = vld [vmem:[%s16992_s12 + $0x1] ss:$0 sm:$0xff] }
0x2fb6   : > { %6623 = vst.msk [vmem:[#allocation2 + $0x8] sm:$0xff] %vm1288_vm0, %v6622_v39 }
0x2fbd   : > { %v16226_v29 = vld [vmem:[#allocation2 + $0x8] sm:$0xff] }
0x2fbe   : > { %v6631_v30 = vsel %vm1288_vm0, %v16226_v29, 0.0 }
0x2fbf   : > { %6632 = vadd.xlane.f32.xlu1 %v6631_v30 }
0x3048   : > { %v6633_v31 = vpop.xlane.xlu1 %6632 }
0x3049   : > { %v6635_v32 = vmul.f32 0.03125, %v6633_v31 }
0x304b   : > { %v6637_v34 = vsub.f32 %v16226_v29, %v6635_v32 }
0x304d   : > { %v6639_v35 = vmul.f32 %v6637_v34, %v6637_v34 }
0x304f   : > { %v6643_v36 = vsel %vm1288_vm0, %v6639_v35, 0.0 }
0x3050   : > { %6644 = vadd.xlane.f32.xlu1 %v6643_v36 }
0x30d9   : > { %v6645_v46 = vpop.xlane.xlu1 %6644 }
0x30da   : > { %v6647_v47 = vmul.f32 0.03125, %v6645_v46 }
0x30dc   : > { %v6649_v9 = vadd.f32 1e-05, %v6647_v47 }
0x30de   : > { %15040 = vrsqrt.f32 %v6649_v9 }
0x30eb   : > { %v15041_v48 = vpop.eup %15040 }
0x30ec   : > { %v6653_v49 = vmul.f32 %v15041_v48, %v6637_v34 }
0x30ee   : > { %v6661_v50 = vmul.f32 %v12726_v61, %v6653_v49 }
0x30f0   : > { %v16237_v51 = vadd.f32 %v12727_v19, %v6661_v50 }
0x30f2   : > { %14275 = vmatmul.mubr.msk.f32.vlgmr.msra.gmra.mxu0 %vm1288_vm0, %v16237_v51 }
0x30f3   : > { %14278 = vmatpush3.msra.mxu0 %v6681_v8  ;;  %14285 = vmatprep.mubr.msk.f32.mxu0 %vm1288_vm0, %v16212_v22  ;;  %v6677_v8 = vld [vmem:[%s16984_s3 + $0x38] sm:$0xff] }
0x30f4   : > { %14279 = vmatprep.subr.mxu0 %v6680_v52 }
0x30f5   : > { %14280 = vmatpush3.msra.mxu0 %v6680_v52  ;;  %v6676_v52 = vld [vmem:[%s16984_s3 + $0x30] sm:$0xff] }
0x30f6   : > { %14281 = vmatprep.subr.mxu0 %v6679_v54 }
0x30f7   : > { %14282 = vmatpush3.msra.mxu0 %v6679_v54  ;;  %v6675_v54 = vld [vmem:[%s16984_s3 + $0x28] sm:$0xff] }
0x30f8   : > { %14283 = vmatprep.subr.mxu0 %v6678_v55 }
0x30f9   : > { %14284 = vmatpush3.msra.mxu0 %v6678_v55  ;;  %v6674_v55 = vld [vmem:[%s16984_s3 + $0x20] sm:$0xff] }
0x30fa   : > { %14286 = vmatmul.mubr.msk.f32.vlgmr.msra.gmra.mxu0 %vm1288_vm0, %v16237_v51  ;;  %14288 = vmatprep.subr.mxu0 %v6689_v57 }
0x30fb   : > { %14289 = vmatpush3.msra.mxu0 %v6689_v57  ;;  %14296 = vmatprep.mubr.msk.f32.mxu0 %vm1288_vm0, %v16212_v22  ;;  %v6693_v57 = vld [vmem:[%s16989_s8 + $0x38] sm:$0xff] }
0x30fc   : > { %14290 = vmatprep.subr.mxu0 %v6688_v58 }
0x30fd   : > { %14291 = vmatpush3.msra.mxu0 %v6688_v58  ;;  %v6692_v58 = vld [vmem:[%s16989_s8 + $0x30] sm:$0xff] }
0x30fe   : > { %14292 = vmatprep.subr.mxu0 %v6687_v59 }
0x30ff   : > { %14293 = vmatpush3.msra.mxu0 %v6687_v59  ;;  %v6691_v59 = vld [vmem:[%s16989_s8 + $0x28] sm:$0xff] }
0x3100   : > { %14294 = vmatprep.subr.mxu0 %v6686_v62 }
0x3101   : > { %14295 = vmatpush3.msra.mxu0 %v6686_v62  ;;  %v6690_v62 = vld [vmem:[%s16989_s8 + $0x20] sm:$0xff] }
0x3102   : > { %14297 = vmatmul.mubr.msk.f32.vlgmr.msra.gmra.mxu0 %vm1288_vm0, %v16237_v51 }
0x31b2   : > { %v14276_v15 = vpop.f32.mrf.mxu0 }
0x31b3   : > { %v6788_v5 = vadd.f32 %v14276_v15, %v12728_v63  ;;  %v16304_v15 = vpop.f32.mrf.mxu1 }
0x31b4   : > { %v6782_v0 = vpop.f32.mrf.mxu0 }
0x31b5   : > { %v6783_v33 = vadd.f32 %v12728_v63, %v6782_v0  ;;  %v6954_v60 = vmul.f32 0.25, %v6788_v5 }
0x31b7   : > { %v6953_v44 = vmul.f32 0.25, %v6783_v33  ;;  %v12743_v33 = vld [vmem:[%s16991_s9 + $0x1] ss:$0 sm:$0xff] }
0x31b9   : > { %14303 = vmatprep.mubr.msk.f32.mxu0 %vm1583_vm2, %v6953_v44 }
0x31ba   : > { %v14287_v37 = vpop.f32.mrf.mxu0 }
0x31bb   : > { %v6869_v3 = vadd.f32 %v14287_v37, %v12731_v2 }
0x31bc   : > { %v6863_v4 = vpop.f32.mrf.mxu0 }
0x31bd   : > { %v6864_v53 = vadd.f32 %v12731_v2, %v6863_v4  ;;  %14299 = vmatprep.subr.msk.mxu0 %vm1583_vm2, %v6869_v3 }
0x31be   : > { %14300 = vmatpush3.xpose.msk.msra.mxu0 %vm1583_vm2, %v6869_v3 }
0x31bf   : > { %14301 = vmatprep.subr.msk.mxu0 %vm1583_vm2, %v6864_v53 }
0x31c2   : > { %v14298_v7 = vpop.f32.mrf.mxu0  ;;  %14302 = vmatpush3.xpose.msk.msra.mxu0 %vm1583_vm2, %v6864_v53  ;;  %v12749_v53 = vld [vmem:[%s16993_s14 + $0x1] ss:$0 sm:$0xff] }
0x31c3   : > { %v6950_v11 = vadd.f32 %v14298_v7, %v12734_v6  ;;  %14324 = vmatprep.subr.mxu0 %v6685_v10 }
0x31c4   : > { %v6944_v12 = vpop.f32.mrf.mxu0 }
0x31c5   : > { %v6945_v13 = vadd.f32 %v12734_v6, %v6944_v12  ;;  %14304 = vmatmul.mubr.msk.f32.vlgmr.msra.gmra.mxu0 %vm1583_vm2, %v6954_v60  ;;  %14306 = vmatprep.subr.mxu1 %v6950_v11 }
0x31c6   : > { %14307 = vmatpush3.msra.mxu1 %v6950_v11  ;;  %14325 = vmatpush3.msra.mxu0 %v6685_v10 }
0x31c7   : > { %14332 = vmatprep.mubr.msk.f32.mxu0 %vm1288_vm0, %v16212_v22  ;;  %14308 = vmatprep.subr.mxu1 %v6945_v13 }
0x31c8   : > { %14326 = vmatprep.subr.mxu0 %v6684_v14  ;;  %14309 = vmatpush3.msra.mxu1 %v6945_v13 }
0x31c9   : > { %14327 = vmatpush3.msra.mxu0 %v6684_v14  ;;  %14313 = vmatprep.subr.mxu1 %v6677_v8 }
0x31ca   : > { %14328 = vmatprep.subr.mxu0 %v6683_v16 }
0x31cb   : > { %14329 = vmatpush3.msra.mxu0 %v6683_v16 }
0x31cc   : > { %14330 = vmatprep.subr.mxu0 %v6682_v56 }
0x31cd   : > { %14331 = vmatpush3.msra.mxu0 %v6682_v56 }
0x31ce   : > { %14333 = vmatmul.mubr.msk.f32.vlgmr.msra.gmra.mxu0 %vm1288_vm0, %v16237_v51 }
0x3285   : > { %v14305_v61 = vpop.f32.mrf.mxu0 }
0x3286   : > { %v7043_v1 = vsel %vm4200_vm5, %v14305_v61, -1.7014117e+38 }
0x3287   : > { %v7033_v17 = vpop.f32.mrf.mxu0  ;;  %v7047_v18 = vsel %vm1583_vm2, %v7043_v1, -inf }
0x3288   : > { %v7042_v19 = vsel %vm4199_vm6, %v7033_v17, -1.7014117e+38  ;;  %7048 = vmax.xlane.f32.xlu1 %v7047_v18 }
0x3289   : > { %v7044_v20 = vsel %vm1583_vm2, %v7042_v19, -inf }
0x328a   : > { %7045 = vmax.xlane.f32.xlu0 %v7044_v20 }
0x328e   : > { %v14334_v24 = vpop.f32.mrf.mxu0 }
0x328f   : > { %v7306_v25 = vadd.f32 %v14334_v24, %v12746_v23 }
0x3290   : > { %v7300_v26 = vpop.f32.mrf.mxu0 }
0x3291   : > { %v7301_v39 = vadd.f32 %v12746_v23, %v7300_v26  ;;  %14346 = vmatprep.subr.msk.mxu0 %vm1583_vm2, %v7306_v25 }
0x3292   : > { %14347 = vmatpush3.xpose.msk.msra.mxu0 %vm1583_vm2, %v7306_v25  ;;  %v6701_v25 = vld [vmem:[%s16995_s26 + $0x8] sm:$0xff] }
0x3293   : > { %14348 = vmatprep.subr.msk.mxu0 %vm1583_vm2, %v7301_v39 }
0x3296   : > { %14349 = vmatpush3.xpose.msk.msra.mxu0 %vm1583_vm2, %v7301_v39 }
0x3311   : > { %v7049_v30 = vpop.xlane.xlu1 %7048 }
0x3312   : > { %v7051_v31 = vsub.f32 %v7043_v1, %v7049_v30 }
0x3313   : > { %v7046_v32 = vpop.xlane.xlu0 %7045 }
0x3314   : > { %v7054_v34 = vmul.f32 1.442695, %v7051_v31  ;;  %v7050_v35 = vsub.f32 %v7042_v19, %v7046_v32 }
0x3316   : > { %15042 = vpow2.f32 %v7054_v34  ;;  %v7052_v36 = vmul.f32 1.442695, %v7050_v35  ;;  %v6700_v35 = vld [vmem:[%s16995_s26] sm:$0xff] }
0x3318   : > { %15044 = vpow2.f32 %v7052_v36  ;;  %v6703_v36 = vld [vmem:[%s16995_s26 + $0x18] sm:$0xff] }
0x3319   : > { %14360 = vmatprep.subr.mxu0 %v6703_v36 }
0x3323   : > { %v15043_v38 = vpop.eup %15042 }
0x3324   : > { %v7059_v41 = vsel %vm1583_vm2, %v15043_v38, 0.0 }
0x3325   : > { %v15045_v42 = vpop.eup %15044  ;;  %7060 = vadd.xlane.f32.xlu1 %v7059_v41 }
0x3326   : > { %v7056_v45 = vsel %vm1583_vm2, %v15045_v42, 0.0 }
0x3327   : > { %7057 = vadd.xlane.f32.xlu0 %v7056_v45 }
0x33ae   : > { %v7061_v46 = vpop.xlane.xlu1 %7060 }
0x33af   : > { %15046 = vrcp.f32 %v7061_v46 }
0x33b0   : > { %v7058_v47 = vpop.xlane.xlu0 %7057 }
0x33b1   : > { %15048 = vrcp.f32 %v7058_v47 }
0x33bc   : > { %v15047_v9 = vpop.eup %15046 }
0x33bd   : > { %v7065_v50 = vmul.f32 %v15047_v9, %v15043_v38  ;;  %v6702_v38 = vld [vmem:[%s16995_s26 + $0x10] sm:$0xff]  ;;  %v12762_v9 = vld [vmem:[%s16996_s16] ss:$0 sm:$0xff] }
0x33be   : > { %v15049_v48 = vpop.eup %15048 }
0x33bf   : > { %v7064_v49 = vmul.f32 %v15049_v48, %v15045_v42 }
0x33c1   : > { %14310 = vmatprep.mubr.msk.f32.mxu1 %vm1583_vm2, %v7064_v49 }
0x33c2   : > { %14311 = vmatmul.mubr.msk.f32.vlgmr.msra.gmra.mxu1 %vm1583_vm2, %v7065_v50 }
0x33c3   : > { %14314 = vmatpush3.msra.mxu1 %v6677_v8  ;;  %14321 = vmatprep.mubr.msk.f32.mxu1 %vm1288_vm0, %v16212_v22 }
0x33c4   : > { %14315 = vmatprep.subr.mxu1 %v6676_v52 }
0x33c5   : > { %14316 = vmatpush3.msra.mxu1 %v6676_v52 }
0x33c6   : > { %14317 = vmatprep.subr.mxu1 %v6675_v54 }
0x33c7   : > { %14318 = vmatpush3.msra.mxu1 %v6675_v54 }
0x33c8   : > { %14319 = vmatprep.subr.mxu1 %v6674_v55 }
0x33c9   : > { %14320 = vmatpush3.msra.mxu1 %v6674_v55 }
0x33ca   : > { %14322 = vmatmul.mubr.msk.f32.vlgmr.msra.gmra.mxu1 %vm1288_vm0, %v16237_v51  ;;  %14335 = vmatprep.subr.mxu1 %v6693_v57 }
0x33cb   : > { %14336 = vmatpush3.msra.mxu1 %v6693_v57  ;;  %14343 = vmatprep.mubr.msk.f32.mxu1 %vm1288_vm0, %v16212_v22 }
0x33cc   : > { %14337 = vmatprep.subr.mxu1 %v6692_v58 }
0x33cd   : > { %14338 = vmatpush3.msra.mxu1 %v6692_v58 }
0x33ce   : > { %14339 = vmatprep.subr.mxu1 %v6691_v59 }
0x33cf   : > { %14340 = vmatpush3.msra.mxu1 %v6691_v59 }
0x33d0   : > { %14341 = vmatprep.subr.mxu1 %v6690_v62 }
0x33d1   : > { %14342 = vmatpush3.msra.mxu1 %v6690_v62 }
0x33d2   : > { %14344 = vmatmul.mubr.msk.f32.vlgmr.msra.gmra.mxu1 %vm1288_vm0, %v16237_v51 }
0x3482   : > { %v14312_v63 = vpop.f32.mrf.mxu1 }
0x3484   : > { %v7138_v0 = vpop.f32.mrf.mxu1 }
0x348a   : > { %v14323_v44 = vpop.f32.mrf.mxu1 }
0x348b   : > { %v7225_v2 = vadd.f32 %v14323_v44, %v12743_v33 }
0x348c   : > { %v7219_v22 = vpop.f32.mrf.mxu1 }
0x348d   : > { %v7220_v37 = vadd.f32 %v12743_v33, %v7219_v22  ;;  %v7391_v4 = vmul.f32 0.25, %v7225_v2 }
0x348f   : > { %v7390_v3 = vmul.f32 0.25, %v7220_v37  ;;  %v7804_v37 = vld [vmem:[%s16997_s18 + $0x18] sm:$0xff] }
0x3491   : > { %14350 = vmatprep.mubr.msk.f32.mxu0 %vm1583_vm2, %v7390_v3  ;;  %v7803_v3 = vld [vmem:[%s16997_s18 + $0x10] sm:$0xff] }
0x3492   : > { %v14345_v5 = vpop.f32.mrf.mxu1  ;;  %14351 = vmatmul.mubr.msk.f32.vlgmr.msra.gmra.mxu0 %vm1583_vm2, %v7391_v4  ;;  %v7802_v4 = vld [vmem:[%s16997_s18 + $0x8] sm:$0xff] }
0x3493   : > { %v7387_v6 = vadd.f32 %v14345_v5, %v12749_v53  ;;  %14361 = vmatpush3.msra.mxu0 %v6703_v36  ;;  %v7914_v36 = vld [vmem:[%s17001_s24 + $0x18] sm:$0xff] }
0x3494   : > { %v7381_v10 = vpop.f32.mrf.mxu1  ;;  %14362 = vmatprep.subr.mxu0 %v6702_v38 }
0x3495   : > { %v7382_v51 = vadd.f32 %v12749_v53, %v7381_v10  ;;  %14353 = vmatprep.subr.mxu1 %v7387_v6  ;;  %14363 = vmatpush3.msra.mxu0 %v6702_v38  ;;  %v7801_v53 = vld [vmem:[%s16997_s18] sm:$0xff]  ;;  %v7913_v38 = vld [vmem:[%s17001_s24 + $0x10] sm:$0xff] }
0x3496   : > { %14354 = vmatpush3.msra.mxu1 %v7387_v6  ;;  %14374 = vmatprep.subr.mxu0 %v7804_v37 }
0x3497   : > { %14355 = vmatprep.subr.mxu1 %v7382_v51 }
0x3498   : > { %14356 = vmatpush3.msra.mxu1 %v7382_v51 }
0x3499   : > { %14367 = vmatprep.subr.mxu1 %v6701_v25 }
0x3552   : > { %v14352_v7 = vpop.f32.mrf.mxu0 }
0x3553   : > { %v7480_v60 = vsel %vm4200_vm5, %v14352_v7, -1.7014117e+38 }
0x3554   : > { %v7470_v11 = vpop.f32.mrf.mxu0  ;;  %v7484_v12 = vsel %vm1583_vm2, %v7480_v60, -inf }
0x3555   : > { %v7479_v13 = vsel %vm4199_vm6, %v7470_v11, -1.7014117e+38  ;;  %7485 = vmax.xlane.f32.xlu1 %v7484_v12  ;;  %v12763_v12 = vld [vmem:[%s16999_s19] ss:$0 sm:$0xff] }
0x3556   : > { %v7481_v14 = vsel %vm1583_vm2, %v7479_v13, -inf }
0x3557   : > { %7482 = vmax.xlane.f32.xlu0 %v7481_v14 }
0x35de   : > { %v7486_v16 = vpop.xlane.xlu1 %7485 }
0x35df   : > { %v7488_v56 = vsub.f32 %v7480_v60, %v7486_v16 }
0x35e0   : > { %v7483_v61 = vpop.xlane.xlu0 %7482 }
0x35e1   : > { %v7491_v1 = vmul.f32 1.442695, %v7488_v56  ;;  %v7487_v17 = vsub.f32 %v7479_v13, %v7483_v61  ;;  %v12764_v61 = vld [vmem:[%s17000_s21] ss:$0 sm:$0xff] }
0x35e3   : > { %15050 = vpow2.f32 %v7491_v1  ;;  %v7489_v18 = vmul.f32 1.442695, %v7487_v17 }
0x35e5   : > { %15052 = vpow2.f32 %v7489_v18 }
0x35f0   : > { %v15051_v19 = vpop.eup %15050 }
0x35f1   : > { %v7496_v20 = vsel %vm1583_vm2, %v15051_v19, 0.0 }
0x35f2   : > { %v15053_v23 = vpop.eup %15052  ;;  %7497 = vadd.xlane.f32.xlu1 %v7496_v20  ;;  %v7925_v20 = vld [vmem:[%s17001_s24 + $0x70] sm:$0xff] }
0x35f3   : > { %v7493_v24 = vsel %vm1583_vm2, %v15053_v23, 0.0 }
0x35f4   : > { %7494 = vadd.xlane.f32.xlu0 %v7493_v24  ;;  %v7923_v24 = vld [vmem:[%s17001_s24 + $0x60] sm:$0xff] }
0x367b   : > { %v7498_v26 = vpop.xlane.xlu1 %7497 }
0x367c   : > { %15054 = vrcp.f32 %v7498_v26  ;;  %v7921_v26 = vld [vmem:[%s17001_s24 + $0x50] sm:$0xff] }
0x367d   : > { %v7495_v39 = vpop.xlane.xlu0 %7494 }
0x367e   : > { %15056 = vrcp.f32 %v7495_v39  ;;  %v7920_v39 = vld [vmem:[%s17001_s24 + $0x48] sm:$0xff] }
0x3689   : > { %v15055_v30 = vpop.eup %15054 }
0x368a   : > { %v7502_v34 = vmul.f32 %v15055_v30, %v15051_v19  ;;  %v7926_v19 = vld [vmem:[%s17001_s24 + $0x78] sm:$0xff]  ;;  %v7919_v30 = vld [vmem:[%s17001_s24 + $0x40] sm:$0xff] }
0x368b   : > { %v15057_v31 = vpop.eup %15056 }
0x368c   : > { %v7501_v32 = vmul.f32 %v15057_v31, %v15053_v23  ;;  %v7924_v23 = vld [vmem:[%s17001_s24 + $0x68] sm:$0xff]  ;;  %v7918_v31 = vld [vmem:[%s17001_s24 + $0x38] sm:$0xff] }
0x368e   : > { %14357 = vmatprep.mubr.msk.f32.mxu1 %vm1583_vm2, %v7501_v32  ;;  %v7917_v32 = vld [vmem:[%s17001_s24 + $0x30] sm:$0xff] }
0x368f   : > { %14358 = vmatmul.mubr.msk.f32.vlgmr.msra.gmra.mxu1 %vm1583_vm2, %v7502_v34  ;;  %v7916_v34 = vld [vmem:[%s17001_s24 + $0x28] sm:$0xff] }
0x3690   : > { %14368 = vmatpush3.msra.mxu1 %v6701_v25  ;;  %14371 = vmatprep.mubr.msk.f32.mxu1 %vm1583_vm2, %v7138_v0  ;;  %v7922_v25 = vld [vmem:[%s17001_s24 + $0x58] sm:$0xff] }
0x3691   : > { %14369 = vmatprep.subr.mxu1 %v6700_v35 }
0x3692   : > { %14370 = vmatpush3.msra.mxu1 %v6700_v35  ;;  %v7915_v35 = vld [vmem:[%s17001_s24 + $0x20] sm:$0xff] }
0x3693   : > { %14372 = vmatmul.mubr.msk.f32.vlgmr.msra.gmra.mxu1 %vm1583_vm2, %v14312_v63  ;;  %14385 = vmatprep.subr.mxu1 %v7926_v19 }
0x3694   : > { %14386 = vmatpush3.msra.mxu1 %v7926_v19  ;;  %v12775_v19 = vld [vmem:[%s16984_s3 + $0x50] sm:$0xff] }
0x3695   : > { %14387 = vmatprep.subr.mxu1 %v7925_v20 }
0x3696   : > { %14388 = vmatpush3.msra.mxu1 %v7925_v20  ;;  %v12774_v20 = vld [vmem:[%s16984_s3 + $0x48] sm:$0xff] }
0x3697   : > { %14389 = vmatprep.subr.mxu1 %v7924_v23 }
0x3698   : > { %14390 = vmatpush3.msra.mxu1 %v7924_v23  ;;  %v12773_v23 = vld [vmem:[%s16984_s3 + $0x40] sm:$0xff] }
0x3699   : > { %14391 = vmatprep.subr.mxu1 %v7923_v24 }
0x369a   : > { %14392 = vmatpush3.msra.mxu1 %v7923_v24  ;;  %v12784_v24 = vld [vmem:[%s16985_s1 + $0x58] sm:$0xff] }
0x369b   : > { %14393 = vmatprep.subr.mxu1 %v7922_v25 }
0x369c   : > { %14394 = vmatpush3.msra.mxu1 %v7922_v25 }
0x369d   : > { %14395 = vmatprep.subr.mxu1 %v7921_v26 }
0x369e   : > { %14396 = vmatpush3.msra.mxu1 %v7921_v26 }
0x369f   : > { %14397 = vmatprep.subr.mxu1 %v7920_v39 }
0x36a0   : > { %14398 = vmatpush3.msra.mxu1 %v7920_v39 }
0x36a1   : > { %14399 = vmatprep.subr.mxu1 %v7919_v30 }
0x36a2   : > { %14400 = vmatpush3.msra.mxu1 %v7919_v30 }
0x36a3   : > { %14401 = vmatprep.subr.mxu1 %v7918_v31 }
0x36a4   : > { %14402 = vmatpush3.msra.mxu1 %v7918_v31 }
0x36a5   : > { %14403 = vmatprep.subr.mxu1 %v7917_v32 }
0x36a6   : > { %14404 = vmatpush3.msra.mxu1 %v7917_v32 }
0x36a7   : > { %14405 = vmatprep.subr.mxu1 %v7916_v34 }
0x36a8   : > { %14406 = vmatpush3.msra.mxu1 %v7916_v34 }
0x36a9   : > { %14407 = vmatprep.subr.mxu1 %v7915_v35 }
0x36aa   : > { %14408 = vmatpush3.msra.mxu1 %v7915_v35  ;;  %v12771_v35 = vld [vmem:[%s16987_s5 + $0x1] ss:$0 sm:$0xff] }
0x36ab   : > { %14409 = vmatprep.subr.mxu1 %v7914_v36 }
0x36ac   : > { %14410 = vmatpush3.msra.mxu1 %v7914_v36 }
0x36ad   : > { %14411 = vmatprep.subr.mxu1 %v7913_v38 }
0x36ae   : > { %14412 = vmatpush3.msra.mxu1 %v7913_v38 }
0x374f   : > { %v14359_v41 = vpop.f32.mrf.mxu1 }
0x3751   : > { %v7575_v42 = vpop.f32.mrf.mxu1 }
0x3752   : > { %14364 = vmatprep.mubr.msk.f32.mxu0 %vm1583_vm2, %v7575_v42  ;;  %v7911_v42 = vld [vmem:[%s17001_s24] sm:$0xff] }
0x3753   : > { %14365 = vmatmul.mubr.msk.f32.vlgmr.msra.gmra.mxu0 %vm1583_vm2, %v14359_v41  ;;  %v14373_v45 = vpop.f32.mrf.mxu1  ;;  %v7912_v41 = vld [vmem:[%s17001_s24 + $0x8] sm:$0xff] }
0x3754   : > { %14375 = vmatpush3.msra.mxu0 %v7804_v37  ;;  %14413 = vmatprep.subr.mxu1 %v7912_v41 }
0x3755   : > { %v7737_v47 = vpop.f32.mrf.mxu1  ;;  %14376 = vmatprep.subr.mxu0 %v7803_v3  ;;  %14414 = vmatpush3.msra.mxu1 %v7912_v41 }
0x3756   : > { %14377 = vmatpush3.msra.mxu0 %v7803_v3  ;;  %14415 = vmatprep.subr.mxu1 %v7911_v42 }
0x3757   : > { %14378 = vmatprep.subr.mxu0 %v7802_v4  ;;  %14416 = vmatpush3.msra.mxu1 %v7911_v42 }
0x3758   : > { %14379 = vmatpush3.msra.mxu0 %v7802_v4  ;;  %v12768_v4 = vld [vmem:[%s15434_s13] ss:$0 sm:$0xff] }
0x3759   : > { %14380 = vmatprep.subr.mxu0 %v7801_v53 }
0x375a   : > { %14381 = vmatpush3.msra.mxu0 %v7801_v53 }
0x3813   : > { %v14366_v8 = vpop.f32.mrf.mxu0 }
0x3814   : > { %v7743_v46 = vadd.f32 %v14373_v45, %v14366_v8  ;;  %v12765_v45 = vld [vmem:[%s17003_s25] ss:$0 sm:$0xff] }
0x3815   : > { %v7656_v48 = vpop.f32.mrf.mxu0 }
0x3816   : > { %v7747_v49 = vadd.f32 %v7743_v46, %v16226_v29  ;;  %v7738_v50 = vadd.f32 %v7737_v47, %v7656_v48 }
0x3818   : > { %v16330_v52 = vadd.f32 %v12762_v9, %v7747_v49  ;;  %v7746_v54 = vadd.f32 %v7738_v50, %v16197_v43 }
0x381a   : > { %v16333_v55 = vadd.f32 %v12762_v9, %v7746_v54  ;;  %v7762_v57 = vsel %vm1288_vm0, %v16330_v52, 0.0 }
0x381b   : > { %7763 = vadd.xlane.f32.xlu1 %v7762_v57 }
0x381c   : > { %v7759_v58 = vsel %vm1288_vm0, %v16333_v55, 0.0 }
0x381d   : > { %7760 = vadd.xlane.f32.xlu0 %v7759_v58 }
0x38a4   : > { %v7764_v59 = vpop.xlane.xlu1 %7763 }
0x38a5   : > { %v7766_v29 = vmul.f32 0.03125, %v7764_v59 }
0x38a6   : > { %v7761_v62 = vpop.xlane.xlu0 %7760 }
0x38a7   : > { %v7768_v63 = vsub.f32 %v16330_v52, %v7766_v29  ;;  %v7765_v43 = vmul.f32 0.03125, %v7761_v62 }
0x38a9   : > { %v7767_v0 = vsub.f32 %v16333_v55, %v7765_v43  ;;  %v7770_v33 = vmul.f32 %v7768_v63, %v7768_v63 }
0x38ab   : > { %v7774_v44 = vsel %vm1288_vm0, %v7770_v33, 0.0  ;;  %v7769_v2 = vmul.f32 %v7767_v0, %v7767_v0 }
0x38ac   : > { %7775 = vadd.xlane.f32.xlu1 %v7774_v44 }
0x38ad   : > { %v7771_v22 = vsel %vm1288_vm0, %v7769_v2, 0.0 }
0x38ae   : > { %7772 = vadd.xlane.f32.xlu0 %v7771_v22 }
0x3935   : > { %v7776_v5 = vpop.xlane.xlu1 %7775 }
0x3936   : > { %v7778_v6 = vmul.f32 0.03125, %v7776_v5 }
0x3937   : > { %v7773_v10 = vpop.xlane.xlu0 %7772 }
0x3938   : > { %v7780_v51 = vadd.f32 1e-05, %v7778_v6  ;;  %v7777_v7 = vmul.f32 0.03125, %v7773_v10 }
0x393a   : > { %15058 = vrsqrt.f32 %v7780_v51  ;;  %v7779_v60 = vadd.f32 1e-05, %v7777_v7 }
0x393c   : > { %15060 = vrsqrt.f32 %v7779_v60 }
0x3947   : > { %v15059_v11 = vpop.eup %15058 }
0x3948   : > { %v7784_v13 = vmul.f32 %v15059_v11, %v7768_v63 }
0x3949   : > { %v15061_v14 = vpop.eup %15060 }
0x394a   : > { %v7783_v16 = vmul.f32 %v15061_v14, %v7767_v0  ;;  %v7792_v56 = vmul.f32 %v12763_v12, %v7784_v13 }
0x394c   : > { %v7791_v1 = vmul.f32 %v12763_v12, %v7783_v16  ;;  %v7800_v18 = vadd.f32 %v12764_v61, %v7792_v56 }
0x394e   : > { %v7799_v17 = vadd.f32 %v12764_v61, %v7791_v1 }
0x3950   : > { %14382 = vmatprep.mubr.msk.f32.mxu0 %vm1288_vm0, %v7799_v17 }
0x3951   : > { %14383 = vmatmul.mubr.msk.f32.vlgmr.msra.gmra.mxu0 %vm1288_vm0, %v7800_v18  ;;  %v12776_v18 = vld [vmem:[%s16984_s3 + $0x58] sm:$0xff] }
0x3952   : > { %14420 = vmatprep.subr.mxu0 %v12776_v18 }
0x3953   : > { %14421 = vmatpush3.msra.mxu0 %v12776_v18 }
0x3954   : > { %14422 = vmatprep.subr.mxu0 %v12775_v19 }
0x3955   : > { %14423 = vmatpush3.msra.mxu0 %v12775_v19 }
0x3956   : > { %14424 = vmatprep.subr.mxu0 %v12774_v20 }
0x3957   : > { %14425 = vmatpush3.msra.mxu0 %v12774_v20 }
0x3958   : > { %14426 = vmatprep.subr.mxu0 %v12773_v23 }
0x3959   : > { %14427 = vmatpush3.msra.mxu0 %v12773_v23 }
0x395a   : > { %14431 = vmatprep.subr.mxu0 %v12784_v24 }
0x3a11   : > { %v14384_v8 = vpop.f32.mrf.mxu0 }
0x3a12   : > { %v7890_v46 = vadd.f32 %v14384_v8, %v12765_v45  ;;  %v12772_v8 = vld [vmem:[%s16988_s6 + $0x1] ss:$0 sm:$0xff] }
0x3a13   : > { %v7884_v47 = vpop.f32.mrf.mxu0 }
0x3a14   : > { %v7894_v9 = vmul.f32 %v7890_v46, %v7890_v46  ;;  %v7885_v48 = vadd.f32 %v12765_v45, %v7884_v47 }
0x3a16   : > { %v7896_v49 = vmul.f32 %v7894_v9, %v7890_v46  ;;  %v7893_v50 = vmul.f32 %v7885_v48, %v7885_v48  ;;  %v12783_v9 = vld [vmem:[%s16985_s1 + $0x50] sm:$0xff] }
0x3a18   : > { %v7898_v54 = vmul.f32 0.044715, %v7896_v49  ;;  %v7895_v57 = vmul.f32 %v7893_v50, %v7885_v48  ;;  %v12781_v49 = vld [vmem:[%s16985_s1 + $0x40] sm:$0xff]  ;;  %v12792_v50 = vld [vmem:[%s16989_s8 + $0x58] sm:$0xff] }
0x3a1a   : > { %v7900_v58 = vadd.f32 %v7898_v54, %v7890_v46  ;;  %v7897_v59 = vmul.f32 0.044715, %v7895_v57  ;;  %v12791_v54 = vld [vmem:[%s16989_s8 + $0x50] sm:$0xff]  ;;  %v12790_v57 = vld [vmem:[%s16989_s8 + $0x48] sm:$0xff] }
0x3a1c   : > { %v7902_v29 = vmul.f32 0.7978846, %v7900_v58  ;;  %v7899_v62 = vadd.f32 %v7897_v59, %v7885_v48  ;;  %v12789_v58 = vld [vmem:[%s16989_s8 + $0x40] sm:$0xff] }
0x3a1e   : > { %15062 = vtanh.f32 %v7902_v29  ;;  %v7901_v63 = vmul.f32 0.7978846, %v7899_v62  ;;  %v12807_v29 = vld [vmem:[%s16991_s9 + $0x2] ss:$0 sm:$0xff] }
0x3a20   : > { %15064 = vtanh.f32 %v7901_v63 }
0x3a2b   : > { %v15063_v43 = vpop.eup %15062 }
0x3a2c   : > { %v7906_v0 = vadd.f32 1.0, %v15063_v43 }
0x3a2d   : > { %v15065_v33 = vpop.eup %15064 }
0x3a2e   : > { %v7905_v44 = vadd.f32 1.0, %v15065_v33  ;;  %v7908_v2 = vmul.f32 0.5, %v7906_v0  ;;  %v12810_v0 = vld [vmem:[%s16992_s12 + $0x2] ss:$0 sm:$0xff] }
0x3a30   : > { %v7907_v22 = vmul.f32 0.5, %v7905_v44  ;;  %v7910_v3 = vmul.f32 %v7908_v2, %v7890_v46 }
0x3a32   : > { %v7909_v37 = vmul.f32 %v7907_v22, %v7885_v48  ;;  %v12782_v48 = vld [vmem:[%s16985_s1 + $0x48] sm:$0xff] }
0x3a34   : > { %14417 = vmatprep.mubr.f32.mxu1 %v7909_v37 }
0x3a35   : > { %14418 = vmatmul.mubr.f32.vlgmr.msra.gmra.mxu1 %v7910_v3  ;;  %v12813_v3 = vld [vmem:[%s16993_s14 + $0x2] ss:$0 sm:$0xff] }
0x3af5   : > { %v14419_v53 = vpop.f32.mrf.mxu1 }
0x3af6   : > { %v8006_v5 = vadd.f32 %v14419_v53, %v12768_v4 }
0x3af7   : > { %v8000_v6 = vpop.f32.mrf.mxu1 }
0x3af8   : > { %v16370_v10 = vadd.f32 %v8006_v5, %v16330_v52  ;;  %v8001_v51 = vadd.f32 %v12768_v4, %v8000_v6  ;;  %v12788_v4 = vld [vmem:[%s16985_s1 + $0x78] sm:$0xff] }
0x3afa   : > { %v16373_v7 = vadd.f32 %v8001_v51, %v16333_v55  ;;  %v8016_v60 = vsel %vm1288_vm0, %v16370_v10, 0.0 }
0x3afb   : > { %8017 = vadd.xlane.f32.xlu1 %v8016_v60 }
0x3afc   : > { %v8013_v11 = vsel %vm1288_vm0, %v16373_v7, 0.0 }
0x3afd   : > { %8014 = vadd.xlane.f32.xlu0 %v8013_v11  ;;  %v12787_v11 = vld [vmem:[%s16985_s1 + $0x70] sm:$0xff] }
0x3b84   : > { %v8018_v12 = vpop.xlane.xlu1 %8017 }
0x3b85   : > { %v8020_v13 = vmul.f32 0.03125, %v8018_v12  ;;  %v12786_v12 = vld [vmem:[%s16985_s1 + $0x68] sm:$0xff] }
0x3b86   : > { %v8015_v14 = vpop.xlane.xlu0 %8014 }
0x3b87   : > { %v8022_v52 = vsub.f32 %v16370_v10, %v8020_v13  ;;  %v8019_v16 = vmul.f32 0.03125, %v8015_v14  ;;  %v12785_v13 = vld [vmem:[%s16985_s1 + $0x60] sm:$0xff] }
0x3b89   : > { %v8021_v55 = vsub.f32 %v16373_v7, %v8019_v16  ;;  %v8024_v56 = vmul.f32 %v8022_v52, %v8022_v52 }
0x3b8b   : > { %v8028_v61 = vsel %vm1288_vm0, %v8024_v56, 0.0  ;;  %v8023_v1 = vmul.f32 %v8021_v55, %v8021_v55 }
0x3b8c   : > { %8029 = vadd.xlane.f32.xlu1 %v8028_v61 }
0x3b8d   : > { %v8025_v17 = vsel %vm1288_vm0, %v8023_v1, 0.0  ;;  %v12825_v1 = vld [vmem:[%s16992_s12 + $0x3] ss:$0 sm:$0xff] }
0x3b8e   : > { %8026 = vadd.xlane.f32.xlu0 %v8025_v17 }
0x3c15   : > { %v8030_v25 = vpop.xlane.xlu1 %8029 }
0x3c16   : > { %v8032_v26 = vmul.f32 0.03125, %v8030_v25 }
0x3c17   : > { %v8027_v39 = vpop.xlane.xlu0 %8026 }
0x3c18   : > { %v8034_v30 = vadd.f32 1e-05, %v8032_v26  ;;  %v8031_v31 = vmul.f32 0.03125, %v8027_v39 }
0x3c1a   : > { %15066 = vrsqrt.f32 %v8034_v30  ;;  %v8033_v32 = vadd.f32 1e-05, %v8031_v31 }
0x3c1c   : > { %15068 = vrsqrt.f32 %v8033_v32 }
0x3c27   : > { %v15067_v34 = vpop.eup %15066 }
0x3c28   : > { %v8038_v36 = vmul.f32 %v15067_v34, %v8022_v52 }
0x3c29   : > { %v15069_v38 = vpop.eup %15068 }
0x3c2a   : > { %v8037_v41 = vmul.f32 %v15069_v38, %v8021_v55  ;;  %v8046_v42 = vmul.f32 %v12771_v35, %v8038_v36  ;;  %v12780_v36 = vld [vmem:[%s16984_s3 + $0x78] sm:$0xff] }
0x3c2c   : > { %v8045_v45 = vmul.f32 %v12771_v35, %v8037_v41  ;;  %v16392_v47 = vadd.f32 %v12772_v8, %v8046_v42 }
0x3c2e   : > { %v16390_v46 = vadd.f32 %v12772_v8, %v8045_v45 }
0x3c30   : > { %14428 = vmatprep.mubr.msk.f32.mxu0 %vm1288_vm0, %v16390_v46 }
0x3c31   : > { %14429 = vmatmul.mubr.msk.f32.vlgmr.msra.gmra.mxu0 %vm1288_vm0, %v16392_v47 }
0x3c32   : > { %14432 = vmatpush3.msra.mxu0 %v12784_v24  ;;  %14439 = vmatprep.mubr.msk.f32.mxu0 %vm1288_vm0, %v16390_v46 }
0x3c33   : > { %14433 = vmatprep.subr.mxu0 %v12783_v9 }
0x3c34   : > { %14434 = vmatpush3.msra.mxu0 %v12783_v9 }
0x3c35   : > { %14435 = vmatprep.subr.mxu0 %v12782_v48 }
0x3c36   : > { %14436 = vmatpush3.msra.mxu0 %v12782_v48  ;;  %v12779_v48 = vld [vmem:[%s16984_s3 + $0x70] sm:$0xff] }
0x3c37   : > { %14437 = vmatprep.subr.mxu0 %v12781_v49 }
0x3c38   : > { %14438 = vmatpush3.msra.mxu0 %v12781_v49  ;;  %v12778_v49 = vld [vmem:[%s16984_s3 + $0x68] sm:$0xff] }
0x3c39   : > { %14440 = vmatmul.mubr.msk.f32.vlgmr.msra.gmra.mxu0 %vm1288_vm0, %v16392_v47  ;;  %14442 = vmatprep.subr.mxu0 %v12792_v50 }
0x3c3a   : > { %14443 = vmatpush3.msra.mxu0 %v12792_v50  ;;  %14450 = vmatprep.mubr.msk.f32.mxu0 %vm1288_vm0, %v16390_v46  ;;  %v12777_v50 = vld [vmem:[%s16984_s3 + $0x60] sm:$0xff] }
0x3c3b   : > { %14444 = vmatprep.subr.mxu0 %v12791_v54 }
0x3c3c   : > { %14445 = vmatpush3.msra.mxu0 %v12791_v54  ;;  %v12796_v54 = vld [vmem:[%s16989_s8 + $0x78] sm:$0xff] }
0x3c3d   : > { %14446 = vmatprep.subr.mxu0 %v12790_v57 }
0x3c3e   : > { %14447 = vmatpush3.msra.mxu0 %v12790_v57  ;;  %v12795_v57 = vld [vmem:[%s16989_s8 + $0x70] sm:$0xff] }
0x3c3f   : > { %14448 = vmatprep.subr.mxu0 %v12789_v58 }
0x3c40   : > { %14449 = vmatpush3.msra.mxu0 %v12789_v58  ;;  %v12794_v58 = vld [vmem:[%s16989_s8 + $0x68] sm:$0xff] }
0x3c41   : > { %14451 = vmatmul.mubr.msk.f32.vlgmr.msra.gmra.mxu0 %vm1288_vm0, %v16392_v47 }
0x3cf1   : > { %v14430_v59 = vpop.f32.mrf.mxu0 }
0x3cf2   : > { %v8173_v37 = vadd.f32 %v14430_v59, %v12807_v29  ;;  %v12793_v59 = vld [vmem:[%s16989_s8 + $0x60] sm:$0xff] }
0x3cf3   : > { %v8167_v62 = vpop.f32.mrf.mxu0 }
0x3cf4   : > { %v8168_v63 = vadd.f32 %v12807_v29, %v8167_v62  ;;  %v8339_v5 = vmul.f32 0.25, %v8173_v37 }
0x3cf6   : > { %v8338_v43 = vmul.f32 0.25, %v8168_v63  ;;  %v12822_v63 = vld [vmem:[%s16991_s9 + $0x3] ss:$0 sm:$0xff] }
0x3cf8   : > { %14457 = vmatprep.mubr.msk.f32.mxu0 %vm1583_vm2, %v8338_v43 }
0x3cf9   : > { %v14441_v33 = vpop.f32.mrf.mxu0 }
0x3cfa   : > { %v8254_v44 = vadd.f32 %v14441_v33, %v12810_v0 }
0x3cfb   : > { %v8248_v2 = vpop.f32.mrf.mxu0 }
0x3cfc   : > { %v8249_v22 = vadd.f32 %v12810_v0, %v8248_v2  ;;  %14453 = vmatprep.subr.msk.mxu0 %vm1583_vm2, %v8254_v44 }
0x3cfd   : > { %14454 = vmatpush3.xpose.msk.msra.mxu0 %vm1583_vm2, %v8254_v44 }
0x3cfe   : > { %14455 = vmatprep.subr.msk.mxu0 %vm1583_vm2, %v8249_v22 }
0x3d01   : > { %v14452_v53 = vpop.f32.mrf.mxu0  ;;  %14456 = vmatpush3.xpose.msk.msra.mxu0 %vm1583_vm2, %v8249_v22  ;;  %v12828_v22 = vld [vmem:[%s16993_s14 + $0x3] ss:$0 sm:$0xff] }
0x3d02   : > { %v8335_v6 = vadd.f32 %v14452_v53, %v12813_v3  ;;  %14478 = vmatprep.subr.mxu0 %v12788_v4 }
0x3d03   : > { %v8329_v51 = vpop.f32.mrf.mxu0 }
0x3d04   : > { %v8330_v60 = vadd.f32 %v12813_v3, %v8329_v51  ;;  %14458 = vmatmul.mubr.msk.f32.vlgmr.msra.gmra.mxu0 %vm1583_vm2, %v8339_v5  ;;  %14460 = vmatprep.subr.mxu1 %v8335_v6 }
0x3d05   : > { %14461 = vmatpush3.msra.mxu1 %v8335_v6  ;;  %14479 = vmatpush3.msra.mxu0 %v12788_v4 }
0x3d06   : > { %14486 = vmatprep.mubr.msk.f32.mxu0 %vm1288_vm0, %v16390_v46  ;;  %14462 = vmatprep.subr.mxu1 %v8330_v60 }
0x3d07   : > { %14480 = vmatprep.subr.mxu0 %v12787_v11  ;;  %14463 = vmatpush3.msra.mxu1 %v8330_v60 }
0x3d08   : > { %14481 = vmatpush3.msra.mxu0 %v12787_v11  ;;  %14467 = vmatprep.subr.mxu1 %v12780_v36 }
0x3d09   : > { %14482 = vmatprep.subr.mxu0 %v12786_v12 }
0x3d0a   : > { %14483 = vmatpush3.msra.mxu0 %v12786_v12 }
0x3d0b   : > { %14484 = vmatprep.subr.mxu0 %v12785_v13 }
0x3d0c   : > { %14485 = vmatpush3.msra.mxu0 %v12785_v13 }
0x3d0d   : > { %14487 = vmatmul.mubr.msk.f32.vlgmr.msra.gmra.mxu0 %vm1288_vm0, %v16392_v47 }
0x3dc4   : > { %v14459_v14 = vpop.f32.mrf.mxu0 }
0x3dc5   : > { %v8428_v52 = vsel %vm4200_vm5, %v14459_v14, -1.7014117e+38 }
0x3dc6   : > { %v8418_v16 = vpop.f32.mrf.mxu0  ;;  %v8432_v55 = vsel %vm1583_vm2, %v8428_v52, -inf }
0x3dc7   : > { %v8427_v56 = vsel %vm4199_vm6, %v8418_v16, -1.7014117e+38  ;;  %8433 = vmax.xlane.f32.xlu1 %v8432_v55 }
0x3dc8   : > { %v8429_v61 = vsel %vm1583_vm2, %v8427_v56, -inf }
0x3dc9   : > { %8430 = vmax.xlane.f32.xlu0 %v8429_v61 }
0x3dcd   : > { %v14488_v17 = vpop.f32.mrf.mxu0 }
0x3dce   : > { %v8691_v18 = vadd.f32 %v14488_v17, %v12825_v1 }
0x3dcf   : > { %v8685_v19 = vpop.f32.mrf.mxu0 }
0x3dd0   : > { %v8686_v20 = vadd.f32 %v12825_v1, %v8685_v19  ;;  %14500 = vmatprep.subr.msk.mxu0 %vm1583_vm2, %v8691_v18 }
0x3dd1   : > { %14501 = vmatpush3.xpose.msk.msra.mxu0 %vm1583_vm2, %v8691_v18  ;;  %v12804_v18 = vld [vmem:[%s16995_s26 + $0x28] sm:$0xff] }
0x3dd2   : > { %14502 = vmatprep.subr.msk.mxu0 %vm1583_vm2, %v8686_v20 }
0x3dd5   : > { %14503 = vmatpush3.xpose.msk.msra.mxu0 %vm1583_vm2, %v8686_v20 }
0x3e50   : > { %v8434_v23 = vpop.xlane.xlu1 %8433 }
0x3e51   : > { %v8436_v24 = vsub.f32 %v8428_v52, %v8434_v23 }
0x3e52   : > { %v8431_v25 = vpop.xlane.xlu0 %8430 }
0x3e53   : > { %v8439_v26 = vmul.f32 1.442695, %v8436_v24  ;;  %v8435_v39 = vsub.f32 %v8427_v56, %v8431_v25 }
0x3e55   : > { %15070 = vpow2.f32 %v8439_v26  ;;  %v8437_v30 = vmul.f32 1.442695, %v8435_v39  ;;  %v12803_v39 = vld [vmem:[%s16995_s26 + $0x20] sm:$0xff] }
0x3e57   : > { %15072 = vpow2.f32 %v8437_v30  ;;  %v12806_v30 = vld [vmem:[%s16995_s26 + $0x38] sm:$0xff] }
0x3e58   : > { %14514 = vmatprep.subr.mxu0 %v12806_v30 }
0x3e62   : > { %v15071_v31 = vpop.eup %15070 }
0x3e63   : > { %v8444_v32 = vsel %vm1583_vm2, %v15071_v31, 0.0 }
0x3e64   : > { %v15073_v34 = vpop.eup %15072  ;;  %8445 = vadd.xlane.f32.xlu1 %v8444_v32 }
0x3e65   : > { %v8441_v35 = vsel %vm1583_vm2, %v15073_v34, 0.0 }
0x3e66   : > { %8442 = vadd.xlane.f32.xlu0 %v8441_v35 }
0x3eed   : > { %v8446_v38 = vpop.xlane.xlu1 %8445 }
0x3eee   : > { %15074 = vrcp.f32 %v8446_v38 }
0x3eef   : > { %v8443_v41 = vpop.xlane.xlu0 %8442 }
0x3ef0   : > { %15076 = vrcp.f32 %v8443_v41 }
0x3efb   : > { %v15075_v42 = vpop.eup %15074 }
0x3efc   : > { %v8450_v9 = vmul.f32 %v15075_v42, %v15071_v31  ;;  %v12805_v31 = vld [vmem:[%s16995_s26 + $0x30] sm:$0xff]  ;;  %v12842_v42 = vld [vmem:[%s16996_s16 + $0x1] ss:$0 sm:$0xff] }
0x3efd   : > { %v15077_v45 = vpop.eup %15076 }
0x3efe   : > { %v8449_v8 = vmul.f32 %v15077_v45, %v15073_v34 }
0x3f00   : > { %14464 = vmatprep.mubr.msk.f32.mxu1 %vm1583_vm2, %v8449_v8 }
0x3f01   : > { %14465 = vmatmul.mubr.msk.f32.vlgmr.msra.gmra.mxu1 %vm1583_vm2, %v8450_v9 }
0x3f02   : > { %14468 = vmatpush3.msra.mxu1 %v12780_v36  ;;  %14475 = vmatprep.mubr.msk.f32.mxu1 %vm1288_vm0, %v16390_v46 }
0x3f03   : > { %14469 = vmatprep.subr.mxu1 %v12779_v48 }
0x3f04   : > { %14470 = vmatpush3.msra.mxu1 %v12779_v48 }
0x3f05   : > { %14471 = vmatprep.subr.mxu1 %v12778_v49 }
0x3f06   : > { %14472 = vmatpush3.msra.mxu1 %v12778_v49 }
0x3f07   : > { %14473 = vmatprep.subr.mxu1 %v12777_v50 }
0x3f08   : > { %14474 = vmatpush3.msra.mxu1 %v12777_v50 }
0x3f09   : > { %14476 = vmatmul.mubr.msk.f32.vlgmr.msra.gmra.mxu1 %vm1288_vm0, %v16392_v47  ;;  %14489 = vmatprep.subr.mxu1 %v12796_v54 }
0x3f0a   : > { %14490 = vmatpush3.msra.mxu1 %v12796_v54  ;;  %14497 = vmatprep.mubr.msk.f32.mxu1 %vm1288_vm0, %v16390_v46 }
0x3f0b   : > { %14491 = vmatprep.subr.mxu1 %v12795_v57 }
0x3f0c   : > { %14492 = vmatpush3.msra.mxu1 %v12795_v57 }
0x3f0d   : > { %14493 = vmatprep.subr.mxu1 %v12794_v58 }
0x3f0e   : > { %14494 = vmatpush3.msra.mxu1 %v12794_v58 }
0x3f0f   : > { %14495 = vmatprep.subr.mxu1 %v12793_v59 }
0x3f10   : > { %14496 = vmatpush3.msra.mxu1 %v12793_v59 }
0x3f11   : > { %14498 = vmatmul.mubr.msk.f32.vlgmr.msra.gmra.mxu1 %vm1288_vm0, %v16392_v47 }
0x3fc1   : > { %v14466_v29 = vpop.f32.mrf.mxu1 }
0x3fc3   : > { %v8523_v62 = vpop.f32.mrf.mxu1 }
0x3fc9   : > { %v14477_v43 = vpop.f32.mrf.mxu1 }
0x3fca   : > { %v8610_v0 = vadd.f32 %v14477_v43, %v12822_v63 }
0x3fcb   : > { %v8604_v33 = vpop.f32.mrf.mxu1 }
0x3fcc   : > { %v8605_v44 = vadd.f32 %v12822_v63, %v8604_v33  ;;  %v8776_v2 = vmul.f32 0.25, %v8610_v0 }
0x3fce   : > { %v8775_v46 = vmul.f32 0.25, %v8605_v44  ;;  %v12850_v44 = vld [vmem:[%s16997_s18 + $0x38] sm:$0xff] }
0x3fd0   : > { %14504 = vmatprep.mubr.msk.f32.mxu0 %vm1583_vm2, %v8775_v46  ;;  %v12849_v46 = vld [vmem:[%s16997_s18 + $0x30] sm:$0xff] }
0x3fd1   : > { %v14499_v37 = vpop.f32.mrf.mxu1  ;;  %14505 = vmatmul.mubr.msk.f32.vlgmr.msra.gmra.mxu0 %vm1583_vm2, %v8776_v2  ;;  %v12848_v2 = vld [vmem:[%s16997_s18 + $0x28] sm:$0xff] }
0x3fd2   : > { %v8772_v3 = vadd.f32 %v14499_v37, %v12828_v22  ;;  %14515 = vmatpush3.msra.mxu0 %v12806_v30  ;;  %v12858_v30 = vld [vmem:[%s17001_s24 + $0x98] sm:$0xff] }
0x3fd3   : > { %v8766_v4 = vpop.f32.mrf.mxu1  ;;  %14516 = vmatprep.subr.mxu0 %v12805_v31 }
0x3fd4   : > { %v8767_v53 = vadd.f32 %v12828_v22, %v8766_v4  ;;  %14507 = vmatprep.subr.mxu1 %v8772_v3  ;;  %14517 = vmatpush3.msra.mxu0 %v12805_v31  ;;  %v12847_v22 = vld [vmem:[%s16997_s18 + $0x20] sm:$0xff]  ;;  %v12857_v31 = vld [vmem:[%s17001_s24 + $0x90] sm:$0xff] }
0x3fd5   : > { %14508 = vmatpush3.msra.mxu1 %v8772_v3  ;;  %14528 = vmatprep.subr.mxu0 %v12850_v44 }
0x3fd6   : > { %14509 = vmatprep.subr.mxu1 %v8767_v53 }
0x3fd7   : > { %14510 = vmatpush3.msra.mxu1 %v8767_v53 }
0x3fd8   : > { %14521 = vmatprep.subr.mxu1 %v12804_v18 }
0x4091   : > { %v14506_v47 = vpop.f32.mrf.mxu0 }
0x4092   : > { %v8865_v5 = vsel %vm4200_vm5, %v14506_v47, -1.7014117e+38 }
0x4093   : > { %v8855_v6 = vpop.f32.mrf.mxu0  ;;  %v8869_v51 = vsel %vm1583_vm2, %v8865_v5, -inf }
0x4094   : > { %v8864_v60 = vsel %vm4199_vm6, %v8855_v6, -1.7014117e+38  ;;  %8870 = vmax.xlane.f32.xlu1 %v8869_v51  ;;  %v12845_v51 = vld [vmem:[%s16999_s19 + $0x1] ss:$0 sm:$0xff] }
0x4095   : > { %v8866_v11 = vsel %vm1583_vm2, %v8864_v60, -inf }
0x4096   : > { %8867 = vmax.xlane.f32.xlu0 %v8866_v11 }
0x411d   : > { %v8871_v12 = vpop.xlane.xlu1 %8870 }
0x411e   : > { %v8873_v13 = vsub.f32 %v8865_v5, %v8871_v12 }
0x411f   : > { %v8868_v14 = vpop.xlane.xlu0 %8867 }
0x4120   : > { %v8876_v52 = vmul.f32 1.442695, %v8873_v13  ;;  %v8872_v16 = vsub.f32 %v8864_v60, %v8868_v14  ;;  %v12846_v14 = vld [vmem:[%s17000_s21 + $0x1] ss:$0 sm:$0xff] }
0x4122   : > { %15078 = vpow2.f32 %v8876_v52  ;;  %v8874_v55 = vmul.f32 1.442695, %v8872_v16 }
0x4124   : > { %15080 = vpow2.f32 %v8874_v55 }
0x412f   : > { %v15079_v56 = vpop.eup %15078 }
0x4130   : > { %v8881_v61 = vsel %vm1583_vm2, %v15079_v56, 0.0 }
0x4131   : > { %v15081_v1 = vpop.eup %15080  ;;  %8882 = vadd.xlane.f32.xlu1 %v8881_v61  ;;  %v12869_v61 = vld [vmem:[%s17001_s24 + $0xf0] sm:$0xff] }
0x4132   : > { %v8878_v17 = vsel %vm1583_vm2, %v15081_v1, 0.0 }
0x4133   : > { %8879 = vadd.xlane.f32.xlu0 %v8878_v17  ;;  %v12867_v17 = vld [vmem:[%s17001_s24 + $0xe0] sm:$0xff] }
0x41ba   : > { %v8883_v19 = vpop.xlane.xlu1 %8882 }
0x41bb   : > { %15082 = vrcp.f32 %v8883_v19  ;;  %v12865_v19 = vld [vmem:[%s17001_s24 + $0xd0] sm:$0xff] }
0x41bc   : > { %v8880_v20 = vpop.xlane.xlu0 %8879 }
0x41bd   : > { %15084 = vrcp.f32 %v8880_v20  ;;  %v12864_v20 = vld [vmem:[%s17001_s24 + $0xc8] sm:$0xff] }
0x41c8   : > { %v15083_v23 = vpop.eup %15082 }
0x41c9   : > { %v8887_v26 = vmul.f32 %v15083_v23, %v15079_v56  ;;  %v12870_v56 = vld [vmem:[%s17001_s24 + $0xf8] sm:$0xff]  ;;  %v12863_v23 = vld [vmem:[%s17001_s24 + $0xc0] sm:$0xff] }
0x41ca   : > { %v15085_v24 = vpop.eup %15084 }
0x41cb   : > { %v8886_v25 = vmul.f32 %v15085_v24, %v15081_v1  ;;  %v12868_v1 = vld [vmem:[%s17001_s24 + $0xe8] sm:$0xff]  ;;  %v12862_v24 = vld [vmem:[%s17001_s24 + $0xb8] sm:$0xff] }
0x41cd   : > { %14511 = vmatprep.mubr.msk.f32.mxu1 %vm1583_vm2, %v8886_v25  ;;  %v12861_v25 = vld [vmem:[%s17001_s24 + $0xb0] sm:$0xff] }
0x41ce   : > { %14512 = vmatmul.mubr.msk.f32.vlgmr.msra.gmra.mxu1 %vm1583_vm2, %v8887_v26  ;;  %v12860_v26 = vld [vmem:[%s17001_s24 + $0xa8] sm:$0xff] }
0x41cf   : > { %14522 = vmatpush3.msra.mxu1 %v12804_v18  ;;  %14525 = vmatprep.mubr.msk.f32.mxu1 %vm1583_vm2, %v8523_v62  ;;  %v12866_v18 = vld [vmem:[%s17001_s24 + $0xd8] sm:$0xff] }
0x41d0   : > { %14523 = vmatprep.subr.mxu1 %v12803_v39 }
0x41d1   : > { %14524 = vmatpush3.msra.mxu1 %v12803_v39  ;;  %v12859_v39 = vld [vmem:[%s17001_s24 + $0xa0] sm:$0xff] }
0x41d2   : > { %14526 = vmatmul.mubr.msk.f32.vlgmr.msra.gmra.mxu1 %vm1583_vm2, %v14466_v29  ;;  %14539 = vmatprep.subr.mxu1 %v12870_v56 }
0x41d3   : > { %14540 = vmatpush3.msra.mxu1 %v12870_v56 }
0x41d4   : > { %14541 = vmatprep.subr.mxu1 %v12869_v61 }
0x41d5   : > { %14542 = vmatpush3.msra.mxu1 %v12869_v61 }
0x41d6   : > { %14543 = vmatprep.subr.mxu1 %v12868_v1 }
0x41d7   : > { %14544 = vmatpush3.msra.mxu1 %v12868_v1 }
0x41d8   : > { %14545 = vmatprep.subr.mxu1 %v12867_v17 }
0x41d9   : > { %14546 = vmatpush3.msra.mxu1 %v12867_v17 }
0x41da   : > { %14547 = vmatprep.subr.mxu1 %v12866_v18 }
0x41db   : > { %14548 = vmatpush3.msra.mxu1 %v12866_v18 }
0x41dc   : > { %14549 = vmatprep.subr.mxu1 %v12865_v19 }
0x41dd   : > { %14550 = vmatpush3.msra.mxu1 %v12865_v19  ;;  %v12873_v19 = vld [vmem:[%s15439_s20] ss:$0 sm:$0xff] }
0x41de   : > { %14551 = vmatprep.subr.mxu1 %v12864_v20 }
0x41df   : > { %14552 = vmatpush3.msra.mxu1 %v12864_v20 }
0x41e0   : > { %14553 = vmatprep.subr.mxu1 %v12863_v23 }
0x41e1   : > { %14554 = vmatpush3.msra.mxu1 %v12863_v23  ;;  %v12874_v23 = vld [vmem:[%s15444_s27] ss:$0 sm:$0xff] }
0x41e2   : > { %14555 = vmatprep.subr.mxu1 %v12862_v24 }
0x41e3   : > { %14556 = vmatpush3.msra.mxu1 %v12862_v24 }
0x41e4   : > { %14557 = vmatprep.subr.mxu1 %v12861_v25 }
0x41e5   : > { %14558 = vmatpush3.msra.mxu1 %v12861_v25 }
0x41e6   : > { %14559 = vmatprep.subr.mxu1 %v12860_v26 }
0x41e7   : > { %14560 = vmatpush3.msra.mxu1 %v12860_v26  ;;  %v12876_v26 = vld [vmem:[%s16987_s5] ss:$0 sm:$0xff] }
0x41e8   : > { %14561 = vmatprep.subr.mxu1 %v12859_v39 }
0x41e9   : > { %14562 = vmatpush3.msra.mxu1 %v12859_v39 }
0x41ea   : > { %14563 = vmatprep.subr.mxu1 %v12858_v30 }
0x41eb   : > { %14564 = vmatpush3.msra.mxu1 %v12858_v30 }
0x41ec   : > { %14565 = vmatprep.subr.mxu1 %v12857_v31 }
0x41ed   : > { %14566 = vmatpush3.msra.mxu1 %v12857_v31  ;;  %v12877_v31 = vld [vmem:[%s16988_s6] ss:$0 sm:$0xff] }
0x428e   : > { %v14513_v32 = vpop.f32.mrf.mxu1 }
0x4290   : > { %v8960_v34 = vpop.f32.mrf.mxu1 }
0x4291   : > { %14518 = vmatprep.mubr.msk.f32.mxu0 %vm1583_vm2, %v8960_v34  ;;  %v12855_v34 = vld [vmem:[%s17001_s24 + $0x80] sm:$0xff] }
0x4292   : > { %14519 = vmatmul.mubr.msk.f32.vlgmr.msra.gmra.mxu0 %vm1583_vm2, %v14513_v32  ;;  %v14527_v35 = vpop.f32.mrf.mxu1  ;;  %v12856_v32 = vld [vmem:[%s17001_s24 + $0x88] sm:$0xff] }
0x4293   : > { %14529 = vmatpush3.msra.mxu0 %v12850_v44  ;;  %14567 = vmatprep.subr.mxu1 %v12856_v32 }
0x4294   : > { %v9122_v41 = vpop.f32.mrf.mxu1  ;;  %14530 = vmatprep.subr.mxu0 %v12849_v46  ;;  %14568 = vmatpush3.msra.mxu1 %v12856_v32 }
0x4295   : > { %14531 = vmatpush3.msra.mxu0 %v12849_v46  ;;  %14569 = vmatprep.subr.mxu1 %v12855_v34 }
0x4296   : > { %14532 = vmatprep.subr.mxu0 %v12848_v2  ;;  %14570 = vmatpush3.msra.mxu1 %v12855_v34 }
0x4297   : > { %14533 = vmatpush3.msra.mxu0 %v12848_v2  ;;  %v12872_v2 = vld [vmem:[%s15434_s13 + $0x1] ss:$0 sm:$0xff] }
0x4298   : > { %14534 = vmatprep.subr.mxu0 %v12847_v22 }
0x4299   : > { %14535 = vmatpush3.msra.mxu0 %v12847_v22 }
0x4352   : > { %v14520_v36 = vpop.f32.mrf.mxu0 }
0x4353   : > { %v9128_v38 = vadd.f32 %v14527_v35, %v14520_v36  ;;  %v12852_v35 = vld [vmem:[%s17003_s25 + $0x1] ss:$0 sm:$0xff] }
0x4354   : > { %v9041_v45 = vpop.f32.mrf.mxu0 }
0x4355   : > { %v9132_v8 = vadd.f32 %v9128_v38, %v16370_v10  ;;  %v9123_v9 = vadd.f32 %v9122_v41, %v9041_v45 }
0x4357   : > { %v16485_v48 = vadd.f32 %v12842_v42, %v9132_v8  ;;  %v9131_v49 = vadd.f32 %v9123_v9, %v16373_v7 }
0x4359   : > { %v16488_v50 = vadd.f32 %v12842_v42, %v9131_v49  ;;  %v9147_v54 = vsel %vm1288_vm0, %v16485_v48, 0.0 }
0x435a   : > { %9148 = vadd.xlane.f32.xlu1 %v9147_v54 }
0x435b   : > { %v9144_v57 = vsel %vm1288_vm0, %v16488_v50, 0.0 }
0x435c   : > { %9145 = vadd.xlane.f32.xlu0 %v9144_v57 }
0x43e3   : > { %v9149_v58 = vpop.xlane.xlu1 %9148 }
0x43e4   : > { %v9151_v10 = vmul.f32 0.03125, %v9149_v58 }
0x43e5   : > { %v9146_v59 = vpop.xlane.xlu0 %9145 }
0x43e6   : > { %v9153_v29 = vsub.f32 %v16485_v48, %v9151_v10  ;;  %v9150_v7 = vmul.f32 0.03125, %v9146_v59 }
0x43e8   : > { %v9152_v62 = vsub.f32 %v16488_v50, %v9150_v7  ;;  %v9155_v63 = vmul.f32 %v9153_v29, %v9153_v29 }
0x43ea   : > { %v9159_v43 = vsel %vm1288_vm0, %v9155_v63, 0.0  ;;  %v9154_v0 = vmul.f32 %v9152_v62, %v9152_v62 }
0x43eb   : > { %9160 = vadd.xlane.f32.xlu1 %v9159_v43 }
0x43ec   : > { %v9156_v33 = vsel %vm1288_vm0, %v9154_v0, 0.0 }
0x43ed   : > { %9157 = vadd.xlane.f32.xlu0 %v9156_v33 }
0x4474   : > { %v9161_v37 = vpop.xlane.xlu1 %9160 }
0x4475   : > { %v9163_v3 = vmul.f32 0.03125, %v9161_v37 }
0x4476   : > { %v9158_v4 = vpop.xlane.xlu0 %9157 }
0x4477   : > { %v9165_v53 = vadd.f32 1e-05, %v9163_v3  ;;  %v9162_v47 = vmul.f32 0.03125, %v9158_v4 }
0x4479   : > { %15086 = vrsqrt.f32 %v9165_v53  ;;  %v9164_v5 = vadd.f32 1e-05, %v9162_v47  ;;  %v16526_v53 = vld [vmem:[#allocation2] sm:$0xff] }
0x447a   : > { %v9453_v47 = vsel %vm1288_vm0, %v16526_v53, 0.0 }
0x447b   : > { %15088 = vrsqrt.f32 %v9164_v5 }
0x4486   : > { %v15087_v6 = vpop.eup %15086 }
0x4487   : > { %v9169_v60 = vmul.f32 %v15087_v6, %v9153_v29 }
0x4488   : > { %v15089_v11 = vpop.eup %15088 }
0x4489   : > { %v9168_v12 = vmul.f32 %v15089_v11, %v9152_v62  ;;  %v9177_v13 = vmul.f32 %v12845_v51, %v9169_v60 }
0x448b   : > { %v9176_v52 = vmul.f32 %v12845_v51, %v9168_v12  ;;  %v9185_v55 = vadd.f32 %v12846_v14, %v9177_v13 }
0x448d   : > { %v9184_v16 = vadd.f32 %v12846_v14, %v9176_v52 }
0x448f   : > { %14536 = vmatprep.mubr.msk.f32.mxu0 %vm1288_vm0, %v9184_v16 }
0x4490   : > { %14537 = vmatmul.mubr.msk.f32.vlgmr.msra.gmra.mxu0 %vm1288_vm0, %v9185_v55 }
0x4550   : > { %v14538_v36 = vpop.f32.mrf.mxu0 }
0x4551   : > { %v9275_v38 = vadd.f32 %v14538_v36, %v12852_v35 }
0x4552   : > { %v9269_v41 = vpop.f32.mrf.mxu0 }
0x4553   : > { %v9279_v42 = vmul.f32 %v9275_v38, %v9275_v38  ;;  %v9270_v45 = vadd.f32 %v12852_v35, %v9269_v41  ;;  %v9446_v35 = vld [vmem:[%s15259_s17 + $0x8] sm:$0xff] }
0x4555   : > { %v9281_v8 = vmul.f32 %v9279_v42, %v9275_v38  ;;  %v9278_v9 = vmul.f32 %v9270_v45, %v9270_v45 }
0x4557   : > { %v9283_v49 = vmul.f32 0.044715, %v9281_v8  ;;  %v9280_v54 = vmul.f32 %v9278_v9, %v9270_v45 }
0x4559   : > { %v9285_v57 = vadd.f32 %v9283_v49, %v9275_v38  ;;  %v9282_v58 = vmul.f32 0.044715, %v9280_v54 }
0x455b   : > { %v9287_v10 = vmul.f32 0.7978846, %v9285_v57  ;;  %v9284_v59 = vadd.f32 %v9282_v58, %v9270_v45 }
0x455d   : > { %15090 = vtanh.f32 %v9287_v10  ;;  %v9286_v29 = vmul.f32 0.7978846, %v9284_v59  ;;  %v9498_v10 = vld [vmem:[%s16984_s3 + $0x18] sm:$0xff]  ;;  %v9497_v59 = vld [vmem:[%s16984_s3 + $0x10] sm:$0xff] }
0x455e   : > { %14574 = vmatprep.subr.mxu0 %v9498_v10 }
0x455f   : > { %15092 = vtanh.f32 %v9286_v29  ;;  %14575 = vmatpush3.msra.mxu0 %v9498_v10  ;;  %v9496_v29 = vld [vmem:[%s16984_s3 + $0x8] sm:$0xff] }
0x4560   : > { %14576 = vmatprep.subr.mxu0 %v9497_v59 }
0x4561   : > { %14577 = vmatpush3.msra.mxu0 %v9497_v59 }
0x4562   : > { %14578 = vmatprep.subr.mxu0 %v9496_v29 }
0x4563   : > { %14579 = vmatpush3.msra.mxu0 %v9496_v29 }
0x456a   : > { %v15091_v7 = vpop.eup %15090 }
0x456b   : > { %v9291_v62 = vadd.f32 1.0, %v15091_v7  ;;  %v9495_v7 = vld [vmem:[%s16984_s3] sm:$0xff] }
0x456c   : > { %v15093_v63 = vpop.eup %15092  ;;  %14580 = vmatprep.subr.mxu0 %v9495_v7 }
0x456d   : > { %v9290_v43 = vadd.f32 1.0, %v15093_v63  ;;  %v9293_v0 = vmul.f32 0.5, %v9291_v62  ;;  %v9506_v62 = vld [vmem:[%s16985_s1 + $0x18] sm:$0xff]  ;;  %14581 = vmatpush3.msra.mxu0 %v9495_v7 }
0x456e   : > { %14585 = vmatprep.subr.mxu0 %v9506_v62 }
0x456f   : > { %v9292_v33 = vmul.f32 0.5, %v9290_v43  ;;  %v9295_v46 = vmul.f32 %v9293_v0, %v9275_v38  ;;  %v15161_v38 = vld [vmem:[%s15492_s2] sm:$0xff] }
0x4571   : > { %v9294_v44 = vmul.f32 %v9292_v33, %v9270_v45 }
0x4573   : > { %14571 = vmatprep.mubr.f32.mxu1 %v9294_v44 }
0x4574   : > { %14572 = vmatmul.mubr.f32.vlgmr.msra.gmra.mxu1 %v9295_v46 }
0x4634   : > { %v14573_v22 = vpop.f32.mrf.mxu1 }
0x4635   : > { %v9391_v37 = vadd.f32 %v14573_v22, %v12872_v2  ;;  %v9505_v22 = vld [vmem:[%s16985_s1 + $0x10] sm:$0xff] }
0x4637   : > { %v9395_v3 = vadd.f32 %v9391_v37, %v16485_v48  ;;  %v9504_v37 = vld [vmem:[%s16985_s1 + $0x8] sm:$0xff] }
0x4639   : > { %v9401_v4 = vsel %vm1288_vm0, %v9395_v3, 0.0 }
0x463a   : > { %9402 = vadd.xlane.f32.xlu0 %v9401_v4  ;;  %v9514_v4 = vld [vmem:[%s16989_s8 + $0x18] sm:$0xff] }
0x463e   : > { %9454 = vadd.xlane.f32.xlu0 %v9453_v47  ;;  %v9513_v47 = vld [vmem:[%s16989_s8 + $0x10] sm:$0xff] }
0x46c3   : > { %v9403_v5 = vpop.xlane.xlu0 %9402 }
0x46c4   : > { %v9405_v6 = vmul.f32 0.03125, %v9403_v5  ;;  %v9512_v5 = vld [vmem:[%s16989_s8 + $0x8] sm:$0xff] }
0x46c6   : > { %v9407_v51 = vsub.f32 %v9395_v3, %v9405_v6  ;;  %v9503_v3 = vld [vmem:[%s16985_s1] sm:$0xff] }
0x46c7   : > { %v9455_v60 = vpop.xlane.xlu0 %9454  ;;  %v9511_v6 = vld [vmem:[%s16989_s8] sm:$0xff] }
0x46c8   : > { %v9459_v11 = vmul.f32 0.03125, %v9455_v60  ;;  %v9409_v12 = vmul.f32 %v9407_v51, %v9407_v51  ;;  %v12878_v60 = vld [vmem:[%s16991_s9] ss:$0 sm:$0xff] }
0x46ca   : > { %v9461_v13 = vsub.f32 %v16526_v53, %v9459_v11  ;;  %v9413_v48 = vsel %vm1288_vm0, %v9409_v12, 0.0 }
0x46cb   : > { %9414 = vadd.xlane.f32.xlu1 %v9413_v48  ;;  %v12881_v48 = vld [vmem:[%s16992_s12] ss:$0 sm:$0xff] }
0x46cc   : > { %v9463_v14 = vmul.f32 %v9461_v13, %v9461_v13 }
0x46ce   : > { %v9465_v52 = vsel %vm1288_vm0, %v9463_v14, 0.0 }
0x46cf   : > { %9466 = vadd.xlane.f32.xlu0 %v9465_v52 }
0x4754   : > { %v9415_v16 = vpop.xlane.xlu1 %9414 }
0x4755   : > { %v9417_v55 = vmul.f32 0.03125, %v9415_v16 }
0x4757   : > { %v9419_v56 = vadd.f32 1e-05, %v9417_v55 }
0x4758   : > { %v9467_v61 = vpop.xlane.xlu0 %9466 }
0x4759   : > { %15094 = vrsqrt.f32 %v9419_v56  ;;  %v9471_v1 = vmul.f32 0.03125, %v9467_v61  ;;  %v12884_v61 = vld [vmem:[%s16993_s14] ss:$0 sm:$0xff] }
0x475b   : > { %v9473_v17 = vadd.f32 1e-05, %v9471_v1  ;;  %v9510_v1 = vld [vmem:[%s16985_s1 + $0x38] sm:$0xff] }
0x475d   : > { %15096 = vrsqrt.f32 %v9473_v17 }
0x4766   : > { %v15095_v18 = vpop.eup %15094 }
0x4767   : > { %v9423_v20 = vmul.f32 %v15095_v18, %v9407_v51 }
0x4769   : > { %v9431_v24 = vmul.f32 %v12873_v19, %v9423_v20 }
0x476a   : > { %v15097_v25 = vpop.eup %15096 }
0x476b   : > { %v9439_v39 = vadd.f32 %v12874_v23, %v9431_v24  ;;  %v9477_v30 = vmul.f32 %v15097_v25, %v9461_v13  ;;  %v9509_v24 = vld [vmem:[%s16985_s1 + $0x30] sm:$0xff]  ;;  %v9508_v25 = vld [vmem:[%s16985_s1 + $0x28] sm:$0xff] }
0x476d   : > { %9441 = vst.msk [vmem:[#allocation3 + $0x8] sm:$0xff] %vm1288_vm0, %v9439_v39  ;;  %v9485_v32 = vmul.f32 %v12876_v26, %v9477_v30 }
0x476f   : > { %v16538_v34 = vadd.f32 %v12877_v31, %v9485_v32 }
0x4771   : > { %14582 = vmatprep.mubr.msk.f32.mxu0 %vm1288_vm0, %v16538_v34 }
0x4774   : > { %v9442_v36 = vld [vmem:[#allocation3 + $0x8] sm:$0xff] }
0x4775   : > { %v9443_v41 = vsel %vm6618_vm7, %v15161_v38, %v9442_v36  ;;  %v12896_v38 = vld [vmem:[%s16992_s12 + $0x1] ss:$0 sm:$0xff] }
0x4776   : > { %v9447_v42 = vadd.f32 %v9446_v35, %v9443_v41  ;;  %12875 = vst.msk [vmem:[%s16221_s7 + $0x8] sm:$0xff] %vm1288_vm0, %v9443_v41 }
0x4778   : > { %9448 = vst.msk [vmem:[#allocation2 + $0x8] sm:$0xff] %vm1288_vm0, %v9447_v42 }
0x477f   : > { %v16549_v45 = vld [vmem:[#allocation2 + $0x8] sm:$0xff] }
0x4780   : > { %v9456_v8 = vsel %vm1288_vm0, %v16549_v45, 0.0 }
0x4781   : > { %9457 = vadd.xlane.f32.xlu1 %v9456_v8 }
0x480a   : > { %v9458_v9 = vpop.xlane.xlu1 %9457 }
0x480b   : > { %v9460_v49 = vmul.f32 0.03125, %v9458_v9 }
0x480d   : > { %v9462_v54 = vsub.f32 %v16549_v45, %v9460_v49 }
0x480f   : > { %v9464_v57 = vmul.f32 %v9462_v54, %v9462_v54 }
0x4811   : > { %v9468_v58 = vsel %vm1288_vm0, %v9464_v57, 0.0 }
0x4812   : > { %9469 = vadd.xlane.f32.xlu1 %v9468_v58 }
0x489b   : > { %v9470_v63 = vpop.xlane.xlu1 %9469 }
0x489c   : > { %v9472_v43 = vmul.f32 0.03125, %v9470_v63 }
0x489e   : > { %v9474_v0 = vadd.f32 1e-05, %v9472_v43  ;;  %v9502_v43 = vld [vmem:[%s16984_s3 + $0x38] sm:$0xff] }
0x48a0   : > { %15098 = vrsqrt.f32 %v9474_v0 }
0x48ad   : > { %v15099_v33 = vpop.eup %15098 }
0x48ae   : > { %v9478_v44 = vmul.f32 %v15099_v33, %v9462_v54 }
0x48b0   : > { %v9486_v46 = vmul.f32 %v12876_v26, %v9478_v44  ;;  %v9507_v26 = vld [vmem:[%s16985_s1 + $0x20] sm:$0xff] }
0x48b2   : > { %v16560_v2 = vadd.f32 %v12877_v31, %v9486_v46 }
0x48b4   : > { %14583 = vmatmul.mubr.msk.f32.vlgmr.msra.gmra.mxu0 %vm1288_vm0, %v16560_v2 }
0x48b5   : > { %14586 = vmatpush3.msra.mxu0 %v9506_v62  ;;  %14593 = vmatprep.mubr.msk.f32.mxu0 %vm1288_vm0, %v16538_v34 }
0x48b6   : > { %14587 = vmatprep.subr.mxu0 %v9505_v22 }
0x48b7   : > { %14588 = vmatpush3.msra.mxu0 %v9505_v22 }
0x48b8   : > { %14589 = vmatprep.subr.mxu0 %v9504_v37 }
0x48b9   : > { %14590 = vmatpush3.msra.mxu0 %v9504_v37 }
0x48ba   : > { %14591 = vmatprep.subr.mxu0 %v9503_v3 }
0x48bb   : > { %14592 = vmatpush3.msra.mxu0 %v9503_v3  ;;  %v9501_v3 = vld [vmem:[%s16984_s3 + $0x30] sm:$0xff] }
0x48bc   : > { %14594 = vmatmul.mubr.msk.f32.vlgmr.msra.gmra.mxu0 %vm1288_vm0, %v16560_v2  ;;  %14596 = vmatprep.subr.mxu0 %v9514_v4 }
0x48bd   : > { %14597 = vmatpush3.msra.mxu0 %v9514_v4  ;;  %14604 = vmatprep.mubr.msk.f32.mxu0 %vm1288_vm0, %v16538_v34  ;;  %v9500_v4 = vld [vmem:[%s16984_s3 + $0x28] sm:$0xff] }
0x48be   : > { %14598 = vmatprep.subr.mxu0 %v9513_v47 }
0x48bf   : > { %14599 = vmatpush3.msra.mxu0 %v9513_v47  ;;  %v9499_v47 = vld [vmem:[%s16984_s3 + $0x20] sm:$0xff] }
0x48c0   : > { %14600 = vmatprep.subr.mxu0 %v9512_v5 }
0x48c1   : > { %14601 = vmatpush3.msra.mxu0 %v9512_v5  ;;  %v9518_v5 = vld [vmem:[%s16989_s8 + $0x38] sm:$0xff] }
0x48c2   : > { %14602 = vmatprep.subr.mxu0 %v9511_v6 }
0x48c3   : > { %14603 = vmatpush3.msra.mxu0 %v9511_v6  ;;  %v9517_v6 = vld [vmem:[%s16989_s8 + $0x30] sm:$0xff] }
0x48c4   : > { %14605 = vmatmul.mubr.msk.f32.vlgmr.msra.gmra.mxu0 %vm1288_vm0, %v16560_v2 }
0x4974   : > { %v14584_v51 = vpop.f32.mrf.mxu0 }
0x4975   : > { %v9613_v56 = vadd.f32 %v14584_v51, %v12878_v60  ;;  %v9516_v51 = vld [vmem:[%s16989_s8 + $0x28] sm:$0xff] }
0x4976   : > { %v9607_v11 = vpop.f32.mrf.mxu0 }
0x4977   : > { %v9608_v12 = vadd.f32 %v12878_v60, %v9607_v11  ;;  %v9779_v18 = vmul.f32 0.25, %v9613_v56  ;;  %v9515_v60 = vld [vmem:[%s16989_s8 + $0x20] sm:$0xff]  ;;  %v16627_v11 = vpop.f32.mrf.mxu1 }
0x4979   : > { %v9778_v13 = vmul.f32 0.25, %v9608_v12 }
0x497b   : > { %14611 = vmatprep.mubr.msk.f32.mxu0 %vm1583_vm2, %v9778_v13 }
0x497c   : > { %v14595_v14 = vpop.f32.mrf.mxu0 }
0x497d   : > { %v9694_v52 = vadd.f32 %v14595_v14, %v12881_v48 }
0x497e   : > { %v9688_v16 = vpop.f32.mrf.mxu0 }
0x497f   : > { %v9689_v55 = vadd.f32 %v12881_v48, %v9688_v16  ;;  %14607 = vmatprep.subr.msk.mxu0 %vm1583_vm2, %v9694_v52  ;;  %v12893_v48 = vld [vmem:[%s16991_s9 + $0x1] ss:$0 sm:$0xff] }
0x4980   : > { %14608 = vmatpush3.xpose.msk.msra.mxu0 %vm1583_vm2, %v9694_v52 }
0x4981   : > { %14609 = vmatprep.subr.msk.mxu0 %vm1583_vm2, %v9689_v55 }
0x4984   : > { %v14606_v17 = vpop.f32.mrf.mxu0  ;;  %14610 = vmatpush3.xpose.msk.msra.mxu0 %vm1583_vm2, %v9689_v55 }
0x4985   : > { %v9775_v19 = vadd.f32 %v14606_v17, %v12884_v61  ;;  %14632 = vmatprep.subr.mxu0 %v9510_v1 }
0x4986   : > { %v9769_v20 = vpop.f32.mrf.mxu0 }
0x4987   : > { %v9770_v23 = vadd.f32 %v12884_v61, %v9769_v20  ;;  %14612 = vmatmul.mubr.msk.f32.vlgmr.msra.gmra.mxu0 %vm1583_vm2, %v9779_v18  ;;  %14614 = vmatprep.subr.mxu1 %v9775_v19  ;;  %v12899_v61 = vld [vmem:[%s16993_s14 + $0x1] ss:$0 sm:$0xff] }
0x4988   : > { %14615 = vmatpush3.msra.mxu1 %v9775_v19  ;;  %14633 = vmatpush3.msra.mxu0 %v9510_v1 }
0x4989   : > { %14640 = vmatprep.mubr.msk.f32.mxu0 %vm1288_vm0, %v16538_v34  ;;  %14616 = vmatprep.subr.mxu1 %v9770_v23 }
0x498a   : > { %14634 = vmatprep.subr.mxu0 %v9509_v24  ;;  %14617 = vmatpush3.msra.mxu1 %v9770_v23 }
0x498b   : > { %14635 = vmatpush3.msra.mxu0 %v9509_v24  ;;  %14621 = vmatprep.subr.mxu1 %v9502_v43 }
0x498c   : > { %14636 = vmatprep.subr.mxu0 %v9508_v25 }
0x498d   : > { %14637 = vmatpush3.msra.mxu0 %v9508_v25 }
0x498e   : > { %14638 = vmatprep.subr.mxu0 %v9507_v26 }
0x498f   : > { %14639 = vmatpush3.msra.mxu0 %v9507_v26 }
0x4990   : > { %14641 = vmatmul.mubr.msk.f32.vlgmr.msra.gmra.mxu0 %vm1288_vm0, %v16560_v2 }
0x4a47   : > { %v14613_v39 = vpop.f32.mrf.mxu0 }
0x4a48   : > { %v9868_v30 = vsel %vm4200_vm5, %v14613_v39, -1.7014117e+38 }
0x4a49   : > { %v9858_v31 = vpop.f32.mrf.mxu0  ;;  %v9872_v32 = vsel %vm1583_vm2, %v9868_v30, -inf }
0x4a4a   : > { %v9867_v35 = vsel %vm4199_vm6, %v9858_v31, -1.7014117e+38  ;;  %9873 = vmax.xlane.f32.xlu1 %v9872_v32 }
0x4a4b   : > { %v9869_v36 = vsel %vm1583_vm2, %v9867_v35, -inf }
0x4a4c   : > { %9870 = vmax.xlane.f32.xlu0 %v9869_v36 }
0x4a50   : > { %v14642_v41 = vpop.f32.mrf.mxu0 }
0x4a51   : > { %v10131_v42 = vadd.f32 %v14642_v41, %v12896_v38 }
0x4a52   : > { %v10125_v8 = vpop.f32.mrf.mxu0 }
0x4a53   : > { %v10126_v9 = vadd.f32 %v12896_v38, %v10125_v8  ;;  %14654 = vmatprep.subr.msk.mxu0 %vm1583_vm2, %v10131_v42 }
0x4a54   : > { %14655 = vmatpush3.xpose.msk.msra.mxu0 %vm1583_vm2, %v10131_v42 }
0x4a55   : > { %14656 = vmatprep.subr.msk.mxu0 %vm1583_vm2, %v10126_v9 }
0x4a58   : > { %14657 = vmatpush3.xpose.msk.msra.mxu0 %vm1583_vm2, %v10126_v9  ;;  %v9526_v9 = vld [vmem:[%s16995_s26 + $0x8] sm:$0xff] }
0x4ad3   : > { %v9874_v49 = vpop.xlane.xlu1 %9873 }
0x4ad4   : > { %v9876_v54 = vsub.f32 %v9868_v30, %v9874_v49 }
0x4ad5   : > { %v9871_v57 = vpop.xlane.xlu0 %9870 }
0x4ad6   : > { %v9879_v58 = vmul.f32 1.442695, %v9876_v54  ;;  %v9875_v10 = vsub.f32 %v9867_v35, %v9871_v57 }
0x4ad8   : > { %15100 = vpow2.f32 %v9879_v58  ;;  %v9877_v59 = vmul.f32 1.442695, %v9875_v10 }
0x4ada   : > { %15102 = vpow2.f32 %v9877_v59 }
0x4ae5   : > { %v15101_v29 = vpop.eup %15100 }
0x4ae6   : > { %v9884_v7 = vsel %vm1583_vm2, %v15101_v29, 0.0 }
0x4ae7   : > { %v15103_v62 = vpop.eup %15102  ;;  %9885 = vadd.xlane.f32.xlu1 %v9884_v7  ;;  %v9528_v7 = vld [vmem:[%s16995_s26 + $0x18] sm:$0xff] }
0x4ae8   : > { %v9881_v63 = vsel %vm1583_vm2, %v15103_v62, 0.0  ;;  %14668 = vmatprep.subr.mxu0 %v9528_v7 }
0x4ae9   : > { %9882 = vadd.xlane.f32.xlu0 %v9881_v63 }
0x4b70   : > { %v9886_v0 = vpop.xlane.xlu1 %9885 }
0x4b71   : > { %15104 = vrcp.f32 %v9886_v0 }
0x4b72   : > { %v9883_v33 = vpop.xlane.xlu0 %9882 }
0x4b73   : > { %15106 = vrcp.f32 %v9883_v33 }
0x4b7e   : > { %v15105_v44 = vpop.eup %15104 }
0x4b7f   : > { %v9890_v37 = vmul.f32 %v15105_v44, %v15101_v29  ;;  %v9525_v29 = vld [vmem:[%s16995_s26] sm:$0xff] }
0x4b80   : > { %v15107_v46 = vpop.eup %15106 }
0x4b81   : > { %v9889_v22 = vmul.f32 %v15107_v46, %v15103_v62  ;;  %v9527_v62 = vld [vmem:[%s16995_s26 + $0x10] sm:$0xff] }
0x4b83   : > { %14618 = vmatprep.mubr.msk.f32.mxu1 %vm1583_vm2, %v9889_v22  ;;  %v12912_v22 = vld [vmem:[%s16996_s16] ss:$0 sm:$0xff] }
0x4b84   : > { %14619 = vmatmul.mubr.msk.f32.vlgmr.msra.gmra.mxu1 %vm1583_vm2, %v9890_v37 }
0x4b85   : > { %14622 = vmatpush3.msra.mxu1 %v9502_v43  ;;  %14629 = vmatprep.mubr.msk.f32.mxu1 %vm1288_vm0, %v16538_v34 }
0x4b86   : > { %14623 = vmatprep.subr.mxu1 %v9501_v3 }
0x4b87   : > { %14624 = vmatpush3.msra.mxu1 %v9501_v3 }
0x4b88   : > { %14625 = vmatprep.subr.mxu1 %v9500_v4 }
0x4b89   : > { %14626 = vmatpush3.msra.mxu1 %v9500_v4 }
0x4b8a   : > { %14627 = vmatprep.subr.mxu1 %v9499_v47 }
0x4b8b   : > { %14628 = vmatpush3.msra.mxu1 %v9499_v47 }
0x4b8c   : > { %14630 = vmatmul.mubr.msk.f32.vlgmr.msra.gmra.mxu1 %vm1288_vm0, %v16560_v2  ;;  %14643 = vmatprep.subr.mxu1 %v9518_v5 }
0x4b8d   : > { %14644 = vmatpush3.msra.mxu1 %v9518_v5  ;;  %14651 = vmatprep.mubr.msk.f32.mxu1 %vm1288_vm0, %v16538_v34 }
0x4b8e   : > { %14645 = vmatprep.subr.mxu1 %v9517_v6 }
0x4b8f   : > { %14646 = vmatpush3.msra.mxu1 %v9517_v6 }
0x4b90   : > { %14647 = vmatprep.subr.mxu1 %v9516_v51 }
0x4b91   : > { %14648 = vmatpush3.msra.mxu1 %v9516_v51 }
0x4b92   : > { %14649 = vmatprep.subr.mxu1 %v9515_v60 }
0x4b93   : > { %14650 = vmatpush3.msra.mxu1 %v9515_v60 }
0x4b94   : > { %14652 = vmatmul.mubr.msk.f32.vlgmr.msra.gmra.mxu1 %vm1288_vm0, %v16560_v2 }
0x4c44   : > { %v14620_v12 = vpop.f32.mrf.mxu1 }
0x4c46   : > { %v9963_v13 = vpop.f32.mrf.mxu1 }
0x4c4c   : > { %v14631_v14 = vpop.f32.mrf.mxu1 }
0x4c4d   : > { %v10050_v52 = vadd.f32 %v14631_v14, %v12893_v48 }
0x4c4e   : > { %v10044_v34 = vpop.f32.mrf.mxu1 }
0x4c4f   : > { %v10045_v16 = vadd.f32 %v12893_v48, %v10044_v34  ;;  %v10216_v56 = vmul.f32 0.25, %v10050_v52 }
0x4c51   : > { %v10215_v55 = vmul.f32 0.25, %v10045_v16 }
0x4c53   : > { %14658 = vmatprep.mubr.msk.f32.mxu0 %vm1583_vm2, %v10215_v55 }
0x4c54   : > { %v14653_v1 = vpop.f32.mrf.mxu1  ;;  %14659 = vmatmul.mubr.msk.f32.vlgmr.msra.gmra.mxu0 %vm1583_vm2, %v10216_v56  ;;  %v10629_v56 = vld [vmem:[%s16997_s18 + $0x18] sm:$0xff] }
0x4c55   : > { %v10212_v17 = vadd.f32 %v14653_v1, %v12899_v61  ;;  %14669 = vmatpush3.msra.mxu0 %v9528_v7  ;;  %v10627_v1 = vld [vmem:[%s16997_s18 + $0x8] sm:$0xff] }
0x4c56   : > { %v10206_v18 = vpop.f32.mrf.mxu1  ;;  %14670 = vmatprep.subr.mxu0 %v9527_v62  ;;  %v10741_v7 = vld [vmem:[%s17001_s24 + $0x28] sm:$0xff] }
0x4c57   : > { %v10207_v2 = vadd.f32 %v12899_v61, %v10206_v18  ;;  %14661 = vmatprep.subr.mxu1 %v10212_v17  ;;  %14671 = vmatpush3.msra.mxu0 %v9527_v62  ;;  %v10628_v61 = vld [vmem:[%s16997_s18 + $0x10] sm:$0xff]  ;;  %v10740_v62 = vld [vmem:[%s17001_s24 + $0x20] sm:$0xff] }
0x4c58   : > { %14662 = vmatpush3.msra.mxu1 %v10212_v17  ;;  %14682 = vmatprep.subr.mxu0 %v10629_v56  ;;  %v10626_v17 = vld [vmem:[%s16997_s18] sm:$0xff] }
0x4c59   : > { %14663 = vmatprep.subr.mxu1 %v10207_v2 }
0x4c5a   : > { %14664 = vmatpush3.msra.mxu1 %v10207_v2 }
0x4c5b   : > { %14675 = vmatprep.subr.mxu1 %v9526_v9 }
0x4d14   : > { %v14660_v19 = vpop.f32.mrf.mxu0 }
0x4d15   : > { %v10305_v20 = vsel %vm4200_vm5, %v14660_v19, -1.7014117e+38 }
0x4d16   : > { %v10295_v23 = vpop.f32.mrf.mxu0  ;;  %v10309_v24 = vsel %vm1583_vm2, %v10305_v20, -inf }
0x4d17   : > { %v10304_v25 = vsel %vm4199_vm6, %v10295_v23, -1.7014117e+38  ;;  %10310 = vmax.xlane.f32.xlu1 %v10309_v24 }
0x4d18   : > { %v10306_v26 = vsel %vm1583_vm2, %v10304_v25, -inf }
0x4d19   : > { %10307 = vmax.xlane.f32.xlu0 %v10306_v26  ;;  %v12913_v26 = vld [vmem:[%s16999_s19] ss:$0 sm:$0xff] }
0x4da0   : > { %v10311_v39 = vpop.xlane.xlu1 %10310 }
0x4da1   : > { %v10313_v30 = vsub.f32 %v10305_v20, %v10311_v39 }
0x4da2   : > { %v10308_v31 = vpop.xlane.xlu0 %10307 }
0x4da3   : > { %v10316_v32 = vmul.f32 1.442695, %v10313_v30  ;;  %v10312_v35 = vsub.f32 %v10304_v25, %v10308_v31 }
0x4da5   : > { %15108 = vpow2.f32 %v10316_v32  ;;  %v10314_v36 = vmul.f32 1.442695, %v10312_v35  ;;  %v12914_v35 = vld [vmem:[%s17000_s21] ss:$0 sm:$0xff] }
0x4da7   : > { %15110 = vpow2.f32 %v10314_v36 }
0x4db2   : > { %v15109_v38 = vpop.eup %15108 }
0x4db3   : > { %v10321_v41 = vsel %vm1583_vm2, %v15109_v38, 0.0 }
0x4db4   : > { %v15111_v42 = vpop.eup %15110  ;;  %10322 = vadd.xlane.f32.xlu1 %v10321_v41 }
0x4db5   : > { %v10318_v8 = vsel %vm1583_vm2, %v15111_v42, 0.0 }
0x4db6   : > { %10319 = vadd.xlane.f32.xlu0 %v10318_v8  ;;  %v10750_v8 = vld [vmem:[%s17001_s24 + $0x70] sm:$0xff] }
0x4e3d   : > { %v10323_v49 = vpop.xlane.xlu1 %10322 }
0x4e3e   : > { %15112 = vrcp.f32 %v10323_v49  ;;  %v10748_v49 = vld [vmem:[%s17001_s24 + $0x60] sm:$0xff] }
0x4e3f   : > { %v10320_v54 = vpop.xlane.xlu0 %10319 }
0x4e40   : > { %15114 = vrcp.f32 %v10320_v54  ;;  %v10747_v54 = vld [vmem:[%s17001_s24 + $0x58] sm:$0xff] }
0x4e4b   : > { %v15113_v57 = vpop.eup %15112 }
0x4e4c   : > { %v10327_v59 = vmul.f32 %v15113_v57, %v15109_v38  ;;  %v10746_v57 = vld [vmem:[%s17001_s24 + $0x50] sm:$0xff] }
0x4e4d   : > { %v15115_v58 = vpop.eup %15114 }
0x4e4e   : > { %v10326_v10 = vmul.f32 %v15115_v58, %v15111_v42  ;;  %v10751_v42 = vld [vmem:[%s17001_s24 + $0x78] sm:$0xff]  ;;  %v10745_v58 = vld [vmem:[%s17001_s24 + $0x48] sm:$0xff] }
0x4e50   : > { %14665 = vmatprep.mubr.msk.f32.mxu1 %vm1583_vm2, %v10326_v10  ;;  %v10744_v10 = vld [vmem:[%s17001_s24 + $0x40] sm:$0xff] }
0x4e51   : > { %14666 = vmatmul.mubr.msk.f32.vlgmr.msra.gmra.mxu1 %vm1583_vm2, %v10327_v59  ;;  %v10743_v59 = vld [vmem:[%s17001_s24 + $0x38] sm:$0xff] }
0x4e52   : > { %14676 = vmatpush3.msra.mxu1 %v9526_v9  ;;  %14679 = vmatprep.mubr.msk.f32.mxu1 %vm1583_vm2, %v9963_v13  ;;  %v10749_v9 = vld [vmem:[%s17001_s24 + $0x68] sm:$0xff] }
0x4e53   : > { %14677 = vmatprep.subr.mxu1 %v9525_v29 }
0x4e54   : > { %14678 = vmatpush3.msra.mxu1 %v9525_v29  ;;  %v10742_v29 = vld [vmem:[%s17001_s24 + $0x30] sm:$0xff] }
0x4e55   : > { %14680 = vmatmul.mubr.msk.f32.vlgmr.msra.gmra.mxu1 %vm1583_vm2, %v14620_v12  ;;  %14693 = vmatprep.subr.mxu1 %v10751_v42 }
0x4e56   : > { %14694 = vmatpush3.msra.mxu1 %v10751_v42 }
0x4e57   : > { %14695 = vmatprep.subr.mxu1 %v10750_v8 }
0x4e58   : > { %14696 = vmatpush3.msra.mxu1 %v10750_v8  ;;  %v12926_v8 = vld [vmem:[%s16984_s3 + $0x58] sm:$0xff] }
0x4e59   : > { %14697 = vmatprep.subr.mxu1 %v10749_v9 }
0x4e5a   : > { %14698 = vmatpush3.msra.mxu1 %v10749_v9  ;;  %v12925_v9 = vld [vmem:[%s16984_s3 + $0x50] sm:$0xff] }
0x4e5b   : > { %14699 = vmatprep.subr.mxu1 %v10748_v49 }
0x4e5c   : > { %14700 = vmatpush3.msra.mxu1 %v10748_v49  ;;  %v12924_v49 = vld [vmem:[%s16984_s3 + $0x48] sm:$0xff] }
0x4e5d   : > { %14701 = vmatprep.subr.mxu1 %v10747_v54 }
0x4e5e   : > { %14702 = vmatpush3.msra.mxu1 %v10747_v54  ;;  %v12923_v54 = vld [vmem:[%s16984_s3 + $0x40] sm:$0xff] }
0x4e5f   : > { %14703 = vmatprep.subr.mxu1 %v10746_v57 }
0x4e60   : > { %14704 = vmatpush3.msra.mxu1 %v10746_v57  ;;  %v12934_v57 = vld [vmem:[%s16985_s1 + $0x58] sm:$0xff] }
0x4e61   : > { %14705 = vmatprep.subr.mxu1 %v10745_v58 }
0x4e62   : > { %14706 = vmatpush3.msra.mxu1 %v10745_v58 }
0x4e63   : > { %14707 = vmatprep.subr.mxu1 %v10744_v10 }
0x4e64   : > { %14708 = vmatpush3.msra.mxu1 %v10744_v10 }
0x4e65   : > { %14709 = vmatprep.subr.mxu1 %v10743_v59 }
0x4e66   : > { %14710 = vmatpush3.msra.mxu1 %v10743_v59 }
0x4e67   : > { %14711 = vmatprep.subr.mxu1 %v10742_v29 }
0x4e68   : > { %14712 = vmatpush3.msra.mxu1 %v10742_v29 }
0x4e69   : > { %14713 = vmatprep.subr.mxu1 %v10741_v7 }
0x4e6a   : > { %14714 = vmatpush3.msra.mxu1 %v10741_v7 }
0x4e6b   : > { %14715 = vmatprep.subr.mxu1 %v10740_v62 }
0x4e6c   : > { %14716 = vmatpush3.msra.mxu1 %v10740_v62 }
0x4f11   : > { %v14667_v63 = vpop.f32.mrf.mxu1 }
0x4f13   : > { %v10400_v43 = vpop.f32.mrf.mxu1 }
0x4f14   : > { %14672 = vmatprep.mubr.msk.f32.mxu0 %vm1583_vm2, %v10400_v43  ;;  %v10738_v43 = vld [vmem:[%s17001_s24 + $0x10] sm:$0xff] }
0x4f15   : > { %14673 = vmatmul.mubr.msk.f32.vlgmr.msra.gmra.mxu0 %vm1583_vm2, %v14667_v63  ;;  %v14681_v0 = vpop.f32.mrf.mxu1  ;;  %v10739_v63 = vld [vmem:[%s17001_s24 + $0x18] sm:$0xff] }
0x4f16   : > { %14683 = vmatpush3.msra.mxu0 %v10629_v56  ;;  %14717 = vmatprep.subr.mxu1 %v10739_v63 }
0x4f17   : > { %v10562_v46 = vpop.f32.mrf.mxu1  ;;  %14684 = vmatprep.subr.mxu0 %v10628_v61  ;;  %14718 = vmatpush3.msra.mxu1 %v10739_v63 }
0x4f18   : > { %14685 = vmatpush3.msra.mxu0 %v10628_v61  ;;  %14719 = vmatprep.subr.mxu1 %v10738_v43 }
0x4f19   : > { %14686 = vmatprep.subr.mxu0 %v10627_v1  ;;  %14720 = vmatpush3.msra.mxu1 %v10738_v43  ;;  %v12921_v43 = vld [vmem:[%s16987_s5 + $0x1] ss:$0 sm:$0xff] }
0x4f1a   : > { %14687 = vmatpush3.msra.mxu0 %v10627_v1 }
0x4f1b   : > { %14688 = vmatprep.subr.mxu0 %v10626_v17 }
0x4f1c   : > { %14689 = vmatpush3.msra.mxu0 %v10626_v17 }
0x4f1d   : > { %14728 = vmatprep.subr.mxu0 %v12926_v8 }
0x4fd5   : > { %v14674_v33 = vpop.f32.mrf.mxu0 }
0x4fd6   : > { %v10568_v44 = vadd.f32 %v14681_v0, %v14674_v33  ;;  %v10737_v0 = vld [vmem:[%s17001_s24 + $0x8] sm:$0xff]  ;;  %v10736_v33 = vld [vmem:[%s17001_s24] sm:$0xff] }
0x4fd7   : > { %v10481_v37 = vpop.f32.mrf.mxu0  ;;  %14721 = vmatprep.subr.mxu1 %v10737_v0 }
0x4fd8   : > { %v10572_v3 = vadd.f32 %v10568_v44, %v16549_v45  ;;  %v10563_v4 = vadd.f32 %v10562_v46, %v10481_v37  ;;  %14722 = vmatpush3.msra.mxu1 %v10737_v0  ;;  %v12915_v44 = vld [vmem:[%s17003_s25] ss:$0 sm:$0xff] }
0x4fd9   : > { %14723 = vmatprep.subr.mxu1 %v10736_v33 }
0x4fda   : > { %v16653_v47 = vadd.f32 %v12912_v22, %v10572_v3  ;;  %v10571_v5 = vadd.f32 %v10563_v4, %v16526_v53  ;;  %14724 = vmatpush3.msra.mxu1 %v10736_v33 }
0x4fdc   : > { %v16656_v6 = vadd.f32 %v12912_v22, %v10571_v5  ;;  %v10587_v51 = vsel %vm1288_vm0, %v16653_v47, 0.0 }
0x4fdd   : > { %10588 = vadd.xlane.f32.xlu1 %v10587_v51 }
0x4fde   : > { %v10584_v60 = vsel %vm1288_vm0, %v16656_v6, 0.0 }
0x4fdf   : > { %10585 = vadd.xlane.f32.xlu0 %v10584_v60 }
0x5066   : > { %v10589_v12 = vpop.xlane.xlu1 %10588 }
0x5067   : > { %v10591_v45 = vmul.f32 0.03125, %v10589_v12 }
0x5068   : > { %v10586_v13 = vpop.xlane.xlu0 %10585 }
0x5069   : > { %v10593_v48 = vsub.f32 %v16653_v47, %v10591_v45  ;;  %v10590_v53 = vmul.f32 0.03125, %v10586_v13 }
0x506b   : > { %v10592_v14 = vsub.f32 %v16656_v6, %v10590_v53  ;;  %v10595_v52 = vmul.f32 %v10593_v48, %v10593_v48 }
0x506d   : > { %v10599_v34 = vsel %vm1288_vm0, %v10595_v52, 0.0  ;;  %v10594_v16 = vmul.f32 %v10592_v14, %v10592_v14 }
0x506e   : > { %10600 = vadd.xlane.f32.xlu1 %v10599_v34 }
0x506f   : > { %v10596_v55 = vsel %vm1288_vm0, %v10594_v16, 0.0 }
0x5070   : > { %10597 = vadd.xlane.f32.xlu0 %v10596_v55 }
0x50f7   : > { %v10601_v18 = vpop.xlane.xlu1 %10600 }
0x50f8   : > { %v10603_v2 = vmul.f32 0.03125, %v10601_v18  ;;  %v12918_v18 = vld [vmem:[%s15434_s13] ss:$0 sm:$0xff] }
0x50f9   : > { %v10598_v19 = vpop.xlane.xlu0 %10597 }
0x50fa   : > { %v10605_v20 = vadd.f32 1e-05, %v10603_v2  ;;  %v10602_v23 = vmul.f32 0.03125, %v10598_v19 }
0x50fc   : > { %15116 = vrsqrt.f32 %v10605_v20  ;;  %v10604_v24 = vadd.f32 1e-05, %v10602_v23 }
0x50fe   : > { %15118 = vrsqrt.f32 %v10604_v24 }
0x5109   : > { %v15117_v25 = vpop.eup %15116 }
0x510a   : > { %v10609_v39 = vmul.f32 %v15117_v25, %v10593_v48 }
0x510b   : > { %v15119_v30 = vpop.eup %15118 }
0x510c   : > { %v10608_v31 = vmul.f32 %v15119_v30, %v10592_v14  ;;  %v10617_v32 = vmul.f32 %v12913_v26, %v10609_v39 }
0x510e   : > { %v10616_v36 = vmul.f32 %v12913_v26, %v10608_v31  ;;  %v10625_v41 = vadd.f32 %v12914_v35, %v10617_v32 }
0x5110   : > { %v10624_v38 = vadd.f32 %v12914_v35, %v10616_v36 }
0x5112   : > { %14690 = vmatprep.mubr.msk.f32.mxu0 %vm1288_vm0, %v10624_v38 }
0x5113   : > { %14691 = vmatmul.mubr.msk.f32.vlgmr.msra.gmra.mxu0 %vm1288_vm0, %v10625_v41 }
0x5114   : > { %14729 = vmatpush3.msra.mxu0 %v12926_v8  ;;  %v12975_v8 = vld [vmem:[%s16992_s12 + $0x3] ss:$0 sm:$0xff] }
0x5115   : > { %14730 = vmatprep.subr.mxu0 %v12925_v9 }
0x5116   : > { %14731 = vmatpush3.msra.mxu0 %v12925_v9 }
0x5117   : > { %14732 = vmatprep.subr.mxu0 %v12924_v49 }
0x5118   : > { %14733 = vmatpush3.msra.mxu0 %v12924_v49 }
0x5119   : > { %14734 = vmatprep.subr.mxu0 %v12923_v54 }
0x511a   : > { %14735 = vmatpush3.msra.mxu0 %v12923_v54 }
0x511b   : > { %14739 = vmatprep.subr.mxu0 %v12934_v57 }
0x51d3   : > { %v14692_v46 = vpop.f32.mrf.mxu0 }
0x51d4   : > { %v10715_v22 = vadd.f32 %v14692_v46, %v12915_v44 }
0x51d5   : > { %v10709_v37 = vpop.f32.mrf.mxu0 }
0x51d6   : > { %v10719_v3 = vmul.f32 %v10715_v22, %v10715_v22  ;;  %v10710_v4 = vadd.f32 %v12915_v44, %v10709_v37  ;;  %v12922_v37 = vld [vmem:[%s16988_s6 + $0x1] ss:$0 sm:$0xff] }
0x51d8   : > { %v10721_v5 = vmul.f32 %v10719_v3, %v10715_v22  ;;  %v10718_v51 = vmul.f32 %v10710_v4, %v10710_v4 }
0x51da   : > { %v10723_v60 = vmul.f32 0.044715, %v10721_v5  ;;  %v10720_v12 = vmul.f32 %v10718_v51, %v10710_v4  ;;  %v12933_v5 = vld [vmem:[%s16985_s1 + $0x50] sm:$0xff]  ;;  %v12932_v51 = vld [vmem:[%s16985_s1 + $0x48] sm:$0xff] }
0x51dc   : > { %v10725_v45 = vadd.f32 %v10723_v60, %v10715_v22  ;;  %v10722_v13 = vmul.f32 0.044715, %v10720_v12  ;;  %v12931_v60 = vld [vmem:[%s16985_s1 + $0x40] sm:$0xff]  ;;  %v12942_v12 = vld [vmem:[%s16989_s8 + $0x58] sm:$0xff] }
0x51de   : > { %v10727_v48 = vmul.f32 0.7978846, %v10725_v45  ;;  %v10724_v53 = vadd.f32 %v10722_v13, %v10710_v4  ;;  %v12941_v45 = vld [vmem:[%s16989_s8 + $0x50] sm:$0xff]  ;;  %v12940_v13 = vld [vmem:[%s16989_s8 + $0x48] sm:$0xff] }
0x51e0   : > { %15120 = vtanh.f32 %v10727_v48  ;;  %v10726_v14 = vmul.f32 0.7978846, %v10724_v53  ;;  %v12939_v48 = vld [vmem:[%s16989_s8 + $0x40] sm:$0xff] }
0x51e2   : > { %15122 = vtanh.f32 %v10726_v14  ;;  %v12957_v14 = vld [vmem:[%s16991_s9 + $0x2] ss:$0 sm:$0xff] }
0x51ed   : > { %v15121_v52 = vpop.eup %15120 }
0x51ee   : > { %v10731_v34 = vadd.f32 1.0, %v15121_v52 }
0x51ef   : > { %v15123_v16 = vpop.eup %15122 }
0x51f0   : > { %v10730_v55 = vadd.f32 1.0, %v15123_v16  ;;  %v10733_v56 = vmul.f32 0.5, %v10731_v34 }
0x51f2   : > { %v10732_v61 = vmul.f32 0.5, %v10730_v55  ;;  %v10735_v17 = vmul.f32 %v10733_v56, %v10715_v22  ;;  %v12960_v55 = vld [vmem:[%s16992_s12 + $0x2] ss:$0 sm:$0xff] }
0x51f4   : > { %v10734_v1 = vmul.f32 %v10732_v61, %v10710_v4 }
0x51f6   : > { %14725 = vmatprep.mubr.f32.mxu1 %v10734_v1 }
0x51f7   : > { %14726 = vmatmul.mubr.f32.vlgmr.msra.gmra.mxu1 %v10735_v17 }
0x52b7   : > { %v14727_v2 = vpop.f32.mrf.mxu1 }
0x52b8   : > { %v10831_v19 = vadd.f32 %v14727_v2, %v12918_v18  ;;  %v12963_v2 = vld [vmem:[%s16993_s14 + $0x2] ss:$0 sm:$0xff] }
0x52b9   : > { %v10825_v20 = vpop.f32.mrf.mxu1 }
0x52ba   : > { %v16693_v23 = vadd.f32 %v10831_v19, %v16653_v47  ;;  %v10826_v24 = vadd.f32 %v12918_v18, %v10825_v20  ;;  %v12938_v19 = vld [vmem:[%s16985_s1 + $0x78] sm:$0xff] }
0x52bc   : > { %v16696_v25 = vadd.f32 %v10826_v24, %v16656_v6  ;;  %v10841_v26 = vsel %vm1288_vm0, %v16693_v23, 0.0 }
0x52bd   : > { %10842 = vadd.xlane.f32.xlu1 %v10841_v26 }
0x52be   : > { %v10838_v39 = vsel %vm1288_vm0, %v16696_v25, 0.0 }
0x52bf   : > { %10839 = vadd.xlane.f32.xlu0 %v10838_v39 }
0x5346   : > { %v10843_v30 = vpop.xlane.xlu1 %10842 }
0x5347   : > { %v10845_v31 = vmul.f32 0.03125, %v10843_v30 }
0x5348   : > { %v10840_v32 = vpop.xlane.xlu0 %10839 }
0x5349   : > { %v10847_v47 = vsub.f32 %v16693_v23, %v10845_v31  ;;  %v10844_v35 = vmul.f32 0.03125, %v10840_v32  ;;  %v12937_v31 = vld [vmem:[%s16985_s1 + $0x70] sm:$0xff]  ;;  %v12936_v32 = vld [vmem:[%s16985_s1 + $0x68] sm:$0xff] }
0x534b   : > { %v10846_v6 = vsub.f32 %v16696_v25, %v10844_v35  ;;  %v10849_v36 = vmul.f32 %v10847_v47, %v10847_v47 }
0x534d   : > { %v10853_v38 = vsel %vm1288_vm0, %v10849_v36, 0.0  ;;  %v10848_v41 = vmul.f32 %v10846_v6, %v10846_v6 }
0x534e   : > { %10854 = vadd.xlane.f32.xlu1 %v10853_v38 }
0x534f   : > { %v10850_v42 = vsel %vm1288_vm0, %v10848_v41, 0.0 }
0x5350   : > { %10851 = vadd.xlane.f32.xlu0 %v10850_v42 }
0x53d7   : > { %v10855_v58 = vpop.xlane.xlu1 %10854 }
0x53d8   : > { %v10857_v10 = vmul.f32 0.03125, %v10855_v58 }
0x53d9   : > { %v10852_v59 = vpop.xlane.xlu0 %10851 }
0x53da   : > { %v10859_v29 = vadd.f32 1e-05, %v10857_v10  ;;  %v10856_v7 = vmul.f32 0.03125, %v10852_v59 }
0x53dc   : > { %15124 = vrsqrt.f32 %v10859_v29  ;;  %v10858_v62 = vadd.f32 1e-05, %v10856_v7 }
0x53de   : > { %15126 = vrsqrt.f32 %v10858_v62 }
0x53e9   : > { %v15125_v63 = vpop.eup %15124 }
0x53ea   : > { %v10863_v0 = vmul.f32 %v15125_v63, %v10847_v47  ;;  %v12935_v47 = vld [vmem:[%s16985_s1 + $0x60] sm:$0xff] }
0x53eb   : > { %v15127_v33 = vpop.eup %15126 }
0x53ec   : > { %v10862_v44 = vmul.f32 %v15127_v33, %v10846_v6  ;;  %v10871_v46 = vmul.f32 %v12921_v43, %v10863_v0 }
0x53ee   : > { %v10870_v22 = vmul.f32 %v12921_v43, %v10862_v44  ;;  %v16715_v4 = vadd.f32 %v12922_v37, %v10871_v46  ;;  %v12930_v44 = vld [vmem:[%s16984_s3 + $0x78] sm:$0xff] }
0x53f0   : > { %v16713_v3 = vadd.f32 %v12922_v37, %v10870_v22 }
0x53f2   : > { %14736 = vmatprep.mubr.msk.f32.mxu0 %vm1288_vm0, %v16713_v3 }
0x53f3   : > { %14737 = vmatmul.mubr.msk.f32.vlgmr.msra.gmra.mxu0 %vm1288_vm0, %v16715_v4 }
0x53f4   : > { %14740 = vmatpush3.msra.mxu0 %v12934_v57  ;;  %14747 = vmatprep.mubr.msk.f32.mxu0 %vm1288_vm0, %v16713_v3 }
0x53f5   : > { %14741 = vmatprep.subr.mxu0 %v12933_v5 }
0x53f6   : > { %14742 = vmatpush3.msra.mxu0 %v12933_v5 }
0x53f7   : > { %14743 = vmatprep.subr.mxu0 %v12932_v51 }
0x53f8   : > { %14744 = vmatpush3.msra.mxu0 %v12932_v51 }
0x53f9   : > { %14745 = vmatprep.subr.mxu0 %v12931_v60 }
0x53fa   : > { %14746 = vmatpush3.msra.mxu0 %v12931_v60 }
0x53fb   : > { %14748 = vmatmul.mubr.msk.f32.vlgmr.msra.gmra.mxu0 %vm1288_vm0, %v16715_v4  ;;  %14750 = vmatprep.subr.mxu0 %v12942_v12 }
0x53fc   : > { %14751 = vmatpush3.msra.mxu0 %v12942_v12  ;;  %14758 = vmatprep.mubr.msk.f32.mxu0 %vm1288_vm0, %v16713_v3  ;;  %v12929_v12 = vld [vmem:[%s16984_s3 + $0x70] sm:$0xff] }
0x53fd   : > { %14752 = vmatprep.subr.mxu0 %v12941_v45 }
0x53fe   : > { %14753 = vmatpush3.msra.mxu0 %v12941_v45  ;;  %v12928_v45 = vld [vmem:[%s16984_s3 + $0x68] sm:$0xff] }
0x53ff   : > { %14754 = vmatprep.subr.mxu0 %v12940_v13 }
0x5400   : > { %14755 = vmatpush3.msra.mxu0 %v12940_v13  ;;  %v12927_v13 = vld [vmem:[%s16984_s3 + $0x60] sm:$0xff] }
0x5401   : > { %14756 = vmatprep.subr.mxu0 %v12939_v48 }
0x5402   : > { %14757 = vmatpush3.msra.mxu0 %v12939_v48  ;;  %v12946_v48 = vld [vmem:[%s16989_s8 + $0x78] sm:$0xff] }
0x5403   : > { %14759 = vmatmul.mubr.msk.f32.vlgmr.msra.gmra.mxu0 %vm1288_vm0, %v16715_v4 }
0x54b3   : > { %v14738_v53 = vpop.f32.mrf.mxu0 }
0x54b4   : > { %v10998_v18 = vadd.f32 %v14738_v53, %v12957_v14  ;;  %v12945_v53 = vld [vmem:[%s16989_s8 + $0x70] sm:$0xff] }
0x54b5   : > { %v10992_v52 = vpop.f32.mrf.mxu0 }
0x54b6   : > { %v10993_v34 = vadd.f32 %v12957_v14, %v10992_v52  ;;  %v11164_v24 = vmul.f32 0.25, %v10998_v18  ;;  %v12944_v14 = vld [vmem:[%s16989_s8 + $0x68] sm:$0xff]  ;;  %v12943_v52 = vld [vmem:[%s16989_s8 + $0x60] sm:$0xff] }
0x54b8   : > { %v11163_v16 = vmul.f32 0.25, %v10993_v34 }
0x54ba   : > { %14765 = vmatprep.mubr.msk.f32.mxu0 %vm1583_vm2, %v11163_v16 }
0x54bb   : > { %v14749_v56 = vpop.f32.mrf.mxu0 }
0x54bc   : > { %v11079_v61 = vadd.f32 %v14749_v56, %v12960_v55 }
0x54bd   : > { %v11073_v1 = vpop.f32.mrf.mxu0 }
0x54be   : > { %v11074_v17 = vadd.f32 %v12960_v55, %v11073_v1  ;;  %14761 = vmatprep.subr.msk.mxu0 %vm1583_vm2, %v11079_v61  ;;  %v12972_v55 = vld [vmem:[%s16991_s9 + $0x3] ss:$0 sm:$0xff] }
0x54bf   : > { %14762 = vmatpush3.xpose.msk.msra.mxu0 %vm1583_vm2, %v11079_v61 }
0x54c0   : > { %14763 = vmatprep.subr.msk.mxu0 %vm1583_vm2, %v11074_v17 }
0x54c3   : > { %v14760_v20 = vpop.f32.mrf.mxu0  ;;  %14764 = vmatpush3.xpose.msk.msra.mxu0 %vm1583_vm2, %v11074_v17 }
0x54c4   : > { %v11160_v26 = vadd.f32 %v14760_v20, %v12963_v2  ;;  %14786 = vmatprep.subr.mxu0 %v12938_v19 }
0x54c5   : > { %v11154_v39 = vpop.f32.mrf.mxu0 }
0x54c6   : > { %v11155_v30 = vadd.f32 %v12963_v2, %v11154_v39  ;;  %14766 = vmatmul.mubr.msk.f32.vlgmr.msra.gmra.mxu0 %vm1583_vm2, %v11164_v24  ;;  %14768 = vmatprep.subr.mxu1 %v11160_v26  ;;  %v12978_v2 = vld [vmem:[%s16993_s14 + $0x3] ss:$0 sm:$0xff] }
0x54c7   : > { %14769 = vmatpush3.msra.mxu1 %v11160_v26  ;;  %14787 = vmatpush3.msra.mxu0 %v12938_v19 }
0x54c8   : > { %14794 = vmatprep.mubr.msk.f32.mxu0 %vm1288_vm0, %v16713_v3  ;;  %14770 = vmatprep.subr.mxu1 %v11155_v30 }
0x54c9   : > { %14788 = vmatprep.subr.mxu0 %v12937_v31  ;;  %14771 = vmatpush3.msra.mxu1 %v11155_v30 }
0x54ca   : > { %14789 = vmatpush3.msra.mxu0 %v12937_v31  ;;  %14775 = vmatprep.subr.mxu1 %v12930_v44 }
0x54cb   : > { %14790 = vmatprep.subr.mxu0 %v12936_v32 }
0x54cc   : > { %14791 = vmatpush3.msra.mxu0 %v12936_v32 }
0x54cd   : > { %14792 = vmatprep.subr.mxu0 %v12935_v47 }
0x54ce   : > { %14793 = vmatpush3.msra.mxu0 %v12935_v47 }
0x54cf   : > { %14795 = vmatmul.mubr.msk.f32.vlgmr.msra.gmra.mxu0 %vm1288_vm0, %v16715_v4 }
0x5586   : > { %v14767_v35 = vpop.f32.mrf.mxu0 }
0x5587   : > { %v11253_v6 = vsel %vm4200_vm5, %v14767_v35, -1.7014117e+38 }
0x5588   : > { %v11257_v36 = vsel %vm1583_vm2, %v11253_v6, -inf  ;;  %v11243_v38 = vpop.f32.mrf.mxu0 }
0x5589   : > { %v11252_v41 = vsel %vm4199_vm6, %v11243_v38, -1.7014117e+38  ;;  %11258 = vmax.xlane.f32.xlu1 %v11257_v36 }
0x558a   : > { %v11254_v42 = vsel %vm1583_vm2, %v11252_v41, -inf }
0x558b   : > { %11255 = vmax.xlane.f32.xlu0 %v11254_v42 }
0x558f   : > { %v14796_v9 = vpop.f32.mrf.mxu0 }
0x5590   : > { %v11516_v49 = vadd.f32 %v14796_v9, %v12975_v8 }
0x5591   : > { %v11510_v54 = vpop.f32.mrf.mxu0 }
0x5592   : > { %v11511_v57 = vadd.f32 %v12975_v8, %v11510_v54  ;;  %14808 = vmatprep.subr.msk.mxu0 %vm1583_vm2, %v11516_v49 }
0x5593   : > { %14809 = vmatpush3.xpose.msk.msra.mxu0 %vm1583_vm2, %v11516_v49  ;;  %v12954_v49 = vld [vmem:[%s16995_s26 + $0x28] sm:$0xff] }
0x5594   : > { %14810 = vmatprep.subr.msk.mxu0 %vm1583_vm2, %v11511_v57 }
0x5597   : > { %14811 = vmatpush3.xpose.msk.msra.mxu0 %vm1583_vm2, %v11511_v57 }
0x5612   : > { %v11259_v58 = vpop.xlane.xlu1 %11258 }
0x5613   : > { %v11261_v10 = vsub.f32 %v11253_v6, %v11259_v58 }
0x5614   : > { %v11256_v59 = vpop.xlane.xlu0 %11255 }
0x5615   : > { %v11264_v29 = vmul.f32 1.442695, %v11261_v10  ;;  %v11260_v7 = vsub.f32 %v11252_v41, %v11256_v59 }
0x5617   : > { %15128 = vpow2.f32 %v11264_v29  ;;  %v11262_v62 = vmul.f32 1.442695, %v11260_v7  ;;  %v12953_v7 = vld [vmem:[%s16995_s26 + $0x20] sm:$0xff] }
0x5619   : > { %15130 = vpow2.f32 %v11262_v62  ;;  %v12956_v62 = vld [vmem:[%s16995_s26 + $0x38] sm:$0xff] }
0x561a   : > { %14822 = vmatprep.subr.mxu0 %v12956_v62 }
0x5624   : > { %v15129_v63 = vpop.eup %15128 }
0x5625   : > { %v11269_v43 = vsel %vm1583_vm2, %v15129_v63, 0.0 }
0x5626   : > { %v15131_v0 = vpop.eup %15130  ;;  %11270 = vadd.xlane.f32.xlu1 %v11269_v43 }
0x5627   : > { %v11266_v33 = vsel %vm1583_vm2, %v15131_v0, 0.0 }
0x5628   : > { %11267 = vadd.xlane.f32.xlu0 %v11266_v33 }
0x56af   : > { %v11271_v46 = vpop.xlane.xlu1 %11270 }
0x56b0   : > { %15132 = vrcp.f32 %v11271_v46 }
0x56b1   : > { %v11268_v22 = vpop.xlane.xlu0 %11267 }
0x56b2   : > { %15134 = vrcp.f32 %v11268_v22 }
0x56bd   : > { %v15133_v37 = vpop.eup %15132 }
0x56be   : > { %v11275_v60 = vmul.f32 %v15133_v37, %v15129_v63  ;;  %v12955_v63 = vld [vmem:[%s16995_s26 + $0x30] sm:$0xff]  ;;  %v12992_v37 = vld [vmem:[%s16996_s16 + $0x1] ss:$0 sm:$0xff] }
0x56bf   : > { %v15135_v5 = vpop.eup %15134 }
0x56c0   : > { %v11274_v51 = vmul.f32 %v15135_v5, %v15131_v0 }
0x56c2   : > { %14772 = vmatprep.mubr.msk.f32.mxu1 %vm1583_vm2, %v11274_v51 }
0x56c3   : > { %14773 = vmatmul.mubr.msk.f32.vlgmr.msra.gmra.mxu1 %vm1583_vm2, %v11275_v60 }
0x56c4   : > { %14776 = vmatpush3.msra.mxu1 %v12930_v44  ;;  %14783 = vmatprep.mubr.msk.f32.mxu1 %vm1288_vm0, %v16713_v3 }
0x56c5   : > { %14777 = vmatprep.subr.mxu1 %v12929_v12 }
0x56c6   : > { %14778 = vmatpush3.msra.mxu1 %v12929_v12 }
0x56c7   : > { %14779 = vmatprep.subr.mxu1 %v12928_v45 }
0x56c8   : > { %14780 = vmatpush3.msra.mxu1 %v12928_v45 }
0x56c9   : > { %14781 = vmatprep.subr.mxu1 %v12927_v13 }
0x56ca   : > { %14782 = vmatpush3.msra.mxu1 %v12927_v13 }
0x56cb   : > { %14784 = vmatmul.mubr.msk.f32.vlgmr.msra.gmra.mxu1 %vm1288_vm0, %v16715_v4  ;;  %14797 = vmatprep.subr.mxu1 %v12946_v48 }
0x56cc   : > { %14798 = vmatpush3.msra.mxu1 %v12946_v48  ;;  %14805 = vmatprep.mubr.msk.f32.mxu1 %vm1288_vm0, %v16713_v3 }
0x56cd   : > { %14799 = vmatprep.subr.mxu1 %v12945_v53 }
0x56ce   : > { %14800 = vmatpush3.msra.mxu1 %v12945_v53 }
0x56cf   : > { %14801 = vmatprep.subr.mxu1 %v12944_v14 }
0x56d0   : > { %14802 = vmatpush3.msra.mxu1 %v12944_v14 }
0x56d1   : > { %14803 = vmatprep.subr.mxu1 %v12943_v52 }
0x56d2   : > { %14804 = vmatpush3.msra.mxu1 %v12943_v52 }
0x56d3   : > { %14806 = vmatmul.mubr.msk.f32.vlgmr.msra.gmra.mxu1 %vm1288_vm0, %v16715_v4 }
0x5783   : > { %v14774_v34 = vpop.f32.mrf.mxu1 }
0x5785   : > { %v11348_v16 = vpop.f32.mrf.mxu1 }
0x578b   : > { %v14785_v56 = vpop.f32.mrf.mxu1 }
0x578c   : > { %v11435_v61 = vadd.f32 %v14785_v56, %v12972_v55 }
0x578d   : > { %v11429_v1 = vpop.f32.mrf.mxu1 }
0x578e   : > { %v11430_v17 = vadd.f32 %v12972_v55, %v11429_v1  ;;  %v11601_v18 = vmul.f32 0.25, %v11435_v61 }
0x5790   : > { %v11600_v3 = vmul.f32 0.25, %v11430_v17 }
0x5792   : > { %14812 = vmatprep.mubr.msk.f32.mxu0 %vm1583_vm2, %v11600_v3 }
0x5793   : > { %v14807_v19 = vpop.f32.mrf.mxu1  ;;  %14813 = vmatmul.mubr.msk.f32.vlgmr.msra.gmra.mxu0 %vm1583_vm2, %v11601_v18 }
0x5794   : > { %v11597_v20 = vadd.f32 %v14807_v19, %v12978_v2  ;;  %14823 = vmatpush3.msra.mxu0 %v12956_v62  ;;  %v12999_v19 = vld [vmem:[%s16997_s18 + $0x30] sm:$0xff]  ;;  %v13010_v62 = vld [vmem:[%s17001_s24 + $0xa8] sm:$0xff] }
0x5795   : > { %v11591_v24 = vpop.f32.mrf.mxu1  ;;  %14824 = vmatprep.subr.mxu0 %v12955_v63 }
0x5796   : > { %v11592_v26 = vadd.f32 %v12978_v2, %v11591_v24  ;;  %14815 = vmatprep.subr.mxu1 %v11597_v20  ;;  %14825 = vmatpush3.msra.mxu0 %v12955_v63  ;;  %v13000_v2 = vld [vmem:[%s16997_s18 + $0x38] sm:$0xff]  ;;  %v13009_v63 = vld [vmem:[%s17001_s24 + $0xa0] sm:$0xff] }
0x5797   : > { %14816 = vmatpush3.msra.mxu1 %v11597_v20  ;;  %14836 = vmatprep.subr.mxu0 %v13000_v2  ;;  %v12998_v20 = vld [vmem:[%s16997_s18 + $0x28] sm:$0xff] }
0x5798   : > { %14817 = vmatprep.subr.mxu1 %v11592_v26 }
0x5799   : > { %14818 = vmatpush3.msra.mxu1 %v11592_v26 }
0x579a   : > { %14829 = vmatprep.subr.mxu1 %v12954_v49 }
0x5853   : > { %v14814_v4 = vpop.f32.mrf.mxu0 }
0x5854   : > { %v11690_v39 = vsel %vm4200_vm5, %v14814_v4, -1.7014117e+38 }
0x5855   : > { %v11694_v30 = vsel %vm1583_vm2, %v11690_v39, -inf  ;;  %v11680_v31 = vpop.f32.mrf.mxu0 }
0x5856   : > { %v11689_v32 = vsel %vm4199_vm6, %v11680_v31, -1.7014117e+38  ;;  %11695 = vmax.xlane.f32.xlu1 %v11694_v30 }
0x5857   : > { %v11691_v47 = vsel %vm1583_vm2, %v11689_v32, -inf }
0x5858   : > { %11692 = vmax.xlane.f32.xlu0 %v11691_v47  ;;  %v12995_v47 = vld [vmem:[%s16999_s19 + $0x1] ss:$0 sm:$0xff] }
0x58df   : > { %v11696_v35 = vpop.xlane.xlu1 %11695 }
0x58e0   : > { %v11698_v6 = vsub.f32 %v11690_v39, %v11696_v35 }
0x58e1   : > { %v11693_v36 = vpop.xlane.xlu0 %11692 }
0x58e2   : > { %v11701_v38 = vmul.f32 1.442695, %v11698_v6  ;;  %v11697_v41 = vsub.f32 %v11689_v32, %v11693_v36 }
0x58e4   : > { %15136 = vpow2.f32 %v11701_v38  ;;  %v11699_v42 = vmul.f32 1.442695, %v11697_v41  ;;  %v12996_v41 = vld [vmem:[%s17000_s21 + $0x1] ss:$0 sm:$0xff] }
0x58e6   : > { %15138 = vpow2.f32 %v11699_v42 }
0x58f1   : > { %v15137_v27 = vpop.eup %15136 }
0x58f2   : > { %v11706_v8 = vsel %vm1583_vm2, %v15137_v27, 0.0 }
0x58f3   : > { %v15139_v9 = vpop.eup %15138  ;;  %11707 = vadd.xlane.f32.xlu1 %v11706_v8 }
0x58f4   : > { %v11703_v28 = vsel %vm1583_vm2, %v15139_v9, 0.0 }
0x58f5   : > { %11704 = vadd.xlane.f32.xlu0 %v11703_v28  ;;  %v13019_v28 = vld [vmem:[%s17001_s24 + $0xf0] sm:$0xff] }
0x597c   : > { %v11708_v54 = vpop.xlane.xlu1 %11707 }
0x597d   : > { %15140 = vrcp.f32 %v11708_v54  ;;  %v13017_v54 = vld [vmem:[%s17001_s24 + $0xe0] sm:$0xff] }
0x597e   : > { %v11705_v57 = vpop.xlane.xlu0 %11704 }
0x597f   : > { %15142 = vrcp.f32 %v11705_v57  ;;  %v13016_v57 = vld [vmem:[%s17001_s24 + $0xd8] sm:$0xff] }
0x598a   : > { %v15141_v58 = vpop.eup %15140 }
0x598b   : > { %v11712_v29 = vmul.f32 %v15141_v58, %v15137_v27  ;;  %v13015_v58 = vld [vmem:[%s17001_s24 + $0xd0] sm:$0xff] }
0x598c   : > { %v15143_v10 = vpop.eup %15142 }
0x598d   : > { %v11711_v59 = vmul.f32 %v15143_v10, %v15139_v9  ;;  %v13020_v9 = vld [vmem:[%s17001_s24 + $0xf8] sm:$0xff]  ;;  %v13014_v10 = vld [vmem:[%s17001_s24 + $0xc8] sm:$0xff] }
0x598f   : > { %14819 = vmatprep.mubr.msk.f32.mxu1 %vm1583_vm2, %v11711_v59  ;;  %v13013_v59 = vld [vmem:[%s17001_s24 + $0xc0] sm:$0xff] }
0x5990   : > { %14820 = vmatmul.mubr.msk.f32.vlgmr.msra.gmra.mxu1 %vm1583_vm2, %v11712_v29  ;;  %v13012_v29 = vld [vmem:[%s17001_s24 + $0xb8] sm:$0xff] }
0x5991   : > { %14830 = vmatpush3.msra.mxu1 %v12954_v49  ;;  %14833 = vmatprep.mubr.msk.f32.mxu1 %vm1583_vm2, %v11348_v16  ;;  %v13018_v49 = vld [vmem:[%s17001_s24 + $0xe8] sm:$0xff] }
0x5992   : > { %14831 = vmatprep.subr.mxu1 %v12953_v7 }
0x5993   : > { %14832 = vmatpush3.msra.mxu1 %v12953_v7  ;;  %v13011_v7 = vld [vmem:[%s17001_s24 + $0xb0] sm:$0xff] }
0x5994   : > { %14834 = vmatmul.mubr.msk.f32.vlgmr.msra.gmra.mxu1 %vm1583_vm2, %v14774_v34  ;;  %14847 = vmatprep.subr.mxu1 %v13020_v9 }
0x5995   : > { %14848 = vmatpush3.msra.mxu1 %v13020_v9 }
0x5996   : > { %14849 = vmatprep.subr.mxu1 %v13019_v28 }
0x5997   : > { %14850 = vmatpush3.msra.mxu1 %v13019_v28 }
0x5998   : > { %14851 = vmatprep.subr.mxu1 %v13018_v49 }
0x5999   : > { %14852 = vmatpush3.msra.mxu1 %v13018_v49 }
0x599a   : > { %14853 = vmatprep.subr.mxu1 %v13017_v54 }
0x599b   : > { %14854 = vmatpush3.msra.mxu1 %v13017_v54 }
0x599c   : > { %14855 = vmatprep.subr.mxu1 %v13016_v57 }
0x599d   : > { %14856 = vmatpush3.msra.mxu1 %v13016_v57 }
0x599e   : > { %14857 = vmatprep.subr.mxu1 %v13015_v58 }
0x599f   : > { %14858 = vmatpush3.msra.mxu1 %v13015_v58 }
0x59a0   : > { %14859 = vmatprep.subr.mxu1 %v13014_v10 }
0x59a1   : > { %14860 = vmatpush3.msra.mxu1 %v13014_v10 }
0x59a2   : > { %14861 = vmatprep.subr.mxu1 %v13013_v59 }
0x59a3   : > { %14862 = vmatpush3.msra.mxu1 %v13013_v59 }
0x59a4   : > { %14863 = vmatprep.subr.mxu1 %v13012_v29 }
0x59a5   : > { %14864 = vmatpush3.msra.mxu1 %v13012_v29 }
0x59a6   : > { %14865 = vmatprep.subr.mxu1 %v13011_v7 }
0x59a7   : > { %14866 = vmatpush3.msra.mxu1 %v13011_v7 }
0x59a8   : > { %14867 = vmatprep.subr.mxu1 %v13010_v62 }
0x59a9   : > { %14868 = vmatpush3.msra.mxu1 %v13010_v62 }
0x59aa   : > { %14869 = vmatprep.subr.mxu1 %v13009_v63 }
0x59ab   : > { %14870 = vmatpush3.msra.mxu1 %v13009_v63 }
0x5a50   : > { %v14821_v43 = vpop.f32.mrf.mxu1 }
0x5a52   : > { %v11785_v0 = vpop.f32.mrf.mxu1 }
0x5a53   : > { %14826 = vmatprep.mubr.msk.f32.mxu0 %vm1583_vm2, %v11785_v0  ;;  %v13007_v0 = vld [vmem:[%s17001_s24 + $0x90] sm:$0xff] }
0x5a54   : > { %14827 = vmatmul.mubr.msk.f32.vlgmr.msra.gmra.mxu0 %vm1583_vm2, %v14821_v43  ;;  %v14835_v33 = vpop.f32.mrf.mxu1  ;;  %v13008_v43 = vld [vmem:[%s17001_s24 + $0x98] sm:$0xff] }
0x5a55   : > { %14837 = vmatpush3.msra.mxu0 %v13000_v2  ;;  %14871 = vmatprep.subr.mxu1 %v13008_v43 }
0x5a56   : > { %v11947_v22 = vpop.f32.mrf.mxu1  ;;  %14838 = vmatprep.subr.mxu0 %v12999_v19  ;;  %14872 = vmatpush3.msra.mxu1 %v13008_v43 }
0x5a57   : > { %14839 = vmatpush3.msra.mxu0 %v12999_v19  ;;  %14873 = vmatprep.subr.mxu1 %v13007_v0 }
0x5a58   : > { %14840 = vmatprep.subr.mxu0 %v12998_v20  ;;  %14874 = vmatpush3.msra.mxu1 %v13007_v0 }
0x5a59   : > { %14841 = vmatpush3.msra.mxu0 %v12998_v20  ;;  %v13022_v20 = vld [vmem:[%s15434_s13 + $0x1] ss:$0 sm:$0xff] }
0x5b14   : > { %v14828_v44 = vpop.f32.mrf.mxu0 }
0x5b15   : > { %v11953_v46 = vadd.f32 %v14835_v33, %v14828_v44  ;;  %v13006_v33 = vld [vmem:[%s17001_s24 + $0x88] sm:$0xff]  ;;  %v13005_v44 = vld [vmem:[%s17001_s24 + $0x80] sm:$0xff] }
0x5b16   : > { %v11866_v5 = vpop.f32.mrf.mxu0  ;;  %14875 = vmatprep.subr.mxu1 %v13006_v33 }
0x5b17   : > { %v11957_v51 = vadd.f32 %v11953_v46, %v16693_v23  ;;  %v11948_v60 = vadd.f32 %v11947_v22, %v11866_v5  ;;  %v15162_v23 = vld [vmem:[%s15434_s13 + $0x1] ss:$0 sm:$0xff]  ;;  %14876 = vmatpush3.msra.mxu1 %v13006_v33 }
0x5b18   : > { %v6561_v16 = vadd.f32 %v15162_v23, %v16304_v15  ;;  %14877 = vmatprep.subr.mxu1 %v13005_v44  ;;  %v13002_v46 = vld [vmem:[%s17003_s25 + $0x1] ss:$0 sm:$0xff] }
0x5b19   : > { %v16808_v12 = vadd.f32 %v12992_v37, %v11957_v51  ;;  %v11956_v45 = vadd.f32 %v11948_v60, %v16696_v25  ;;  %14878 = vmatpush3.msra.mxu1 %v13005_v44 }
0x5b1a   : > { %v16822_v1 = vadd.f32 %v6561_v16, %v16159_v40  ;;  %v12997_v40 = vld [vmem:[%s16997_s18 + $0x20] sm:$0xff] }
0x5b1b   : > { %v16811_v13 = vadd.f32 %v12992_v37, %v11956_v45  ;;  %v11972_v48 = vsel %vm1288_vm0, %v16808_v12, 0.0  ;;  %14842 = vmatprep.subr.mxu0 %v12997_v40 }
0x5b1c   : > { %11973 = vadd.xlane.f32.xlu1 %v11972_v48  ;;  %v6573_v15 = vsel %vm1288_vm0, %v16822_v1, 0.0  ;;  %14843 = vmatpush3.msra.mxu0 %v12997_v40 }
0x5b1d   : > { %v11969_v53 = vsel %vm1288_vm0, %v16811_v13, 0.0 }
0x5b1e   : > { %11970 = vadd.xlane.f32.xlu0 %v11969_v53 }
0x5ba5   : > { %v11974_v14 = vpop.xlane.xlu1 %11973 }
0x5ba6   : > { %v11976_v52 = vmul.f32 0.03125, %v11974_v14 }
0x5ba7   : > { %v11971_v34 = vpop.xlane.xlu0 %11970 }
0x5ba8   : > { %v11978_v25 = vsub.f32 %v16808_v12, %v11976_v52  ;;  %v11975_v55 = vmul.f32 0.03125, %v11971_v34 }
0x5baa   : > { %v11977_v56 = vsub.f32 %v16811_v13, %v11975_v55  ;;  %v11980_v61 = vmul.f32 %v11978_v25, %v11978_v25 }
0x5bac   : > { %v11984_v17 = vsel %vm1288_vm0, %v11980_v61, 0.0  ;;  %v11979_v3 = vmul.f32 %v11977_v56, %v11977_v56 }
0x5bad   : > { %11985 = vadd.xlane.f32.xlu1 %v11984_v17 }
0x5bae   : > { %v11981_v18 = vsel %vm1288_vm0, %v11979_v3, 0.0 }
0x5baf   : > { %11982 = vadd.xlane.f32.xlu0 %v11981_v18 }
0x5bb1   : > { %6574 = vadd.xlane.f32.xlu1 %v6573_v15 }
0x5c36   : > { %v11986_v24 = vpop.xlane.xlu1 %11985 }
0x5c37   : > { %v11988_v26 = vmul.f32 0.03125, %v11986_v24 }
0x5c38   : > { %v11983_v4 = vpop.xlane.xlu0 %11982 }
0x5c39   : > { %v11990_v39 = vadd.f32 1e-05, %v11988_v26  ;;  %v11987_v30 = vmul.f32 0.03125, %v11983_v4  ;;  %v15163_v26 = vld [vmem:[%s15434_s13 + $0x1] ss:$0 sm:$0xff] }
0x5c3a   : > { %v6575_v19 = vpop.xlane.xlu1 %6574  ;;  %v9386_v4 = vadd.f32 %v15163_v26, %v16627_v11 }
0x5c3b   : > { %15144 = vrsqrt.f32 %v11990_v39  ;;  %v11989_v31 = vadd.f32 1e-05, %v11987_v30  ;;  %v6579_v40 = vmul.f32 0.03125, %v6575_v19 }
0x5c3d   : > { %15146 = vrsqrt.f32 %v11989_v31  ;;  %v6581_v31 = vsub.f32 %v16822_v1, %v6579_v40 }
0x5c48   : > { %v15145_v32 = vpop.eup %15144 }
0x5c49   : > { %v11994_v35 = vmul.f32 %v15145_v32, %v11978_v25 }
0x5c4a   : > { %v15147_v6 = vpop.eup %15146 }
0x5c4b   : > { %v11993_v36 = vmul.f32 %v15147_v6, %v11977_v56  ;;  %v12002_v38 = vmul.f32 %v12995_v47, %v11994_v35  ;;  %v9394_v35 = vadd.f32 %v9386_v4, %v16488_v50 }
0x5c4d   : > { %v12001_v42 = vmul.f32 %v12995_v47, %v11993_v36  ;;  %v12010_v8 = vadd.f32 %v12996_v41, %v12002_v38  ;;  %v9398_v11 = vsel %vm1288_vm0, %v9394_v35, 0.0 }
0x5c4f   : > { %v12009_v27 = vadd.f32 %v12996_v41, %v12001_v42  ;;  %v6583_v41 = vmul.f32 %v6581_v31, %v6581_v31 }
0x5c51   : > { %14844 = vmatprep.mubr.msk.f32.mxu0 %vm1288_vm0, %v12009_v27  ;;  %v6585_v42 = vsel %vm1288_vm0, %v6583_v41, 0.0 }
0x5c52   : > { %14845 = vmatmul.mubr.msk.f32.vlgmr.msra.gmra.mxu0 %vm1288_vm0, %v12010_v8 }
0x5d12   : > { %v14846_v22 = vpop.f32.mrf.mxu0 }
0x5d13   : > { %v12100_v37 = vadd.f32 %v14846_v22, %v13002_v46 }
0x5d14   : > { %v12094_v5 = vpop.f32.mrf.mxu0 }
0x5d15   : > { %v12104_v51 = vmul.f32 %v12100_v37, %v12100_v37  ;;  %v12095_v60 = vadd.f32 %v13002_v46, %v12094_v5 }
0x5d17   : > { %v12106_v45 = vmul.f32 %v12104_v51, %v12100_v37  ;;  %v12103_v48 = vmul.f32 %v12095_v60, %v12095_v60 }
0x5d19   : > { %v12108_v53 = vmul.f32 0.044715, %v12106_v45  ;;  %v12105_v14 = vmul.f32 %v12103_v48, %v12095_v60  ;;  %v13023_v48 = vld [vmem:[%s15439_s20] ss:$0 sm:$0xff] }
0x5d1b   : > { %v12110_v52 = vadd.f32 %v12108_v53, %v12100_v37  ;;  %v12107_v34 = vmul.f32 0.044715, %v12105_v14 }
0x5d1d   : > { %v12112_v23 = vmul.f32 0.7978846, %v12110_v52  ;;  %v12109_v16 = vadd.f32 %v12107_v34, %v12095_v60  ;;  %v13024_v52 = vld [vmem:[%s15444_s27] ss:$0 sm:$0xff] }
0x5d1f   : > { %15148 = vtanh.f32 %v12112_v23  ;;  %v12111_v25 = vmul.f32 0.7978846, %v12109_v16 }
0x5d21   : > { %15150 = vtanh.f32 %v12111_v25 }
0x5d2c   : > { %v15149_v55 = vpop.eup %15148 }
0x5d2d   : > { %v12116_v56 = vadd.f32 1.0, %v15149_v55  ;;  %v15168_v55 = vld [vmem:[%s15492_s2] sm:$0xff] }
0x5d2e   : > { %v15151_v61 = vpop.eup %15150 }
0x5d2f   : > { %v12115_v17 = vadd.f32 1.0, %v15151_v61  ;;  %v12118_v3 = vmul.f32 0.5, %v12116_v56  ;;  %v12312_v61 = vld [vmem:[%s16221_s7] sm:$0xff] (%p15476_p4) }
0x5d30   : > { %12313 = vst [vmem:[%s12279_s11] sm:$0xff] (%p15476_p4), %v12312_v61 }
0x5d31   : > { %v12117_v18 = vmul.f32 0.5, %v12115_v17  ;;  %v12120_v2 = vmul.f32 %v12118_v3, %v12100_v37  ;;  %v12314_v17 = vld [vmem:[%s16221_s7 + $0x8] sm:$0xff] (%p15476_p4) }
0x5d32   : > { %12315 = vst [vmem:[%s12279_s11 + $0x10] sm:$0xff] (%p15476_p4), %v12314_v17 }
0x5d33   : > { %v12119_v15 = vmul.f32 %v12117_v18, %v12095_v60 }
0x5d35   : > { %14879 = vmatprep.mubr.f32.mxu1 %v12119_v15 }
0x5d36   : > { %14880 = vmatmul.mubr.f32.vlgmr.msra.gmra.mxu1 %v12120_v2 }
0x5df6   : > { %v14881_v24 = vpop.f32.mrf.mxu1 }
0x5df7   : > { %v12216_v39 = vadd.f32 %v14881_v24, %v13022_v20 }
0x5df8   : > { %v12210_v30 = vpop.f32.mrf.mxu1 }
0x5df9   : > { %v12220_v32 = vadd.f32 %v12216_v39, %v16808_v12  ;;  %v12211_v47 = vadd.f32 %v13022_v20, %v12210_v30 }
0x5dfb   : > { %v12219_v6 = vadd.f32 %v12211_v47, %v16811_v13  ;;  %v12226_v36 = vsel %vm1288_vm0, %v12220_v32, 0.0 }
0x5dfc   : > { %12227 = vadd.xlane.f32.xlu0 %v12226_v36 }
0x5dfd   : > { %v12223_v38 = vsel %vm1288_vm0, %v12219_v6, 0.0 }
0x5dfe   : > { %12224 = vadd.xlane.f32.xlu1 %v12223_v38 }
0x5e00   : > { %9399 = vadd.xlane.f32.xlu0 %v9398_v11 }
0x5e02   : > { %6586 = vadd.xlane.f32.xlu1 %v6585_v42 }
0x5e85   : > { %v12228_v1 = vpop.xlane.xlu0 %12227 }
0x5e86   : > { %v12230_v12 = vmul.f32 0.03125, %v12228_v1 }
0x5e87   : > { %v12225_v27 = vpop.xlane.xlu1 %12224 }
0x5e88   : > { %v12232_v8 = vsub.f32 %v12220_v32, %v12230_v12  ;;  %v12229_v50 = vmul.f32 0.03125, %v12225_v27 }
0x5e89   : > { %v9400_v9 = vpop.xlane.xlu0 %9399 }
0x5e8a   : > { %v12231_v13 = vsub.f32 %v12219_v6, %v12229_v50  ;;  %v9404_v28 = vmul.f32 0.03125, %v9400_v9  ;;  %v12234_v49 = vmul.f32 %v12232_v8, %v12232_v8 }
0x5e8b   : > { %v6587_v54 = vpop.xlane.xlu1 %6586 }
0x5e8c   : > { %v9406_v57 = vsub.f32 %v9394_v35, %v9404_v28  ;;  %v6591_v58 = vmul.f32 0.03125, %v6587_v54  ;;  %v12238_v10 = vsel %vm1288_vm0, %v12234_v49, 0.0  ;;  %v12233_v59 = vmul.f32 %v12231_v13, %v12231_v13 }
0x5e8d   : > { %12239 = vadd.xlane.f32.xlu0 %v12238_v10 }
0x5e8e   : > { %v6593_v29 = vadd.f32 1e-05, %v6591_v58  ;;  %v12235_v7 = vsel %vm1288_vm0, %v12233_v59, 0.0  ;;  %v9408_v62 = vmul.f32 %v9406_v57, %v9406_v57 }
0x5e8f   : > { %12236 = vadd.xlane.f32.xlu1 %v12235_v7 }
0x5e90   : > { %15152 = vrsqrt.f32 %v6593_v29  ;;  %v9410_v63 = vsel %vm1288_vm0, %v9408_v62, 0.0 }
0x5e91   : > { %9411 = vadd.xlane.f32.xlu0 %v9410_v63 }
0x5e9d   : > { %v15153_v43 = vpop.eup %15152 }
0x5f16   : > { %v12240_v0 = vpop.xlane.xlu0 %12239 }
0x5f17   : > { %v12242_v33 = vmul.f32 0.03125, %v12240_v0 }
0x5f18   : > { %v12237_v44 = vpop.xlane.xlu1 %12236 }
0x5f19   : > { %v12244_v46 = vadd.f32 1e-05, %v12242_v33  ;;  %v12241_v22 = vmul.f32 0.03125, %v12237_v44 }
0x5f1a   : > { %v9412_v37 = vpop.xlane.xlu0 %9411 }
0x5f1b   : > { %15154 = vrsqrt.f32 %v12244_v46  ;;  %v12243_v5 = vadd.f32 1e-05, %v12241_v22  ;;  %v9416_v51 = vmul.f32 0.03125, %v9412_v37 }
0x5f1d   : > { %15156 = vrsqrt.f32 %v12243_v5  ;;  %v9418_v60 = vadd.f32 1e-05, %v9416_v51 }
0x5f1f   : > { %15158 = vrsqrt.f32 %v9418_v60 }
0x5f28   : > { %v15155_v45 = vpop.eup %15154 }
0x5f29   : > { %v12248_v53 = vmul.f32 %v15155_v45, %v12232_v8 }
0x5f2a   : > { %v15157_v14 = vpop.eup %15156 }
0x5f2b   : > { %v12256_v34 = vmul.f32 %v13023_v48, %v12248_v53 }
0x5f2c   : > { %v15159_v23 = vpop.eup %15158 }
0x5f2d   : > { %v12264_v16 = vadd.f32 %v13024_v52, %v12256_v34 }
0x5f2f   : > { %12266 = vst.msk [vmem:[#allocation3 + $0x8] sm:$0xff] %vm1288_vm0, %v12264_v16 }
0x5f34   : > { %12277 = sbr.rel (!%p15476_p4) target bundleno = 24385 (0x5f41), region = 188 }
0x5f36   : > { %v12267_v25 = vld [vmem:[#allocation3 + $0x8] sm:$0xff] }
0x5f37   : > { %v12268_v56 = vsel %vm6618_vm7, %v15168_v55, %v12267_v25 }
0x5f38   : > { %13025 = vst.msk [vmem:[%s16221_s7 + $0x10] sm:$0xff] %vm1288_vm0, %v12268_v56 }
0x5f3f   : > { %v12316_v3 = vld [vmem:[%s16221_s7 + $0x10] sm:$0xff] }
0x5f40   : > { %12317 = vst [vmem:[%s12279_s11 + $0x20] sm:$0xff] %v12316_v3 }
0x5f41 PF: > { %p90_p8 = scmp.ge.s32.totalorder %s15466_s15, 4   ;;  %s17004_s7 = smov %s15187_s10 }
0x5f42   : > { %s17005_s10 = smov %s15474_s22  ;;  %s17006_s11 = smov %s15466_s15 }
0x5f43   :  { %92 = sbr.rel (!%p90_p8) target bundleno = 90 (0x5a), region = 336 }

</bundles_post_ra>
